<compile_context>
chip_gen: v7x
topology: tpu7x:2x2x1
jax: 0.10.0
libtpu: 0.0.40
codegen_flags: <defaults>
</compile_context>

<pallas_src>
import functools

import numpy as np
import jax
import jax.numpy as jnp
from jax.experimental import pallas as pl
from jax.experimental.pallas import tpu as pltpu


# ---------------------------------------------------------------------------
# Configuration (small, deterministic test geometry)
# ---------------------------------------------------------------------------
LAYER_NUMS = (1, 1, 1)
LAYER_STRIDES = (2, 2, 2)
NUM_FILTERS = (16, 16, 32)
UPSAMPLE_STRIDES = (1, 2, 4)
NUM_UPSAMPLE_FILTERS = (16, 16, 16)
NUM_INPUT_FEATURES = 16
BN_EPS = 1e-3


def _round_up(v, m):
    return (v + m - 1) // m * m


# ---------------------------------------------------------------------------
# Fused Pallas kernel: whole RPN forward, one batch element per grid step
# ---------------------------------------------------------------------------
def _make_fused_kernel(stage_metas, n_scratch):
    """stage_metas: tuple of (conv_metas, (k, cu, out_off)) with
    conv_meta = (pc_in, wc_in, top_margin, stride, pc_out, cin)."""

    def kernel(*refs):
        scratch_refs = refs[-n_scratch:]
        out_ref = refs[-(n_scratch + 1)]
        const_it = iter(refs[1:-(n_scratch + 1)])
        x_ref = refs[0]

        # Zero the shift-margin scratches.  Margins only feed canvas-ring rows
        # (masked / dropped later) but must be finite zeros so masking works.
        for scr in scratch_refs:
            scr[...] = jnp.zeros(scr.shape, scr.dtype)

        a = x_ref[...]                            # (Pc, Cin) zero-ring canvas
        si = 0
        for convs, (k, cu, out_off) in stage_metas:
            # ---- conv layers: 3x3 conv (pad=1, stride) + folded BN + ReLU ----
            for (pc_in, wc_in, top, stride, _pc_out, _cin) in convs:
                scr = scratch_refs[si]
                si += 1
                scr[top:top + pc_in, :] = a
                taps = []
                for ky in range(3):
                    for kx in range(3):
                        off = top + (ky - 1) * wc_in + (kx - 1)
                        taps.append(scr[off:off + pc_in, :])
                im2col = jnp.concatenate(taps, axis=-1)       # (Pc, 9*Cin)
                w_ref = next(const_it)                        # (9*Cin, Cout)
                b_ref = next(const_it)                        # (1, Cout)
                sel_ref = next(const_it)                      # mask / row-select
                y = jnp.dot(im2col, w_ref[...],
                            preferred_element_type=jnp.float32)
                y = jnp.maximum(y + b_ref[...], 0.0)
                if stride == 1:
                    a = y * sel_ref[...]          # zero the canvas ring (Pc,1)
                else:
                    # one-hot row-select onto the (smaller) output canvas
                    a = jnp.dot(sel_ref[...], y,
                                preferred_element_type=jnp.float32)

            # ---- deblock: ConvTranspose2d(k, stride=k) + folded BN + ReLU ----
            wd_ref = next(const_it)               # (Cin, k*k*Cu)  BN-folded
            bd_ref = next(const_it)               # (1, Cu)
            g_ref = next(const_it)                # (Hb*Wb, k*k*Pc) one-hot
            z = jnp.dot(a, wd_ref[...], preferred_element_type=jnp.float32)
            if k > 1:
                z = jnp.concatenate(
                    [z[:, t * cu:(t + 1) * cu] for t in range(k * k)], axis=0)
            up = jnp.dot(g_ref[...], z, preferred_element_type=jnp.float32)
            out_ref[:, out_off:out_off + cu] = jnp.maximum(up + bd_ref[...], 0.0)

    return kernel


@functools.partial(jax.jit, static_argnums=(2,))
def rpn_forward(x_nchw, arrays, meta):
    """Fused RPNBase forward.  x_nchw: (N, C, H, W) -> (N, sum(Cu), Hb, Wb)."""
    stage_metas, (hb, wb, c_total) = meta
    N, C, H, W = x_nchw.shape
    hc0, wc0 = H + 2, W + 2

    # Put the input on a zero-ring canvas once (tiny XLA pad), flat row-major.
    x_nhwc = jnp.transpose(x_nchw, (0, 2, 3, 1))
    x_canvas = jnp.pad(x_nhwc, ((0, 0), (1, 1), (1, 1), (0, 0)))
    x_canvas = x_canvas.reshape(N, hc0 * wc0, C)

    arrays = tuple(arrays)
    in_specs = [pl.BlockSpec((None, hc0 * wc0, C), lambda n: (n, 0, 0))]
    for arr in arrays:
        in_specs.append(
            pl.BlockSpec(arr.shape, lambda n, _nd=arr.ndim: (0,) * _nd))

    scratch_shapes = []
    for convs, _ in stage_metas:
        for (pc_in, wc_in, top, _stride, _pc_out, cin) in convs:
            scratch_shapes.append(
                pltpu.VMEM((top + pc_in + wc_in + 1, cin), jnp.float32))
    n_scratch = len(scratch_shapes)

    kernel = _make_fused_kernel(stage_metas, n_scratch)

    out = pl.pallas_call(
        kernel,
        out_shape=jax.ShapeDtypeStruct((N, hb * wb, c_total), jnp.float32),
        grid_spec=pltpu.PrefetchScalarGridSpec(
            num_scalar_prefetch=0,
            grid=(N,),
            in_specs=in_specs,
            out_specs=pl.BlockSpec((None, hb * wb, c_total),
                                   lambda n: (n, 0, 0)),
            scratch_shapes=scratch_shapes),
        compiler_params=pltpu.CompilerParams(
            dimension_semantics=("parallel",)),
    )(x_canvas, *arrays)

    return jnp.transpose(out, (0, 2, 1)).reshape(N, c_total, hb, wb)


# ---------------------------------------------------------------------------
# Host-side preparation (runs once): BN-folded GEMM weights + tiny one-hot
# row-select / scatter matrices + ring masks + static geometry metadata.
# ---------------------------------------------------------------------------
def _ring_mask(hc, wc):
    m = np.zeros((hc * wc, 1), np.float32)
    for y in range(1, hc - 1):
        for x in range(1, wc - 1):
            m[y * wc + x, 0] = 1.0
    return m


def _subsample_mat(hc_in, wc_in, hc_out, wc_out, stride):
    """One-hot (Pc_out, Pc_in): picks the strided conv results off the input
    canvas and places them on the (zero-ringed) output canvas."""
    S = np.zeros((hc_out * wc_out, hc_in * wc_in), np.float32)
    ho, wo = hc_out - 2, wc_out - 2
    for i in range(ho):
        for j in range(wo):
            src = (stride * i + 1) * wc_in + (stride * j + 1)
            S[(i + 1) * wc_out + (j + 1), src] = 1.0
    return S


def _deblock_gather(ho, wo, k):
    """One-hot (Hb*Wb, k*k*Pc): places tap t=(a,b) of canvas pixel (i,j) at
    output pixel (i*k+a, j*k+b)."""
    hc, wc = ho + 2, wo + 2
    pc = hc * wc
    wb = wo * k
    G = np.zeros((ho * k * wb, k * k * pc), np.float32)
    for i in range(ho):
        for j in range(wo):
            p = (i + 1) * wc + (j + 1)
            for a in range(k):
                for b in range(k):
                    t = a * k + b
                    r = (i * k + a) * wb + (j * k + b)
                    G[r, t * pc + p] = 1.0
    return G


def prepare_kernel_params(params, H, W):
    arrays = []
    stage_metas = []
    h, w = H, W
    out_off = 0
    hb = wb = 0
    for block, deblock in zip(params["blocks"], params["deblocks"]):
        conv_metas = []
        for (wt, scale, bias, stride) in block:
            cout, cin = wt.shape[0], wt.shape[1]
            hc_in, wc_in = h + 2, w + 2
            pc_in = hc_in * wc_in
            ho = (h + 2 - 3) // stride + 1
            wo = (w + 2 - 3) // stride + 1
            hc_out, wc_out = ho + 2, wo + 2
            pc_out = hc_out * wc_out
            top = _round_up(wc_in + 1, 8)

            w_np = np.asarray(wt)
            s_np = np.asarray(scale)
            # (Cout, Cin, 3, 3) -> (9*Cin, Cout), BN scale folded into columns.
            wk = (np.transpose(w_np, (2, 3, 1, 0)).reshape(9 * cin, cout)
                  * s_np[None, :]).astype(np.float32)
            arrays.append(jnp.asarray(wk))
            arrays.append(jnp.asarray(
                np.asarray(bias).reshape(1, cout).astype(np.float32)))
            if stride == 1:
                arrays.append(jnp.asarray(_ring_mask(hc_in, wc_in)))
            else:
                arrays.append(jnp.asarray(
                    _subsample_mat(hc_in, wc_in, hc_out, wc_out, stride)))
            conv_metas.append((pc_in, wc_in, top, stride, pc_out, cin))
            h, w = ho, wo

        dw, ds, db, k = deblock
        cin_d, cu = dw.shape[0], dw.shape[1]
        dw_np = np.asarray(dw)
        ds_np = np.asarray(ds)
        # (Cin, Cu, k, k) -> (Cin, k*k*Cu), BN scale folded in.
        wd = (np.transpose(dw_np, (0, 2, 3, 1)) * ds_np[None, None, None, :]
              ).reshape(cin_d, k * k * cu).astype(np.float32)
        arrays.append(jnp.asarray(wd))
        arrays.append(jnp.asarray(
            np.asarray(db).reshape(1, cu).astype(np.float32)))
        arrays.append(jnp.asarray(_deblock_gather(h, w, k)))
        stage_metas.append((tuple(conv_metas), (k, cu, out_off)))
        out_off += cu
        hb, wb = h * k, w * k

    meta = (tuple(stage_metas), (hb, wb, out_off))
    return tuple(arrays), meta


# ---------------------------------------------------------------------------
# Pure-JAX reference (matches the PyTorch module semantics)
# ---------------------------------------------------------------------------
def _ref_conv(x, w, scale, bias, stride):
    w_hwio = jnp.transpose(w, (2, 3, 1, 0))
    y = jax.lax.conv_general_dilated(
        x, w_hwio, window_strides=(stride, stride),
        padding=((1, 1), (1, 1)),
        dimension_numbers=("NHWC", "HWIO", "NHWC"))
    return jnp.maximum(y * scale + bias, 0.0)


def _ref_deconv(x, w, scale, bias, k):
    N, Ho, Wo, _ = x.shape
    cout = w.shape[1]
    y = jnp.einsum("nijq,qoab->nijabo", x, w)
    y = jnp.transpose(y, (0, 1, 3, 2, 4, 5)).reshape(N, Ho * k, Wo * k, cout)
    return jnp.maximum(y * scale + bias, 0.0)


def rpn_forward_ref(x_nchw, params):
    x = jnp.transpose(x_nchw, (0, 2, 3, 1))
    ups = []
    for i, block in enumerate(params["blocks"]):
        for (w, s, b, stride) in block:
            x = _ref_conv(x, w, s, b, stride)
        dw, ds, db, k = params["deblocks"][i]
        ups.append(_ref_deconv(x, dw, ds, db, k))
    out = jnp.concatenate(ups, axis=-1)
    return jnp.transpose(out, (0, 3, 1, 2))


# ---------------------------------------------------------------------------
# Deterministic parameter construction (folded BatchNorm, eps=1e-3)
# ---------------------------------------------------------------------------
def _bn_fold(key, c):
    k1, k2, k3, k4 = jax.random.split(key, 4)
    gamma = 1.0 + 0.1 * jax.random.normal(k1, (c,), jnp.float32)
    beta = 0.1 * jax.random.normal(k2, (c,), jnp.float32)
    mean = 0.1 * jax.random.normal(k3, (c,), jnp.float32)
    var = 1.0 + 0.1 * jnp.abs(jax.random.normal(k4, (c,), jnp.float32))
    scale = gamma / jnp.sqrt(var + BN_EPS)
    bias = beta - mean * scale
    return scale, bias


def make_params(key):
    params = {"blocks": [], "deblocks": []}
    in_filters = [NUM_INPUT_FEATURES, *NUM_FILTERS[:-1]]
    for i, layer_num in enumerate(LAYER_NUMS):
        cin, cout = in_filters[i], NUM_FILTERS[i]
        block = []
        key, kw, kb = jax.random.split(key, 3)
        w = 0.05 * jax.random.normal(kw, (cout, cin, 3, 3), jnp.float32)
        s, b = _bn_fold(kb, cout)
        block.append((w, s, b, LAYER_STRIDES[i]))
        for _ in range(layer_num):
            key, kw, kb = jax.random.split(key, 3)
            w = 0.05 * jax.random.normal(kw, (cout, cout, 3, 3), jnp.float32)
            s, b = _bn_fold(kb, cout)
            block.append((w, s, b, 1))
        params["blocks"].append(block)

        k_up = int(round(UPSAMPLE_STRIDES[i]))            # all >= 1 here
        cu = NUM_UPSAMPLE_FILTERS[i]
        key, kw, kb = jax.random.split(key, 3)
        w = 0.05 * jax.random.normal(kw, (cout, cu, k_up, k_up), jnp.float32)
        s, b = _bn_fold(kb, cu)
        params["deblocks"].append((w, s, b, k_up))
    return params


if __name__ == "__main__":
    key = jax.random.PRNGKey(0)
    key, kx, kp = jax.random.split(key, 3)

    # PyTorch-convention NCHW input: (batch=2, C=16, H=16, W=16)
    x = jax.random.normal(kx, (2, NUM_INPUT_FEATURES, 16, 16), jnp.float32)
    params = make_params(kp)
    arrays, meta = prepare_kernel_params(params, 16, 16)

    out = rpn_forward(x, arrays, meta)
    out = jax.block_until_ready(out)

    expected_channels = sum(NUM_UPSAMPLE_FILTERS)
    assert out.shape == (2, expected_channels, 8, 8), out.shape
    assert bool(jnp.all(jnp.isfinite(out)))

    ref = jax.block_until_ready(rpn_forward_ref(x, params))
    assert jnp.allclose(out, ref, atol=1e-4, rtol=1e-4), (
        float(jnp.max(jnp.abs(out - ref))))

    print("KERNEL_OK")
</pallas_src>

<mosaic_0001>
module attributes {stable_mosaic.version = 11 : i64} {
  func.func @kernel(%arg0: i32, %arg1: memref<1x324x16xf32, #tpu.memory_space<vmem>>, %arg2: memref<144x16xf32, #tpu.memory_space<vmem>>, %arg3: memref<1x16xf32, #tpu.memory_space<vmem>>, %arg4: memref<100x324xf32, #tpu.memory_space<vmem>>, %arg5: memref<144x16xf32, #tpu.memory_space<vmem>>, %arg6: memref<1x16xf32, #tpu.memory_space<vmem>>, %arg7: memref<100x1xf32, #tpu.memory_space<vmem>>, %arg8: memref<16x16xf32, #tpu.memory_space<vmem>>, %arg9: memref<1x16xf32, #tpu.memory_space<vmem>>, %arg10: memref<64x100xf32, #tpu.memory_space<vmem>>, %arg11: memref<144x16xf32, #tpu.memory_space<vmem>>, %arg12: memref<1x16xf32, #tpu.memory_space<vmem>>, %arg13: memref<36x100xf32, #tpu.memory_space<vmem>>, %arg14: memref<144x16xf32, #tpu.memory_space<vmem>>, %arg15: memref<1x16xf32, #tpu.memory_space<vmem>>, %arg16: memref<36x1xf32, #tpu.memory_space<vmem>>, %arg17: memref<16x64xf32, #tpu.memory_space<vmem>>, %arg18: memref<1x16xf32, #tpu.memory_space<vmem>>, %arg19: memref<64x144xf32, #tpu.memory_space<vmem>>, %arg20: memref<144x32xf32, #tpu.memory_space<vmem>>, %arg21: memref<1x32xf32, #tpu.memory_space<vmem>>, %arg22: memref<16x36xf32, #tpu.memory_space<vmem>>, %arg23: memref<288x32xf32, #tpu.memory_space<vmem>>, %arg24: memref<1x32xf32, #tpu.memory_space<vmem>>, %arg25: memref<16x1xf32, #tpu.memory_space<vmem>>, %arg26: memref<32x256xf32, #tpu.memory_space<vmem>>, %arg27: memref<1x16xf32, #tpu.memory_space<vmem>>, %arg28: memref<64x256xf32, #tpu.memory_space<vmem>>, %arg29: memref<1x64x48xf32, #tpu.memory_space<vmem>>, %arg30: memref<367x16xf32, #tpu.memory_space<vmem>>, %arg31: memref<127x16xf32, #tpu.memory_space<vmem>>, %arg32: memref<127x16xf32, #tpu.memory_space<vmem>>, %arg33: memref<51x16xf32, #tpu.memory_space<vmem>>, %arg34: memref<51x16xf32, #tpu.memory_space<vmem>>, %arg35: memref<29x32xf32, #tpu.memory_space<vmem>>) attributes {dimension_semantics = [#tpu.dimension_semantics<parallel>], iteration_bounds = array<i64: 2>, scalar_prefetch = 0 : i64, scratch_operands = 6 : i64, tpu.core_type = #tpu.core_type<tc>, window_params = [{transform_indices = @transform_0, window_bounds = array<i64: 1, 324, 16>}, {pipeline_mode = #tpu.pipeline_mode<synchronous>, transform_indices = @transform_1, window_bounds = array<i64: 144, 16>}, {pipeline_mode = #tpu.pipeline_mode<synchronous>, transform_indices = @transform_2, window_bounds = array<i64: 1, 16>}, {pipeline_mode = #tpu.pipeline_mode<synchronous>, transform_indices = @transform_3, window_bounds = array<i64: 100, 324>}, {pipeline_mode = #tpu.pipeline_mode<synchronous>, transform_indices = @transform_4, window_bounds = array<i64: 144, 16>}, {pipeline_mode = #tpu.pipeline_mode<synchronous>, transform_indices = @transform_5, window_bounds = array<i64: 1, 16>}, {pipeline_mode = #tpu.pipeline_mode<synchronous>, transform_indices = @transform_6, window_bounds = array<i64: 100, 1>}, {pipeline_mode = #tpu.pipeline_mode<synchronous>, transform_indices = @transform_7, window_bounds = array<i64: 16, 16>}, {pipeline_mode = #tpu.pipeline_mode<synchronous>, transform_indices = @transform_8, window_bounds = array<i64: 1, 16>}, {pipeline_mode = #tpu.pipeline_mode<synchronous>, transform_indices = @transform_9, window_bounds = array<i64: 64, 100>}, {pipeline_mode = #tpu.pipeline_mode<synchronous>, transform_indices = @transform_10, window_bounds = array<i64: 144, 16>}, {pipeline_mode = #tpu.pipeline_mode<synchronous>, transform_indices = @transform_11, window_bounds = array<i64: 1, 16>}, {pipeline_mode = #tpu.pipeline_mode<synchronous>, transform_indices = @transform_12, window_bounds = array<i64: 36, 100>}, {pipeline_mode = #tpu.pipeline_mode<synchronous>, transform_indices = @transform_13, window_bounds = array<i64: 144, 16>}, {pipeline_mode = #tpu.pipeline_mode<synchronous>, transform_indices = @transform_14, window_bounds = array<i64: 1, 16>}, {pipeline_mode = #tpu.pipeline_mode<synchronous>, transform_indices = @transform_15, window_bounds = array<i64: 36, 1>}, {pipeline_mode = #tpu.pipeline_mode<synchronous>, transform_indices = @transform_16, window_bounds = array<i64: 16, 64>}, {pipeline_mode = #tpu.pipeline_mode<synchronous>, transform_indices = @transform_17, window_bounds = array<i64: 1, 16>}, {pipeline_mode = #tpu.pipeline_mode<synchronous>, transform_indices = @transform_18, window_bounds = array<i64: 64, 144>}, {pipeline_mode = #tpu.pipeline_mode<synchronous>, transform_indices = @transform_19, window_bounds = array<i64: 144, 32>}, {pipeline_mode = #tpu.pipeline_mode<synchronous>, transform_indices = @transform_20, window_bounds = array<i64: 1, 32>}, {pipeline_mode = #tpu.pipeline_mode<synchronous>, transform_indices = @transform_21, window_bounds = array<i64: 16, 36>}, {pipeline_mode = #tpu.pipeline_mode<synchronous>, transform_indices = @transform_22, window_bounds = array<i64: 288, 32>}, {pipeline_mode = #tpu.pipeline_mode<synchronous>, transform_indices = @transform_23, window_bounds = array<i64: 1, 32>}, {pipeline_mode = #tpu.pipeline_mode<synchronous>, transform_indices = @transform_24, window_bounds = array<i64: 16, 1>}, {pipeline_mode = #tpu.pipeline_mode<synchronous>, transform_indices = @transform_25, window_bounds = array<i64: 32, 256>}, {pipeline_mode = #tpu.pipeline_mode<synchronous>, transform_indices = @transform_26, window_bounds = array<i64: 1, 16>}, {pipeline_mode = #tpu.pipeline_mode<synchronous>, transform_indices = @transform_27, window_bounds = array<i64: 64, 256>}, {transform_indices = @transform_28, window_bounds = array<i64: 1, 64, 48>}]} {
    %cst = arith.constant 0.000000e+00 : f32
    %0 = vector.broadcast %cst : f32 to vector<367x16xf32>
    %c0 = arith.constant 0 : index
    %c0_0 = arith.constant 0 : index
    %1 = vector.load %arg30[%c0, %c0_0] : memref<367x16xf32, #tpu.memory_space<vmem>>, vector<367x16xf32>
    tpu.vector_store %arg30[%c0, %c0_0], %0 {strides = array<i32>} : memref<367x16xf32, #tpu.memory_space<vmem>>, vector<367x16xf32>,
    %cst_1 = arith.constant 0.000000e+00 : f32
    %2 = vector.broadcast %cst_1 : f32 to vector<127x16xf32>
    %c0_2 = arith.constant 0 : index
    %c0_3 = arith.constant 0 : index
    %3 = vector.load %arg31[%c0_2, %c0_3] : memref<127x16xf32, #tpu.memory_space<vmem>>, vector<127x16xf32>
    tpu.vector_store %arg31[%c0_2, %c0_3], %2 {strides = array<i32>} : memref<127x16xf32, #tpu.memory_space<vmem>>, vector<127x16xf32>,
    %cst_4 = arith.constant 0.000000e+00 : f32
    %4 = vector.broadcast %cst_4 : f32 to vector<127x16xf32>
    %c0_5 = arith.constant 0 : index
    %c0_6 = arith.constant 0 : index
    %5 = vector.load %arg32[%c0_5, %c0_6] : memref<127x16xf32, #tpu.memory_space<vmem>>, vector<127x16xf32>
    tpu.vector_store %arg32[%c0_5, %c0_6], %4 {strides = array<i32>} : memref<127x16xf32, #tpu.memory_space<vmem>>, vector<127x16xf32>,
    %cst_7 = arith.constant 0.000000e+00 : f32
    %6 = vector.broadcast %cst_7 : f32 to vector<51x16xf32>
    %c0_8 = arith.constant 0 : index
    %c0_9 = arith.constant 0 : index
    %7 = vector.load %arg33[%c0_8, %c0_9] : memref<51x16xf32, #tpu.memory_space<vmem>>, vector<51x16xf32>
    tpu.vector_store %arg33[%c0_8, %c0_9], %6 {strides = array<i32>} : memref<51x16xf32, #tpu.memory_space<vmem>>, vector<51x16xf32>,
    %cst_10 = arith.constant 0.000000e+00 : f32
    %8 = vector.broadcast %cst_10 : f32 to vector<51x16xf32>
    %c0_11 = arith.constant 0 : index
    %c0_12 = arith.constant 0 : index
    %9 = vector.load %arg34[%c0_11, %c0_12] : memref<51x16xf32, #tpu.memory_space<vmem>>, vector<51x16xf32>
    tpu.vector_store %arg34[%c0_11, %c0_12], %8 {strides = array<i32>} : memref<51x16xf32, #tpu.memory_space<vmem>>, vector<51x16xf32>,
    %cst_13 = arith.constant 0.000000e+00 : f32
    %10 = vector.broadcast %cst_13 : f32 to vector<29x32xf32>
    %c0_14 = arith.constant 0 : index
    %c0_15 = arith.constant 0 : index
    %11 = vector.load %arg35[%c0_14, %c0_15] : memref<29x32xf32, #tpu.memory_space<vmem>>, vector<29x32xf32>
    tpu.vector_store %arg35[%c0_14, %c0_15], %10 {strides = array<i32>} : memref<29x32xf32, #tpu.memory_space<vmem>>, vector<29x32xf32>,
    %c0_16 = arith.constant 0 : index
    %c0_17 = arith.constant 0 : index
    %c0_18 = arith.constant 0 : index
    %12 = vector.load %arg1[%c0_16, %c0_17, %c0_18] : memref<1x324x16xf32, #tpu.memory_space<vmem>>, vector<1x324x16xf32>
    %13 = vector.shape_cast %12 : vector<1x324x16xf32> to vector<324x16xf32>
    %c24 = arith.constant 24 : index
    %c0_19 = arith.constant 0 : index
    %14 = vector.load %arg30[%c24, %c0_19] : memref<367x16xf32, #tpu.memory_space<vmem>>, vector<324x16xf32>
    tpu.vector_store %arg30[%c24, %c0_19], %13 {strides = array<i32>} : memref<367x16xf32, #tpu.memory_space<vmem>>, vector<324x16xf32>,
    %c5 = arith.constant 5 : index
    %c0_20 = arith.constant 0 : index
    %15 = vector.load %arg30[%c5, %c0_20] : memref<367x16xf32, #tpu.memory_space<vmem>>, vector<324x16xf32>
    %c6 = arith.constant 6 : index
    %c0_21 = arith.constant 0 : index
    %16 = vector.load %arg30[%c6, %c0_21] : memref<367x16xf32, #tpu.memory_space<vmem>>, vector<324x16xf32>
    %c7 = arith.constant 7 : index
    %c0_22 = arith.constant 0 : index
    %17 = vector.load %arg30[%c7, %c0_22] : memref<367x16xf32, #tpu.memory_space<vmem>>, vector<324x16xf32>
    %c23 = arith.constant 23 : index
    %c0_23 = arith.constant 0 : index
    %18 = vector.load %arg30[%c23, %c0_23] : memref<367x16xf32, #tpu.memory_space<vmem>>, vector<324x16xf32>
    %c24_24 = arith.constant 24 : index
    %c0_25 = arith.constant 0 : index
    %19 = vector.load %arg30[%c24_24, %c0_25] : memref<367x16xf32, #tpu.memory_space<vmem>>, vector<324x16xf32>
    %c25 = arith.constant 25 : index
    %c0_26 = arith.constant 0 : index
    %20 = vector.load %arg30[%c25, %c0_26] : memref<367x16xf32, #tpu.memory_space<vmem>>, vector<324x16xf32>
    %c41 = arith.constant 41 : index
    %c0_27 = arith.constant 0 : index
    %21 = vector.load %arg30[%c41, %c0_27] : memref<367x16xf32, #tpu.memory_space<vmem>>, vector<324x16xf32>
    %c42 = arith.constant 42 : index
    %c0_28 = arith.constant 0 : index
    %22 = vector.load %arg30[%c42, %c0_28] : memref<367x16xf32, #tpu.memory_space<vmem>>, vector<324x16xf32>
    %c43 = arith.constant 43 : index
    %c0_29 = arith.constant 0 : index
    %23 = vector.load %arg30[%c43, %c0_29] : memref<367x16xf32, #tpu.memory_space<vmem>>, vector<324x16xf32>
    %24 = tpu.concatenate %15, %16, %17, %18, %19, %20, %21, %22, %23 in 1 : vector<324x16xf32>, vector<324x16xf32>, vector<324x16xf32>, vector<324x16xf32>, vector<324x16xf32>, vector<324x16xf32>, vector<324x16xf32>, vector<324x16xf32>, vector<324x16xf32> -> vector<324x144xf32>
    %c0_30 = arith.constant 0 : index
    %c0_31 = arith.constant 0 : index
    %25 = vector.load %arg2[%c0_30, %c0_31] : memref<144x16xf32, #tpu.memory_space<vmem>>, vector<144x16xf32>
    %cst_32 = arith.constant dense<0.000000e+00> : vector<324x16xf32>
    %26 = tpu.matmul %24, %25, %cst_32 {dimension_numbers = #tpu.dot_dimension_numbers<[1], [0], [0], [1], [0, 0, 1, 1], [], []>} : vector<324x144xf32>, vector<144x16xf32>, vector<324x16xf32> -> vector<324x16xf32>
    %c0_33 = arith.constant 0 : index
    %c0_34 = arith.constant 0 : index
    %27 = vector.load %arg3[%c0_33, %c0_34] : memref<1x16xf32, #tpu.memory_space<vmem>>, vector<1x16xf32>
    %28 = vector.broadcast %27 : vector<1x16xf32> to vector<324x16xf32>
    %29 = arith.addf %26, %28 : vector<324x16xf32>
    %cst_35 = arith.constant 0.000000e+00 : f32
    %30 = vector.broadcast %cst_35 : f32 to vector<324x16xf32>
    %31 = arith.maximumf %29, %30 : vector<324x16xf32>
    %c0_36 = arith.constant 0 : index
    %c0_37 = arith.constant 0 : index
    %32 = vector.load %arg4[%c0_36, %c0_37] : memref<100x324xf32, #tpu.memory_space<vmem>>, vector<100x324xf32>
    %cst_38 = arith.constant dense<0.000000e+00> : vector<100x16xf32>
    %33 = tpu.matmul %32, %31, %cst_38 {dimension_numbers = #tpu.dot_dimension_numbers<[1], [0], [0], [1], [0, 0, 1, 1], [], []>} : vector<100x324xf32>, vector<324x16xf32>, vector<100x16xf32> -> vector<100x16xf32>
    %c16 = arith.constant 16 : index
    %c0_39 = arith.constant 0 : index
    %34 = vector.load %arg31[%c16, %c0_39] : memref<127x16xf32, #tpu.memory_space<vmem>>, vector<100x16xf32>
    tpu.vector_store %arg31[%c16, %c0_39], %33 {strides = array<i32>} : memref<127x16xf32, #tpu.memory_space<vmem>>, vector<100x16xf32>,
    %c5_40 = arith.constant 5 : index
    %c0_41 = arith.constant 0 : index
    %35 = vector.load %arg31[%c5_40, %c0_41] : memref<127x16xf32, #tpu.memory_space<vmem>>, vector<100x16xf32>
    %c6_42 = arith.constant 6 : index
    %c0_43 = arith.constant 0 : index
    %36 = vector.load %arg31[%c6_42, %c0_43] : memref<127x16xf32, #tpu.memory_space<vmem>>, vector<100x16xf32>
    %c7_44 = arith.constant 7 : index
    %c0_45 = arith.constant 0 : index
    %37 = vector.load %arg31[%c7_44, %c0_45] : memref<127x16xf32, #tpu.memory_space<vmem>>, vector<100x16xf32>
    %c15 = arith.constant 15 : index
    %c0_46 = arith.constant 0 : index
    %38 = vector.load %arg31[%c15, %c0_46] : memref<127x16xf32, #tpu.memory_space<vmem>>, vector<100x16xf32>
    %c16_47 = arith.constant 16 : index
    %c0_48 = arith.constant 0 : index
    %39 = vector.load %arg31[%c16_47, %c0_48] : memref<127x16xf32, #tpu.memory_space<vmem>>, vector<100x16xf32>
    %c17 = arith.constant 17 : index
    %c0_49 = arith.constant 0 : index
    %40 = vector.load %arg31[%c17, %c0_49] : memref<127x16xf32, #tpu.memory_space<vmem>>, vector<100x16xf32>
    %c25_50 = arith.constant 25 : index
    %c0_51 = arith.constant 0 : index
    %41 = vector.load %arg31[%c25_50, %c0_51] : memref<127x16xf32, #tpu.memory_space<vmem>>, vector<100x16xf32>
    %c26 = arith.constant 26 : index
    %c0_52 = arith.constant 0 : index
    %42 = vector.load %arg31[%c26, %c0_52] : memref<127x16xf32, #tpu.memory_space<vmem>>, vector<100x16xf32>
    %c27 = arith.constant 27 : index
    %c0_53 = arith.constant 0 : index
    %43 = vector.load %arg31[%c27, %c0_53] : memref<127x16xf32, #tpu.memory_space<vmem>>, vector<100x16xf32>
    %44 = tpu.concatenate %35, %36, %37, %38, %39, %40, %41, %42, %43 in 1 : vector<100x16xf32>, vector<100x16xf32>, vector<100x16xf32>, vector<100x16xf32>, vector<100x16xf32>, vector<100x16xf32>, vector<100x16xf32>, vector<100x16xf32>, vector<100x16xf32> -> vector<100x144xf32>
    %c0_54 = arith.constant 0 : index
    %c0_55 = arith.constant 0 : index
    %45 = vector.load %arg5[%c0_54, %c0_55] : memref<144x16xf32, #tpu.memory_space<vmem>>, vector<144x16xf32>
    %cst_56 = arith.constant dense<0.000000e+00> : vector<100x16xf32>
    %46 = tpu.matmul %44, %45, %cst_56 {dimension_numbers = #tpu.dot_dimension_numbers<[1], [0], [0], [1], [0, 0, 1, 1], [], []>} : vector<100x144xf32>, vector<144x16xf32>, vector<100x16xf32> -> vector<100x16xf32>
    %c0_57 = arith.constant 0 : index
    %c0_58 = arith.constant 0 : index
    %47 = vector.load %arg6[%c0_57, %c0_58] : memref<1x16xf32, #tpu.memory_space<vmem>>, vector<1x16xf32>
    %48 = vector.broadcast %47 : vector<1x16xf32> to vector<100x16xf32>
    %49 = arith.addf %46, %48 : vector<100x16xf32>
    %cst_59 = arith.constant 0.000000e+00 : f32
    %50 = vector.broadcast %cst_59 : f32 to vector<100x16xf32>
    %51 = arith.maximumf %49, %50 : vector<100x16xf32>
    %c0_60 = arith.constant 0 : index
    %c0_61 = arith.constant 0 : index
    %52 = vector.load %arg7[%c0_60, %c0_61] : memref<100x1xf32, #tpu.memory_space<vmem>>, vector<100x1xf32>
    %53 = vector.broadcast %52 : vector<100x1xf32> to vector<100x16xf32>
    %54 = arith.mulf %51, %53 : vector<100x16xf32>
    %c0_62 = arith.constant 0 : index
    %c0_63 = arith.constant 0 : index
    %55 = vector.load %arg8[%c0_62, %c0_63] : memref<16x16xf32, #tpu.memory_space<vmem>>, vector<16x16xf32>
    %cst_64 = arith.constant dense<0.000000e+00> : vector<100x16xf32>
    %56 = tpu.matmul %54, %55, %cst_64 {dimension_numbers = #tpu.dot_dimension_numbers<[1], [0], [0], [1], [0, 0, 1, 1], [], []>} : vector<100x16xf32>, vector<16x16xf32>, vector<100x16xf32> -> vector<100x16xf32>
    %c0_65 = arith.constant 0 : index
    %c0_66 = arith.constant 0 : index
    %57 = vector.load %arg10[%c0_65, %c0_66] : memref<64x100xf32, #tpu.memory_space<vmem>>, vector<64x100xf32>
    %cst_67 = arith.constant dense<0.000000e+00> : vector<64x16xf32>
    %58 = tpu.matmul %57, %56, %cst_67 {dimension_numbers = #tpu.dot_dimension_numbers<[1], [0], [0], [1], [0, 0, 1, 1], [], []>} : vector<64x100xf32>, vector<100x16xf32>, vector<64x16xf32> -> vector<64x16xf32>
    %c0_68 = arith.constant 0 : index
    %c0_69 = arith.constant 0 : index
    %59 = vector.load %arg9[%c0_68, %c0_69] : memref<1x16xf32, #tpu.memory_space<vmem>>, vector<1x16xf32>
    %60 = vector.broadcast %59 : vector<1x16xf32> to vector<64x16xf32>
    %61 = arith.addf %58, %60 : vector<64x16xf32>
    %cst_70 = arith.constant 0.000000e+00 : f32
    %62 = vector.broadcast %cst_70 : f32 to vector<64x16xf32>
    %63 = arith.maximumf %61, %62 : vector<64x16xf32>
    %c0_71 = arith.constant 0 : index
    %c0_72 = arith.constant 0 : index
    %c0_73 = arith.constant 0 : index
    %64 = vector.load %arg29[%c0_71, %c0_72, %c0_73] : memref<1x64x48xf32, #tpu.memory_space<vmem>>, vector<1x64x16xf32>
    %65 = vector.shape_cast %64 : vector<1x64x16xf32> to vector<64x16xf32>
    %66 = vector.shape_cast %63 : vector<64x16xf32> to vector<1x64x16xf32>
    tpu.vector_store %arg29[%c0_71, %c0_72, %c0_73], %66 {strides = array<i32>} : memref<1x64x48xf32, #tpu.memory_space<vmem>>, vector<1x64x16xf32>,
    %c16_74 = arith.constant 16 : index
    %c0_75 = arith.constant 0 : index
    %67 = vector.load %arg32[%c16_74, %c0_75] : memref<127x16xf32, #tpu.memory_space<vmem>>, vector<100x16xf32>
    tpu.vector_store %arg32[%c16_74, %c0_75], %54 {strides = array<i32>} : memref<127x16xf32, #tpu.memory_space<vmem>>, vector<100x16xf32>,
    %c5_76 = arith.constant 5 : index
    %c0_77 = arith.constant 0 : index
    %68 = vector.load %arg32[%c5_76, %c0_77] : memref<127x16xf32, #tpu.memory_space<vmem>>, vector<100x16xf32>
    %c6_78 = arith.constant 6 : index
    %c0_79 = arith.constant 0 : index
    %69 = vector.load %arg32[%c6_78, %c0_79] : memref<127x16xf32, #tpu.memory_space<vmem>>, vector<100x16xf32>
    %c7_80 = arith.constant 7 : index
    %c0_81 = arith.constant 0 : index
    %70 = vector.load %arg32[%c7_80, %c0_81] : memref<127x16xf32, #tpu.memory_space<vmem>>, vector<100x16xf32>
    %c15_82 = arith.constant 15 : index
    %c0_83 = arith.constant 0 : index
    %71 = vector.load %arg32[%c15_82, %c0_83] : memref<127x16xf32, #tpu.memory_space<vmem>>, vector<100x16xf32>
    %c16_84 = arith.constant 16 : index
    %c0_85 = arith.constant 0 : index
    %72 = vector.load %arg32[%c16_84, %c0_85] : memref<127x16xf32, #tpu.memory_space<vmem>>, vector<100x16xf32>
    %c17_86 = arith.constant 17 : index
    %c0_87 = arith.constant 0 : index
    %73 = vector.load %arg32[%c17_86, %c0_87] : memref<127x16xf32, #tpu.memory_space<vmem>>, vector<100x16xf32>
    %c25_88 = arith.constant 25 : index
    %c0_89 = arith.constant 0 : index
    %74 = vector.load %arg32[%c25_88, %c0_89] : memref<127x16xf32, #tpu.memory_space<vmem>>, vector<100x16xf32>
    %c26_90 = arith.constant 26 : index
    %c0_91 = arith.constant 0 : index
    %75 = vector.load %arg32[%c26_90, %c0_91] : memref<127x16xf32, #tpu.memory_space<vmem>>, vector<100x16xf32>
    %c27_92 = arith.constant 27 : index
    %c0_93 = arith.constant 0 : index
    %76 = vector.load %arg32[%c27_92, %c0_93] : memref<127x16xf32, #tpu.memory_space<vmem>>, vector<100x16xf32>
    %77 = tpu.concatenate %68, %69, %70, %71, %72, %73, %74, %75, %76 in 1 : vector<100x16xf32>, vector<100x16xf32>, vector<100x16xf32>, vector<100x16xf32>, vector<100x16xf32>, vector<100x16xf32>, vector<100x16xf32>, vector<100x16xf32>, vector<100x16xf32> -> vector<100x144xf32>
    %c0_94 = arith.constant 0 : index
    %c0_95 = arith.constant 0 : index
    %78 = vector.load %arg11[%c0_94, %c0_95] : memref<144x16xf32, #tpu.memory_space<vmem>>, vector<144x16xf32>
    %cst_96 = arith.constant dense<0.000000e+00> : vector<100x16xf32>
    %79 = tpu.matmul %77, %78, %cst_96 {dimension_numbers = #tpu.dot_dimension_numbers<[1], [0], [0], [1], [0, 0, 1, 1], [], []>} : vector<100x144xf32>, vector<144x16xf32>, vector<100x16xf32> -> vector<100x16xf32>
    %c0_97 = arith.constant 0 : index
    %c0_98 = arith.constant 0 : index
    %80 = vector.load %arg12[%c0_97, %c0_98] : memref<1x16xf32, #tpu.memory_space<vmem>>, vector<1x16xf32>
    %81 = vector.broadcast %80 : vector<1x16xf32> to vector<100x16xf32>
    %82 = arith.addf %79, %81 : vector<100x16xf32>
    %cst_99 = arith.constant 0.000000e+00 : f32
    %83 = vector.broadcast %cst_99 : f32 to vector<100x16xf32>
    %84 = arith.maximumf %82, %83 : vector<100x16xf32>
    %c0_100 = arith.constant 0 : index
    %c0_101 = arith.constant 0 : index
    %85 = vector.load %arg13[%c0_100, %c0_101] : memref<36x100xf32, #tpu.memory_space<vmem>>, vector<36x100xf32>
    %cst_102 = arith.constant dense<0.000000e+00> : vector<36x16xf32>
    %86 = tpu.matmul %85, %84, %cst_102 {dimension_numbers = #tpu.dot_dimension_numbers<[1], [0], [0], [1], [0, 0, 1, 1], [], []>} : vector<36x100xf32>, vector<100x16xf32>, vector<36x16xf32> -> vector<36x16xf32>
    %c8 = arith.constant 8 : index
    %c0_103 = arith.constant 0 : index
    %87 = vector.load %arg33[%c8, %c0_103] : memref<51x16xf32, #tpu.memory_space<vmem>>, vector<36x16xf32>
    tpu.vector_store %arg33[%c8, %c0_103], %86 {strides = array<i32>} : memref<51x16xf32, #tpu.memory_space<vmem>>, vector<36x16xf32>,
    %c1 = arith.constant 1 : index
    %c0_104 = arith.constant 0 : index
    %88 = vector.load %arg33[%c1, %c0_104] : memref<51x16xf32, #tpu.memory_space<vmem>>, vector<36x16xf32>
    %c2 = arith.constant 2 : index
    %c0_105 = arith.constant 0 : index
    %89 = vector.load %arg33[%c2, %c0_105] : memref<51x16xf32, #tpu.memory_space<vmem>>, vector<36x16xf32>
    %c3 = arith.constant 3 : index
    %c0_106 = arith.constant 0 : index
    %90 = vector.load %arg33[%c3, %c0_106] : memref<51x16xf32, #tpu.memory_space<vmem>>, vector<36x16xf32>
    %c7_107 = arith.constant 7 : index
    %c0_108 = arith.constant 0 : index
    %91 = vector.load %arg33[%c7_107, %c0_108] : memref<51x16xf32, #tpu.memory_space<vmem>>, vector<36x16xf32>
    %c8_109 = arith.constant 8 : index
    %c0_110 = arith.constant 0 : index
    %92 = vector.load %arg33[%c8_109, %c0_110] : memref<51x16xf32, #tpu.memory_space<vmem>>, vector<36x16xf32>
    %c9 = arith.constant 9 : index
    %c0_111 = arith.constant 0 : index
    %93 = vector.load %arg33[%c9, %c0_111] : memref<51x16xf32, #tpu.memory_space<vmem>>, vector<36x16xf32>
    %c13 = arith.constant 13 : index
    %c0_112 = arith.constant 0 : index
    %94 = vector.load %arg33[%c13, %c0_112] : memref<51x16xf32, #tpu.memory_space<vmem>>, vector<36x16xf32>
    %c14 = arith.constant 14 : index
    %c0_113 = arith.constant 0 : index
    %95 = vector.load %arg33[%c14, %c0_113] : memref<51x16xf32, #tpu.memory_space<vmem>>, vector<36x16xf32>
    %c15_114 = arith.constant 15 : index
    %c0_115 = arith.constant 0 : index
    %96 = vector.load %arg33[%c15_114, %c0_115] : memref<51x16xf32, #tpu.memory_space<vmem>>, vector<36x16xf32>
    %97 = tpu.concatenate %88, %89, %90, %91, %92, %93, %94, %95, %96 in 1 : vector<36x16xf32>, vector<36x16xf32>, vector<36x16xf32>, vector<36x16xf32>, vector<36x16xf32>, vector<36x16xf32>, vector<36x16xf32>, vector<36x16xf32>, vector<36x16xf32> -> vector<36x144xf32>
    %c0_116 = arith.constant 0 : index
    %c0_117 = arith.constant 0 : index
    %98 = vector.load %arg14[%c0_116, %c0_117] : memref<144x16xf32, #tpu.memory_space<vmem>>, vector<144x16xf32>
    %cst_118 = arith.constant dense<0.000000e+00> : vector<36x16xf32>
    %99 = tpu.matmul %97, %98, %cst_118 {dimension_numbers = #tpu.dot_dimension_numbers<[1], [0], [0], [1], [0, 0, 1, 1], [], []>} : vector<36x144xf32>, vector<144x16xf32>, vector<36x16xf32> -> vector<36x16xf32>
    %c0_119 = arith.constant 0 : index
    %c0_120 = arith.constant 0 : index
    %100 = vector.load %arg15[%c0_119, %c0_120] : memref<1x16xf32, #tpu.memory_space<vmem>>, vector<1x16xf32>
    %101 = vector.broadcast %100 : vector<1x16xf32> to vector<36x16xf32>
    %102 = arith.addf %99, %101 : vector<36x16xf32>
    %cst_121 = arith.constant 0.000000e+00 : f32
    %103 = vector.broadcast %cst_121 : f32 to vector<36x16xf32>
    %104 = arith.maximumf %102, %103 : vector<36x16xf32>
    %c0_122 = arith.constant 0 : index
    %c0_123 = arith.constant 0 : index
    %105 = vector.load %arg16[%c0_122, %c0_123] : memref<36x1xf32, #tpu.memory_space<vmem>>, vector<36x1xf32>
    %106 = vector.broadcast %105 : vector<36x1xf32> to vector<36x16xf32>
    %107 = arith.mulf %104, %106 : vector<36x16xf32>
    %c0_124 = arith.constant 0 : index
    %c0_125 = arith.constant 0 : index
    %108 = vector.load %arg17[%c0_124, %c0_125] : memref<16x64xf32, #tpu.memory_space<vmem>>, vector<16x64xf32>
    %cst_126 = arith.constant dense<0.000000e+00> : vector<36x64xf32>
    %109 = tpu.matmul %107, %108, %cst_126 {dimension_numbers = #tpu.dot_dimension_numbers<[1], [0], [0], [1], [0, 0, 1, 1], [], []>} : vector<36x16xf32>, vector<16x64xf32>, vector<36x64xf32> -> vector<36x64xf32>
    %110 = vector.extract_strided_slice %109 {offsets = [0, 0], sizes = [36, 16], strides = [1, 1]} : vector<36x64xf32> to vector<36x16xf32>
    %111 = vector.extract_strided_slice %109 {offsets = [0, 16], sizes = [36, 16], strides = [1, 1]} : vector<36x64xf32> to vector<36x16xf32>
    %112 = vector.extract_strided_slice %109 {offsets = [0, 32], sizes = [36, 16], strides = [1, 1]} : vector<36x64xf32> to vector<36x16xf32>
    %113 = vector.extract_strided_slice %109 {offsets = [0, 48], sizes = [36, 16], strides = [1, 1]} : vector<36x64xf32> to vector<36x16xf32>
    %114 = tpu.concatenate %110, %111, %112, %113 in 0 : vector<36x16xf32>, vector<36x16xf32>, vector<36x16xf32>, vector<36x16xf32> -> vector<144x16xf32>
    %c0_127 = arith.constant 0 : index
    %c0_128 = arith.constant 0 : index
    %115 = vector.load %arg19[%c0_127, %c0_128] : memref<64x144xf32, #tpu.memory_space<vmem>>, vector<64x144xf32>
    %cst_129 = arith.constant dense<0.000000e+00> : vector<64x16xf32>
    %116 = tpu.matmul %115, %114, %cst_129 {dimension_numbers = #tpu.dot_dimension_numbers<[1], [0], [0], [1], [0, 0, 1, 1], [], []>} : vector<64x144xf32>, vector<144x16xf32>, vector<64x16xf32> -> vector<64x16xf32>
    %c0_130 = arith.constant 0 : index
    %c0_131 = arith.constant 0 : index
    %117 = vector.load %arg18[%c0_130, %c0_131] : memref<1x16xf32, #tpu.memory_space<vmem>>, vector<1x16xf32>
    %118 = vector.broadcast %117 : vector<1x16xf32> to vector<64x16xf32>
    %119 = arith.addf %116, %118 : vector<64x16xf32>
    %cst_132 = arith.constant 0.000000e+00 : f32
    %120 = vector.broadcast %cst_132 : f32 to vector<64x16xf32>
    %121 = arith.maximumf %119, %120 : vector<64x16xf32>
    %c0_133 = arith.constant 0 : index
    %c0_134 = arith.constant 0 : index
    %c16_135 = arith.constant 16 : index
    %122 = vector.load %arg29[%c0_133, %c0_134, %c16_135] : memref<1x64x48xf32, #tpu.memory_space<vmem>>, vector<1x64x16xf32>
    %123 = vector.shape_cast %122 : vector<1x64x16xf32> to vector<64x16xf32>
    %124 = vector.shape_cast %121 : vector<64x16xf32> to vector<1x64x16xf32>
    tpu.vector_store %arg29[%c0_133, %c0_134, %c16_135], %124 {strides = array<i32>} : memref<1x64x48xf32, #tpu.memory_space<vmem>>, vector<1x64x16xf32>,
    %c8_136 = arith.constant 8 : index
    %c0_137 = arith.constant 0 : index
    %125 = vector.load %arg34[%c8_136, %c0_137] : memref<51x16xf32, #tpu.memory_space<vmem>>, vector<36x16xf32>
    tpu.vector_store %arg34[%c8_136, %c0_137], %107 {strides = array<i32>} : memref<51x16xf32, #tpu.memory_space<vmem>>, vector<36x16xf32>,
    %c1_138 = arith.constant 1 : index
    %c0_139 = arith.constant 0 : index
    %126 = vector.load %arg34[%c1_138, %c0_139] : memref<51x16xf32, #tpu.memory_space<vmem>>, vector<36x16xf32>
    %c2_140 = arith.constant 2 : index
    %c0_141 = arith.constant 0 : index
    %127 = vector.load %arg34[%c2_140, %c0_141] : memref<51x16xf32, #tpu.memory_space<vmem>>, vector<36x16xf32>
    %c3_142 = arith.constant 3 : index
    %c0_143 = arith.constant 0 : index
    %128 = vector.load %arg34[%c3_142, %c0_143] : memref<51x16xf32, #tpu.memory_space<vmem>>, vector<36x16xf32>
    %c7_144 = arith.constant 7 : index
    %c0_145 = arith.constant 0 : index
    %129 = vector.load %arg34[%c7_144, %c0_145] : memref<51x16xf32, #tpu.memory_space<vmem>>, vector<36x16xf32>
    %c8_146 = arith.constant 8 : index
    %c0_147 = arith.constant 0 : index
    %130 = vector.load %arg34[%c8_146, %c0_147] : memref<51x16xf32, #tpu.memory_space<vmem>>, vector<36x16xf32>
    %c9_148 = arith.constant 9 : index
    %c0_149 = arith.constant 0 : index
    %131 = vector.load %arg34[%c9_148, %c0_149] : memref<51x16xf32, #tpu.memory_space<vmem>>, vector<36x16xf32>
    %c13_150 = arith.constant 13 : index
    %c0_151 = arith.constant 0 : index
    %132 = vector.load %arg34[%c13_150, %c0_151] : memref<51x16xf32, #tpu.memory_space<vmem>>, vector<36x16xf32>
    %c14_152 = arith.constant 14 : index
    %c0_153 = arith.constant 0 : index
    %133 = vector.load %arg34[%c14_152, %c0_153] : memref<51x16xf32, #tpu.memory_space<vmem>>, vector<36x16xf32>
    %c15_154 = arith.constant 15 : index
    %c0_155 = arith.constant 0 : index
    %134 = vector.load %arg34[%c15_154, %c0_155] : memref<51x16xf32, #tpu.memory_space<vmem>>, vector<36x16xf32>
    %135 = tpu.concatenate %126, %127, %128, %129, %130, %131, %132, %133, %134 in 1 : vector<36x16xf32>, vector<36x16xf32>, vector<36x16xf32>, vector<36x16xf32>, vector<36x16xf32>, vector<36x16xf32>, vector<36x16xf32>, vector<36x16xf32>, vector<36x16xf32> -> vector<36x144xf32>
    %c0_156 = arith.constant 0 : index
    %c0_157 = arith.constant 0 : index
    %136 = vector.load %arg20[%c0_156, %c0_157] : memref<144x32xf32, #tpu.memory_space<vmem>>, vector<144x32xf32>
    %cst_158 = arith.constant dense<0.000000e+00> : vector<36x32xf32>
    %137 = tpu.matmul %135, %136, %cst_158 {dimension_numbers = #tpu.dot_dimension_numbers<[1], [0], [0], [1], [0, 0, 1, 1], [], []>} : vector<36x144xf32>, vector<144x32xf32>, vector<36x32xf32> -> vector<36x32xf32>
    %c0_159 = arith.constant 0 : index
    %c0_160 = arith.constant 0 : index
    %138 = vector.load %arg21[%c0_159, %c0_160] : memref<1x32xf32, #tpu.memory_space<vmem>>, vector<1x32xf32>
    %139 = vector.broadcast %138 : vector<1x32xf32> to vector<36x32xf32>
    %140 = arith.addf %137, %139 : vector<36x32xf32>
    %cst_161 = arith.constant 0.000000e+00 : f32
    %141 = vector.broadcast %cst_161 : f32 to vector<36x32xf32>
    %142 = arith.maximumf %140, %141 : vector<36x32xf32>
    %c0_162 = arith.constant 0 : index
    %c0_163 = arith.constant 0 : index
    %143 = vector.load %arg22[%c0_162, %c0_163] : memref<16x36xf32, #tpu.memory_space<vmem>>, vector<16x36xf32>
    %cst_164 = arith.constant dense<0.000000e+00> : vector<16x32xf32>
    %144 = tpu.matmul %143, %142, %cst_164 {dimension_numbers = #tpu.dot_dimension_numbers<[1], [0], [0], [1], [0, 0, 1, 1], [], []>} : vector<16x36xf32>, vector<36x32xf32>, vector<16x32xf32> -> vector<16x32xf32>
    %c8_165 = arith.constant 8 : index
    %c0_166 = arith.constant 0 : index
    %145 = vector.load %arg35[%c8_165, %c0_166] : memref<29x32xf32, #tpu.memory_space<vmem>>, vector<16x32xf32>
    tpu.vector_store %arg35[%c8_165, %c0_166], %144 {strides = array<i32>} : memref<29x32xf32, #tpu.memory_space<vmem>>, vector<16x32xf32>,
    %c3_167 = arith.constant 3 : index
    %c0_168 = arith.constant 0 : index
    %146 = vector.load %arg35[%c3_167, %c0_168] : memref<29x32xf32, #tpu.memory_space<vmem>>, vector<16x32xf32>
    %c4 = arith.constant 4 : index
    %c0_169 = arith.constant 0 : index
    %147 = vector.load %arg35[%c4, %c0_169] : memref<29x32xf32, #tpu.memory_space<vmem>>, vector<16x32xf32>
    %c5_170 = arith.constant 5 : index
    %c0_171 = arith.constant 0 : index
    %148 = vector.load %arg35[%c5_170, %c0_171] : memref<29x32xf32, #tpu.memory_space<vmem>>, vector<16x32xf32>
    %c7_172 = arith.constant 7 : index
    %c0_173 = arith.constant 0 : index
    %149 = vector.load %arg35[%c7_172, %c0_173] : memref<29x32xf32, #tpu.memory_space<vmem>>, vector<16x32xf32>
    %c8_174 = arith.constant 8 : index
    %c0_175 = arith.constant 0 : index
    %150 = vector.load %arg35[%c8_174, %c0_175] : memref<29x32xf32, #tpu.memory_space<vmem>>, vector<16x32xf32>
    %c9_176 = arith.constant 9 : index
    %c0_177 = arith.constant 0 : index
    %151 = vector.load %arg35[%c9_176, %c0_177] : memref<29x32xf32, #tpu.memory_space<vmem>>, vector<16x32xf32>
    %c11 = arith.constant 11 : index
    %c0_178 = arith.constant 0 : index
    %152 = vector.load %arg35[%c11, %c0_178] : memref<29x32xf32, #tpu.memory_space<vmem>>, vector<16x32xf32>
    %c12 = arith.constant 12 : index
    %c0_179 = arith.constant 0 : index
    %153 = vector.load %arg35[%c12, %c0_179] : memref<29x32xf32, #tpu.memory_space<vmem>>, vector<16x32xf32>
    %c13_180 = arith.constant 13 : index
    %c0_181 = arith.constant 0 : index
    %154 = vector.load %arg35[%c13_180, %c0_181] : memref<29x32xf32, #tpu.memory_space<vmem>>, vector<16x32xf32>
    %155 = tpu.concatenate %146, %147, %148, %149, %150, %151, %152, %153, %154 in 1 : vector<16x32xf32>, vector<16x32xf32>, vector<16x32xf32>, vector<16x32xf32>, vector<16x32xf32>, vector<16x32xf32>, vector<16x32xf32>, vector<16x32xf32>, vector<16x32xf32> -> vector<16x288xf32>
    %c0_182 = arith.constant 0 : index
    %c0_183 = arith.constant 0 : index
    %156 = vector.load %arg23[%c0_182, %c0_183] : memref<288x32xf32, #tpu.memory_space<vmem>>, vector<288x32xf32>
    %cst_184 = arith.constant dense<0.000000e+00> : vector<16x32xf32>
    %157 = tpu.matmul %155, %156, %cst_184 {dimension_numbers = #tpu.dot_dimension_numbers<[1], [0], [0], [1], [0, 0, 1, 1], [], []>} : vector<16x288xf32>, vector<288x32xf32>, vector<16x32xf32> -> vector<16x32xf32>
    %c0_185 = arith.constant 0 : index
    %c0_186 = arith.constant 0 : index
    %158 = vector.load %arg24[%c0_185, %c0_186] : memref<1x32xf32, #tpu.memory_space<vmem>>, vector<1x32xf32>
    %159 = vector.broadcast %158 : vector<1x32xf32> to vector<16x32xf32>
    %160 = arith.addf %157, %159 : vector<16x32xf32>
    %cst_187 = arith.constant 0.000000e+00 : f32
    %161 = vector.broadcast %cst_187 : f32 to vector<16x32xf32>
    %162 = arith.maximumf %160, %161 : vector<16x32xf32>
    %c0_188 = arith.constant 0 : index
    %c0_189 = arith.constant 0 : index
    %163 = vector.load %arg25[%c0_188, %c0_189] : memref<16x1xf32, #tpu.memory_space<vmem>>, vector<16x1xf32>
    %164 = vector.broadcast %163 : vector<16x1xf32> to vector<16x32xf32>
    %165 = arith.mulf %162, %164 : vector<16x32xf32>
    %c0_190 = arith.constant 0 : index
    %c0_191 = arith.constant 0 : index
    %166 = vector.load %arg26[%c0_190, %c0_191] : memref<32x256xf32, #tpu.memory_space<vmem>>, vector<32x256xf32>
    %cst_192 = arith.constant dense<0.000000e+00> : vector<16x256xf32>
    %167 = tpu.matmul %165, %166, %cst_192 {dimension_numbers = #tpu.dot_dimension_numbers<[1], [0], [0], [1], [0, 0, 1, 1], [], []>} : vector<16x32xf32>, vector<32x256xf32>, vector<16x256xf32> -> vector<16x256xf32>
    %168 = vector.extract_strided_slice %167 {offsets = [0, 0], sizes = [16, 16], strides = [1, 1]} : vector<16x256xf32> to vector<16x16xf32>
    %169 = vector.extract_strided_slice %167 {offsets = [0, 16], sizes = [16, 16], strides = [1, 1]} : vector<16x256xf32> to vector<16x16xf32>
    %170 = vector.extract_strided_slice %167 {offsets = [0, 32], sizes = [16, 16], strides = [1, 1]} : vector<16x256xf32> to vector<16x16xf32>
    %171 = vector.extract_strided_slice %167 {offsets = [0, 48], sizes = [16, 16], strides = [1, 1]} : vector<16x256xf32> to vector<16x16xf32>
    %172 = vector.extract_strided_slice %167 {offsets = [0, 64], sizes = [16, 16], strides = [1, 1]} : vector<16x256xf32> to vector<16x16xf32>
    %173 = vector.extract_strided_slice %167 {offsets = [0, 80], sizes = [16, 16], strides = [1, 1]} : vector<16x256xf32> to vector<16x16xf32>
    %174 = vector.extract_strided_slice %167 {offsets = [0, 96], sizes = [16, 16], strides = [1, 1]} : vector<16x256xf32> to vector<16x16xf32>
    %175 = vector.extract_strided_slice %167 {offsets = [0, 112], sizes = [16, 16], strides = [1, 1]} : vector<16x256xf32> to vector<16x16xf32>
    %176 = vector.extract_strided_slice %167 {offsets = [0, 128], sizes = [16, 16], strides = [1, 1]} : vector<16x256xf32> to vector<16x16xf32>
    %177 = vector.extract_strided_slice %167 {offsets = [0, 144], sizes = [16, 16], strides = [1, 1]} : vector<16x256xf32> to vector<16x16xf32>
    %178 = vector.extract_strided_slice %167 {offsets = [0, 160], sizes = [16, 16], strides = [1, 1]} : vector<16x256xf32> to vector<16x16xf32>
    %179 = vector.extract_strided_slice %167 {offsets = [0, 176], sizes = [16, 16], strides = [1, 1]} : vector<16x256xf32> to vector<16x16xf32>
    %180 = vector.extract_strided_slice %167 {offsets = [0, 192], sizes = [16, 16], strides = [1, 1]} : vector<16x256xf32> to vector<16x16xf32>
    %181 = vector.extract_strided_slice %167 {offsets = [0, 208], sizes = [16, 16], strides = [1, 1]} : vector<16x256xf32> to vector<16x16xf32>
    %182 = vector.extract_strided_slice %167 {offsets = [0, 224], sizes = [16, 16], strides = [1, 1]} : vector<16x256xf32> to vector<16x16xf32>
    %183 = vector.extract_strided_slice %167 {offsets = [0, 240], sizes = [16, 16], strides = [1, 1]} : vector<16x256xf32> to vector<16x16xf32>
    %184 = tpu.concatenate %168, %169, %170, %171, %172, %173, %174, %175, %176, %177, %178, %179, %180, %181, %182, %183 in 0 : vector<16x16xf32>, vector<16x16xf32>, vector<16x16xf32>, vector<16x16xf32>, vector<16x16xf32>, vector<16x16xf32>, vector<16x16xf32>, vector<16x16xf32>, vector<16x16xf32>, vector<16x16xf32>, vector<16x16xf32>, vector<16x16xf32>, vector<16x16xf32>, vector<16x16xf32>, vector<16x16xf32>, vector<16x16xf32> -> vector<256x16xf32>
    %c0_193 = arith.constant 0 : index
    %c0_194 = arith.constant 0 : index
    %185 = vector.load %arg28[%c0_193, %c0_194] : memref<64x256xf32, #tpu.memory_space<vmem>>, vector<64x256xf32>
    %cst_195 = arith.constant dense<0.000000e+00> : vector<64x16xf32>
    %186 = tpu.matmul %185, %184, %cst_195 {dimension_numbers = #tpu.dot_dimension_numbers<[1], [0], [0], [1], [0, 0, 1, 1], [], []>} : vector<64x256xf32>, vector<256x16xf32>, vector<64x16xf32> -> vector<64x16xf32>
    %c0_196 = arith.constant 0 : index
    %c0_197 = arith.constant 0 : index
    %187 = vector.load %arg27[%c0_196, %c0_197] : memref<1x16xf32, #tpu.memory_space<vmem>>, vector<1x16xf32>
    %188 = vector.broadcast %187 : vector<1x16xf32> to vector<64x16xf32>
    %189 = arith.addf %186, %188 : vector<64x16xf32>
    %cst_198 = arith.constant 0.000000e+00 : f32
    %190 = vector.broadcast %cst_198 : f32 to vector<64x16xf32>
    %191 = arith.maximumf %189, %190 : vector<64x16xf32>
    %c0_199 = arith.constant 0 : index
    %c0_200 = arith.constant 0 : index
    %c32 = arith.constant 32 : index
    %192 = vector.load %arg29[%c0_199, %c0_200, %c32] : memref<1x64x48xf32, #tpu.memory_space<vmem>>, vector<1x64x16xf32>
    %193 = vector.shape_cast %192 : vector<1x64x16xf32> to vector<64x16xf32>
    %194 = vector.shape_cast %191 : vector<64x16xf32> to vector<1x64x16xf32>
    tpu.vector_store %arg29[%c0_199, %c0_200, %c32], %194 {strides = array<i32>} : memref<1x64x48xf32, #tpu.memory_space<vmem>>, vector<1x64x16xf32>,
    return
  }
  func.func @transform_0(%arg0: i32) -> (i32, i32, i32) {
    %c0_i32 = arith.constant 0 : i32
    %c0_i32_0 = arith.constant 0 : i32
    %c0_i32_1 = arith.constant 0 : i32
    return %arg0, %c0_i32, %c0_i32_0 : i32, i32, i32
  }
  func.func @transform_1(%arg0: i32) -> (i32, i32) {
    %c0_i32 = arith.constant 0 : i32
    %c0_i32_0 = arith.constant 0 : i32
    %c0_i32_1 = arith.constant 0 : i32
    return %c0_i32, %c0_i32_0 : i32, i32
  }
  func.func @transform_2(%arg0: i32) -> (i32, i32) {
    %c0_i32 = arith.constant 0 : i32
    %c0_i32_0 = arith.constant 0 : i32
    %c0_i32_1 = arith.constant 0 : i32
    return %c0_i32, %c0_i32_0 : i32, i32
  }
  func.func @transform_3(%arg0: i32) -> (i32, i32) {
    %c0_i32 = arith.constant 0 : i32
    %c0_i32_0 = arith.constant 0 : i32
    %c0_i32_1 = arith.constant 0 : i32
    return %c0_i32, %c0_i32_0 : i32, i32
  }
  func.func @transform_4(%arg0: i32) -> (i32, i32) {
    %c0_i32 = arith.constant 0 : i32
    %c0_i32_0 = arith.constant 0 : i32
    %c0_i32_1 = arith.constant 0 : i32
    return %c0_i32, %c0_i32_0 : i32, i32
  }
  func.func @transform_5(%arg0: i32) -> (i32, i32) {
    %c0_i32 = arith.constant 0 : i32
    %c0_i32_0 = arith.constant 0 : i32
    %c0_i32_1 = arith.constant 0 : i32
    return %c0_i32, %c0_i32_0 : i32, i32
  }
  func.func @transform_6(%arg0: i32) -> (i32, i32) {
    %c0_i32 = arith.constant 0 : i32
    %c0_i32_0 = arith.constant 0 : i32
    %c0_i32_1 = arith.constant 0 : i32
    return %c0_i32, %c0_i32_0 : i32, i32
  }
  func.func @transform_7(%arg0: i32) -> (i32, i32) {
    %c0_i32 = arith.constant 0 : i32
    %c0_i32_0 = arith.constant 0 : i32
    %c0_i32_1 = arith.constant 0 : i32
    return %c0_i32, %c0_i32_0 : i32, i32
  }
  func.func @transform_8(%arg0: i32) -> (i32, i32) {
    %c0_i32 = arith.constant 0 : i32
    %c0_i32_0 = arith.constant 0 : i32
    %c0_i32_1 = arith.constant 0 : i32
    return %c0_i32, %c0_i32_0 : i32, i32
  }
  func.func @transform_9(%arg0: i32) -> (i32, i32) {
    %c0_i32 = arith.constant 0 : i32
    %c0_i32_0 = arith.constant 0 : i32
    %c0_i32_1 = arith.constant 0 : i32
    return %c0_i32, %c0_i32_0 : i32, i32
  }
  func.func @transform_10(%arg0: i32) -> (i32, i32) {
    %c0_i32 = arith.constant 0 : i32
    %c0_i32_0 = arith.constant 0 : i32
    %c0_i32_1 = arith.constant 0 : i32
    return %c0_i32, %c0_i32_0 : i32, i32
  }
  func.func @transform_11(%arg0: i32) -> (i32, i32) {
    %c0_i32 = arith.constant 0 : i32
    %c0_i32_0 = arith.constant 0 : i32
    %c0_i32_1 = arith.constant 0 : i32
    return %c0_i32, %c0_i32_0 : i32, i32
  }
  func.func @transform_12(%arg0: i32) -> (i32, i32) {
    %c0_i32 = arith.constant 0 : i32
    %c0_i32_0 = arith.constant 0 : i32
    %c0_i32_1 = arith.constant 0 : i32
    return %c0_i32, %c0_i32_0 : i32, i32
  }
  func.func @transform_13(%arg0: i32) -> (i32, i32) {
    %c0_i32 = arith.constant 0 : i32
    %c0_i32_0 = arith.constant 0 : i32
    %c0_i32_1 = arith.constant 0 : i32
    return %c0_i32, %c0_i32_0 : i32, i32
  }
  func.func @transform_14(%arg0: i32) -> (i32, i32) {
    %c0_i32 = arith.constant 0 : i32
    %c0_i32_0 = arith.constant 0 : i32
    %c0_i32_1 = arith.constant 0 : i32
    return %c0_i32, %c0_i32_0 : i32, i32
  }
  func.func @transform_15(%arg0: i32) -> (i32, i32) {
    %c0_i32 = arith.constant 0 : i32
    %c0_i32_0 = arith.constant 0 : i32
    %c0_i32_1 = arith.constant 0 : i32
    return %c0_i32, %c0_i32_0 : i32, i32
  }
  func.func @transform_16(%arg0: i32) -> (i32, i32) {
    %c0_i32 = arith.constant 0 : i32
    %c0_i32_0 = arith.constant 0 : i32
    %c0_i32_1 = arith.constant 0 : i32
    return %c0_i32, %c0_i32_0 : i32, i32
  }
  func.func @transform_17(%arg0: i32) -> (i32, i32) {
    %c0_i32 = arith.constant 0 : i32
    %c0_i32_0 = arith.constant 0 : i32
    %c0_i32_1 = arith.constant 0 : i32
    return %c0_i32, %c0_i32_0 : i32, i32
  }
  func.func @transform_18(%arg0: i32) -> (i32, i32) {
    %c0_i32 = arith.constant 0 : i32
    %c0_i32_0 = arith.constant 0 : i32
    %c0_i32_1 = arith.constant 0 : i32
    return %c0_i32, %c0_i32_0 : i32, i32
  }
  func.func @transform_19(%arg0: i32) -> (i32, i32) {
    %c0_i32 = arith.constant 0 : i32
    %c0_i32_0 = arith.constant 0 : i32
    %c0_i32_1 = arith.constant 0 : i32
    return %c0_i32, %c0_i32_0 : i32, i32
  }
  func.func @transform_20(%arg0: i32) -> (i32, i32) {
    %c0_i32 = arith.constant 0 : i32
    %c0_i32_0 = arith.constant 0 : i32
    %c0_i32_1 = arith.constant 0 : i32
    return %c0_i32, %c0_i32_0 : i32, i32
  }
  func.func @transform_21(%arg0: i32) -> (i32, i32) {
    %c0_i32 = arith.constant 0 : i32
    %c0_i32_0 = arith.constant 0 : i32
    %c0_i32_1 = arith.constant 0 : i32
    return %c0_i32, %c0_i32_0 : i32, i32
  }
  func.func @transform_22(%arg0: i32) -> (i32, i32) {
    %c0_i32 = arith.constant 0 : i32
    %c0_i32_0 = arith.constant 0 : i32
    %c0_i32_1 = arith.constant 0 : i32
    return %c0_i32, %c0_i32_0 : i32, i32
  }
  func.func @transform_23(%arg0: i32) -> (i32, i32) {
    %c0_i32 = arith.constant 0 : i32
    %c0_i32_0 = arith.constant 0 : i32
    %c0_i32_1 = arith.constant 0 : i32
    return %c0_i32, %c0_i32_0 : i32, i32
  }
  func.func @transform_24(%arg0: i32) -> (i32, i32) {
    %c0_i32 = arith.constant 0 : i32
    %c0_i32_0 = arith.constant 0 : i32
    %c0_i32_1 = arith.constant 0 : i32
    return %c0_i32, %c0_i32_0 : i32, i32
  }
  func.func @transform_25(%arg0: i32) -> (i32, i32) {
    %c0_i32 = arith.constant 0 : i32
    %c0_i32_0 = arith.constant 0 : i32
    %c0_i32_1 = arith.constant 0 : i32
    return %c0_i32, %c0_i32_0 : i32, i32
  }
  func.func @transform_26(%arg0: i32) -> (i32, i32) {
    %c0_i32 = arith.constant 0 : i32
    %c0_i32_0 = arith.constant 0 : i32
    %c0_i32_1 = arith.constant 0 : i32
    return %c0_i32, %c0_i32_0 : i32, i32
  }
  func.func @transform_27(%arg0: i32) -> (i32, i32) {
    %c0_i32 = arith.constant 0 : i32
    %c0_i32_0 = arith.constant 0 : i32
    %c0_i32_1 = arith.constant 0 : i32
    return %c0_i32, %c0_i32_0 : i32, i32
  }
  func.func @transform_28(%arg0: i32) -> (i32, i32, i32) {
    %c0_i32 = arith.constant 0 : i32
    %c0_i32_0 = arith.constant 0 : i32
    %c0_i32_1 = arith.constant 0 : i32
    return %arg0, %c0_i32, %c0_i32_0 : i32, i32, i32
  }
}

</mosaic_0001>

<bundles_post_ra>
// kernel: rpn_forward.1
= control target key start
LH: loop header
LB: loop body
LE: loop exit
PB: predicated region body
PF: predicated region fallthrough
CT: control target
= control target key end

     0   :  { %s12953_s0 = inlined_call_operand.vmem [shape: f32[2,324,16], index: 0, kind: input, shape index: {}]   ;;  %s12954_s1 = inlined_call_operand.vmem [shape: f32[144,16], index: 1, kind: input, shape index: {}]   ;;  %s12955_s2 = inlined_call_operand.vmem [shape: f32[1,16], index: 2, kind: input, shape index: {}]   ;;  %s12956_s3 = inlined_call_operand.vmem [shape: f32[100,324], index: 3, kind: input, shape index: {}]   ;;  %s12957_s4 = inlined_call_operand.vmem [shape: f32[144,16], index: 4, kind: input, shape index: {}]   ;;  %s12958_s5 = inlined_call_operand.vmem [shape: f32[1,16], index: 5, kind: input, shape index: {}]   ;;  %s12959_s6 = inlined_call_operand.vmem [shape: f32[100,1], index: 6, kind: input, shape index: {}]   ;;  %s12960_s7 = inlined_call_operand.vmem [shape: f32[16,16], index: 7, kind: input, shape index: {}]   ;;  %s12961_s8 = inlined_call_operand.vmem [shape: f32[1,16], index: 8, kind: input, shape index: {}]   ;;  %s12962_s9 = inlined_call_operand.vmem [shape: f32[64,100], index: 9, kind: input, shape index: {}]   ;;  %s12963_s10 = inlined_call_operand.vmem [shape: f32[144,16], index: 10, kind: input, shape index: {}]   ;;  %s12964_s11 = inlined_call_operand.vmem [shape: f32[1,16], index: 11, kind: input, shape index: {}]   ;;  %s12965_s12 = inlined_call_operand.vmem [shape: f32[36,100], index: 12, kind: input, shape index: {}]   ;;  %s12966_s13 = inlined_call_operand.vmem [shape: f32[144,16], index: 13, kind: input, shape index: {}]   ;;  %s12967_s14 = inlined_call_operand.vmem [shape: f32[1,16], index: 14, kind: input, shape index: {}]   ;;  %s12968_s15 = inlined_call_operand.vmem [shape: f32[36,1], index: 15, kind: input, shape index: {}]   ;;  %s12969_s16 = inlined_call_operand.vmem [shape: f32[16,64], index: 16, kind: input, shape index: {}]   ;;  %s12970_s17 = inlined_call_operand.vmem [shape: f32[1,16], index: 17, kind: input, shape index: {}]   ;;  %s12971_s18 = inlined_call_operand.vmem [shape: f32[64,144], index: 18, kind: input, shape index: {}]   ;;  %s12972_s19 = inlined_call_operand.vmem [shape: f32[144,32], index: 19, kind: input, shape index: {}]   ;;  %s12973_s20 = inlined_call_operand.vmem [shape: f32[1,32], index: 20, kind: input, shape index: {}]   ;;  %s12974_s21 = inlined_call_operand.vmem [shape: f32[16,36], index: 21, kind: input, shape index: {}]   ;;  %s12975_s22 = inlined_call_operand.vmem [shape: f32[288,32], index: 22, kind: input, shape index: {}]   ;;  %s12976_s23 = inlined_call_operand.vmem [shape: f32[1,32], index: 23, kind: input, shape index: {}]   ;;  %s12977_s24 = inlined_call_operand.vmem [shape: f32[16,1], index: 24, kind: input, shape index: {}]   ;;  %s12978_s25 = inlined_call_operand.vmem [shape: f32[32,256], index: 25, kind: input, shape index: {}]   ;;  %s12979_s26 = inlined_call_operand.vmem [shape: f32[1,16], index: 26, kind: input, shape index: {}]   ;;  %s12980_s27 = inlined_call_operand.vmem [shape: f32[64,256], index: 27, kind: input, shape index: {}]   ;;  %s12981_s28 = inlined_call_operand.hbm [shape: f32[2,64,48], index: 28, kind: output, shape index: {}]  }
   0x1   :  { %13024 = sst [smem:[#allocation19_spill]] %s12953_s0 }
   0x2   :  { %13025 = sst [smem:[#allocation20_spill]] %s12954_s1 }
   0x3   :  { %13026 = sst [smem:[#allocation21_spill]] %s12955_s2 }
   0x4   :  { %13027 = sst [smem:[#allocation22_spill]] %s12956_s3 }
   0x5   :  { %13028 = sst [smem:[#allocation23_spill]] %s12957_s4 }
   0x6   :  { %13029 = sst [smem:[#allocation24_spill]] %s12958_s5 }
   0x7   :  { %13030 = sst [smem:[#allocation25_spill]] %s12959_s6 }
   0x8   :  { %13031 = sst [smem:[#allocation26_spill]] %s12960_s7 }
   0x9   :  { %13032 = sst [smem:[#allocation27_spill]] %s12961_s8 }
   0xa   :  { %13033 = sst [smem:[#allocation28_spill]] %s12962_s9 }
   0xb   :  { %13034 = sst [smem:[#allocation29_spill]] %s12963_s10 }
   0xc   :  { %13035 = sst [smem:[#allocation30_spill]] %s12964_s11 }
   0xd   :  { %13036 = sst [smem:[#allocation31_spill]] %s12965_s12 }
   0xe   :  { %13037 = sst [smem:[#allocation32_spill]] %s12966_s13 }
   0xf   :  { %13038 = sst [smem:[#allocation33_spill]] %s12979_s26 }
  0x10   :  { %13039 = sst [smem:[#allocation34_spill]] %s12980_s27 }
  0x11   :  { %13040 = sst [smem:[#allocation35_spill]] %s12981_s28 }
  0x12   :  { %33 = vsyncpa [#allocation9], 0 }
  0x13   :  { %35 = vsyncpa [#allocation9 + $0x1], 0  ;;  %s10090_s8 = smov 0   ;;  %s10092_s5 = smov 0  }
  0x14   :  { %s10094_s9 = smov 0   ;;  %s10096_s30 = smov 0  }
  0x15 LB: > { %13041 = sst [smem:[#allocation11_spill]] %s9917_s8  ;;  %s10111_s3 = sadd.s32 4294967295, %s9929_s30   ;;  %s9929_s30 = sphi %s10096_s30, %s13085_s30   ;;  %s9925_s9 = sphi %s10094_s9, %s13087_s9   ;;  %s9921_s5 = sphi %s10092_s5, %s13089_s5   ;;  %s9917_s8 = sphi %s10090_s8, %s13088_s8  }
  0x16   : > { %13042 = sst [smem:[#allocation12_spill]] %s9925_s9  ;;  %s7437_s6 = sadd.s32 4294967294, %s9929_s30  }
  0x17   : > { %13043 = sst [smem:[#allocation13_spill]] %s9929_s30  ;;  %s10115_s10 = sadd.s32 1, %s9929_s30  }
  0x18   : > { %13044 = sst [smem:[#allocation14_spill]] %s10111_s3  ;;  %s641_s0 = sadd.s32 1, %s9925_s9 }
  0x19   : > { %13045 = sst [smem:[#allocation15_spill]] %s10115_s10  ;;  %s638_s11 = ssub.s32 %s9929_s30, %s10115_s10 }
  0x1a   : > { %p651_p0 = scmp.ne.s32.totalorder %s9925_s9, %s9921_s5  ;;  %p639_p1 = scmp.eq.s32.totalorder %s638_s11, 0 }
  0x1b   : > { %p652_p2 = scmp.eq.s32.totalorder %s10111_s3, 1  ;;  %p657_p3 = scmp.ne.s32.totalorder %s9921_s5, %s9917_s8 }
  0x1c   : > { %p658_p4 = scmp.eq.s32.totalorder %s7437_s6, 1  ;;  %p7440_p7 = scmp.ge.s32.totalorder %s9929_s30, 1 }
  0x1d   : > { %s10126_s29 = scalar_select %p639_p1, %s9925_s9, %s641_s0  }
  0x1e   : > { %p10128_p5 = por %p652_p2, %p651_p0  ;;  %p10132_p6 = por %p658_p4, %p657_p3 }
  0x1f   : > { %13046 = sst [smem:[#allocation16_spill]] %s10126_s29  ;;  %p765_p8 = scmp.lt.s32.totalorder %s9929_s30, 3 }
  0x20   : > { %s13047_s2 = scalar_select %p10128_p5, 1, 0 }
  0x21   : > { %s13049_s7 = scalar_select %p10132_p6, 1, 0 }
  0x22   : > { %13048 = sst [smem:[#allocation17_spill]] %s13047_s2  ;;  %p766_p9 = pnand %p7440_p7, %p765_p8 }
  0x23   : > { %13050 = sst [smem:[#allocation18_spill]] %s13049_s7  ;;  %vm844_vm0 = vcmask (!%p766_p9), 130048   ;;  %s13051_s4 = sld [smem:[#allocation20_spill]] (!%p766_p9)  ;;  %v9931_v1 = vmov (!%p766_p9), 0.0   ;;  %v9932_v2 = vmov (!%p766_p9), 0.0|0.0   ;;  %vm939_vm1 = vcmask (!%p766_p9), 261120  }
  0x24   : > { %769 = sbr.rel (%p766_p9) target bundleno = 4173 (0x104d), region = 132  ;;  %845 = vst.msk [vmem:[#allocation2] sm:$0xff] (!%p766_p9), %vm844_vm0, %v9931_v1  ;;  %846 = vst.msk [vmem:[#allocation2 + $0x8] sm:$0xff] (!%p766_p9), %vm844_vm0, %v9931_v1  ;;  %p839_p10 = scmp.lt.s32.totalorder (!%p766_p9), %s10111_s3, 1  ;;  %8080 = vmatprep.subr.bf16.mxu0 (!%p766_p9), %v9932_v2  ;;  %vm2475_vm2 = vcmask (!%p766_p9), 392192   ;;  %vm2517_vm3 = vcmask (!%p766_p9), 523264  }
  0x25   : > { %847 = vst.msk [vmem:[#allocation2 + $0x10] sm:$0xff] (!%p766_p9), %vm844_vm0, %v9931_v1  ;;  %848 = vst.msk [vmem:[#allocation2 + $0x18] sm:$0xff] (!%p766_p9), %vm844_vm0, %v9931_v1  ;;  %s13052_s7 = sld [smem:[#allocation19_spill]] (!%p766_p9)  ;;  %s13007_s28 = smov (!%p766_p9), 16   ;;  %vm2559_vm4 = vcmask (!%p766_p9), 654336   ;;  %vm1026_vm5 = vcmask (!%p766_p9), 125952  }
  0x26   : > { %849 = vst.msk [vmem:[#allocation2 + $0x20] sm:$0xff] (!%p766_p9), %vm844_vm0, %v9931_v1  ;;  %850 = vst.msk [vmem:[#allocation2 + $0x28] sm:$0xff] (!%p766_p9), %vm844_vm0, %v9931_v1  ;;  %s13003_s29 = smov (!%p766_p9), 48   ;;  %s13001_s10 = smov (!%p766_p9), 80   ;;  %vm2601_vm6 = vcmask (!%p766_p9), 785408   ;;  %vm2643_vm7 = vcmask (!%p766_p9), 916480  }
  0x27   : > { %851 = vst.msk [vmem:[#allocation2 + $0x30] sm:$0xff] (!%p766_p9), %vm844_vm0, %v9931_v1  ;;  %852 = vst.msk [vmem:[#allocation2 + $0x38] sm:$0xff] (!%p766_p9), %vm844_vm0, %v9931_v1  ;;  %s13005_s12 = smov (!%p766_p9), 64   ;;  %s12997_s9 = smov (!%p766_p9), 112   ;;  %vm890_vm8 = vcmask (!%p766_p9), 129024   ;;  %vm9940_vm9 = vmmov (!%p766_p9), 0  }
  0x28   : > { %853 = vst.msk [vmem:[#allocation2 + $0x40] sm:$0xff] (!%p766_p9), %vm844_vm0, %v9931_v1  ;;  %854 = vst.msk [vmem:[#allocation2 + $0x48] sm:$0xff] (!%p766_p9), %vm844_vm0, %v9931_v1  ;;  %s12999_s11 = smov (!%p766_p9), 96   ;;  %vm3223_vm10 = vcmask (!%p766_p9), 1043456   ;;  %vm3183_vm11 = vcmask (!%p766_p9), 556032   ;;  %s13062_s30 = sld [smem:[#allocation25_spill]] (!%p766_p9) }
  0x29   : > { %v10141_v0 = vld [vmem:[%s13051_s4] sm:$0xff] (!%p766_p9)  ;;  %855 = vst.msk [vmem:[#allocation2 + $0x50] sm:$0xff] (!%p766_p9), %vm844_vm0, %v9931_v1  ;;  %856 = vst.msk [vmem:[#allocation2 + $0x58] sm:$0xff] (!%p766_p9), %vm844_vm0, %v9931_v1  ;;  %v2686_v3 = vld [vmem:[%s13051_s4 + $0x8] sm:$0xff] (!%p766_p9)  ;;  %s13064_s26 = sld [smem:[#allocation26_spill]] (!%p766_p9)  ;;  %vm4512_vm12 = vcmask (!%p766_p9), 818176  }
  0x2a   : > { %857 = vst.msk [vmem:[#allocation2 + $0x60] sm:$0xff] (!%p766_p9), %vm844_vm0, %v9931_v1  ;;  %858 = vst.msk [vmem:[#allocation2 + $0x68] sm:$0xff] (!%p766_p9), %vm844_vm0, %v9931_v1  ;;  %v2687_v4 = vld [vmem:[%s13051_s4 + $0x10] sm:$0xff] (!%p766_p9)  ;;  %v2688_v5 = vld [vmem:[%s13051_s4 + $0x18] sm:$0xff] (!%p766_p9)  ;;  %v8081_v6 = vpack.c.bf16 (!%p766_p9), %v2686_v3, %v10141_v0  ;;  %s13072_s2 = sld [smem:[#allocation30_spill]] (!%p766_p9)  ;;  %vm930_vm13 = vcmask (!%p766_p9), 124928  }
  0x2b   : > { %859 = vst.msk [vmem:[#allocation2 + $0x70] sm:$0xff] %vm844_vm0, %v9931_v1  ;;  %860 = vst.msk [vmem:[#allocation2 + $0x78] sm:$0xff] %vm844_vm0, %v9931_v1  ;;  %s840_s6 = scalar_select %p839_p10, %s10111_s3, 1  ;;  %v8084_v7 = vpack.c.bf16 %v2688_v5, %v2687_v4  ;;  %v2689_v8 = vld [vmem:[%s13051_s4 + $0x20] sm:$0xff]  ;;  %v2690_v9 = vld [vmem:[%s13051_s4 + $0x28] sm:$0xff]  ;;  %vm6630_vm14 = vcmask 293888  }
  0x2c   : > { %861 = vst.msk [vmem:[#allocation2 + $0x80] sm:$0xff] %vm844_vm0, %v9931_v1  ;;  %862 = vst.msk [vmem:[#allocation2 + $0x88] sm:$0xff] %vm844_vm0, %v9931_v1  ;;  %8082 = vmatpush1.bf16.msra.mxu0 %v8081_v6  ;;  %v2691_v10 = vld [vmem:[%s13051_s4 + $0x30] sm:$0xff]  ;;  %v2692_v11 = vld [vmem:[%s13051_s4 + $0x38] sm:$0xff]  ;;  %v8087_v15 = vpack.c.bf16 %v2690_v9, %v2689_v8  ;;  %s13020_s3 = sand.u32 1, %s9921_s5   ;;  %s13074_s13 = sld [smem:[#allocation32_spill]] }
  0x2d   : > { %863 = vst.msk [vmem:[#allocation2 + $0x90] sm:$0xff] %vm844_vm0, %v9931_v1  ;;  %864 = vst.msk [vmem:[#allocation2 + $0x98] sm:$0xff] %vm844_vm0, %v9931_v1  ;;  %s8422_s0 = smul.u32 328, %s840_s6  ;;  %8083 = vmatprep.subr.bf16.mxu0 %v9932_v2  ;;  %v1069_v12 = vld [vmem:[#allocation2 + $0x6] sm:$0xff]  ;;  %v1070_v13 = vld [vmem:[#allocation2 + $0xe] sm:$0xff]  ;;  %v8090_v32 = vpack.c.bf16 %v2692_v11, %v2691_v10  ;;  %s13053_s6 = sld [smem:[#allocation21_spill]] }
  0x2e   : > { %865 = vst.msk [vmem:[#allocation2 + $0xa0] sm:$0xff] %vm844_vm0, %v9931_v1  ;;  %866 = vst.msk [vmem:[#allocation2 + $0xa8] sm:$0xff] %vm844_vm0, %v9931_v1  ;;  %v1110_v14 = vld [vmem:[#allocation2 + $0x7] sm:$0xff]  ;;  %v8475_v16 = vpack.i.bf16 %v1070_v13, %v1069_v12  ;;  %v1111_v17 = vld [vmem:[#allocation2 + $0xf] sm:$0xff]  ;;  %vm943_vm15 = vcmask 258048  }
  0x2f   : > { %867 = vst.msk [vmem:[#allocation2 + $0xb0] sm:$0xff] %vm844_vm0, %v9931_v1  ;;  %868 = vst.msk [vmem:[#allocation2 + $0xb8] sm:$0xff] %vm844_vm0, %v9931_v1  ;;  %s10346_s8 = scalar_lea.vmem %s13052_s7, %s8422_s0  ;;  %v8480_v23 = vpack.i.bf16 %v1111_v17, %v1110_v14  ;;  %v2693_v27 = vld [vmem:[%s13051_s4 + $0x40] sm:$0xff]  ;;  %v2694_v28 = vld [vmem:[%s13051_s4 + $0x48] sm:$0xff]  ;;  %s13009_s0 = smov 32  }
  0x30   : > { %869 = vst.msk [vmem:[#allocation2 + $0xc0] sm:$0xff] %vm844_vm0, %v9931_v1  ;;  %870 = vst.msk [vmem:[#allocation2 + $0xc8] sm:$0xff] %vm844_vm0, %v9931_v1  ;;  %8085 = vmatpush1.bf16.msra.mxu0 %v8084_v7  ;;  %v945_v18 = vld [vmem:[%s10346_s8] sm:$0xff]  ;;  %v946_v19 = vld [vmem:[%s10346_s8 + $0x8] sm:$0xff]  ;;  %8476 = vrot.lane.b32.xlu0 %v8475_v16, %s13007_s28  ;;  %v8093_v41 = vpack.c.bf16 %v2694_v28, %v2693_v27  ;;  %s13059_s7 = smov 80  }
  0x31   : > { %871 = vst.msk [vmem:[#allocation2 + $0xd0] sm:$0xff] %vm844_vm0, %v9931_v1  ;;  %872 = vst.msk [vmem:[#allocation2 + $0xd8] sm:$0xff] %vm844_vm0, %v9931_v1  ;;  %8086 = vmatprep.subr.bf16.mxu0 %v9932_v2  ;;  %v947_v20 = vld [vmem:[%s10346_s8 + $0x10] sm:$0xff]  ;;  %v948_v21 = vld [vmem:[%s10346_s8 + $0x18] sm:$0xff] }
  0x32   : > { %873 = vst.msk [vmem:[#allocation2 + $0xe0] sm:$0xff] %vm844_vm0, %v9931_v1  ;;  %874 = vst.msk [vmem:[#allocation2 + $0xe8] sm:$0xff] %vm844_vm0, %v9931_v1  ;;  %v949_v22 = vld [vmem:[%s10346_s8 + $0x20] sm:$0xff]  ;;  %v950_v24 = vld [vmem:[%s10346_s8 + $0x28] sm:$0xff] }
  0x33   : > { %875 = vst.msk [vmem:[#allocation2 + $0xf0] sm:$0xff] %vm844_vm0, %v9931_v1  ;;  %876 = vst.msk [vmem:[#allocation2 + $0xf8] sm:$0xff] %vm844_vm0, %v9931_v1  ;;  %v951_v25 = vld [vmem:[%s10346_s8 + $0x30] sm:$0xff]  ;;  %v952_v26 = vld [vmem:[%s10346_s8 + $0x38] sm:$0xff] }
  0x34   : > { %877 = vst.msk [vmem:[#allocation2 + $0x100] sm:$0xff] %vm844_vm0, %v9931_v1  ;;  %878 = vst.msk [vmem:[#allocation2 + $0x108] sm:$0xff] %vm844_vm0, %v9931_v1  ;;  %v953_v29 = vld [vmem:[%s10346_s8 + $0x40] sm:$0xff]  ;;  %v954_v30 = vld [vmem:[%s10346_s8 + $0x48] sm:$0xff]  ;;  %8088 = vmatpush1.bf16.msra.mxu0 %v8087_v15  ;;  %8481 = vrot.lane.b32.xlu0 %v8480_v23, %s13009_s0 }
  0x35   : > { %879 = vst.msk [vmem:[#allocation2 + $0x110] sm:$0xff] %vm844_vm0, %v9931_v1  ;;  %880 = vst.msk [vmem:[#allocation2 + $0x118] sm:$0xff] %vm844_vm0, %v9931_v1  ;;  %v955_v31 = vld [vmem:[%s10346_s8 + $0x50] sm:$0xff]  ;;  %v956_v33 = vld [vmem:[%s10346_s8 + $0x58] sm:$0xff]  ;;  %8089 = vmatprep.subr.bf16.mxu0 %v9932_v2 }
  0x36   : > { %881 = vst.msk [vmem:[#allocation2 + $0x120] sm:$0xff] %vm844_vm0, %v9931_v1  ;;  %882 = vst.msk [vmem:[#allocation2 + $0x128] sm:$0xff] %vm844_vm0, %v9931_v1  ;;  %v957_v34 = vld [vmem:[%s10346_s8 + $0x60] sm:$0xff]  ;;  %v958_v35 = vld [vmem:[%s10346_s8 + $0x68] sm:$0xff] }
  0x37   : > { %883 = vst.msk [vmem:[#allocation2 + $0x130] sm:$0xff] %vm844_vm0, %v9931_v1  ;;  %884 = vst.msk [vmem:[#allocation2 + $0x138] sm:$0xff] %vm844_vm0, %v9931_v1  ;;  %v959_v36 = vld [vmem:[%s10346_s8 + $0x70] sm:$0xff]  ;;  %v960_v37 = vld [vmem:[%s10346_s8 + $0x78] sm:$0xff] }
  0x38   : > { %885 = vst.msk [vmem:[#allocation2 + $0x140] sm:$0xff] %vm844_vm0, %v9931_v1  ;;  %886 = vst.msk [vmem:[#allocation2 + $0x148] sm:$0xff] %vm844_vm0, %v9931_v1  ;;  %v961_v38 = vld [vmem:[%s10346_s8 + $0x80] sm:$0xff]  ;;  %v962_v39 = vld [vmem:[%s10346_s8 + $0x88] sm:$0xff]  ;;  %8091 = vmatpush1.bf16.msra.mxu0 %v8090_v32 }
  0x39   : > { %887 = vst.msk [vmem:[#allocation2 + $0x150] sm:$0xff] %vm844_vm0, %v9931_v1  ;;  %888 = vst.msk [vmem:[#allocation2 + $0x158] sm:$0xff] %vm844_vm0, %v9931_v1  ;;  %v963_v40 = vld [vmem:[%s10346_s8 + $0x90] sm:$0xff]  ;;  %v2696_v43 = vld [vmem:[%s13051_s4 + $0x58] sm:$0xff]  ;;  %8092 = vmatprep.subr.bf16.mxu0 %v9932_v2 }
  0x3a   : > { %889 = vst.msk [vmem:[#allocation2 + $0x160] sm:$0xff] %vm844_vm0, %v9931_v1  ;;  %892 = vst.msk [vmem:[#allocation3] sm:$0xff] %vm844_vm0, %v9931_v1  ;;  %v2695_v42 = vld [vmem:[%s13051_s4 + $0x50] sm:$0xff]  ;;  %v2697_v56 = vld [vmem:[%s13051_s4 + $0x60] sm:$0xff] }
  0x3b   : > { %893 = vst.msk [vmem:[#allocation3 + $0x8] sm:$0xff] %vm844_vm0, %v9931_v1  ;;  %894 = vst.msk [vmem:[#allocation3 + $0x10] sm:$0xff] %vm844_vm0, %v9931_v1  ;;  %v8096_v55 = vpack.c.bf16 %v2696_v43, %v2695_v42  ;;  %v2698_v60 = vld [vmem:[%s13051_s4 + $0x68] sm:$0xff]  ;;  %v2699_v63 = vld [vmem:[%s13051_s4 + $0x70] sm:$0xff] }
  0x3c   : > { %895 = vst.msk [vmem:[#allocation3 + $0x18] sm:$0xff] %vm844_vm0, %v9931_v1  ;;  %896 = vst.msk [vmem:[#allocation3 + $0x20] sm:$0xff] %vm844_vm0, %v9931_v1  ;;  %8094 = vmatpush1.bf16.msra.mxu0 %v8093_v41  ;;  %v8099_v62 = vpack.c.bf16 %v2698_v60, %v2697_v56  ;;  %v2700_v4 = vld [vmem:[%s13051_s4 + $0x78] sm:$0xff]  ;;  %v2702_v32 = vld [vmem:[%s13051_s4 + $0x88] sm:$0xff] }
  0x3d   : > { %897 = vst.msk [vmem:[#allocation3 + $0x28] sm:$0xff] %vm844_vm0, %v9931_v1  ;;  %898 = vst.msk [vmem:[#allocation3 + $0x30] sm:$0xff] %vm844_vm0, %v9931_v1  ;;  %8095 = vmatprep.subr.bf16.mxu0 %v9932_v2  ;;  %v8102_v8 = vpack.c.bf16 %v2700_v4, %v2699_v63  ;;  %v968_v42 = vld [vmem:[%s10346_s8 + $0xb8] sm:$0xff]  ;;  %v969_v43 = vld [vmem:[%s10346_s8 + $0xc0] sm:$0xff] }
  0x3e   : > { %899 = vst.msk [vmem:[#allocation3 + $0x38] sm:$0xff] %vm844_vm0, %v9931_v1  ;;  %900 = vst.msk [vmem:[#allocation3 + $0x40] sm:$0xff] %vm844_vm0, %v9931_v1  ;;  %v972_v63 = vld [vmem:[%s10346_s8 + $0xd8] sm:$0xff]  ;;  %v973_v4 = vld [vmem:[%s10346_s8 + $0xe0] sm:$0xff] }
  0x3f   : > { %901 = vst.msk [vmem:[#allocation3 + $0x48] sm:$0xff] %vm844_vm0, %v9931_v1  ;;  %902 = vst.msk [vmem:[#allocation3 + $0x50] sm:$0xff] %vm844_vm0, %v9931_v1 }
  0x40   : > { %903 = vst.msk [vmem:[#allocation3 + $0x58] sm:$0xff] %vm844_vm0, %v9931_v1  ;;  %904 = vst.msk [vmem:[#allocation3 + $0x60] sm:$0xff] %vm844_vm0, %v9931_v1  ;;  %8097 = vmatpush1.bf16.msra.mxu0 %v8096_v55 }
  0x41   : > { %905 = vst.msk [vmem:[#allocation3 + $0x68] sm:$0xff] %vm844_vm0, %v9931_v1  ;;  %906 = vst.msk [vmem:[#allocation3 + $0x70] sm:$0xff] %vm844_vm0, %v9931_v1  ;;  %8098 = vmatprep.subr.bf16.mxu0 %v9932_v2 }
  0x42   : > { %908 = vst.msk [vmem:[#allocation4] sm:$0xff] %vm844_vm0, %v9931_v1  ;;  %909 = vst.msk [vmem:[#allocation4 + $0x8] sm:$0xff] %vm844_vm0, %v9931_v1 }
  0x43   : > { %910 = vst.msk [vmem:[#allocation4 + $0x10] sm:$0xff] %vm844_vm0, %v9931_v1  ;;  %911 = vst.msk [vmem:[#allocation4 + $0x18] sm:$0xff] %vm844_vm0, %v9931_v1 }
  0x44   : > { %912 = vst.msk [vmem:[#allocation4 + $0x20] sm:$0xff] %vm844_vm0, %v9931_v1  ;;  %913 = vst.msk [vmem:[#allocation4 + $0x28] sm:$0xff] %vm844_vm0, %v9931_v1  ;;  %8100 = vmatpush1.bf16.msra.mxu0 %v8099_v62 }
  0x45   : > { %914 = vst.msk [vmem:[#allocation4 + $0x30] sm:$0xff] %vm844_vm0, %v9931_v1  ;;  %915 = vst.msk [vmem:[#allocation4 + $0x38] sm:$0xff] %vm844_vm0, %v9931_v1  ;;  %8101 = vmatprep.subr.bf16.mxu0 %v9932_v2 }
  0x46   : > { %916 = vst.msk [vmem:[#allocation4 + $0x40] sm:$0xff] %vm844_vm0, %v9931_v1  ;;  %917 = vst.msk [vmem:[#allocation4 + $0x48] sm:$0xff] %vm844_vm0, %v9931_v1 }
  0x47   : > { %918 = vst.msk [vmem:[#allocation4 + $0x50] sm:$0xff] %vm844_vm0, %v9931_v1  ;;  %919 = vst.msk [vmem:[#allocation4 + $0x58] sm:$0xff] %vm844_vm0, %v9931_v1 }
  0x48   : > { %920 = vst.msk [vmem:[#allocation4 + $0x60] sm:$0xff] %vm844_vm0, %v9931_v1  ;;  %921 = vst.msk [vmem:[#allocation4 + $0x68] sm:$0xff] %vm844_vm0, %v9931_v1  ;;  %8103 = vmatpush1.bf16.msra.mxu0 %v8102_v8 }
  0x49   : > { %922 = vst.msk [vmem:[#allocation4 + $0x70] sm:$0xff] %vm844_vm0, %v9931_v1  ;;  %924 = vst.msk [vmem:[#allocation5] sm:$0xff] %vm844_vm0, %v9931_v1  ;;  %8104 = vmatprep.subr.bf16.mxu0 %v9932_v2 }
  0x4a   : > { %925 = vst.msk [vmem:[#allocation5 + $0x8] sm:$0xff] %vm844_vm0, %v9931_v1  ;;  %926 = vst.msk [vmem:[#allocation5 + $0x10] sm:$0xff] %vm844_vm0, %v9931_v1 }
  0x4b   : > { %927 = vst.msk [vmem:[#allocation5 + $0x18] sm:$0xff] %vm844_vm0, %v9931_v1  ;;  %928 = vst.msk [vmem:[#allocation5 + $0x20] sm:$0xff] %vm844_vm0, %v9931_v1 }
  0x4c   : > { %929 = vst.msk [vmem:[#allocation5 + $0x28] sm:$0xff] %vm844_vm0, %v9931_v1  ;;  %932 = vst.msk [vmem:[#allocation6] sm:$0xff] %vm844_vm0, %v9931_v1 }
  0x4d   : > { %933 = vst.msk [vmem:[#allocation6 + $0x8] sm:$0xff] %vm844_vm0, %v9931_v1  ;;  %934 = vst.msk [vmem:[#allocation6 + $0x10] sm:$0xff] %vm844_vm0, %v9931_v1 }
  0x4e   : > { %935 = vst.msk [vmem:[#allocation6 + $0x18] sm:$0xff] %vm844_vm0, %v9931_v1  ;;  %936 = vst.msk [vmem:[#allocation6 + $0x20] sm:$0xff] %vm844_vm0, %v9931_v1 }
  0x4f   : > { %937 = vst.msk [vmem:[#allocation6 + $0x28] sm:$0xff] %vm844_vm0, %v9931_v1  ;;  %986 = vst.msk [vmem:[#allocation2 + $0x18] sm:$0xff] %vm844_vm0, %v945_v18 }
  0x50   : > { %940 = vst.msk [vmem:[#allocation7] sm:$0xff] %vm939_vm1, %v9931_v1  ;;  %941 = vst.msk [vmem:[#allocation7 + $0x8] sm:$0xff] %vm939_vm1, %v9931_v1 }
  0x51   : > { %942 = vst.msk [vmem:[#allocation7 + $0x10] sm:$0xff] %vm939_vm1, %v9931_v1 }
  0x52   : > { %987 = vst.msk [vmem:[#allocation2 + $0x20] sm:$0xff] %vm844_vm0, %v946_v19  ;;  %988 = vst.msk [vmem:[#allocation2 + $0x28] sm:$0xff] %vm844_vm0, %v947_v20 }
  0x53   : > { %989 = vst.msk [vmem:[#allocation2 + $0x30] sm:$0xff] %vm844_vm0, %v948_v21  ;;  %990 = vst.msk [vmem:[#allocation2 + $0x38] sm:$0xff] %vm844_vm0, %v949_v22 }
  0x54   : > { %991 = vst.msk [vmem:[#allocation2 + $0x40] sm:$0xff] %vm844_vm0, %v950_v24  ;;  %992 = vst.msk [vmem:[#allocation2 + $0x48] sm:$0xff] %vm844_vm0, %v951_v25 }
  0x55   : > { %993 = vst.msk [vmem:[#allocation2 + $0x50] sm:$0xff] %vm844_vm0, %v952_v26  ;;  %994 = vst.msk [vmem:[#allocation2 + $0x58] sm:$0xff] %vm844_vm0, %v953_v29  ;;  %v964_v29 = vld [vmem:[%s10346_s8 + $0x98] sm:$0xff] }
  0x56   : > { %995 = vst.msk [vmem:[#allocation2 + $0x60] sm:$0xff] %vm844_vm0, %v954_v30  ;;  %996 = vst.msk [vmem:[#allocation2 + $0x68] sm:$0xff] %vm844_vm0, %v955_v31  ;;  %v1112_v44 = vld [vmem:[#allocation2 + $0x17] sm:$0xff]  ;;  %v965_v30 = vld [vmem:[%s10346_s8 + $0xa0] sm:$0xff] }
  0x57   : > { %997 = vst.msk [vmem:[#allocation2 + $0x70] sm:$0xff] %vm844_vm0, %v956_v33  ;;  %998 = vst.msk [vmem:[#allocation2 + $0x78] sm:$0xff] %vm844_vm0, %v957_v34  ;;  %v1154_v46 = vld [vmem:[#allocation2 + $0x18] sm:$0xff]  ;;  %v2701_v31 = vld [vmem:[%s13051_s4 + $0x80] sm:$0xff]  ;;  %s13066_s4 = smov 32  }
  0x58   : > { %999 = vst.msk [vmem:[#allocation2 + $0x80] sm:$0xff] %vm844_vm0, %v958_v35  ;;  %1000 = vst.msk [vmem:[#allocation2 + $0x88] sm:$0xff] %vm844_vm0, %v959_v36  ;;  %v1071_v0 = vld [vmem:[#allocation2 + $0x16] sm:$0xff]  ;;  %v8105_v33 = vpack.c.bf16 %v2702_v32, %v2701_v31 }
  0x59   : > { %1001 = vst.msk [vmem:[#allocation2 + $0x90] sm:$0xff] %vm844_vm0, %v960_v37  ;;  %1002 = vst.msk [vmem:[#allocation2 + $0x98] sm:$0xff] %vm844_vm0, %v961_v38  ;;  %v1113_v45 = vld [vmem:[#allocation2 + $0x1f] sm:$0xff]  ;;  %v1156_v5 = vld [vmem:[#allocation2 + $0x28] sm:$0xff] }
  0x5a   : > { %1003 = vst.msk [vmem:[#allocation2 + $0xa0] sm:$0xff] %vm844_vm0, %v962_v39  ;;  %1004 = vst.msk [vmem:[#allocation2 + $0xa8] sm:$0xff] %vm844_vm0, %v963_v40  ;;  %v8485_v47 = vpack.i.bf16 %v1113_v45, %v1112_v44  ;;  %v1155_v48 = vld [vmem:[#allocation2 + $0x20] sm:$0xff]  ;;  %v1239_v52 = vld [vmem:[#allocation2 + $0x2a] sm:$0xff]  ;;  %8106 = vmatpush1.bf16.msra.mxu0 %v8105_v33 }
  0x5b   : > { %v1195_v49 = vld [vmem:[#allocation2 + $0x19] sm:$0xff]  ;;  %v1196_v50 = vld [vmem:[#allocation2 + $0x21] sm:$0xff]  ;;  %v8490_v53 = vpack.i.bf16 %v1155_v48, %v1154_v46  ;;  %v1197_v57 = vld [vmem:[#allocation2 + $0x29] sm:$0xff]  ;;  %1005 = vst.msk [vmem:[#allocation2 + $0xb0] sm:$0xff] %vm844_vm0, %v964_v29 }
  0x5c   : > { %v8495_v51 = vpack.i.bf16 %v1196_v50, %v1195_v49  ;;  %8486 = vrot.lane.b32.xlu1 %v8485_v47, %s13003_s29  ;;  %v1240_v54 = vld [vmem:[#allocation2 + $0x32] sm:$0xff]  ;;  %v1072_v3 = vld [vmem:[#allocation2 + $0x1e] sm:$0xff]  ;;  %v1114_v9 = vld [vmem:[#allocation2 + $0x27] sm:$0xff]  ;;  %1006 = vst.msk [vmem:[#allocation2 + $0xb8] sm:$0xff] %vm844_vm0, %v965_v30 }
  0x5d   : > { %v1198_v58 = vld [vmem:[#allocation2 + $0x31] sm:$0xff]  ;;  %v8505_v59 = vpack.i.bf16 %v1240_v54, %v1239_v52  ;;  %v8510_v7 = vpack.i.bf16 %v1072_v3, %v1071_v0  ;;  %v1199_v12 = vld [vmem:[#allocation2 + $0x39] sm:$0xff]  ;;  %v1200_v13 = vld [vmem:[#allocation2 + $0x41] sm:$0xff]  ;;  %1009 = vst.msk [vmem:[#allocation2 + $0xd0] sm:$0xff] %vm844_vm0, %v968_v42 }
  0x5e   : > { %8496 = vrot.lane.b32.xlu0 %v8495_v51, %s13001_s10  ;;  %v8500_v61 = vpack.i.bf16 %v1198_v58, %v1197_v57  ;;  %v1157_v6 = vld [vmem:[#allocation2 + $0x30] sm:$0xff]  ;;  %v8535_v15 = vpack.i.bf16 %v1200_v13, %v1199_v12  ;;  %v1073_v16 = vld [vmem:[#allocation2 + $0x26] sm:$0xff]  ;;  %v1241_v18 = vld [vmem:[#allocation2 + $0x3a] sm:$0xff]  ;;  %1010 = vst.msk [vmem:[#allocation2 + $0xd8] sm:$0xff] %vm844_vm0, %v969_v43 }
  0x5f   : > { %v1115_v10 = vld [vmem:[#allocation2 + $0x2f] sm:$0xff]  ;;  %v8525_v11 = vpack.i.bf16 %v1157_v6, %v1156_v5  ;;  %v1242_v19 = vld [vmem:[#allocation2 + $0x42] sm:$0xff]  ;;  %v1116_v21 = vld [vmem:[#allocation2 + $0x37] sm:$0xff]  ;;  %1013 = vst.msk [vmem:[#allocation2 + $0xf0] sm:$0xff] %vm844_vm0, %v972_v63 }
  0x60   : > { %8491 = vrot.lane.b32.xlu1 %v8490_v53, %s13005_s12  ;;  %v8520_v14 = vpack.i.bf16 %v1115_v10, %v1114_v9  ;;  %v1074_v17 = vld [vmem:[#allocation2 + $0x2e] sm:$0xff]  ;;  %v1117_v22 = vld [vmem:[#allocation2 + $0x3f] sm:$0xff]  ;;  %v8540_v23 = vpack.i.bf16 %v1242_v19, %v1241_v18  ;;  %v1075_v44 = vld [vmem:[#allocation2 + $0x36] sm:$0xff]  ;;  %1014 = vst.msk [vmem:[#allocation2 + $0xf8] sm:$0xff] %vm844_vm0, %v973_v4 }
  0x61   : > { %v8545_v20 = vpack.i.bf16 %v1074_v17, %v1073_v16  ;;  %v8555_v24 = vpack.i.bf16 %v1117_v22, %v1116_v21  ;;  %v1158_v25 = vld [vmem:[#allocation2 + $0x38] sm:$0xff]  ;;  %v1159_v26 = vld [vmem:[#allocation2 + $0x40] sm:$0xff]  ;;  %v1243_v27 = vld [vmem:[#allocation2 + $0x4a] sm:$0xff]  ;;  %891 = vst.msk [vmem:[#allocation2 + $0x168] sm:$0x7f] %vm890_vm8, %v9931_v1 }
  0x62   : > { %8506 = vrot.lane.b32.xlu0 %v8505_v59, %s12997_s9  ;;  %v1244_v28 = vld [vmem:[#allocation2 + $0x52] sm:$0xff]  ;;  %v8560_v35 = vpack.i.bf16 %v1159_v26, %v1158_v25  ;;  %v1201_v36 = vld [vmem:[#allocation2 + $0x49] sm:$0xff]  ;;  %v1076_v45 = vld [vmem:[#allocation2 + $0x3e] sm:$0xff]  ;;  %907 = vst.msk [vmem:[#allocation3 + $0x78] sm:$0x7f] %vm890_vm8, %v9931_v1 }
  0x63   : > { %v1280_v34 = vld [vmem:[#allocation2 + $0x2b] sm:$0xff]  ;;  %v8575_v38 = vpack.i.bf16 %v1244_v28, %v1243_v27  ;;  %v8580_v48 = vpack.i.bf16 %v1076_v45, %v1075_v44  ;;  %v1203_v52 = vld [vmem:[#allocation2 + $0x59] sm:$0xff]  ;;  %v1204_v53 = vld [vmem:[#allocation2 + $0x61] sm:$0xff]  ;;  %923 = vst.msk [vmem:[#allocation4 + $0x78] sm:$0x7f] %vm890_vm8, %v9931_v1 }
  0x64   : > { %8501 = vrot.lane.b32.xlu1 %v8500_v61, %s12999_s11  ;;  %7444 = vmatprep.mubr.msk.f32.mxu0 %vm844_vm0, %v1280_v34  ;;  %v1202_v37 = vld [vmem:[#allocation2 + $0x51] sm:$0xff]  ;;  %v966_v39 = vld [vmem:[%s10346_s8 + $0xa8] sm:$0xff]  ;;  %v8605_v55 = vpack.i.bf16 %v1204_v53, %v1203_v52  ;;  %v1245_v60 = vld [vmem:[#allocation2 + $0x5a] sm:$0xff]  ;;  %931 = vst.msk [vmem:[#allocation5 + $0x30] sm:$0x7] %vm930_vm13, %v9931_v1 }
  0x65   : > { %v967_v40 = vld [vmem:[%s10346_s8 + $0xb0] sm:$0xff]  ;;  %1007 = vst.msk [vmem:[#allocation2 + $0xc0] sm:$0xff] %vm844_vm0, %v966_v39  ;;  %v8570_v41 = vpack.i.bf16 %v1202_v37, %v1201_v36  ;;  %v1160_v46 = vld [vmem:[#allocation2 + $0x48] sm:$0xff]  ;;  %v1121_v3 = vld [vmem:[#allocation2 + $0x5f] sm:$0xff] }
  0x66   : > { %8516 = vrot.lane.b32.xlu0 %v8485_v47, %s13009_s0  ;;  %1008 = vst.msk [vmem:[#allocation2 + $0xc8] sm:$0xff] %vm844_vm0, %v967_v40  ;;  %v1161_v47 = vld [vmem:[#allocation2 + $0x50] sm:$0xff]  ;;  %v1118_v49 = vld [vmem:[#allocation2 + $0x47] sm:$0xff]  ;;  %v1080_v19 = vld [vmem:[#allocation2 + $0x5e] sm:$0xff] }
  0x67   : > { %v1119_v50 = vld [vmem:[#allocation2 + $0x4f] sm:$0xff]  ;;  %v8595_v51 = vpack.i.bf16 %v1161_v47, %v1160_v46  ;;  %v1077_v56 = vld [vmem:[#allocation2 + $0x46] sm:$0xff]  ;;  %v1120_v0 = vld [vmem:[#allocation2 + $0x57] sm:$0xff]  ;;  %938 = vst.msk [vmem:[#allocation6 + $0x30] sm:$0x7] %vm930_vm13, %v9931_v1 }
  0x68   : > { %8511 = vrot.lane.b32.xlu1 %v8510_v7, %s13007_s28  ;;  %v8590_v54 = vpack.i.bf16 %v1119_v50, %v1118_v49  ;;  %v1078_v57 = vld [vmem:[#allocation2 + $0x4e] sm:$0xff]  ;;  %v8625_v6 = vpack.i.bf16 %v1121_v3, %v1120_v0  ;;  %v1162_v7 = vld [vmem:[#allocation2 + $0x58] sm:$0xff]  ;;  %v1163_v8 = vld [vmem:[#allocation2 + $0x60] sm:$0xff]  ;;  %944 = vst.msk [vmem:[#allocation7 + $0x18] sm:$0x1f] %vm943_vm15, %v9931_v1 }
  0x69   : > { %v970_v58 = vld [vmem:[%s10346_s8 + $0xc8] sm:$0xff]  ;;  %v971_v59 = vld [vmem:[%s10346_s8 + $0xd0] sm:$0xff]  ;;  %v8615_v62 = vpack.i.bf16 %v1078_v57, %v1077_v56  ;;  %v976_v26 = vld [vmem:[%s10346_s8 + $0xf8] sm:$0xff] }
  0x6a   : > { %8526 = vrot.lane.b32.xlu0 %v8525_v11, %s13005_s12  ;;  %1011 = vst.msk [vmem:[#allocation2 + $0xe0] sm:$0xff] %vm844_vm0, %v970_v58  ;;  %1012 = vst.msk [vmem:[#allocation2 + $0xe8] sm:$0xff] %vm844_vm0, %v971_v59  ;;  %v1247_v9 = vld [vmem:[#allocation2 + $0x6a] sm:$0xff]  ;;  %v1248_v10 = vld [vmem:[#allocation2 + $0x72] sm:$0xff]  ;;  %v8630_v11 = vpack.i.bf16 %v1163_v8, %v1162_v7 }
  0x6b   : > { %v974_v12 = vld [vmem:[%s10346_s8 + $0xe8] sm:$0xff]  ;;  %v975_v13 = vld [vmem:[%s10346_s8 + $0xf0] sm:$0xff]  ;;  %v8645_v16 = vpack.i.bf16 %v1248_v10, %v1247_v9  ;;  %v977_v27 = vld [vmem:[%s10346_s8 + $0x100] sm:$0xff]  ;;  %1017 = vst.msk [vmem:[#allocation2 + $0x110] sm:$0xff] %vm844_vm0, %v976_v26 }
  0x6c   : > { %8521 = vrot.lane.b32.xlu1 %v8520_v14, %s13003_s29  ;;  %1015 = vst.msk [vmem:[#allocation2 + $0x100] sm:$0xff] %vm844_vm0, %v974_v12  ;;  %1016 = vst.msk [vmem:[#allocation2 + $0x108] sm:$0xff] %vm844_vm0, %v975_v13  ;;  %v1079_v18 = vld [vmem:[#allocation2 + $0x56] sm:$0xff]  ;;  %v1208_v29 = vld [vmem:[#allocation2 + $0x81] sm:$0xff] }
  0x6d   : > { %v1165_v21 = vld [vmem:[#allocation2 + $0x70] sm:$0xff]  ;;  %v8650_v22 = vpack.i.bf16 %v1080_v19, %v1079_v18  ;;  %v1207_v28 = vld [vmem:[#allocation2 + $0x79] sm:$0xff]  ;;  %1018 = vst.msk [vmem:[#allocation2 + $0x118] sm:$0xff] %vm844_vm0, %v977_v27  ;;  %v1081_v32 = vld [vmem:[#allocation2 + $0x66] sm:$0xff] }
  0x6e   : > { %8536 = vrot.lane.b32.xlu0 %v8535_v15, %s12999_s11  ;;  %v8675_v31 = vpack.i.bf16 %v1208_v29, %v1207_v28  ;;  %v1082_v33 = vld [vmem:[#allocation2 + $0x6e] sm:$0xff]  ;;  %v1249_v34 = vld [vmem:[#allocation2 + $0x7a] sm:$0xff]  ;;  %v1085_v4 = vld [vmem:[#allocation2 + $0x86] sm:$0xff] }
  0x6f   : > { %v8685_v36 = vpack.i.bf16 %v1082_v33, %v1081_v32  ;;  %v1124_v37 = vld [vmem:[#allocation2 + $0x77] sm:$0xff]  ;;  %v1167_v44 = vld [vmem:[#allocation2 + $0x80] sm:$0xff]  ;;  %v1251_v45 = vld [vmem:[#allocation2 + $0x8a] sm:$0xff] }
  0x70   : > { %8531 = vrot.lane.b32.xlu1 %v8500_v61, %s13001_s10  ;;  %v1246_v61 = vld [vmem:[#allocation2 + $0x62] sm:$0xff]  ;;  %v979_v42 = vld [vmem:[%s10346_s8 + $0x110] sm:$0xff]  ;;  %v1166_v43 = vld [vmem:[#allocation2 + $0x78] sm:$0xff] }
  0x71   : > { %v8610_v5 = vpack.i.bf16 %v1246_v61, %v1245_v60  ;;  %1020 = vst.msk [vmem:[#allocation2 + $0x128] sm:$0xff] %vm844_vm0, %v979_v42  ;;  %v1252_v46 = vld [vmem:[#allocation2 + $0x92] sm:$0xff]  ;;  %v8700_v47 = vpack.i.bf16 %v1167_v44, %v1166_v43  ;;  %v1084_v53 = vld [vmem:[#allocation2 + $0x7e] sm:$0xff]  ;;  %v1126_v57 = vld [vmem:[#allocation2 + $0x87] sm:$0xff] }
  0x72   : > { %8546 = vrot.lane.b32.xlu0 %v8545_v20, %s13007_s28  ;;  %v1164_v20 = vld [vmem:[#allocation2 + $0x68] sm:$0xff]  ;;  %v1210_v49 = vld [vmem:[#allocation2 + $0x91] sm:$0xff]  ;;  %v8715_v50 = vpack.i.bf16 %v1252_v46, %v1251_v45  ;;  %v981_v61 = vld [vmem:[%s10346_s8 + $0x120] sm:$0xff] }
  0x73   : > { %v8665_v25 = vpack.i.bf16 %v1165_v21, %v1164_v20  ;;  %v1083_v52 = vld [vmem:[#allocation2 + $0x76] sm:$0xff]  ;;  %v1212_v63 = vld [vmem:[#allocation2 + $0xa1] sm:$0xff]  ;;  %1022 = vst.msk [vmem:[#allocation2 + $0x138] sm:$0xff] %vm844_vm0, %v981_v61  ;;  %v1255_v20 = vld [vmem:[#allocation2 + $0xaa] sm:$0xff] }
  0x74   : > { %8541 = vrot.lane.b32.xlu1 %v8540_v23, %s12997_s9  ;;  %v1122_v23 = vld [vmem:[#allocation2 + $0x67] sm:$0xff]  ;;  %v8720_v56 = vpack.i.bf16 %v1084_v53, %v1083_v52  ;;  %v1127_v58 = vld [vmem:[#allocation2 + $0x8f] sm:$0xff]  ;;  %v980_v60 = vld [vmem:[%s10346_s8 + $0x118] sm:$0xff] }
  0x75   : > { %1021 = vst.msk [vmem:[#allocation2 + $0x130] sm:$0xff] %vm844_vm0, %v980_v60  ;;  %v8730_v0 = vpack.i.bf16 %v1127_v58, %v1126_v57  ;;  %v1254_v7 = vld [vmem:[#allocation2 + $0xa2] sm:$0xff]  ;;  %v1128_v9 = vld [vmem:[#allocation2 + $0x97] sm:$0xff]  ;;  %v1131_v53 = vld [vmem:[#allocation2 + $0xaf] sm:$0xff] }
  0x76   : > { %8556 = vrot.lane.b32.xlu0 %v8555_v24, %s13003_s29  ;;  %v1129_v10 = vld [vmem:[#allocation2 + $0x9f] sm:$0xff]  ;;  %v1256_v21 = vld [vmem:[#allocation2 + $0xb2] sm:$0xff]  ;;  %v1213_v27 = vld [vmem:[#allocation2 + $0xa9] sm:$0xff] }
  0x77   : > { %v8765_v13 = vpack.i.bf16 %v1129_v10, %v1128_v9  ;;  %v1214_v28 = vld [vmem:[#allocation2 + $0xb1] sm:$0xff]  ;;  %v8785_v29 = vpack.i.bf16 %v1256_v21, %v1255_v20  ;;  %v1172_v42 = vld [vmem:[#allocation2 + $0xa8] sm:$0xff]  ;;  %v1215_v61 = vld [vmem:[#allocation2 + $0xb9] sm:$0xff] }
  0x78   : > { %8551 = vrot.lane.b32.xlu1 %v8520_v14, %s13009_s0  ;;  %v1205_v14 = vld [vmem:[#allocation2 + $0x69] sm:$0xff] }
  0x79   : > { %v1173_v43 = vld [vmem:[#allocation2 + $0xb0] sm:$0xff] }
  0x7a   : > { %8566 = vrot.lane.b32.xlu0 %v8535_v15, %s13001_s10  ;;  %v1206_v15 = vld [vmem:[#allocation2 + $0x71] sm:$0xff] }
  0x7b   : > { %v8640_v17 = vpack.i.bf16 %v1206_v15, %v1205_v14  ;;  %v982_v14 = vld [vmem:[%s10346_s8 + $0x128] sm:$0xff]  ;;  %v983_v15 = vld [vmem:[%s10346_s8 + $0x130] sm:$0xff] }
  0x7c   : > { %8561 = vrot.lane.b32.xlu1 %v8560_v35, %s13005_s12  ;;  %v1250_v35 = vld [vmem:[#allocation2 + $0x82] sm:$0xff]  ;;  %1023 = vst.msk [vmem:[#allocation2 + $0x140] sm:$0xff] %vm844_vm0, %v982_v14  ;;  %1024 = vst.msk [vmem:[#allocation2 + $0x148] sm:$0xff] %vm844_vm0, %v983_v15 }
  0x7d   : > { %v8680_v39 = vpack.i.bf16 %v1250_v35, %v1249_v34  ;;  %v1089_v15 = vld [vmem:[#allocation2 + $0xa6] sm:$0xff] }
  0x7e   : > { %8576 = vrot.lane.b32.xlu0 %v8575_v38, %s12997_s9  ;;  %v1125_v38 = vld [vmem:[#allocation2 + $0x7f] sm:$0xff] }
  0x7f   : > { %v8695_v40 = vpack.i.bf16 %v1125_v38, %v1124_v37  ;;  %v1087_v38 = vld [vmem:[#allocation2 + $0x96] sm:$0xff] }
  0x80   : > { %8571 = vrot.lane.b32.xlu1 %v8570_v41, %s12999_s11 }
  0x82   : > { %8586 = vrot.lane.b32.xlu0 %v8555_v24, %s13009_s0  ;;  %v1123_v24 = vld [vmem:[#allocation2 + $0x6f] sm:$0xff] }
  0x83   : > { %v8660_v30 = vpack.i.bf16 %v1123_v24, %v1122_v23 }
  0x84   : > { %8581 = vrot.lane.b32.xlu1 %v8580_v48, %s13007_s28  ;;  %v1209_v48 = vld [vmem:[#allocation2 + $0x89] sm:$0xff] }
  0x86   : > { %8596 = vrot.lane.b32.xlu0 %v8595_v51, %s13005_s12  ;;  %v8710_v51 = vpack.i.bf16 %v1210_v49, %v1209_v48 }
  0x88   : > { %8591 = vrot.lane.b32.xlu1 %v8590_v54, %s13003_s29 }
  0x8a   : > { %8606 = vrot.lane.b32.xlu0 %v8605_v55, %s12999_s11 }
  0x8c   : > { %8601 = vrot.lane.b32.xlu1 %v8570_v41, %s13001_s10  ;;  %v978_v41 = vld [vmem:[%s10346_s8 + $0x108] sm:$0xff] }
  0x8d   : > { %1019 = vst.msk [vmem:[#allocation2 + $0x120] sm:$0xff] %vm844_vm0, %v978_v41 }
  0x8e   : > { %8616 = vrot.lane.b32.xlu0 %v8615_v62, %s13007_s28  ;;  %v1211_v62 = vld [vmem:[#allocation2 + $0x99] sm:$0xff] }
  0x8f   : > { %v8745_v3 = vpack.i.bf16 %v1212_v63, %v1211_v62  ;;  %v1216_v62 = vld [vmem:[#allocation2 + $0xc1] sm:$0xff] }
  0x90   : > { %8611 = vrot.lane.b32.xlu1 %v8610_v5, %s12997_s9  ;;  %v1086_v5 = vld [vmem:[#allocation2 + $0x8e] sm:$0xff]  ;;  %v10555_v9 = vpack.i.bf16 %v1216_v62, %v1215_v61 }
  0x91   : > { %v8755_v8 = vpack.i.bf16 %v1086_v5, %v1085_v4 }
  0x92   : > { %8626 = vrot.lane.b32.xlu0 %v8625_v6, %s13003_s29 }
  0x94   : > { %8621 = vrot.lane.b32.xlu1 %v8590_v54, %s13009_s0  ;;  %v1168_v54 = vld [vmem:[#allocation2 + $0x88] sm:$0xff] }
  0x96   : > { %8636 = vrot.lane.b32.xlu0 %v8605_v55, %s13001_s10  ;;  %v1169_v55 = vld [vmem:[#allocation2 + $0x90] sm:$0xff] }
  0x97   : > { %v8735_v59 = vpack.i.bf16 %v1169_v55, %v1168_v54  ;;  %v8805_v54 = vpack.i.bf16 %v1173_v43, %v1172_v42  ;;  %v984_v55 = vld [vmem:[%s10346_s8 + $0x138] sm:$0xff] }
  0x98   : > { %8631 = vrot.lane.b32.xlu1 %v8630_v11, %s13005_s12  ;;  %1025 = vst.msk [vmem:[#allocation2 + $0x150] sm:$0xff] %vm844_vm0, %v984_v55  ;;  %v1259_v55 = vld [vmem:[#allocation2 + $0xca] sm:$0xff] }
  0x9a   : > { %8646 = vrot.lane.b32.xlu0 %v8645_v16, %s12997_s9  ;;  %v1170_v16 = vld [vmem:[#allocation2 + $0x98] sm:$0xff] }
  0x9c   : > { %8641 = vrot.lane.b32.xlu1 %v8640_v17, %s12999_s11 }
  0x9e   : > { %8656 = vrot.lane.b32.xlu0 %v8625_v6, %s13009_s0  ;;  %v1253_v6 = vld [vmem:[#allocation2 + $0x9a] sm:$0xff] }
  0x9f   : > { %v8750_v11 = vpack.i.bf16 %v1254_v7, %v1253_v6 }
  0xa0   : > { %8651 = vrot.lane.b32.xlu1 %v8650_v22, %s13007_s28  ;;  %v1028_v22 = vld [vmem:[#allocation2 + $0x5] sm:$0xff] }
  0xa2   : > { %8666 = vrot.lane.b32.xlu0 %v8665_v25, %s13005_s12  ;;  %v8477_v12 = vpop.permute.xlu0 %8476  ;;  %v1029_v25 = vld [vmem:[#allocation2 + $0xd] sm:$0xff] }
  0xa3   : > { %v8478_v18 = vunpack.i.l.bf16 %v8477_v12  ;;  %v8479_v23 = vunpack.i.h.bf16 %v8477_v12  ;;  %v1030_v12 = vld [vmem:[#allocation2 + $0x15] sm:$0xff] }
  0xa4   : > { %8661 = vrot.lane.b32.xlu1 %v8660_v30, %s13003_s29 }
  0xa5   : > { %v2394_v34 = vsel %vm844_vm0, %v1029_v25, %v8479_v23  ;;  %v1257_v23 = vld [vmem:[#allocation2 + $0xba] sm:$0xff] }
  0xa6   : > { %8676 = vrot.lane.b32.xlu0 %v8675_v31, %s12999_s11  ;;  %v8482_v19 = vpop.permute.xlu0 %8481 }
  0xa7   : > { %v8483_v26 = vunpack.i.l.bf16 %v8482_v19  ;;  %v8484_v32 = vunpack.i.h.bf16 %v8482_v19 }
  0xa8   : > { %8671 = vrot.lane.b32.xlu1 %v8640_v17, %s13001_s10  ;;  %v1171_v17 = vld [vmem:[#allocation2 + $0xa0] sm:$0xff] }
  0xa9   : > { %v8770_v24 = vpack.i.bf16 %v1171_v17, %v1170_v16  ;;  %v2435_v44 = vsel %vm939_vm1, %v2394_v34, %v8484_v32  ;;  %v1090_v16 = vld [vmem:[#allocation2 + $0xae] sm:$0xff] }
  0xaa   : > { %8686 = vrot.lane.b32.xlu0 %v8685_v36, %s13007_s28  ;;  %v10533_v36 = vpack.i.bf16 %v1214_v28, %v1213_v27  ;;  %v8825_v25 = vpack.i.bf16 %v1090_v16, %v1089_v15  ;;  %v1031_v27 = vld [vmem:[#allocation2 + $0x1d] sm:$0xff] }
  0xac   : > { %8681 = vrot.lane.b32.xlu1 %v8680_v39, %s12997_s9  ;;  %v1088_v39 = vld [vmem:[#allocation2 + $0x9e] sm:$0xff] }
  0xae   : > { %8696 = vrot.lane.b32.xlu0 %v8695_v40, %s13003_s29 }
  0xb0   : > { %8691 = vrot.lane.b32.xlu1 %v8660_v30, %s13009_s0  ;;  %v2393_v30 = vsel %vm844_vm0, %v1028_v22, %v8478_v18 }
  0xb1   : > { %v2434_v37 = vsel %vm939_vm1, %v2393_v30, %v8483_v26  ;;  %v1282_v26 = vld [vmem:[#allocation2 + $0x3b] sm:$0xff] }
  0xb2   : > { %8706 = vrot.lane.b32.xlu0 %v8675_v31, %s13001_s10  ;;  %v1132_v30 = vld [vmem:[#allocation2 + $0xb7] sm:$0xff] }
  0xb4   : > { %8701 = vrot.lane.b32.xlu1 %v8700_v47, %s13005_s12 }
  0xb6   : > { %8716 = vrot.lane.b32.xlu0 %v8715_v50, %s12997_s9  ;;  %v8790_v50 = vpack.i.bf16 %v1088_v39, %v1087_v38 }
  0xb8   : > { %8711 = vrot.lane.b32.xlu1 %v8710_v51, %s12999_s11 }
  0xba   : > { %8726 = vrot.lane.b32.xlu0 %v8695_v40, %s13009_s0 }
  0xbc   : > { %8721 = vrot.lane.b32.xlu1 %v8720_v56, %s13007_s28  ;;  %v985_v56 = vld [vmem:[%s10346_s8 + $0x140] sm:$0xf]  ;;  %s13054_s8 = sld [smem:[#allocation22_spill]] }
  0xbd   : > { %1027 = vst.msk [vmem:[#allocation2 + $0x158] sm:$0xf] %vm1026_vm5, %v985_v56  ;;  %v1260_v56 = vld [vmem:[#allocation2 + $0xd2] sm:$0xff] }
  0xbe   : > { %8736 = vrot.lane.b32.xlu0 %v8735_v59, %s13005_s12 }
  0xc0   : > { %8731 = vrot.lane.b32.xlu1 %v8730_v0, %s13003_s29 }
  0xc2   : > { %8746 = vrot.lane.b32.xlu0 %v8745_v3, %s12999_s11  ;;  %s13055_s1 = smov %s13054_s8 }
  0xc4   : > { %8741 = vrot.lane.b32.xlu1 %v8710_v51, %s13001_s10  ;;  %v1130_v51 = vld [vmem:[#allocation2 + $0xa7] sm:$0xff] }
  0xc5   : > { %v10551_v6 = vpack.i.bf16 %v1131_v53, %v1130_v51 }
  0xc6   : > { %8756 = vrot.lane.b32.xlu0 %v8755_v8, %s13007_s28  ;;  %v1281_v8 = vld [vmem:[#allocation2 + $0x33] sm:$0xff] }
  0xc8   : > { %8751 = vrot.lane.b32.xlu1 %v8750_v11, %s12997_s9 }
  0xca   : > { %8766 = vrot.lane.b32.xlu0 %v8765_v13, %s13003_s29 }
  0xcc   : > { %8761 = vrot.lane.b32.xlu1 %v8730_v0, %s13009_s0 }
  0xce   : > { %8776 = vrot.lane.b32.xlu0 %v8745_v3, %s13001_s10  ;;  %v8487_v31 = vpop.permute.xlu1 %8486 }
  0xcf   : > { %v8488_v35 = vunpack.i.l.bf16 %v8487_v31  ;;  %v8489_v40 = vunpack.i.h.bf16 %v8487_v31  ;;  %v1133_v31 = vld [vmem:[#allocation2 + $0xbf] sm:$0xff] }
  0xd0   : > { %v8497_v33 = vpop.permute.xlu0 %8496  ;;  %8771 = vrot.lane.b32.xlu1 %v8770_v24, %s13005_s12  ;;  %v1258_v24 = vld [vmem:[#allocation2 + $0xc2] sm:$0xff]  ;;  %v10576_v42 = vpack.i.bf16 %v1133_v31, %v1132_v30 }
  0xd1   : > { %v2476_v48 = vsel %vm2475_vm2, %v2434_v37, %v8488_v35  ;;  %v8498_v49 = vunpack.i.l.bf16 %v8497_v33  ;;  %v2477_v57 = vsel %vm2475_vm2, %v2435_v44, %v8489_v40  ;;  %v8499_v58 = vunpack.i.h.bf16 %v8497_v33 }
  0xd2   : > { %8786 = vrot.lane.b32.xlu0 %v8785_v29, %s12997_s9  ;;  %v8492_v41 = vpop.permute.xlu1 %8491  ;;  %v8820_v38 = vpack.i.bf16 %v1258_v24, %v1257_v23  ;;  %v1091_v23 = vld [vmem:[#allocation2 + $0xb6] sm:$0xff]  ;;  %v1092_v24 = vld [vmem:[#allocation2 + $0xbe] sm:$0xff] }
  0xd3   : > { %v8494_v45 = vunpack.i.h.bf16 %v8492_v41  ;;  %v8493_v46 = vunpack.i.l.bf16 %v8492_v41 }
  0xd4   : > { %v8507_v47 = vpop.permute.xlu0 %8506  ;;  %8781 = vrot.lane.b32.xlu1 %v10533_v36, %s12999_s11 }
  0xd5   : > { %v2518_v52 = vsel %vm2517_vm3, %v2476_v48, %v8493_v46  ;;  %v8508_v60 = vunpack.i.l.bf16 %v8507_v47  ;;  %v2519_v63 = vsel %vm2517_vm3, %v2477_v57, %v8494_v45  ;;  %v8509_v10 = vunpack.i.h.bf16 %v8507_v47 }
  0xd6   : > { %8796 = vrot.lane.b32.xlu0 %v8765_v13, %s13009_s0  ;;  %v8502_v59 = vpop.permute.xlu1 %8501  ;;  %v2560_v5 = vsel %vm2559_vm4, %v2518_v52, %v8498_v49  ;;  %v2561_v14 = vsel %vm2559_vm4, %v2519_v63, %v8499_v58  ;;  %v1174_v49 = vld [vmem:[#allocation2 + $0xb8] sm:$0xff] }
  0xd7   : > { %v8504_v0 = vunpack.i.h.bf16 %v8502_v59  ;;  %v8503_v3 = vunpack.i.l.bf16 %v8502_v59 }
  0xd8   : > { %v8517_v4 = vpop.permute.xlu0 %8516  ;;  %8791 = vrot.lane.b32.xlu1 %v8790_v50, %s13007_s28  ;;  %v1175_v50 = vld [vmem:[#allocation2 + $0xc0] sm:$0xff] }
  0xd9   : > { %v2602_v7 = vsel %vm2601_vm6, %v2560_v5, %v8503_v3  ;;  %v2603_v19 = vsel %vm2601_vm6, %v2561_v14, %v8504_v0  ;;  %v8518_v20 = vunpack.i.l.bf16 %v8517_v4  ;;  %v8519_v34 = vunpack.i.h.bf16 %v8517_v4  ;;  %v1283_v0 = vld [vmem:[#allocation2 + $0x43] sm:$0xff]  ;;  %v1033_v14 = vld [vmem:[#allocation2 + $0x2d] sm:$0xff] }
  0xda   : > { %8806 = vrot.lane.b32.xlu0 %v8805_v54, %s13005_s12  ;;  %v8512_v11 = vpop.permute.xlu1 %8511  ;;  %v2644_v13 = vsel %vm2643_vm7, %v2602_v7, %v8508_v60  ;;  %v2645_v29 = vsel %vm2643_vm7, %v2603_v19, %v8509_v10  ;;  %v8840_v59 = vpack.i.bf16 %v1175_v50, %v1174_v49  ;;  %v1032_v4 = vld [vmem:[#allocation2 + $0x25] sm:$0xff]  ;;  %v1218_v10 = vld [vmem:[#allocation2 + $0xd1] sm:$0xff] }
  0xdb   : > { %v8513_v17 = vunpack.i.l.bf16 %v8512_v11  ;;  %2898 = vmatmul.mubr.f32.vlgmr.msra.gmra.mrb[0].mxu0 %v2644_v13  ;;  %v8514_v21 = vunpack.i.h.bf16 %v8512_v11  ;;  %v8855_v11 = vpack.i.bf16 %v1260_v56, %v1259_v55 }
  0xdc   : > { %v8527_v18 = vpop.permute.xlu0 %8526  ;;  %8801 = vrot.lane.b32.xlu1 %v10551_v6, %s13003_s29  ;;  %7445 = vmatprep.mubr.msk.f32.mxu0 %vm844_vm0, %v1281_v8  ;;  %v1217_v8 = vld [vmem:[#allocation2 + $0xc9] sm:$0xff] }
  0xdd   : > { %v2395_v22 = vsel %vm844_vm0, %v1030_v12, %v8513_v17  ;;  %v8528_v37 = vunpack.i.l.bf16 %v8527_v18  ;;  %v2396_v39 = vsel %vm844_vm0, %v1031_v27, %v8514_v21  ;;  %v8529_v46 = vunpack.i.h.bf16 %v8527_v18 }
  0xde   : > { %8816 = vrot.lane.b32.xlu0 %v10555_v9, %s12999_s11  ;;  %v8522_v28 = vpop.permute.xlu1 %8521  ;;  %v2436_v35 = vsel %vm939_vm1, %v2395_v22, %v8518_v20  ;;  %v10602_v19 = vpack.i.bf16 %v1218_v10, %v1217_v8  ;;  %v1284_v20 = vld [vmem:[#allocation2 + $0x4b] sm:$0xff]  ;;  %v1261_v8 = vld [vmem:[#allocation2 + $0xda] sm:$0xff]  ;;  %v1262_v10 = vld [vmem:[#allocation2 + $0xe2] sm:$0xff] }
  0xdf   : > { %v8523_v32 = vunpack.i.l.bf16 %v8522_v28  ;;  %2903 = vmatmul.mubr.f32.gmra.mrb[2].mxu0 %v2645_v29  ;;  %v8524_v40 = vunpack.i.h.bf16 %v8522_v28  ;;  %v1176_v28 = vld [vmem:[#allocation2 + $0xc8] sm:$0xff]  ;;  %v1177_v29 = vld [vmem:[#allocation2 + $0xd0] sm:$0xff] }
  0xe0   : > { %v10567_v33 = vpop.permute.xlu0 %8536  ;;  %8811 = vrot.lane.b32.xlu1 %v10533_v36, %s13001_s10  ;;  %7446 = vmatprep.mubr.msk.f32.mxu0 %vm844_vm0, %v1282_v26  ;;  %v2437_v36 = vsel %vm939_vm1, %v2396_v39, %v8519_v34  ;;  %v1134_v39 = vld [vmem:[#allocation2 + $0xc7] sm:$0xff] }
  0xe1   : > { %v2478_v41 = vsel %vm2475_vm2, %v2436_v35, %v8523_v32  ;;  %v8538_v48 = vunpack.i.l.bf16 %v10567_v33  ;;  %v2479_v51 = vsel %vm2475_vm2, %v2437_v36, %v8524_v40  ;;  %v8539_v61 = vunpack.i.h.bf16 %v10567_v33  ;;  %v1135_v40 = vld [vmem:[#allocation2 + $0xcf] sm:$0xff] }
  0xe2   : > { %8826 = vrot.lane.b32.xlu0 %v8825_v25, %s13007_s28  ;;  %v8532_v43 = vpop.permute.xlu1 %8531  ;;  %v2520_v47 = vsel %vm2517_vm3, %v2478_v41, %v8528_v37  ;;  %v2521_v60 = vsel %vm2517_vm3, %v2479_v51, %v8529_v46  ;;  %v8860_v37 = vpack.i.bf16 %v1092_v24, %v1091_v23  ;;  %v8875_v41 = vpack.i.bf16 %v1177_v29, %v1176_v28  ;;  %v1219_v46 = vld [vmem:[#allocation2 + $0xd9] sm:$0xff] }
  0xe3   : > { %v8533_v44 = vunpack.i.l.bf16 %v8532_v43  ;;  %v8534_v52 = vunpack.i.h.bf16 %v8532_v43 }
  0xe4   : > { %v8547_v45 = vpop.permute.xlu0 %8546  ;;  %8821 = vrot.lane.b32.xlu1 %v8820_v38, %s12997_s9 }
  0xe5   : > { %v2562_v53 = vsel %vm2559_vm4, %v2520_v47, %v8533_v44  ;;  %v8548_v62 = vunpack.i.l.bf16 %v8547_v45  ;;  %v2563_v7 = vsel %vm2559_vm4, %v2521_v60, %v8534_v52  ;;  %v8549_v12 = vunpack.i.h.bf16 %v8547_v45  ;;  %v1220_v47 = vld [vmem:[#allocation2 + $0xe1] sm:$0xff] }
  0xe6   : > { %8836 = vrot.lane.b32.xlu0 %v10576_v42, %s13003_s29  ;;  %v8542_v54 = vpop.permute.xlu1 %8541  ;;  %v2604_v63 = vsel %vm2601_vm6, %v2562_v53, %v8538_v48  ;;  %v10624_v55 = vpack.i.bf16 %v1220_v47, %v1219_v46 }
  0xe7   : > { %v8543_v57 = vunpack.i.l.bf16 %v8542_v54  ;;  %v8544_v3 = vunpack.i.h.bf16 %v8542_v54  ;;  %v2397_v17 = vsel %vm844_vm0, %v1032_v4, %v8548_v62  ;;  %v2398_v25 = vsel %vm844_vm0, %v1033_v14, %v8549_v12  ;;  %v1285_v54 = vld [vmem:[#allocation2 + $0x53] sm:$0xff]  ;;  %v1286_v12 = vld [vmem:[#allocation2 + $0x5b] sm:$0xff] }
  0xe8   : > { %v8557_v58 = vpop.permute.xlu0 %8556  ;;  %8831 = vrot.lane.b32.xlu1 %v10551_v6, %s13009_s0  ;;  %v1094_v62 = vld [vmem:[#allocation2 + $0xce] sm:$0xff] }
  0xe9   : > { %v2646_v5 = vsel %vm2643_vm7, %v2604_v63, %v8543_v57  ;;  %v8558_v18 = vunpack.i.l.bf16 %v8557_v58  ;;  %v8559_v26 = vunpack.i.h.bf16 %v8557_v58  ;;  %v1034_v57 = vld [vmem:[#allocation2 + $0x35] sm:$0xff] }
  0xea   : > { %8846 = vrot.lane.b32.xlu0 %v10555_v9, %s13001_s10  ;;  %v8552_v13 = vpop.permute.xlu1 %8551  ;;  %2908 = vmatmul.mubr.f32.gmra.mrb[4].mxu0 %v2646_v5  ;;  %v2605_v9 = vsel %vm2601_vm6, %v2563_v7, %v8539_v61  ;;  %v1093_v61 = vld [vmem:[#allocation2 + $0xc6] sm:$0xff] }
  0xeb   : > { %v8554_v6 = vunpack.i.h.bf16 %v8552_v13  ;;  %v8553_v15 = vunpack.i.l.bf16 %v8552_v13  ;;  %7447 = vmatprep.mubr.msk.f32.mxu0 %vm844_vm0, %v1283_v0  ;;  %v2647_v22 = vsel %vm2643_vm7, %v2605_v9, %v8544_v3  ;;  %v1035_v13 = vld [vmem:[#allocation2 + $0x3d] sm:$0xff] }
  0xec   : > { %v8567_v16 = vpop.permute.xlu0 %8566  ;;  %8841 = vrot.lane.b32.xlu1 %v8840_v59, %s13005_s12 }
  0xed   : > { %v2438_v21 = vsel %vm939_vm1, %v2397_v17, %v8553_v15  ;;  %v2439_v30 = vsel %vm939_vm1, %v2398_v25, %v8554_v6  ;;  %v8568_v35 = vunpack.i.l.bf16 %v8567_v16  ;;  %v8569_v44 = vunpack.i.h.bf16 %v8567_v16  ;;  %v1136_v15 = vld [vmem:[#allocation2 + $0xd7] sm:$0xff]  ;;  %v1137_v16 = vld [vmem:[#allocation2 + $0xdf] sm:$0xff] }
  0xee   : > { %8856 = vrot.lane.b32.xlu0 %v8855_v11, %s12997_s9  ;;  %v8562_v27 = vpop.permute.xlu1 %8561  ;;  %2913 = vmatmul.mubr.f32.gmra.mrb[6].mxu0 %v2647_v22  ;;  %v2480_v34 = vsel %vm2475_vm2, %v2438_v21, %v8558_v18  ;;  %v2481_v43 = vsel %vm2475_vm2, %v2439_v30, %v8559_v26  ;;  %v8895_v11 = vpack.i.bf16 %v1094_v62, %v1093_v61 }
  0xef   : > { %v8564_v31 = vunpack.i.h.bf16 %v8562_v27  ;;  %v8563_v32 = vunpack.i.l.bf16 %v8562_v27  ;;  %7448 = vmatprep.mubr.msk.f32.mxu0 %vm844_vm0, %v1284_v20  ;;  %v8890_v22 = vpack.i.bf16 %v1262_v10, %v1261_v8  ;;  %v10643_v26 = vpack.i.bf16 %v1137_v16, %v1136_v15  ;;  %v1095_v8 = vld [vmem:[#allocation2 + $0xd6] sm:$0xff]  ;;  %v1096_v10 = vld [vmem:[#allocation2 + $0xde] sm:$0xff] }
  0xf0   : > { %v8577_v33 = vpop.permute.xlu0 %8576  ;;  %8851 = vrot.lane.b32.xlu1 %v10602_v19, %s12999_s11 }
  0xf1   : > { %v2522_v38 = vsel %vm2517_vm3, %v2480_v34, %v8563_v32  ;;  %v8578_v36 = vunpack.i.l.bf16 %v8577_v33  ;;  %v2523_v48 = vsel %vm2517_vm3, %v2481_v43, %v8564_v31  ;;  %v8579_v56 = vunpack.i.h.bf16 %v8577_v33  ;;  %v1178_v33 = vld [vmem:[#allocation2 + $0xd8] sm:$0xff]  ;;  %v1179_v34 = vld [vmem:[#allocation2 + $0xe0] sm:$0xff] }
  0xf2   : > { %8866 = vrot.lane.b32.xlu0 %v10576_v42, %s13009_s0  ;;  %v8572_v45 = vpop.permute.xlu1 %8571  ;;  %v2564_v52 = vsel %vm2559_vm4, %v2522_v38, %v8568_v35  ;;  %v10620_v42 = vpack.i.bf16 %v1135_v40, %v1134_v39  ;;  %v2565_v60 = vsel %vm2559_vm4, %v2523_v48, %v8569_v44  ;;  %v1263_v40 = vld [vmem:[#allocation2 + $0xea] sm:$0xff] }
  0xf3   : > { %v8574_v49 = vunpack.i.h.bf16 %v8572_v45  ;;  %v8573_v50 = vunpack.i.l.bf16 %v8572_v45  ;;  %v8910_v45 = vpack.i.bf16 %v1179_v34, %v1178_v33 }
  0xf4   : > { %v8587_v51 = vpop.permute.xlu0 %8586  ;;  %8861 = vrot.lane.b32.xlu1 %v8860_v37, %s13007_s28 }
  0xf5   : > { %v2606_v53 = vsel %vm2601_vm6, %v2564_v52, %v8573_v50  ;;  %v2607_v3 = vsel %vm2601_vm6, %v2565_v60, %v8574_v49  ;;  %v8588_v4 = vunpack.i.l.bf16 %v8587_v51  ;;  %v8589_v9 = vunpack.i.h.bf16 %v8587_v51  ;;  %v1287_v49 = vld [vmem:[#allocation2 + $0x63] sm:$0xff]  ;;  %v1037_v60 = vld [vmem:[#allocation2 + $0x4d] sm:$0xff] }
  0xf6   : > { %8876 = vrot.lane.b32.xlu0 %v8875_v41, %s13005_s12  ;;  %v8582_v58 = vpop.permute.xlu1 %8581  ;;  %v2648_v59 = vsel %vm2643_vm7, %v2606_v53, %v8578_v36  ;;  %v2649_v6 = vsel %vm2643_vm7, %v2607_v3, %v8579_v56  ;;  %v1264_v41 = vld [vmem:[#allocation2 + $0xf2] sm:$0xff]  ;;  %v1036_v51 = vld [vmem:[#allocation2 + $0x45] sm:$0xff] }
  0xf7   : > { %v8583_v63 = vunpack.i.l.bf16 %v8582_v58  ;;  %2918 = vmatmul.mubr.f32.gmra.mrb[8].mxu0 %v2648_v59  ;;  %v8584_v5 = vunpack.i.h.bf16 %v8582_v58  ;;  %v1222_v56 = vld [vmem:[#allocation2 + $0xf1] sm:$0xff] }
  0xf8   : > { %v8597_v0 = vpop.permute.xlu0 %8596  ;;  %8871 = vrot.lane.b32.xlu1 %v10620_v42, %s13003_s29  ;;  %7449 = vmatprep.mubr.msk.f32.mxu0 %vm844_vm0, %v1285_v54  ;;  %v1221_v54 = vld [vmem:[#allocation2 + $0xe9] sm:$0xff] }
  0xf9   : > { %v2399_v7 = vsel %vm844_vm0, %v1034_v57, %v8583_v63  ;;  %v8598_v21 = vunpack.i.l.bf16 %v8597_v0  ;;  %v2400_v23 = vsel %vm844_vm0, %v1035_v13, %v8584_v5  ;;  %v8599_v31 = vunpack.i.h.bf16 %v8597_v0 }
  0xfa   : > { %8886 = vrot.lane.b32.xlu0 %v10624_v55, %s12999_s11  ;;  %v8592_v14 = vpop.permute.xlu1 %8591  ;;  %v2440_v20 = vsel %vm939_vm1, %v2399_v7, %v8588_v4  ;;  %v2441_v30 = vsel %vm939_vm1, %v2400_v23, %v8589_v9  ;;  %v8925_v57 = vpack.i.bf16 %v1264_v41, %v1263_v40  ;;  %v10664_v3 = vpack.i.bf16 %v1222_v56, %v1221_v54  ;;  %v1288_v4 = vld [vmem:[#allocation2 + $0x6b] sm:$0xff]  ;;  %v1265_v54 = vld [vmem:[#allocation2 + $0xfa] sm:$0xff]  ;;  %v1266_v56 = vld [vmem:[#allocation2 + $0x102] sm:$0xff] }
  0xfb   : > { %v8593_v17 = vunpack.i.l.bf16 %v8592_v14  ;;  %2923 = vmatmul.mubr.f32.gmra.mrb[10].mxu0 %v2649_v6  ;;  %v8594_v24 = vunpack.i.h.bf16 %v8592_v14  ;;  %v1180_v14 = vld [vmem:[#allocation2 + $0xe8] sm:$0xff]  ;;  %v1181_v6 = vld [vmem:[#allocation2 + $0xf0] sm:$0xff] }
  0xfc   : > { %v8607_v18 = vpop.permute.xlu0 %8606  ;;  %8881 = vrot.lane.b32.xlu1 %v10602_v19, %s13001_s10  ;;  %7450 = vmatprep.mubr.msk.f32.mxu0 %vm844_vm0, %v1286_v12  ;;  %v1138_v23 = vld [vmem:[#allocation2 + $0xe7] sm:$0xff] }
  0xfd   : > { %v2482_v25 = vsel %vm2475_vm2, %v2440_v20, %v8593_v17  ;;  %v8608_v32 = vunpack.i.l.bf16 %v8607_v18  ;;  %v2483_v35 = vsel %vm2475_vm2, %v2441_v30, %v8594_v24  ;;  %v8609_v46 = vunpack.i.h.bf16 %v8607_v18  ;;  %v1139_v24 = vld [vmem:[#allocation2 + $0xef] sm:$0xff] }
  0xfe   : > { %8896 = vrot.lane.b32.xlu0 %v8895_v11, %s13007_s28  ;;  %v8602_v27 = vpop.permute.xlu1 %8601  ;;  %v2524_v19 = vsel %vm2517_vm3, %v2482_v25, %v8598_v21  ;;  %v2525_v36 = vsel %vm2517_vm3, %v2483_v35, %v8599_v31  ;;  %v8930_v21 = vpack.i.bf16 %v1096_v10, %v1095_v8  ;;  %v8945_v25 = vpack.i.bf16 %v1181_v6, %v1180_v14  ;;  %v1223_v31 = vld [vmem:[#allocation2 + $0xf9] sm:$0xff] }
  0xff   : > { %v8603_v28 = vunpack.i.l.bf16 %v8602_v27  ;;  %v8604_v37 = vunpack.i.h.bf16 %v8602_v27 }
 0x100   : > { %v8617_v29 = vpop.permute.xlu0 %8616  ;;  %8891 = vrot.lane.b32.xlu1 %v8890_v22, %s12997_s9 }
 0x101   : > { %v2566_v38 = vsel %vm2559_vm4, %v2524_v19, %v8603_v28  ;;  %v8618_v47 = vunpack.i.l.bf16 %v8617_v29  ;;  %v2567_v53 = vsel %vm2559_vm4, %v2525_v36, %v8604_v37  ;;  %v8619_v58 = vunpack.i.h.bf16 %v8617_v29  ;;  %v1224_v19 = vld [vmem:[#allocation2 + $0x101] sm:$0xff] }
 0x102   : > { %8906 = vrot.lane.b32.xlu0 %v10643_v26, %s13003_s29  ;;  %v8612_v39 = vpop.permute.xlu1 %8611  ;;  %v2608_v48 = vsel %vm2601_vm6, %v2566_v38, %v8608_v32  ;;  %v10686_v40 = vpack.i.bf16 %v1224_v19, %v1223_v31 }
 0x103   : > { %v8613_v43 = vunpack.i.l.bf16 %v8612_v39  ;;  %v8614_v50 = vunpack.i.h.bf16 %v8612_v39  ;;  %v2401_v63 = vsel %vm844_vm0, %v1036_v51, %v8618_v47  ;;  %v2402_v11 = vsel %vm844_vm0, %v1037_v60, %v8619_v58  ;;  %v1289_v39 = vld [vmem:[#allocation2 + $0x73] sm:$0xff]  ;;  %v1290_v58 = vld [vmem:[#allocation2 + $0x7b] sm:$0xff] }
 0x104   : > { %v8627_v44 = vpop.permute.xlu0 %8626  ;;  %8901 = vrot.lane.b32.xlu1 %v10620_v42, %s13009_s0  ;;  %v1098_v47 = vld [vmem:[#allocation2 + $0xee] sm:$0xff] }
 0x105   : > { %v2650_v52 = vsel %vm2643_vm7, %v2608_v48, %v8613_v43  ;;  %v8628_v0 = vunpack.i.l.bf16 %v8627_v44  ;;  %v8629_v12 = vunpack.i.h.bf16 %v8627_v44  ;;  %v1038_v43 = vld [vmem:[#allocation2 + $0x55] sm:$0xff] }
 0x106   : > { %8916 = vrot.lane.b32.xlu0 %v10624_v55, %s13001_s10  ;;  %v8622_v59 = vpop.permute.xlu1 %8621  ;;  %2928 = vmatmul.mubr.f32.gmra.mrb[12].mxu0 %v2650_v52  ;;  %v2609_v55 = vsel %vm2601_vm6, %v2567_v53, %v8609_v46  ;;  %v1097_v46 = vld [vmem:[#allocation2 + $0xe6] sm:$0xff] }
 0x107   : > { %v8624_v42 = vunpack.i.h.bf16 %v8622_v59  ;;  %v8623_v61 = vunpack.i.l.bf16 %v8622_v59  ;;  %7451 = vmatprep.mubr.msk.f32.mxu0 %vm844_vm0, %v1287_v49  ;;  %v2651_v7 = vsel %vm2643_vm7, %v2609_v55, %v8614_v50  ;;  %v1039_v59 = vld [vmem:[#allocation2 + $0x5d] sm:$0xff] }
 0x108   : > { %v8637_v62 = vpop.permute.xlu0 %8636  ;;  %8911 = vrot.lane.b32.xlu1 %v8910_v45, %s13005_s12 }
 0x109   : > { %v2442_v5 = vsel %vm939_vm1, %v2401_v63, %v8623_v61  ;;  %v2443_v15 = vsel %vm939_vm1, %v2402_v11, %v8624_v42  ;;  %v8638_v20 = vunpack.i.l.bf16 %v8637_v62  ;;  %v8639_v28 = vunpack.i.h.bf16 %v8637_v62  ;;  %v1140_v61 = vld [vmem:[#allocation2 + $0xf7] sm:$0xff]  ;;  %v1141_v62 = vld [vmem:[#allocation2 + $0xff] sm:$0xff] }
 0x10a   : > { %8926 = vrot.lane.b32.xlu0 %v8925_v57, %s12997_s9  ;;  %v8632_v13 = vpop.permute.xlu1 %8631  ;;  %2933 = vmatmul.mubr.f32.gmra.mrb[14].mxu0 %v2651_v7  ;;  %v2484_v9 = vsel %vm2475_vm2, %v2442_v5, %v8628_v0  ;;  %v2485_v27 = vsel %vm2475_vm2, %v2443_v15, %v8629_v12  ;;  %v8965_v57 = vpack.i.bf16 %v1098_v47, %v1097_v46 }
 0x10b   : > { %v8634_v16 = vunpack.i.h.bf16 %v8632_v13  ;;  %v8633_v17 = vunpack.i.l.bf16 %v8632_v13  ;;  %7452 = vmatprep.mubr.msk.f32.mxu0 %vm844_vm0, %v1288_v4  ;;  %v8960_v7 = vpack.i.bf16 %v1266_v56, %v1265_v54  ;;  %v10705_v12 = vpack.i.bf16 %v1141_v62, %v1140_v61  ;;  %v1099_v54 = vld [vmem:[#allocation2 + $0xf6] sm:$0xff]  ;;  %v1100_v56 = vld [vmem:[#allocation2 + $0xfe] sm:$0xff] }
 0x10c   : > { %v8647_v18 = vpop.permute.xlu0 %8646  ;;  %8921 = vrot.lane.b32.xlu1 %v10664_v3, %s12999_s11 }
 0x10d   : > { %v2526_v22 = vsel %vm2517_vm3, %v2484_v9, %v8633_v17  ;;  %v8648_v30 = vunpack.i.l.bf16 %v8647_v18  ;;  %v2527_v32 = vsel %vm2517_vm3, %v2485_v27, %v8634_v16  ;;  %v8649_v41 = vunpack.i.h.bf16 %v8647_v18  ;;  %v1182_v18 = vld [vmem:[#allocation2 + $0xf8] sm:$0xff]  ;;  %v1183_v9 = vld [vmem:[#allocation2 + $0x100] sm:$0xff] }
 0x10e   : > { %8936 = vrot.lane.b32.xlu0 %v10643_v26, %s13009_s0  ;;  %v8642_v29 = vpop.permute.xlu1 %8641  ;;  %v2568_v37 = vsel %vm2559_vm4, %v2526_v22, %v8638_v20  ;;  %v10682_v26 = vpack.i.bf16 %v1139_v24, %v1138_v23  ;;  %v2569_v36 = vsel %vm2559_vm4, %v2527_v32, %v8639_v28  ;;  %v1267_v24 = vld [vmem:[#allocation2 + $0x10a] sm:$0xff] }
 0x10f   : > { %v8644_v33 = vunpack.i.h.bf16 %v8642_v29  ;;  %v8643_v34 = vunpack.i.l.bf16 %v8642_v29  ;;  %v8980_v29 = vpack.i.bf16 %v1183_v9, %v1182_v18 }
 0x110   : > { %v8657_v35 = vpop.permute.xlu0 %8656  ;;  %8931 = vrot.lane.b32.xlu1 %v8930_v21, %s13007_s28 }
 0x111   : > { %v2610_v38 = vsel %vm2601_vm6, %v2568_v37, %v8643_v34  ;;  %v2611_v50 = vsel %vm2601_vm6, %v2569_v36, %v8644_v33  ;;  %v8658_v51 = vunpack.i.l.bf16 %v8657_v35  ;;  %v8659_v55 = vunpack.i.h.bf16 %v8657_v35  ;;  %v1291_v33 = vld [vmem:[#allocation2 + $0x83] sm:$0xff]  ;;  %v1041_v36 = vld [vmem:[#allocation2 + $0x6d] sm:$0xff] }
 0x112   : > { %8946 = vrot.lane.b32.xlu0 %v8945_v25, %s13005_s12  ;;  %v8652_v44 = vpop.permute.xlu1 %8651  ;;  %v2652_v45 = vsel %vm2643_vm7, %v2610_v38, %v8648_v30  ;;  %v2653_v42 = vsel %vm2643_vm7, %v2611_v50, %v8649_v41  ;;  %v1268_v25 = vld [vmem:[#allocation2 + $0x112] sm:$0xff]  ;;  %v1040_v35 = vld [vmem:[#allocation2 + $0x65] sm:$0xff] }
 0x113   : > { %v8653_v48 = vunpack.i.l.bf16 %v8652_v44  ;;  %2938 = vmatmul.mubr.f32.gmra.mrb[16].mxu0 %v2652_v45  ;;  %v8654_v52 = vunpack.i.h.bf16 %v8652_v44  ;;  %v1226_v41 = vld [vmem:[#allocation2 + $0x111] sm:$0xff] }
 0x114   : > { %v8667_v49 = vpop.permute.xlu0 %8666  ;;  %8941 = vrot.lane.b32.xlu1 %v10682_v26, %s13003_s29  ;;  %7453 = vmatprep.mubr.msk.f32.mxu0 %vm844_vm0, %v1289_v39  ;;  %v1225_v39 = vld [vmem:[#allocation2 + $0x109] sm:$0xff] }
 0x115   : > { %v2403_v53 = vsel %vm844_vm0, %v1038_v43, %v8653_v48  ;;  %v8668_v5 = vunpack.i.l.bf16 %v8667_v49  ;;  %v2404_v8 = vsel %vm844_vm0, %v1039_v59, %v8654_v52  ;;  %v8669_v16 = vunpack.i.h.bf16 %v8667_v49 }
 0x116   : > { %8956 = vrot.lane.b32.xlu0 %v10686_v40, %s12999_s11  ;;  %v8662_v60 = vpop.permute.xlu1 %8661  ;;  %v2444_v4 = vsel %vm939_vm1, %v2403_v53, %v8658_v51  ;;  %v2445_v15 = vsel %vm939_vm1, %v2404_v8, %v8659_v55  ;;  %v8995_v43 = vpack.i.bf16 %v1268_v25, %v1267_v24  ;;  %v10726_v50 = vpack.i.bf16 %v1226_v41, %v1225_v39  ;;  %v1292_v51 = vld [vmem:[#allocation2 + $0x8b] sm:$0xff]  ;;  %v1269_v39 = vld [vmem:[#allocation2 + $0x11a] sm:$0xff]  ;;  %v1270_v41 = vld [vmem:[#allocation2 + $0x122] sm:$0xff] }
 0x117   : > { %v8663_v63 = vunpack.i.l.bf16 %v8662_v60  ;;  %2943 = vmatmul.mubr.f32.gmra.mrb[18].mxu0 %v2653_v42  ;;  %v8664_v10 = vunpack.i.h.bf16 %v8662_v60  ;;  %v1184_v60 = vld [vmem:[#allocation2 + $0x108] sm:$0xff]  ;;  %v1185_v42 = vld [vmem:[#allocation2 + $0x110] sm:$0xff] }
 0x118   : > { %v8677_v0 = vpop.permute.xlu0 %8676  ;;  %8951 = vrot.lane.b32.xlu1 %v10664_v3, %s13001_s10  ;;  %7454 = vmatprep.mubr.msk.f32.mxu0 %vm844_vm0, %v1290_v58  ;;  %v1142_v8 = vld [vmem:[#allocation2 + $0x107] sm:$0xff] }
 0x119   : > { %v2486_v11 = vsel %vm2475_vm2, %v2444_v4, %v8663_v63  ;;  %v8678_v17 = vunpack.i.l.bf16 %v8677_v0  ;;  %v2487_v20 = vsel %vm2475_vm2, %v2445_v15, %v8664_v10  ;;  %v8679_v31 = vunpack.i.h.bf16 %v8677_v0  ;;  %v1143_v10 = vld [vmem:[#allocation2 + $0x10f] sm:$0xff] }
 0x11a   : > { %8966 = vrot.lane.b32.xlu0 %v8965_v57, %s13007_s28  ;;  %v8672_v13 = vpop.permute.xlu1 %8671  ;;  %v2528_v3 = vsel %vm2517_vm3, %v2486_v11, %v8668_v5  ;;  %v2529_v30 = vsel %vm2517_vm3, %v2487_v20, %v8669_v16  ;;  %v9000_v5 = vpack.i.bf16 %v1100_v56, %v1099_v54  ;;  %v9015_v11 = vpack.i.bf16 %v1185_v42, %v1184_v60  ;;  %v1227_v16 = vld [vmem:[#allocation2 + $0x119] sm:$0xff] }
 0x11b   : > { %v8673_v14 = vunpack.i.l.bf16 %v8672_v13  ;;  %v8674_v21 = vunpack.i.h.bf16 %v8672_v13 }
 0x11c   : > { %v8687_v6 = vpop.permute.xlu0 %8686  ;;  %8961 = vrot.lane.b32.xlu1 %v8960_v7, %s12997_s9 }
 0x11d   : > { %v2570_v22 = vsel %vm2559_vm4, %v2528_v3, %v8673_v14  ;;  %v8688_v19 = vunpack.i.l.bf16 %v8687_v6  ;;  %v2571_v38 = vsel %vm2559_vm4, %v2529_v30, %v8674_v21  ;;  %v8689_v44 = vunpack.i.h.bf16 %v8687_v6  ;;  %v1228_v3 = vld [vmem:[#allocation2 + $0x121] sm:$0xff] }
 0x11e   : > { %8976 = vrot.lane.b32.xlu0 %v10705_v12, %s13003_s29  ;;  %v8682_v23 = vpop.permute.xlu1 %8681  ;;  %v2612_v32 = vsel %vm2601_vm6, %v2570_v22, %v8678_v17  ;;  %v10748_v24 = vpack.i.bf16 %v1228_v3, %v1227_v16 }
 0x11f   : > { %v8683_v27 = vunpack.i.l.bf16 %v8682_v23  ;;  %v8684_v34 = vunpack.i.h.bf16 %v8682_v23  ;;  %v2405_v48 = vsel %vm844_vm0, %v1040_v35, %v8688_v19  ;;  %v2406_v57 = vsel %vm844_vm0, %v1041_v36, %v8689_v44  ;;  %v1293_v23 = vld [vmem:[#allocation2 + $0x93] sm:$0xff]  ;;  %v1294_v44 = vld [vmem:[#allocation2 + $0x9b] sm:$0xff] }
 0x120   : > { %v8697_v28 = vpop.permute.xlu0 %8696  ;;  %8971 = vrot.lane.b32.xlu1 %v10682_v26, %s13009_s0  ;;  %v1102_v19 = vld [vmem:[#allocation2 + $0x10e] sm:$0xff] }
 0x121   : > { %v2654_v37 = vsel %vm2643_vm7, %v2612_v32, %v8683_v27  ;;  %v8698_v49 = vunpack.i.l.bf16 %v8697_v28  ;;  %v8699_v58 = vunpack.i.h.bf16 %v8697_v28  ;;  %v1042_v27 = vld [vmem:[#allocation2 + $0x75] sm:$0xff] }
 0x122   : > { %8986 = vrot.lane.b32.xlu0 %v10686_v40, %s13001_s10  ;;  %v8692_v45 = vpop.permute.xlu1 %8691  ;;  %2948 = vmatmul.mubr.f32.gmra.mrb[20].mxu0 %v2654_v37  ;;  %v2613_v40 = vsel %vm2601_vm6, %v2571_v38, %v8679_v31  ;;  %v1101_v31 = vld [vmem:[#allocation2 + $0x106] sm:$0xff] }
 0x123   : > { %v8694_v26 = vunpack.i.h.bf16 %v8692_v45  ;;  %v8693_v46 = vunpack.i.l.bf16 %v8692_v45  ;;  %7455 = vmatprep.mubr.msk.f32.mxu0 %vm844_vm0, %v1291_v33  ;;  %v2655_v53 = vsel %vm2643_vm7, %v2613_v40, %v8684_v34  ;;  %v1043_v45 = vld [vmem:[#allocation2 + $0x7d] sm:$0xff] }
 0x124   : > { %v8707_v47 = vpop.permute.xlu0 %8706  ;;  %8981 = vrot.lane.b32.xlu1 %v8980_v29, %s13005_s12 }
 0x125   : > { %v2446_v52 = vsel %vm939_vm1, %v2405_v48, %v8693_v46  ;;  %v2447_v61 = vsel %vm939_vm1, %v2406_v57, %v8694_v26  ;;  %v8708_v4 = vunpack.i.l.bf16 %v8707_v47  ;;  %v8709_v14 = vunpack.i.h.bf16 %v8707_v47  ;;  %v1144_v46 = vld [vmem:[#allocation2 + $0x117] sm:$0xff]  ;;  %v1145_v47 = vld [vmem:[#allocation2 + $0x11f] sm:$0xff] }
 0x126   : > { %8996 = vrot.lane.b32.xlu0 %v8995_v43, %s12997_s9  ;;  %v8702_v59 = vpop.permute.xlu1 %8701  ;;  %2953 = vmatmul.mubr.f32.gmra.mrb[22].mxu0 %v2655_v53  ;;  %v2488_v55 = vsel %vm2475_vm2, %v2446_v52, %v8698_v49  ;;  %v2489_v13 = vsel %vm2475_vm2, %v2447_v61, %v8699_v58  ;;  %v9035_v43 = vpack.i.bf16 %v1102_v19, %v1101_v31 }
 0x127   : > { %v8704_v62 = vunpack.i.h.bf16 %v8702_v59  ;;  %v8703_v63 = vunpack.i.l.bf16 %v8702_v59  ;;  %7456 = vmatprep.mubr.msk.f32.mxu0 %vm844_vm0, %v1292_v51  ;;  %v9030_v53 = vpack.i.bf16 %v1270_v41, %v1269_v39  ;;  %v10767_v58 = vpack.i.bf16 %v1145_v47, %v1144_v46  ;;  %v1103_v39 = vld [vmem:[#allocation2 + $0x116] sm:$0xff]  ;;  %v1104_v41 = vld [vmem:[#allocation2 + $0x11e] sm:$0xff] }
 0x128   : > { %v8717_v0 = vpop.permute.xlu0 %8716  ;;  %8991 = vrot.lane.b32.xlu1 %v10726_v50, %s12999_s11 }
 0x129   : > { %v2530_v7 = vsel %vm2517_vm3, %v2488_v55, %v8703_v63  ;;  %v8718_v15 = vunpack.i.l.bf16 %v8717_v0  ;;  %v2531_v17 = vsel %vm2517_vm3, %v2489_v13, %v8704_v62  ;;  %v8719_v25 = vunpack.i.h.bf16 %v8717_v0  ;;  %v1186_v0 = vld [vmem:[#allocation2 + $0x118] sm:$0xff]  ;;  %v1187_v55 = vld [vmem:[#allocation2 + $0x120] sm:$0xff] }
 0x12a   : > { %9006 = vrot.lane.b32.xlu0 %v10705_v12, %s13009_s0  ;;  %v8712_v6 = vpop.permute.xlu1 %8711  ;;  %v2572_v21 = vsel %vm2559_vm4, %v2530_v7, %v8708_v4  ;;  %v10744_v12 = vpack.i.bf16 %v1143_v10, %v1142_v8  ;;  %v2573_v30 = vsel %vm2559_vm4, %v2531_v17, %v8709_v14  ;;  %v1271_v10 = vld [vmem:[#allocation2 + $0x12a] sm:$0xff] }
 0x12b   : > { %v8714_v18 = vunpack.i.h.bf16 %v8712_v6  ;;  %v8713_v9 = vunpack.i.l.bf16 %v8712_v6  ;;  %v9050_v6 = vpack.i.bf16 %v1187_v55, %v1186_v0 }
 0x12c   : > { %v8727_v20 = vpop.permute.xlu0 %8726  ;;  %9001 = vrot.lane.b32.xlu1 %v9000_v5, %s13007_s28 }
 0x12d   : > { %v2614_v22 = vsel %vm2601_vm6, %v2572_v21, %v8713_v9  ;;  %v2615_v34 = vsel %vm2601_vm6, %v2573_v30, %v8714_v18  ;;  %v8728_v35 = vunpack.i.l.bf16 %v8727_v20  ;;  %v8729_v40 = vunpack.i.h.bf16 %v8727_v20  ;;  %v1295_v18 = vld [vmem:[#allocation2 + $0xa3] sm:$0xff]  ;;  %v1045_v30 = vld [vmem:[#allocation2 + $0x8d] sm:$0xff] }
 0x12e   : > { %9016 = vrot.lane.b32.xlu0 %v9015_v11, %s13005_s12  ;;  %v8722_v28 = vpop.permute.xlu1 %8721  ;;  %v2656_v29 = vsel %vm2643_vm7, %v2614_v22, %v8718_v15  ;;  %v2657_v26 = vsel %vm2643_vm7, %v2615_v34, %v8719_v25  ;;  %v1272_v11 = vld [vmem:[#allocation2 + $0x132] sm:$0xff]  ;;  %v1044_v20 = vld [vmem:[#allocation2 + $0x85] sm:$0xff] }
 0x12f   : > { %v8723_v32 = vunpack.i.l.bf16 %v8722_v28  ;;  %2958 = vmatmul.mubr.f32.gmra.mrb[24].mxu0 %v2656_v29  ;;  %v8724_v37 = vunpack.i.h.bf16 %v8722_v28  ;;  %v1230_v25 = vld [vmem:[#allocation2 + $0x131] sm:$0xff] }
 0x130   : > { %v8737_v33 = vpop.permute.xlu0 %8736  ;;  %9011 = vrot.lane.b32.xlu1 %v10744_v12, %s13003_s29  ;;  %7457 = vmatprep.mubr.msk.f32.mxu0 %vm844_vm0, %v1293_v23  ;;  %v1229_v23 = vld [vmem:[#allocation2 + $0x129] sm:$0xff] }
 0x131   : > { %v2407_v38 = vsel %vm844_vm0, %v1042_v27, %v8723_v32  ;;  %v8738_v52 = vunpack.i.l.bf16 %v8737_v33  ;;  %v2408_v54 = vsel %vm844_vm0, %v1043_v45, %v8724_v37  ;;  %v8739_v62 = vunpack.i.h.bf16 %v8737_v33 }
 0x132   : > { %9026 = vrot.lane.b32.xlu0 %v10748_v24, %s12999_s11  ;;  %v8732_v36 = vpop.permute.xlu1 %8731  ;;  %v2448_v51 = vsel %vm939_vm1, %v2407_v38, %v8728_v35  ;;  %v2449_v61 = vsel %vm939_vm1, %v2408_v54, %v8729_v40  ;;  %v9065_v27 = vpack.i.bf16 %v1272_v11, %v1271_v10  ;;  %v10788_v34 = vpack.i.bf16 %v1230_v25, %v1229_v23  ;;  %v1296_v35 = vld [vmem:[#allocation2 + $0xab] sm:$0xff]  ;;  %v1273_v23 = vld [vmem:[#allocation2 + $0x13a] sm:$0xff]  ;;  %v1274_v25 = vld [vmem:[#allocation2 + $0x142] sm:$0xff] }
 0x133   : > { %v8733_v48 = vunpack.i.l.bf16 %v8732_v36  ;;  %2963 = vmatmul.mubr.f32.gmra.mrb[26].mxu0 %v2657_v26  ;;  %v8734_v56 = vunpack.i.h.bf16 %v8732_v36  ;;  %v1188_v36 = vld [vmem:[#allocation2 + $0x128] sm:$0xff]  ;;  %v1189_v26 = vld [vmem:[#allocation2 + $0x130] sm:$0xff] }
 0x134   : > { %v8747_v49 = vpop.permute.xlu0 %8746  ;;  %9021 = vrot.lane.b32.xlu1 %v10726_v50, %s13001_s10  ;;  %7458 = vmatprep.mubr.msk.f32.mxu0 %vm844_vm0, %v1294_v44  ;;  %v1146_v54 = vld [vmem:[#allocation2 + $0x127] sm:$0xff] }
 0x135   : > { %v2490_v57 = vsel %vm2475_vm2, %v2448_v51, %v8733_v48  ;;  %v8748_v63 = vunpack.i.l.bf16 %v8747_v49  ;;  %v2491_v4 = vsel %vm2475_vm2, %v2449_v61, %v8734_v56  ;;  %v8749_v16 = vunpack.i.h.bf16 %v8747_v49  ;;  %v1147_v56 = vld [vmem:[#allocation2 + $0x12f] sm:$0xff] }
 0x136   : > { %9036 = vrot.lane.b32.xlu0 %v9035_v43, %s13007_s28  ;;  %v8742_v59 = vpop.permute.xlu1 %8741  ;;  %v2532_v50 = vsel %vm2517_vm3, %v2490_v57, %v8738_v52  ;;  %v2533_v15 = vsel %vm2517_vm3, %v2491_v4, %v8739_v62  ;;  %v9070_v52 = vpack.i.bf16 %v1104_v41, %v1103_v39  ;;  %v9085_v57 = vpack.i.bf16 %v1189_v26, %v1188_v36  ;;  %v1231_v62 = vld [vmem:[#allocation2 + $0x139] sm:$0xff] }
 0x137   : > { %v8743_v60 = vunpack.i.l.bf16 %v8742_v59  ;;  %v8744_v5 = vunpack.i.h.bf16 %v8742_v59 }
 0x138   : > { %v8757_v42 = vpop.permute.xlu0 %8756  ;;  %9031 = vrot.lane.b32.xlu1 %v9030_v53, %s12997_s9 }
 0x139   : > { %v2574_v7 = vsel %vm2559_vm4, %v2532_v50, %v8743_v60  ;;  %v8758_v3 = vunpack.i.l.bf16 %v8757_v42  ;;  %v2575_v22 = vsel %vm2559_vm4, %v2533_v15, %v8744_v5  ;;  %v8759_v28 = vunpack.i.h.bf16 %v8757_v42  ;;  %v1232_v50 = vld [vmem:[#allocation2 + $0x141] sm:$0xff] }
 0x13a   : > { %9046 = vrot.lane.b32.xlu0 %v10767_v58, %s13003_s29  ;;  %v8752_v8 = vpop.permute.xlu1 %8751  ;;  %v2616_v17 = vsel %vm2601_vm6, %v2574_v7, %v8748_v63  ;;  %v10810_v10 = vpack.i.bf16 %v1232_v50, %v1231_v62 }
 0x13b   : > { %v8753_v13 = vunpack.i.l.bf16 %v8752_v8  ;;  %v8754_v9 = vunpack.i.h.bf16 %v8752_v8  ;;  %v2409_v32 = vsel %vm844_vm0, %v1044_v20, %v8758_v3  ;;  %v2410_v43 = vsel %vm844_vm0, %v1045_v30, %v8759_v28  ;;  %v1297_v8 = vld [vmem:[#allocation2 + $0xb3] sm:$0xff]  ;;  %v1298_v28 = vld [vmem:[#allocation2 + $0xbb] sm:$0xff] }
 0x13c   : > { %v8767_v14 = vpop.permute.xlu0 %8766  ;;  %9041 = vrot.lane.b32.xlu1 %v10744_v12, %s13009_s0  ;;  %v1106_v3 = vld [vmem:[#allocation2 + $0x12e] sm:$0xff] }
 0x13d   : > { %v2658_v21 = vsel %vm2643_vm7, %v2616_v17, %v8753_v13  ;;  %v8768_v33 = vunpack.i.l.bf16 %v8767_v14  ;;  %v8769_v44 = vunpack.i.h.bf16 %v8767_v14  ;;  %v1046_v13 = vld [vmem:[#allocation2 + $0x95] sm:$0xff] }
 0x13e   : > { %9056 = vrot.lane.b32.xlu0 %v10748_v24, %s13001_s10  ;;  %v8762_v29 = vpop.permute.xlu1 %8761  ;;  %2968 = vmatmul.mubr.f32.gmra.mrb[28].mxu0 %v2658_v21  ;;  %v2617_v24 = vsel %vm2601_vm6, %v2575_v22, %v8749_v16  ;;  %v1105_v16 = vld [vmem:[#allocation2 + $0x126] sm:$0xff] }
 0x13f   : > { %v8764_v12 = vunpack.i.h.bf16 %v8762_v29  ;;  %v8763_v31 = vunpack.i.l.bf16 %v8762_v29  ;;  %7459 = vmatprep.mubr.msk.f32.mxu0 %vm844_vm0, %v1295_v18  ;;  %v2659_v38 = vsel %vm2643_vm7, %v2617_v24, %v8754_v9  ;;  %v1047_v29 = vld [vmem:[#allocation2 + $0x9d] sm:$0xff] }
 0x140   : > { %v8777_v19 = vpop.permute.xlu0 %8776  ;;  %9051 = vrot.lane.b32.xlu1 %v9050_v6, %s13005_s12 }
 0x141   : > { %v2450_v37 = vsel %vm939_vm1, %v2409_v32, %v8763_v31  ;;  %v2451_v46 = vsel %vm939_vm1, %v2410_v43, %v8764_v12  ;;  %v8778_v51 = vunpack.i.l.bf16 %v8777_v19  ;;  %v8779_v60 = vunpack.i.h.bf16 %v8777_v19  ;;  %v1148_v31 = vld [vmem:[#allocation2 + $0x137] sm:$0xff]  ;;  %v1149_v19 = vld [vmem:[#allocation2 + $0x13f] sm:$0xff] }
 0x142   : > { %9066 = vrot.lane.b32.xlu0 %v9065_v27, %s12997_s9  ;;  %v8772_v45 = vpop.permute.xlu1 %8771  ;;  %2973 = vmatmul.mubr.f32.gmra.mrb[30].mxu0 %v2659_v38  ;;  %v2492_v40 = vsel %vm2475_vm2, %v2450_v37, %v8768_v33  ;;  %v2493_v59 = vsel %vm2475_vm2, %v2451_v46, %v8769_v44  ;;  %v9105_v27 = vpack.i.bf16 %v1106_v3, %v1105_v16 }
 0x143   : > { %v8774_v47 = vunpack.i.h.bf16 %v8772_v45  ;;  %v8773_v48 = vunpack.i.l.bf16 %v8772_v45  ;;  %7460 = vmatprep.mubr.msk.f32.mxu0 %vm844_vm0, %v1296_v35  ;;  %v9100_v38 = vpack.i.bf16 %v1274_v25, %v1273_v23  ;;  %v10829_v44 = vpack.i.bf16 %v1149_v19, %v1148_v31  ;;  %v1107_v23 = vld [vmem:[#allocation2 + $0x136] sm:$0xff]  ;;  %v1108_v25 = vld [vmem:[#allocation2 + $0x13e] sm:$0xff] }
 0x144   : > { %v8787_v49 = vpop.permute.xlu0 %8786  ;;  %9061 = vrot.lane.b32.xlu1 %v10788_v34, %s12999_s11 }
 0x145   : > { %v2534_v53 = vsel %vm2517_vm3, %v2492_v40, %v8773_v48  ;;  %v8788_v61 = vunpack.i.l.bf16 %v8787_v49  ;;  %v2535_v63 = vsel %vm2517_vm3, %v2493_v59, %v8774_v47  ;;  %v8789_v11 = vunpack.i.h.bf16 %v8787_v49  ;;  %v1190_v49 = vld [vmem:[#allocation2 + $0x138] sm:$0xff]  ;;  %v1191_v40 = vld [vmem:[#allocation2 + $0x140] sm:$0xff] }
 0x146   : > { %9076 = vrot.lane.b32.xlu0 %v10767_v58, %s13009_s0  ;;  %v8782_v42 = vpop.permute.xlu1 %8781  ;;  %v2576_v5 = vsel %vm2559_vm4, %v2534_v53, %v8778_v51  ;;  %v10806_v58 = vpack.i.bf16 %v1147_v56, %v1146_v54  ;;  %v2577_v15 = vsel %vm2559_vm4, %v2535_v63, %v8779_v60  ;;  %v1275_v56 = vld [vmem:[#allocation2 + $0x14a] sm:$0xff] }
 0x147   : > { %v8784_v0 = vunpack.i.h.bf16 %v8782_v42  ;;  %v8783_v55 = vunpack.i.l.bf16 %v8782_v42  ;;  %v9120_v42 = vpack.i.bf16 %v1191_v40, %v1190_v49 }
 0x148   : > { %v8797_v4 = vpop.permute.xlu0 %8796  ;;  %9071 = vrot.lane.b32.xlu1 %v9070_v52, %s13007_s28 }
 0x149   : > { %v2618_v7 = vsel %vm2601_vm6, %v2576_v5, %v8783_v55  ;;  %v2619_v9 = vsel %vm2601_vm6, %v2577_v15, %v8784_v0  ;;  %v8798_v20 = vunpack.i.l.bf16 %v8797_v4  ;;  %v8799_v24 = vunpack.i.h.bf16 %v8797_v4  ;;  %v1299_v0 = vld [vmem:[#allocation2 + $0xc3] sm:$0xff]  ;;  %v1049_v15 = vld [vmem:[#allocation2 + $0xad] sm:$0xff] }
 0x14a   : > { %9086 = vrot.lane.b32.xlu0 %v9085_v57, %s13005_s12  ;;  %v8792_v14 = vpop.permute.xlu1 %8791  ;;  %v2660_v6 = vsel %vm2643_vm7, %v2618_v7, %v8788_v61  ;;  %v2661_v12 = vsel %vm2643_vm7, %v2619_v9, %v8789_v11  ;;  %v1276_v57 = vld [vmem:[#allocation2 + $0x152] sm:$0xff]  ;;  %v1048_v4 = vld [vmem:[#allocation2 + $0xa5] sm:$0xff] }
 0x14b   : > { %v8793_v17 = vunpack.i.l.bf16 %v8792_v14  ;;  %2978 = vmatmul.mubr.f32.gmra.mrb[32].mxu0 %v2660_v6  ;;  %v8794_v21 = vunpack.i.h.bf16 %v8792_v14  ;;  %v1234_v11 = vld [vmem:[#allocation2 + $0x151] sm:$0xff] }
 0x14c   : > { %v8807_v18 = vpop.permute.xlu0 %8806  ;;  %9081 = vrot.lane.b32.xlu1 %v10806_v58, %s13003_s29  ;;  %7461 = vmatprep.mubr.msk.f32.mxu0 %vm844_vm0, %v1297_v8  ;;  %v1233_v8 = vld [vmem:[#allocation2 + $0x149] sm:$0xff] }
 0x14d   : > { %v2411_v22 = vsel %vm844_vm0, %v1046_v13, %v8793_v17  ;;  %v8808_v37 = vunpack.i.l.bf16 %v8807_v18  ;;  %v2412_v39 = vsel %vm844_vm0, %v1047_v29, %v8794_v21  ;;  %v8809_v47 = vunpack.i.h.bf16 %v8807_v18 }
 0x14e   : > { %9096 = vrot.lane.b32.xlu0 %v10810_v10, %s12999_s11  ;;  %v8802_v30 = vpop.permute.xlu1 %8801  ;;  %v2452_v35 = vsel %vm939_vm1, %v2411_v22, %v8798_v20  ;;  %v2453_v46 = vsel %vm939_vm1, %v2412_v39, %v8799_v24  ;;  %v9135_v13 = vpack.i.bf16 %v1276_v57, %v1275_v56  ;;  %v10850_v9 = vpack.i.bf16 %v1234_v11, %v1233_v8  ;;  %v1300_v20 = vld [vmem:[#allocation2 + $0xcb] sm:$0xff]  ;;  %v1302_v8 = vld [vmem:[#allocation2 + $0xdb] sm:$0xff] }
 0x14f   : > { %v8803_v32 = vunpack.i.l.bf16 %v8802_v30  ;;  %2983 = vmatmul.mubr.f32.gmra.mrb[34].mxu0 %v2661_v12  ;;  %v8804_v41 = vunpack.i.h.bf16 %v8802_v30  ;;  %v1192_v30 = vld [vmem:[#allocation2 + $0x148] sm:$0xff]  ;;  %v1193_v12 = vld [vmem:[#allocation2 + $0x150] sm:$0xff]  ;;  %v1051_v11 = vld [vmem:[#allocation2 + $0xbd] sm:$0xff] }
 0x150   : > { %v8817_v33 = vpop.permute.xlu0 %8816  ;;  %9091 = vrot.lane.b32.xlu1 %v10788_v34, %s13001_s10  ;;  %7462 = vmatprep.mubr.msk.f32.mxu0 %vm844_vm0, %v1298_v28  ;;  %v1151_v39 = vld [vmem:[#allocation2 + $0x147] sm:$0xff] }
 0x151   : > { %v2494_v43 = vsel %vm2475_vm2, %v2452_v35, %v8803_v32  ;;  %v8818_v48 = vunpack.i.l.bf16 %v8817_v33  ;;  %v2495_v51 = vsel %vm2475_vm2, %v2453_v46, %v8804_v41  ;;  %v8819_v62 = vunpack.i.h.bf16 %v8817_v33  ;;  %v1152_v41 = vld [vmem:[#allocation2 + $0x14f] sm:$0xff] }
 0x152   : > { %9106 = vrot.lane.b32.xlu0 %v9105_v27, %s13007_s28  ;;  %v8812_v45 = vpop.permute.xlu1 %8811  ;;  %v2536_v34 = vsel %vm2517_vm3, %v2494_v43, %v8808_v37  ;;  %v2537_v61 = vsel %vm2517_vm3, %v2495_v51, %v8809_v47  ;;  %v9140_v37 = vpack.i.bf16 %v1108_v25, %v1107_v23  ;;  %v9155_v43 = vpack.i.bf16 %v1193_v12, %v1192_v30  ;;  %v1236_v47 = vld [vmem:[#allocation2 + $0x159] sm:$0xff] }
 0x153   : > { %v8813_v36 = vunpack.i.l.bf16 %v8812_v45  ;;  %v8814_v52 = vunpack.i.h.bf16 %v8812_v45  ;;  %v1153_v23 = vld [vmem:[#allocation2 + $0x157] sm:$0xf] }
 0x154   : > { %v8827_v26 = vpop.permute.xlu0 %8826  ;;  %9101 = vrot.lane.b32.xlu1 %v9100_v38, %s12997_s9 }
 0x155   : > { %v2578_v53 = vsel %vm2559_vm4, %v2536_v34, %v8813_v36  ;;  %v8828_v50 = vunpack.i.l.bf16 %v8827_v26  ;;  %v2579_v7 = vsel %vm2559_vm4, %v2537_v61, %v8814_v52  ;;  %v8829_v14 = vunpack.i.h.bf16 %v8827_v26  ;;  %v1237_v34 = vld [vmem:[#allocation2 + $0x161] sm:$0xff] }
 0x156   : > { %9116 = vrot.lane.b32.xlu0 %v10829_v44, %s13003_s29  ;;  %v8822_v54 = vpop.permute.xlu1 %8821  ;;  %v2620_v63 = vsel %vm2601_vm6, %v2578_v53, %v8818_v48  ;;  %v9165_v56 = vpack.i.bf16 %v1237_v34, %v1236_v47  ;;  %v1194_v47 = vld [vmem:[#allocation2 + $0x158] sm:$0xf] }
 0x157   : > { %v8823_v59 = vunpack.i.l.bf16 %v8822_v54  ;;  %v8824_v55 = vunpack.i.h.bf16 %v8822_v54  ;;  %v2413_v17 = vsel %vm844_vm0, %v1048_v4, %v8828_v50  ;;  %v2414_v27 = vsel %vm844_vm0, %v1049_v15, %v8829_v14  ;;  %v1301_v54 = vld [vmem:[#allocation2 + $0xd3] sm:$0xff] }
 0x158   : > { %v8837_v60 = vpop.permute.xlu0 %8836  ;;  %9111 = vrot.lane.b32.xlu1 %v10806_v58, %s13009_s0 }
 0x159   : > { %v2662_v5 = vsel %vm2643_vm7, %v2620_v63, %v8823_v59  ;;  %v8838_v18 = vunpack.i.l.bf16 %v8837_v60  ;;  %v8839_v28 = vunpack.i.h.bf16 %v8837_v60  ;;  %v1050_v59 = vld [vmem:[#allocation2 + $0xb5] sm:$0xff] }
 0x15a   : > { %9126 = vrot.lane.b32.xlu0 %v10810_v10, %s13001_s10  ;;  %v8832_v6 = vpop.permute.xlu1 %8831  ;;  %2988 = vmatmul.mubr.f32.gmra.mrb[36].mxu0 %v2662_v5  ;;  %v2621_v10 = vsel %vm2601_vm6, %v2579_v7, %v8819_v62  ;;  %v1277_v5 = vld [vmem:[#allocation2 + $0x15a] sm:$0xff]  ;;  %v1278_v7 = vld [vmem:[#allocation2 + $0x162] sm:$0xff] }
 0x15b   : > { %v8834_v58 = vunpack.i.h.bf16 %v8832_v6  ;;  %v8833_v16 = vunpack.i.l.bf16 %v8832_v6  ;;  %7463 = vmatprep.mubr.msk.f32.mxu0 %vm844_vm0, %v1299_v0  ;;  %v2663_v22 = vsel %vm2643_vm7, %v2621_v10, %v8824_v55  ;;  %v1109_v6 = vld [vmem:[#allocation2 + $0x146] sm:$0xf] }
 0x15c   : > { %v8847_v3 = vpop.permute.xlu0 %8846  ;;  %9121 = vrot.lane.b32.xlu1 %v9120_v42, %s13005_s12 }
 0x15d   : > { %v2454_v21 = vsel %vm939_vm1, %v2413_v17, %v8833_v16  ;;  %v2455_v31 = vsel %vm939_vm1, %v2414_v27, %v8834_v58  ;;  %v8848_v35 = vunpack.i.l.bf16 %v8847_v3  ;;  %v8849_v36 = vunpack.i.h.bf16 %v8847_v3 }
 0x15e   : > { %9136 = vrot.lane.b32.xlu0 %v9135_v13, %s12997_s9  ;;  %v8842_v29 = vpop.permute.xlu1 %8841  ;;  %2993 = vmatmul.mubr.f32.gmra.mrb[38].mxu0 %v2663_v22  ;;  %v2496_v24 = vsel %vm2475_vm2, %v2454_v21, %v8838_v18  ;;  %v2497_v45 = vsel %vm2475_vm2, %v2455_v31, %v8839_v28  ;;  %v9170_v18 = vpack.i.bf16 %v1278_v7, %v1277_v5 }
 0x15f   : > { %v8844_v19 = vunpack.i.h.bf16 %v8842_v29  ;;  %v8843_v32 = vunpack.i.l.bf16 %v8842_v29  ;;  %7464 = vmatprep.mubr.msk.f32.mxu0 %vm844_vm0, %v1300_v20 }
 0x160   : > { %v8857_v33 = vpop.permute.xlu0 %8856  ;;  %9131 = vrot.lane.b32.xlu1 %v10850_v9, %s12999_s11 }
 0x161   : > { %v2538_v38 = vsel %vm2517_vm3, %v2496_v24, %v8843_v32  ;;  %v8858_v46 = vunpack.i.l.bf16 %v8857_v33  ;;  %v2539_v48 = vsel %vm2517_vm3, %v2497_v45, %v8844_v19  ;;  %v8859_v57 = vunpack.i.h.bf16 %v8857_v33  ;;  %v1150_v19 = vld [vmem:[#allocation2 + $0x147] sm:$0xf]  ;;  %v1235_v24 = vld [vmem:[#allocation2 + $0x159] sm:$0xf] }
 0x162   : > { %9146 = vrot.lane.b32.xlu0 %v10829_v44, %s13009_s0  ;;  %v8852_v26 = vpop.permute.xlu1 %8851  ;;  %v2580_v52 = vsel %vm2559_vm4, %v2538_v38, %v8848_v35  ;;  %v9150_v44 = vpack.i.bf16 %v1152_v41, %v1151_v39  ;;  %v2581_v61 = vsel %vm2559_vm4, %v2539_v48, %v8849_v36  ;;  %v1303_v45 = vld [vmem:[#allocation2 + $0xe3] sm:$0xff] }
 0x163   : > { %v8854_v49 = vunpack.i.h.bf16 %v8852_v26  ;;  %v8853_v40 = vunpack.i.l.bf16 %v8852_v26  ;;  %v1052_v26 = vld [vmem:[#allocation2 + $0xc5] sm:$0xff] }
 0x164   : > { %v8867_v51 = vpop.permute.xlu0 %8866  ;;  %9141 = vrot.lane.b32.xlu1 %v9140_v37, %s13007_s28 }
 0x165   : > { %v2622_v53 = vsel %vm2601_vm6, %v2580_v52, %v8853_v40  ;;  %v2623_v63 = vsel %vm2601_vm6, %v2581_v61, %v8854_v49  ;;  %v8868_v0 = vunpack.i.l.bf16 %v8867_v51  ;;  %v8869_v16 = vunpack.i.h.bf16 %v8867_v51  ;;  %v1279_v40 = vld [vmem:[#allocation2 + $0x16a] sm:$0xf] }
 0x166   : > { %9156 = vrot.lane.b32.xlu0 %v9155_v43, %s13005_s12  ;;  %v8862_v60 = vpop.permute.xlu1 %8861  ;;  %v2664_v42 = vsel %vm2643_vm7, %v2622_v53, %v8858_v46  ;;  %v2665_v14 = vsel %vm2643_vm7, %v2623_v63, %v8859_v57  ;;  %v1053_v51 = vld [vmem:[#allocation2 + $0xcd] sm:$0xff]  ;;  %v1238_v61 = vld [vmem:[#allocation2 + $0x169] sm:$0xf] }
 0x167   : > { %v8863_v62 = vunpack.i.l.bf16 %v8862_v60  ;;  %2998 = vmatmul.mubr.f32.gmra.mrb[40].mxu0 %v2664_v42  ;;  %v8864_v55 = vunpack.i.h.bf16 %v8862_v60 }
 0x168   : > { %v8877_v50 = vpop.permute.xlu0 %8876  ;;  %9151 = vrot.lane.b32.xlu1 %v9150_v44, %s13003_s29  ;;  %7465 = vmatprep.mubr.msk.f32.mxu0 %vm844_vm0, %v1301_v54 }
 0x169   : > { %v2415_v4 = vsel %vm844_vm0, %v1050_v59, %v8863_v62  ;;  %v8878_v17 = vunpack.i.l.bf16 %v8877_v50  ;;  %v2416_v10 = vsel %vm844_vm0, %v1051_v11, %v8864_v55  ;;  %v8879_v29 = vunpack.i.h.bf16 %v8877_v50  ;;  %v1304_v59 = vld [vmem:[#allocation2 + $0xeb] sm:$0xff] }
 0x16a   : > { %9166 = vrot.lane.b32.xlu0 %v9165_v56, %s12999_s11  ;;  %v8872_v13 = vpop.permute.xlu1 %8871  ;;  %v2456_v3 = vsel %vm939_vm1, %v2415_v4, %v8868_v0  ;;  %v2457_v28 = vsel %vm939_vm1, %v2416_v10, %v8869_v16 }
 0x16b   : > { %v8873_v15 = vunpack.i.l.bf16 %v8872_v13  ;;  %3003 = vmatmul.mubr.f32.gmra.mrb[42].mxu0 %v2665_v14  ;;  %v8874_v20 = vunpack.i.h.bf16 %v8872_v13 }
 0x16c   : > { %v8887_v58 = vpop.permute.xlu0 %8886  ;;  %9161 = vrot.lane.b32.xlu1 %v10850_v9, %s13001_s10  ;;  %7466 = vmatprep.mubr.msk.f32.mxu0 %vm844_vm0, %v1302_v8 }
 0x16d   : > { %v2498_v21 = vsel %vm2475_vm2, %v2456_v3, %v8873_v15  ;;  %v8888_v9 = vunpack.i.l.bf16 %v8887_v58  ;;  %v2499_v12 = vsel %vm2475_vm2, %v2457_v28, %v8874_v20  ;;  %v8889_v39 = vunpack.i.h.bf16 %v8887_v58  ;;  %v1305_v20 = vld [vmem:[#allocation2 + $0xf3] sm:$0xff] }
 0x16e   : > { %1442 = vrot.lane.b32.xlu0 %v1109_v6, %s13007_s28  ;;  %v8882_v22 = vpop.permute.xlu1 %8881  ;;  %v2540_v30 = vsel %vm2517_vm3, %v2498_v21, %v8878_v17  ;;  %v2541_v38 = vsel %vm2517_vm3, %v2499_v12, %v8879_v29 }
 0x16f   : > { %v8883_v25 = vunpack.i.l.bf16 %v8882_v22  ;;  %v8884_v31 = vunpack.i.h.bf16 %v8882_v22  ;;  %v1054_v22 = vld [vmem:[#allocation2 + $0xd5] sm:$0xff] }
 0x170   : > { %v8897_v27 = vpop.permute.xlu0 %8896  ;;  %9171 = vrot.lane.b32.xlu1 %v9170_v18, %s12997_s9 }
 0x171   : > { %v2582_v32 = vsel %vm2559_vm4, %v2540_v30, %v8883_v25  ;;  %v8898_v41 = vunpack.i.l.bf16 %v8897_v27  ;;  %v2583_v34 = vsel %vm2559_vm4, %v2541_v38, %v8884_v31  ;;  %v8899_v48 = vunpack.i.h.bf16 %v8897_v27 }
 0x172   : > { %1732 = vrot.lane.b32.xlu0 %v1153_v23, %s13003_s29  ;;  %v8892_v33 = vpop.permute.xlu1 %8891  ;;  %v2624_v43 = vsel %vm2601_vm6, %v2582_v32, %v8888_v9  ;;  %v2625_v57 = vsel %vm2601_vm6, %v2583_v34, %v8889_v39  ;;  %v1055_v32 = vld [vmem:[#allocation2 + $0xdd] sm:$0xff]  ;;  %s13058_s29 = smov 48  }
 0x173   : > { %v8893_v35 = vunpack.i.l.bf16 %v8892_v33  ;;  %v8894_v36 = vunpack.i.h.bf16 %v8892_v33  ;;  %v2417_v54 = vsel %vm844_vm0, %v1052_v26, %v8898_v41  ;;  %v2418_v62 = vsel %vm844_vm0, %v1053_v51, %v8899_v48 }
 0x174   : > { %v8907_v37 = vpop.permute.xlu0 %8906  ;;  %1606 = vrot.lane.b32.xlu1 %v1150_v19, %s13009_s0  ;;  %v1306_v19 = vld [vmem:[#allocation2 + $0xfb] sm:$0xff] }
 0x175   : > { %v2666_v46 = vsel %vm2643_vm7, %v2624_v43, %v8893_v35  ;;  %v8908_v56 = vunpack.i.l.bf16 %v8907_v37  ;;  %v2667_v42 = vsel %vm2643_vm7, %v2625_v57, %v8894_v36  ;;  %v8909_v50 = vunpack.i.h.bf16 %v8907_v37 }
 0x176   : > { %2060 = vrot.lane.b32.xlu0 %v1235_v24, %s13001_s10  ;;  %v8902_v49 = vpop.permute.xlu1 %8901  ;;  %3008 = vmatmul.mubr.f32.gmra.mrb[44].mxu0 %v2666_v46  ;;  %s13061_s10 = smov 112  }
 0x177   : > { %v8904_v52 = vunpack.i.h.bf16 %v8902_v49  ;;  %v8903_v44 = vunpack.i.l.bf16 %v8902_v49  ;;  %7467 = vmatprep.mubr.msk.f32.mxu0 %vm844_vm0, %v1303_v45 }
 0x178   : > { %v8917_v53 = vpop.permute.xlu0 %8916  ;;  %1896 = vrot.lane.b32.xlu1 %v1194_v47, %s13005_s12  ;;  %s13057_s12 = smov 64  }
 0x179   : > { %v2458_v60 = vsel %vm939_vm1, %v2417_v54, %v8903_v44  ;;  %v2459_v0 = vsel %vm939_vm1, %v2418_v62, %v8904_v52  ;;  %v8918_v8 = vunpack.i.l.bf16 %v8917_v53  ;;  %v8919_v14 = vunpack.i.h.bf16 %v8917_v53 }
 0x17a   : > { %2350 = vrot.lane.b32.xlu0 %v1279_v40, %s12997_s9  ;;  %v8912_v63 = vpop.permute.xlu1 %8911  ;;  %3013 = vmatmul.mubr.f32.gmra.mrb[46].mxu0 %v2667_v42  ;;  %v2500_v7 = vsel %vm2475_vm2, %v2458_v60, %v8908_v56  ;;  %v2501_v13 = vsel %vm2475_vm2, %v2459_v0, %v8909_v50  ;;  %v1056_v50 = vld [vmem:[#allocation2 + $0xe5] sm:$0xff]  ;;  %s13068_s9 = sld [smem:[#allocation28_spill]] }
 0x17b   : > { %v8914_v55 = vunpack.i.h.bf16 %v8912_v63  ;;  %v8913_v4 = vunpack.i.l.bf16 %v8912_v63  ;;  %7468 = vmatprep.mubr.msk.f32.mxu0 %vm844_vm0, %v1304_v59 }
 0x17c   : > { %v8927_v5 = vpop.permute.xlu0 %8926  ;;  %2186 = vrot.lane.b32.xlu1 %v1238_v61, %s12999_s11  ;;  %v1307_v61 = vld [vmem:[#allocation2 + $0x103] sm:$0xff]  ;;  %s13056_s11 = sld [smem:[#allocation23_spill]] }
 0x17d   : > { %v2542_v11 = vsel %vm2517_vm3, %v2500_v7, %v8913_v4  ;;  %v8928_v15 = vunpack.i.l.bf16 %v8927_v5  ;;  %v2543_v58 = vsel %vm2517_vm3, %v2501_v13, %v8914_v55  ;;  %v8929_v21 = vunpack.i.h.bf16 %v8927_v5  ;;  %v1057_v5 = vld [vmem:[#allocation2 + $0xed] sm:$0xff] }
 0x17e   : > { %v8922_v6 = vpop.permute.xlu1 %8921  ;;  %v2584_v18 = vsel %vm2559_vm4, %v2542_v11, %v8918_v8  ;;  %v2585_v27 = vsel %vm2559_vm4, %v2543_v58, %v8919_v14 }
 0x17f   : > { %v8924_v16 = vunpack.i.h.bf16 %v8922_v6  ;;  %v8923_v3 = vunpack.i.l.bf16 %v8922_v6 }
 0x180   : > { %v8937_v17 = vpop.permute.xlu0 %8936 }
 0x181   : > { %v2626_v10 = vsel %vm2601_vm6, %v2584_v18, %v8923_v3  ;;  %v2627_v30 = vsel %vm2601_vm6, %v2585_v27, %v8924_v16  ;;  %v8938_v9 = vunpack.i.l.bf16 %v8937_v17  ;;  %v8939_v38 = vunpack.i.h.bf16 %v8937_v17 }
 0x182   : > { %v8932_v23 = vpop.permute.xlu1 %8931  ;;  %v2668_v25 = vsel %vm2643_vm7, %v2626_v10, %v8928_v15  ;;  %v2669_v24 = vsel %vm2643_vm7, %v2627_v30, %v8929_v21  ;;  %v1308_v15 = vld [vmem:[#allocation2 + $0x10b] sm:$0xff] }
 0x183   : > { %v8933_v28 = vunpack.i.l.bf16 %v8932_v23  ;;  %3018 = vmatmul.mubr.f32.gmra.mrb[48].mxu0 %v2668_v25  ;;  %v8934_v12 = vunpack.i.h.bf16 %v8932_v23 }
 0x184   : > { %v8947_v29 = vpop.permute.xlu0 %8946  ;;  %7469 = vmatprep.mubr.msk.f32.mxu0 %vm844_vm0, %v1305_v20 }
 0x185   : > { %v2419_v31 = vsel %vm844_vm0, %v1054_v22, %v8933_v28  ;;  %v8948_v41 = vunpack.i.l.bf16 %v8947_v29  ;;  %v2420_v43 = vsel %vm844_vm0, %v1055_v32, %v8934_v12  ;;  %v8949_v48 = vunpack.i.h.bf16 %v8947_v29 }
 0x186   : > { %v8942_v33 = vpop.permute.xlu1 %8941  ;;  %v2460_v39 = vsel %vm939_vm1, %v2419_v31, %v8938_v9  ;;  %v2461_v34 = vsel %vm939_vm1, %v2420_v43, %v8939_v38  ;;  %v1058_v38 = vld [vmem:[#allocation2 + $0xf5] sm:$0xff] }
 0x187   : > { %v8943_v35 = vunpack.i.l.bf16 %v8942_v33  ;;  %3023 = vmatmul.mubr.f32.gmra.mrb[50].mxu0 %v2669_v24  ;;  %v8944_v45 = vunpack.i.h.bf16 %v8942_v33 }
 0x188   : > { %v8957_v37 = vpop.permute.xlu0 %8956  ;;  %7470 = vmatprep.mubr.msk.f32.mxu0 %vm844_vm0, %v1306_v19 }
 0x189   : > { %v2502_v36 = vsel %vm2475_vm2, %v2460_v39, %v8943_v35  ;;  %v8958_v40 = vunpack.i.l.bf16 %v8957_v37  ;;  %v2503_v51 = vsel %vm2475_vm2, %v2461_v34, %v8944_v45  ;;  %v8959_v59 = vunpack.i.h.bf16 %v8957_v37  ;;  %v1309_v35 = vld [vmem:[#allocation2 + $0x113] sm:$0xff] }
 0x18a   : > { %v8952_v26 = vpop.permute.xlu1 %8951  ;;  %v2544_v49 = vsel %vm2517_vm3, %v2502_v36, %v8948_v41  ;;  %v2545_v57 = vsel %vm2517_vm3, %v2503_v51, %v8949_v48  ;;  %v1310_v48 = vld [vmem:[#allocation2 + $0x11b] sm:$0xff] }
 0x18b   : > { %v8953_v46 = vunpack.i.l.bf16 %v8952_v26  ;;  %v8954_v52 = vunpack.i.h.bf16 %v8952_v26 }
 0x18c   : > { %v8967_v47 = vpop.permute.xlu0 %8966 }
 0x18d   : > { %v2586_v44 = vsel %vm2559_vm4, %v2544_v49, %v8953_v46  ;;  %v8968_v60 = vunpack.i.l.bf16 %v8967_v47  ;;  %v2587_v0 = vsel %vm2559_vm4, %v2545_v57, %v8954_v52  ;;  %v8969_v55 = vunpack.i.h.bf16 %v8967_v47  ;;  %v1059_v49 = vld [vmem:[#allocation2 + $0xfd] sm:$0xff] }
 0x18e   : > { %v8962_v53 = vpop.permute.xlu1 %8961  ;;  %v2628_v42 = vsel %vm2601_vm6, %v2586_v44, %v8958_v40  ;;  %v2629_v6 = vsel %vm2601_vm6, %v2587_v0, %v8959_v59 }
 0x18f   : > { %v8963_v54 = vunpack.i.l.bf16 %v8962_v53  ;;  %v8964_v62 = vunpack.i.h.bf16 %v8962_v53  ;;  %v2421_v13 = vsel %vm844_vm0, %v1056_v50, %v8968_v60  ;;  %v2422_v3 = vsel %vm844_vm0, %v1057_v5, %v8969_v55 }
 0x190   : > { %v8977_v56 = vpop.permute.xlu0 %8976 }
 0x191   : > { %v2670_v63 = vsel %vm2643_vm7, %v2628_v42, %v8963_v54  ;;  %v8978_v14 = vunpack.i.l.bf16 %v8977_v56  ;;  %v2671_v16 = vsel %vm2643_vm7, %v2629_v6, %v8964_v62  ;;  %v8979_v17 = vunpack.i.h.bf16 %v8977_v56 }
 0x192   : > { %v8972_v4 = vpop.permute.xlu1 %8971  ;;  %3028 = vmatmul.mubr.f32.gmra.mrb[52].mxu0 %v2670_v63 }
 0x193   : > { %v8974_v7 = vunpack.i.h.bf16 %v8972_v4  ;;  %v8973_v8 = vunpack.i.l.bf16 %v8972_v4  ;;  %7471 = vmatprep.mubr.msk.f32.mxu0 %vm844_vm0, %v1307_v61 }
 0x194   : > { %v8987_v11 = vpop.permute.xlu0 %8986 }
 0x195   : > { %v2462_v58 = vsel %vm939_vm1, %v2421_v13, %v8973_v8  ;;  %v2463_v10 = vsel %vm939_vm1, %v2422_v3, %v8974_v7  ;;  %v8988_v25 = vunpack.i.l.bf16 %v8987_v11  ;;  %v8989_v29 = vunpack.i.h.bf16 %v8987_v11 }
 0x196   : > { %v8982_v18 = vpop.permute.xlu1 %8981  ;;  %3033 = vmatmul.mubr.f32.gmra.mrb[54].mxu0 %v2671_v16  ;;  %v2504_v23 = vsel %vm2475_vm2, %v2462_v58, %v8978_v14  ;;  %v2505_v28 = vsel %vm2475_vm2, %v2463_v10, %v8979_v17  ;;  %v1311_v16 = vld [vmem:[#allocation2 + $0x123] sm:$0xff] }
 0x197   : > { %v8984_v20 = vunpack.i.h.bf16 %v8982_v18  ;;  %v8983_v21 = vunpack.i.l.bf16 %v8982_v18  ;;  %7472 = vmatprep.mubr.msk.f32.mxu0 %vm844_vm0, %v1308_v15  ;;  %v1060_v17 = vld [vmem:[#allocation2 + $0x105] sm:$0xff] }
 0x198   : > { %v8997_v22 = vpop.permute.xlu0 %8996 }
 0x199   : > { %v2546_v27 = vsel %vm2517_vm3, %v2504_v23, %v8983_v21  ;;  %v8998_v9 = vunpack.i.l.bf16 %v8997_v22  ;;  %v2547_v12 = vsel %vm2517_vm3, %v2505_v28, %v8984_v20  ;;  %v8999_v37 = vunpack.i.h.bf16 %v8997_v22  ;;  %v10967_v21 = vld [vmem:[%s13053_s6] ss:$0 sm:$0xff]  ;;  %s13069_s6 = smov %s13068_s9 }
 0x19a   : > { %v8992_v30 = vpop.permute.xlu1 %8991  ;;  %v2588_v33 = vsel %vm2559_vm4, %v2546_v27, %v8988_v25  ;;  %v2589_v43 = vsel %vm2559_vm4, %v2547_v12, %v8989_v29  ;;  %v1061_v25 = vld [vmem:[#allocation2 + $0x10d] sm:$0xff] }
 0x19b   : > { %v8994_v31 = vunpack.i.h.bf16 %v8992_v30  ;;  %v8993_v19 = vunpack.i.l.bf16 %v8992_v30 }
 0x19c   : > { %v9007_v32 = vpop.permute.xlu0 %9006 }
 0x19d   : > { %v2630_v24 = vsel %vm2601_vm6, %v2588_v33, %v8993_v19  ;;  %v2631_v26 = vsel %vm2601_vm6, %v2589_v43, %v8994_v31  ;;  %v9008_v46 = vunpack.i.l.bf16 %v9007_v32  ;;  %v9009_v53 = vunpack.i.h.bf16 %v9007_v32  ;;  %v1312_v19 = vld [vmem:[#allocation2 + $0x12b] sm:$0xff] }
 0x19e   : > { %v9002_v39 = vpop.permute.xlu1 %9001  ;;  %v2672_v41 = vsel %vm2643_vm7, %v2630_v24, %v8998_v9  ;;  %v2673_v51 = vsel %vm2643_vm7, %v2631_v26, %v8999_v37 }
 0x19f   : > { %v9003_v45 = vunpack.i.l.bf16 %v9002_v39  ;;  %3038 = vmatmul.mubr.f32.gmra.mrb[56].mxu0 %v2672_v41  ;;  %v9004_v47 = vunpack.i.h.bf16 %v9002_v39 }
 0x1a0   : > { %v9017_v36 = vpop.permute.xlu0 %9016  ;;  %7473 = vmatprep.mubr.msk.f32.mxu0 %vm844_vm0, %v1309_v35 }
 0x1a1   : > { %v2423_v34 = vsel %vm844_vm0, %v1058_v38, %v9003_v45  ;;  %v9018_v56 = vunpack.i.l.bf16 %v9017_v36  ;;  %v2424_v57 = vsel %vm844_vm0, %v1059_v49, %v9004_v47  ;;  %v9019_v63 = vunpack.i.h.bf16 %v9017_v36 }
 0x1a2   : > { %v9012_v40 = vpop.permute.xlu1 %9011  ;;  %v2464_v54 = vsel %vm939_vm1, %v2423_v34, %v9008_v46  ;;  %v2465_v50 = vsel %vm939_vm1, %v2424_v57, %v9009_v53 }
 0x1a3   : > { %v9013_v52 = vunpack.i.l.bf16 %v9012_v40  ;;  %3043 = vmatmul.mubr.f32.gmra.mrb[58].mxu0 %v2673_v51  ;;  %v9014_v59 = vunpack.i.h.bf16 %v9012_v40 }
 0x1a4   : > { %v9027_v44 = vpop.permute.xlu0 %9026  ;;  %7474 = vmatprep.mubr.msk.f32.mxu0 %vm844_vm0, %v1310_v48 }
 0x1a5   : > { %v2506_v60 = vsel %vm2475_vm2, %v2464_v54, %v9013_v52  ;;  %v9028_v55 = vunpack.i.l.bf16 %v9027_v44  ;;  %v2507_v4 = vsel %vm2475_vm2, %v2465_v50, %v9014_v59  ;;  %v9029_v6 = vunpack.i.h.bf16 %v9027_v44 }
 0x1a6   : > { %v9022_v42 = vpop.permute.xlu1 %9021  ;;  %v2548_v0 = vsel %vm2517_vm3, %v2506_v60, %v9018_v56  ;;  %v2549_v14 = vsel %vm2517_vm3, %v2507_v4, %v9019_v63  ;;  %v1062_v63 = vld [vmem:[#allocation2 + $0x115] sm:$0xff] }
 0x1a7   : > { %v9023_v61 = vunpack.i.l.bf16 %v9022_v42  ;;  %v9024_v5 = vunpack.i.h.bf16 %v9022_v42 }
 0x1a8   : > { %v9037_v62 = vpop.permute.xlu0 %9036 }
 0x1a9   : > { %v2590_v7 = vsel %vm2559_vm4, %v2548_v0, %v9023_v61  ;;  %v9038_v15 = vunpack.i.l.bf16 %v9037_v62  ;;  %v2591_v10 = vsel %vm2559_vm4, %v2549_v14, %v9024_v5  ;;  %v9039_v20 = vunpack.i.h.bf16 %v9037_v62  ;;  %v1313_v62 = vld [vmem:[#allocation2 + $0x133] sm:$0xff]  ;;  %v1063_v14 = vld [vmem:[#allocation2 + $0x11d] sm:$0xff] }
 0x1aa   : > { %v9032_v8 = vpop.permute.xlu1 %9031  ;;  %v2632_v58 = vsel %vm2601_vm6, %v2590_v7, %v9028_v55  ;;  %v2633_v31 = vsel %vm2601_vm6, %v2591_v10, %v9029_v6 }
 0x1ab   : > { %v9033_v11 = vunpack.i.l.bf16 %v9032_v8  ;;  %v9034_v3 = vunpack.i.h.bf16 %v9032_v8  ;;  %v2425_v9 = vsel %vm844_vm0, %v1060_v17, %v9038_v15  ;;  %v2426_v35 = vsel %vm844_vm0, %v1061_v25, %v9039_v20 }
 0x1ac   : > { %v9047_v13 = vpop.permute.xlu0 %9046 }
 0x1ad   : > { %v2674_v18 = vsel %vm2643_vm7, %v2632_v58, %v9033_v11  ;;  %v9048_v12 = vunpack.i.l.bf16 %v9047_v13  ;;  %v2675_v24 = vsel %vm2643_vm7, %v2633_v31, %v9034_v3  ;;  %v9049_v37 = vunpack.i.h.bf16 %v9047_v13  ;;  %v1314_v58 = vld [vmem:[#allocation2 + $0x13b] sm:$0xff] }
 0x1ae   : > { %v2899_v22 = vpop.f32.mrb[0].mxu0  ;;  %v9042_v23 = vpop.permute.xlu1 %9041  ;;  %3048 = vmatmul.mubr.f32.gmra.mrb[60].mxu0 %v2674_v18 }
 0x1af   : > { %v9044_v27 = vunpack.i.h.bf16 %v9042_v23  ;;  %v9043_v28 = vunpack.i.l.bf16 %v9042_v23  ;;  %v2901_v29 = vpop.f32.mrb[1].mxu0  ;;  %7475 = vmatprep.mubr.msk.f32.mxu0 %vm844_vm0, %v1311_v16  ;;  %v2900_v32 = vadd.f32 %v10967_v21, %v2899_v22 }
 0x1b0   : > { %v9057_v30 = vpop.permute.xlu0 %9056 }
 0x1b1   : > { %v2466_v33 = vsel %vm939_vm1, %v2425_v9, %v9043_v28  ;;  %v2467_v41 = vsel %vm939_vm1, %v2426_v35, %v9044_v27  ;;  %v9058_v34 = vunpack.i.l.bf16 %v9057_v30  ;;  %v3103_v48 = vmax.f32 %v2900_v32, 0.0 }
 0x1b2   : > { %v2904_v38 = vpop.f32.mrb[2].mxu0  ;;  %v9052_v39 = vpop.permute.xlu1 %9051  ;;  %3053 = vmatmul.mubr.f32.gmra.mrb[62].mxu0 %v2675_v24  ;;  %v2508_v47 = vsel %vm2475_vm2, %v2466_v33, %v9048_v12  ;;  %v2509_v51 = vsel %vm2475_vm2, %v2467_v41, %v9049_v37  ;;  %v9059_v52 = vunpack.i.h.bf16 %v9057_v30 }
 0x1b3   : > { %v2905_v43 = vadd.f32 %v10967_v21, %v2904_v38  ;;  %v9054_v45 = vunpack.i.h.bf16 %v9052_v39  ;;  %v9053_v36 = vunpack.i.l.bf16 %v9052_v39  ;;  %v2906_v26 = vpop.f32.mrb[3].mxu0  ;;  %7476 = vmatprep.mubr.msk.f32.mxu0 %vm844_vm0, %v1312_v19 }
 0x1b4   : > { %v9067_v46 = vpop.permute.xlu0 %9066 }
 0x1b5   : > { %v3104_v49 = vmax.f32 %v2905_v43, 0.0  ;;  %v2550_v40 = vsel %vm2517_vm3, %v2508_v47, %v9053_v36  ;;  %v9068_v53 = vunpack.i.l.bf16 %v9067_v46  ;;  %v2551_v54 = vsel %vm2517_vm3, %v2509_v51, %v9054_v45  ;;  %v1315_v51 = vld [vmem:[#allocation2 + $0x143] sm:$0xff] }
 0x1b6   : > { %v9062_v44 = vpop.permute.xlu1 %9061  ;;  %v2592_v42 = vsel %vm2559_vm4, %v2550_v40, %v9058_v34  ;;  %v9069_v50 = vunpack.i.h.bf16 %v9067_v46  ;;  %v2593_v4 = vsel %vm2559_vm4, %v2551_v54, %v9059_v52 }
 0x1b7   : > { %v9064_v56 = vunpack.i.h.bf16 %v9062_v44  ;;  %v9063_v57 = vunpack.i.l.bf16 %v9062_v44  ;;  %v10983_v60 = vpack.c.bf16 %v3104_v49, %v3103_v48  ;;  %v1064_v44 = vld [vmem:[#allocation2 + $0x125] sm:$0xff] }
 0x1b8   : > { %v9077_v59 = vpop.permute.xlu0 %9076 }
 0x1b9   : > { %v2634_v61 = vsel %vm2601_vm6, %v2592_v42, %v9063_v57  ;;  %v2635_v8 = vsel %vm2601_vm6, %v2593_v4, %v9064_v56  ;;  %v9078_v13 = vunpack.i.l.bf16 %v9077_v59  ;;  %v9079_v18 = vunpack.i.h.bf16 %v9077_v59  ;;  %v1065_v42 = vld [vmem:[#allocation2 + $0x12d] sm:$0xff] }
 0x1ba   : > { %v9072_v0 = vpop.permute.xlu1 %9071  ;;  %v2676_v55 = vsel %vm2643_vm7, %v2634_v61, %v9068_v53  ;;  %v2677_v17 = vsel %vm2643_vm7, %v2635_v8, %v9069_v50 }
 0x1bb   : > { %v9073_v5 = vunpack.i.l.bf16 %v9072_v0  ;;  %3058 = vmatmul.mubr.f32.gmra.mrb[64].mxu0 %v2676_v55  ;;  %v9074_v11 = vunpack.i.h.bf16 %v9072_v0 }
 0x1bc   : > { %v9087_v7 = vpop.permute.xlu0 %9086  ;;  %7477 = vmatprep.mubr.msk.f32.mxu0 %vm844_vm0, %v1313_v62 }
 0x1bd   : > { %v2427_v6 = vsel %vm844_vm0, %v1062_v63, %v9073_v5  ;;  %v2909_v15 = vpop.f32.mrb[4].mxu0  ;;  %v2428_v22 = vsel %vm844_vm0, %v1063_v14, %v9074_v11  ;;  %v9088_v27 = vunpack.i.l.bf16 %v9087_v7  ;;  %v9089_v32 = vunpack.i.h.bf16 %v9087_v7  ;;  %v1316_v5 = vld [vmem:[#allocation2 + $0x14b] sm:$0xff] }
 0x1be   : > { %v9082_v16 = vpop.permute.xlu1 %9081  ;;  %v2911_v3 = vpop.f32.mrb[5].mxu0  ;;  %v2468_v23 = vsel %vm939_vm1, %v2427_v6, %v9078_v13  ;;  %v2910_v25 = vadd.f32 %v10967_v21, %v2909_v15  ;;  %v2469_v19 = vsel %vm939_vm1, %v2428_v22, %v9079_v18 }
 0x1bf   : > { %v9083_v10 = vunpack.i.l.bf16 %v9082_v16  ;;  %3063 = vmatmul.mubr.f32.gmra.mrb[66].mxu0 %v2677_v17  ;;  %v9084_v28 = vunpack.i.h.bf16 %v9082_v16 }
 0x1c0   : > { %v9097_v20 = vpop.permute.xlu0 %9096  ;;  %7478 = vmatprep.mubr.msk.f32.mxu0 %vm844_vm0, %v1314_v58  ;;  %v3105_v35 = vmax.f32 %v2910_v25, 0.0 }
 0x1c1   : > { %v2510_v29 = vsel %vm2475_vm2, %v2468_v23, %v9083_v10  ;;  %v2914_v30 = vpop.f32.mrb[6].mxu0  ;;  %v9098_v39 = vunpack.i.l.bf16 %v9097_v20  ;;  %v2511_v41 = vsel %vm2475_vm2, %v2469_v19, %v9084_v28  ;;  %v9099_v48 = vunpack.i.h.bf16 %v9097_v20 }
 0x1c2   : > { %v2915_v9 = vadd.f32 %v10967_v21, %v2914_v30  ;;  %v9092_v12 = vpop.permute.xlu1 %9091  ;;  %v2916_v31 = vpop.f32.mrb[7].mxu0  ;;  %v2552_v37 = vsel %vm2517_vm3, %v2510_v29, %v9088_v27  ;;  %v2553_v34 = vsel %vm2517_vm3, %v2511_v41, %v9089_v32 }
 0x1c3   : > { %v9093_v33 = vunpack.i.l.bf16 %v9092_v12  ;;  %v9094_v43 = vunpack.i.h.bf16 %v9092_v12 }
 0x1c4   : > { %v9107_v24 = vpop.permute.xlu0 %9106  ;;  %v3106_v38 = vmax.f32 %v2915_v9, 0.0 }
 0x1c5   : > { %v2594_v45 = vsel %vm2559_vm4, %v2552_v37, %v9093_v33  ;;  %v9108_v49 = vunpack.i.l.bf16 %v9107_v24  ;;  %v2595_v54 = vsel %vm2559_vm4, %v2553_v34, %v9094_v43  ;;  %v9109_v56 = vunpack.i.h.bf16 %v9107_v24  ;;  %v1317_v37 = vld [vmem:[#allocation2 + $0x153] sm:$0xff] }
 0x1c6   : > { %v11003_v36 = vpack.c.bf16 %v3106_v38, %v3105_v35  ;;  %v9102_v26 = vpop.permute.xlu1 %9101  ;;  %v2636_v40 = vsel %vm2601_vm6, %v2594_v45, %v9098_v39  ;;  %v2637_v4 = vsel %vm2601_vm6, %v2595_v54, %v9099_v48  ;;  %v1066_v39 = vld [vmem:[#allocation2 + $0x135] sm:$0xff] }
 0x1c7   : > { %v9103_v46 = vunpack.i.l.bf16 %v9102_v26  ;;  %v9104_v52 = vunpack.i.h.bf16 %v9102_v26  ;;  %v2429_v0 = vsel %vm844_vm0, %v1064_v44, %v9108_v49  ;;  %v2430_v13 = vsel %vm844_vm0, %v1065_v42, %v9109_v56  ;;  %v1067_v49 = vld [vmem:[#allocation2 + $0x13d] sm:$0xff] }
 0x1c8   : > { %v9117_v47 = vpop.permute.xlu0 %9116 }
 0x1c9   : > { %v2678_v53 = vsel %vm2643_vm7, %v2636_v40, %v9103_v46  ;;  %v9118_v55 = vunpack.i.l.bf16 %v9117_v47  ;;  %v2679_v11 = vsel %vm2643_vm7, %v2637_v4, %v9104_v52  ;;  %v9119_v14 = vunpack.i.h.bf16 %v9117_v47  ;;  %v1318_v52 = vld [vmem:[#allocation2 + $0x15b] sm:$0xff] }
 0x1ca   : > { %v9112_v57 = vpop.permute.xlu1 %9111  ;;  %v2919_v59 = vpop.f32.mrb[8].mxu0  ;;  %3068 = vmatmul.mubr.f32.gmra.mrb[68].mxu0 %v2678_v53 }
 0x1cb   : > { %v9114_v61 = vunpack.i.h.bf16 %v9112_v57  ;;  %v9113_v62 = vunpack.i.l.bf16 %v9112_v57  ;;  %v2921_v50 = vpop.f32.mrb[9].mxu0  ;;  %7479 = vmatprep.mubr.msk.f32.mxu0 %vm844_vm0, %v1315_v51  ;;  %v2920_v8 = vadd.f32 %v10967_v21, %v2919_v59 }
 0x1cc   : > { %v9127_v63 = vpop.permute.xlu0 %9126 }
 0x1cd   : > { %v2470_v7 = vsel %vm939_vm1, %v2429_v0, %v9113_v62  ;;  %v2471_v58 = vsel %vm939_vm1, %v2430_v13, %v9114_v61  ;;  %v9128_v22 = vunpack.i.l.bf16 %v9127_v63  ;;  %v3107_v23 = vmax.f32 %v2920_v8, 0.0 }
 0x1ce   : > { %v9122_v6 = vpop.permute.xlu1 %9121  ;;  %v2924_v15 = vpop.f32.mrb[10].mxu0  ;;  %3073 = vmatmul.mubr.f32.gmra.mrb[70].mxu0 %v2679_v11  ;;  %v2512_v20 = vsel %vm2475_vm2, %v2470_v7, %v9118_v55  ;;  %v2513_v28 = vsel %vm2475_vm2, %v2471_v58, %v9119_v14  ;;  %v9129_v29 = vunpack.i.h.bf16 %v9127_v63 }
 0x1cf   : > { %v9124_v16 = vunpack.i.h.bf16 %v9122_v6  ;;  %v9123_v3 = vunpack.i.l.bf16 %v9122_v6  ;;  %v2925_v17 = vadd.f32 %v10967_v21, %v2924_v15  ;;  %v2926_v18 = vpop.f32.mrb[11].mxu0  ;;  %7480 = vmatprep.mubr.msk.f32.mxu0 %vm844_vm0, %v1316_v5 }
 0x1d0   : > { %v9137_v10 = vpop.permute.xlu0 %9136 }
 0x1d1   : > { %v2554_v25 = vsel %vm2517_vm3, %v2512_v20, %v9123_v3  ;;  %v3108_v27 = vmax.f32 %v2925_v17, 0.0  ;;  %v9138_v9 = vunpack.i.l.bf16 %v9137_v10  ;;  %v2555_v12 = vsel %vm2517_vm3, %v2513_v28, %v9124_v16 }
 0x1d2   : > { %v9132_v30 = vpop.permute.xlu1 %9131  ;;  %v2596_v24 = vsel %vm2559_vm4, %v2554_v25, %v9128_v22  ;;  %v9139_v38 = vunpack.i.h.bf16 %v9137_v10  ;;  %v2597_v45 = vsel %vm2559_vm4, %v2555_v12, %v9129_v29 }
 0x1d3   : > { %v11023_v31 = vpack.c.bf16 %v3108_v27, %v3107_v23  ;;  %v9134_v19 = vunpack.i.h.bf16 %v9132_v30  ;;  %v9133_v32 = vunpack.i.l.bf16 %v9132_v30  ;;  %v1068_v23 = vld [vmem:[#allocation2 + $0x145] sm:$0xf] }
 0x1d4   : > { %v9147_v33 = vpop.permute.xlu0 %9146  ;;  %v1319_v30 = vld [vmem:[#allocation2 + $0x163] sm:$0xff] }
 0x1d5   : > { %v2638_v35 = vsel %vm2601_vm6, %v2596_v24, %v9133_v32  ;;  %v2639_v47 = vsel %vm2601_vm6, %v2597_v45, %v9134_v19  ;;  %v9148_v48 = vunpack.i.l.bf16 %v9147_v33  ;;  %v9149_v56 = vunpack.i.h.bf16 %v9147_v33 }
 0x1d6   : > { %v9142_v41 = vpop.permute.xlu1 %9141  ;;  %v2680_v43 = vsel %vm2643_vm7, %v2638_v35, %v9138_v9  ;;  %v2681_v54 = vsel %vm2643_vm7, %v2639_v47, %v9139_v38 }
 0x1d7   : > { %v9143_v26 = vunpack.i.l.bf16 %v9142_v41  ;;  %3078 = vmatmul.mubr.f32.gmra.mrb[72].mxu0 %v2680_v43  ;;  %v9144_v34 = vunpack.i.h.bf16 %v9142_v41  ;;  %v1320_v41 = vld [vmem:[#allocation2 + $0x16b] sm:$0xf] }
 0x1d8   : > { %v9157_v46 = vpop.permute.xlu0 %9156  ;;  %7481 = vmatprep.mubr.msk.f32.mxu0 %vm844_vm0, %v1317_v37 }
 0x1d9   : > { %v2431_v40 = vsel %vm844_vm0, %v1066_v39, %v9143_v26  ;;  %v2929_v51 = vpop.f32.mrb[12].mxu0  ;;  %v2432_v42 = vsel %vm844_vm0, %v1067_v49, %v9144_v34  ;;  %v9158_v50 = vunpack.i.l.bf16 %v9157_v46  ;;  %v9159_v11 = vunpack.i.h.bf16 %v9157_v46 }
 0x1da   : > { %v9152_v44 = vpop.permute.xlu1 %9151  ;;  %v2931_v53 = vpop.f32.mrb[13].mxu0  ;;  %v2472_v61 = vsel %vm939_vm1, %v2431_v40, %v9148_v48  ;;  %v2930_v62 = vadd.f32 %v10967_v21, %v2929_v51  ;;  %v2473_v8 = vsel %vm939_vm1, %v2432_v42, %v9149_v56 }
 0x1db   : > { %v9153_v57 = vunpack.i.l.bf16 %v9152_v44  ;;  %3083 = vmatmul.mubr.f32.gmra.mrb[74].mxu0 %v2681_v54  ;;  %v9154_v63 = vunpack.i.h.bf16 %v9152_v44 }
 0x1dc   : > { %v9167_v59 = vpop.permute.xlu0 %9166  ;;  %7482 = vmatprep.mubr.msk.f32.mxu0 %vm844_vm0, %v1318_v52  ;;  %v3109_v6 = vmax.f32 %v2930_v62, 0.0 }
 0x1dd   : > { %v2514_v0 = vsel %vm2475_vm2, %v2472_v61, %v9153_v57  ;;  %v2934_v55 = vpop.f32.mrb[14].mxu0  ;;  %v9168_v16 = vunpack.i.l.bf16 %v9167_v59  ;;  %v2515_v3 = vsel %vm2475_vm2, %v2473_v8, %v9154_v63  ;;  %v9169_v28 = vunpack.i.h.bf16 %v9167_v59 }
 0x1de   : > { %v2935_v4 = vadd.f32 %v10967_v21, %v2934_v55  ;;  %v9162_v5 = vpop.permute.xlu1 %9161  ;;  %v2936_v7 = vpop.f32.mrb[15].mxu0  ;;  %v2556_v15 = vsel %vm2517_vm3, %v2514_v0, %v9158_v50  ;;  %v2557_v27 = vsel %vm2517_vm3, %v2515_v3, %v9159_v11 }
 0x1df   : > { %v9163_v13 = vunpack.i.l.bf16 %v9162_v5  ;;  %v9164_v17 = vunpack.i.h.bf16 %v9162_v5 }
 0x1e0   : > { %v1443_v14 = vpop.permute.xlu0 %1442  ;;  %v3110_v58 = vmax.f32 %v2935_v4, 0.0 }
 0x1e1   : > { %v2598_v18 = vsel %vm2559_vm4, %v2556_v15, %v9163_v13  ;;  %v2599_v19 = vsel %vm2559_vm4, %v2557_v27, %v9164_v17  ;;  %v2433_v32 = vsel %vm844_vm0, %v1068_v23, %v1443_v14 }
 0x1e2   : > { %v11043_v10 = vpack.c.bf16 %v3110_v58, %v3109_v6  ;;  %v9172_v20 = vpop.permute.xlu1 %9171  ;;  %v2640_v29 = vsel %vm2601_vm6, %v2598_v18, %v9168_v16  ;;  %v2641_v39 = vsel %vm2601_vm6, %v2599_v19, %v9169_v28  ;;  %v3145_v18 = vld [vmem:[%s13054_s8 + $0x8] sm:$0xff]  ;;  %s13060_s8 = smov 96  }
 0x1e3   : > { %v9173_v22 = vunpack.i.l.bf16 %v9172_v20  ;;  %v9174_v9 = vunpack.i.h.bf16 %v9172_v20  ;;  %3291 = vmatprep.mubr.f32.mxu1 %v3145_v18 }
 0x1e4   : > { %v1733_v25 = vpop.permute.xlu0 %1732 }
 0x1e5   : > { %v2682_v12 = vsel %vm2643_vm7, %v2640_v29, %v9173_v22  ;;  %v2683_v45 = vsel %vm2643_vm7, %v2641_v39, %v9174_v9 }
 0x1e6   : > { %v1607_v33 = vpop.permute.xlu1 %1606  ;;  %v2939_v24 = vpop.f32.mrb[16].mxu0  ;;  %3088 = vmatmul.mubr.f32.gmra.mrb[76].mxu0 %v2682_v12 }
 0x1e7   : > { %v2474_v35 = vsel %vm939_vm1, %v2433_v32, %v1607_v33  ;;  %v2941_v37 = vpop.f32.mrb[17].mxu0  ;;  %7483 = vmatprep.mubr.msk.f32.mxu0 %vm844_vm0, %v1319_v30  ;;  %v2940_v43 = vadd.f32 %v10967_v21, %v2939_v24 }
 0x1e8   : > { %v2061_v38 = vpop.permute.xlu0 %2060  ;;  %v2516_v26 = vsel %vm2475_vm2, %v2474_v35, %v1733_v25 }
 0x1e9   : > { %v3111_v40 = vmax.f32 %v2940_v43, 0.0 }
 0x1ea   : > { %v1897_v46 = vpop.permute.xlu1 %1896  ;;  %v2944_v47 = vpop.f32.mrb[18].mxu0  ;;  %3093 = vmatmul.mubr.f32.gmra.mrb[78].mxu0 %v2683_v45 }
 0x1eb   : > { %v2558_v34 = vsel %vm2517_vm3, %v2516_v26, %v1897_v46  ;;  %v2945_v48 = vadd.f32 %v10967_v21, %v2944_v47  ;;  %v2946_v49 = vpop.f32.mrb[19].mxu0  ;;  %7484 = vmatprep.mubr.msk.f32.mxu0 %vm844_vm0, %v1320_v41 }
 0x1ec   : > { %v2351_v52 = vpop.permute.xlu0 %2350  ;;  %v2600_v44 = vsel %vm2559_vm4, %v2558_v34, %v2061_v38 }
 0x1ed   : > { %v3112_v51 = vmax.f32 %v2945_v48, 0.0 }
 0x1ee   : > { %v2187_v53 = vpop.permute.xlu1 %2186 }
 0x1ef   : > { %v11060_v54 = vpack.c.bf16 %v3112_v51, %v3111_v40  ;;  %v2642_v56 = vsel %vm2601_vm6, %v2600_v44, %v2187_v53 }
 0x1f0   : > { %v2684_v57 = vsel %vm2643_vm7, %v2642_v56, %v2351_v52 }
 0x1f1   : > { %3098 = vmatmul.mubr.f32.gmra.mrb[80].mxu0 %v2684_v57 }
 0x1f5   : > { %v2949_v59 = vpop.f32.mrb[20].mxu0 }
 0x1f6   : > { %v2951_v42 = vpop.f32.mrb[21].mxu0  ;;  %v2950_v61 = vadd.f32 %v10967_v21, %v2949_v59 }
 0x1f8   : > { %v3113_v0 = vmax.f32 %v2950_v61, 0.0 }
 0x1f9   : > { %v2954_v62 = vpop.f32.mrb[22].mxu0 }
 0x1fa   : > { %v2955_v50 = vadd.f32 %v10967_v21, %v2954_v62  ;;  %v2956_v63 = vpop.f32.mrb[23].mxu0 }
 0x1fc   : > { %v3114_v55 = vmax.f32 %v2955_v50, 0.0 }
 0x1fe   : > { %v11066_v4 = vpack.c.bf16 %v3114_v55, %v3113_v0 }
 0x202   : > { %v2959_v5 = vpop.f32.mrb[24].mxu0 }
 0x203   : > { %v2961_v7 = vpop.f32.mrb[25].mxu0  ;;  %v2960_v8 = vadd.f32 %v10967_v21, %v2959_v5 }
 0x205   : > { %v3115_v6 = vmax.f32 %v2960_v8, 0.0 }
 0x206   : > { %v2964_v11 = vpop.f32.mrb[26].mxu0 }
 0x207   : > { %v2965_v13 = vadd.f32 %v10967_v21, %v2964_v11  ;;  %v2966_v14 = vpop.f32.mrb[27].mxu0 }
 0x209   : > { %v3116_v15 = vmax.f32 %v2965_v13, 0.0 }
 0x20b   : > { %v11070_v58 = vpack.c.bf16 %v3116_v15, %v3115_v6 }
 0x211   : > { %v2969_v16 = vpop.f32.mrb[28].mxu0 }
 0x212   : > { %v2971_v3 = vpop.f32.mrb[29].mxu0  ;;  %v2970_v17 = vadd.f32 %v10967_v21, %v2969_v16 }
 0x214   : > { %v3117_v25 = vmax.f32 %v2970_v17, 0.0 }
 0x215   : > { %v2974_v20 = vpop.f32.mrb[30].mxu0 }
 0x216   : > { %v2975_v22 = vadd.f32 %v10967_v21, %v2974_v20  ;;  %v2976_v23 = vpop.f32.mrb[31].mxu0 }
 0x218   : > { %v3118_v27 = vmax.f32 %v2975_v22, 0.0 }
 0x21a   : > { %v11077_v28 = vpack.c.bf16 %v3118_v27, %v3117_v25 }
 0x21e   : > { %v2979_v29 = vpop.f32.mrb[32].mxu0 }
 0x21f   : > { %v2981_v30 = vpop.f32.mrb[33].mxu0  ;;  %v2980_v9 = vadd.f32 %v10967_v21, %v2979_v29 }
 0x221   : > { %v3119_v33 = vmax.f32 %v2980_v9, 0.0 }
 0x222   : > { %v2984_v12 = vpop.f32.mrb[34].mxu0 }
 0x223   : > { %v2985_v19 = vadd.f32 %v10967_v21, %v2984_v12  ;;  %v2986_v32 = vpop.f32.mrb[35].mxu0 }
 0x225   : > { %v3120_v24 = vmax.f32 %v2985_v19, 0.0 }
 0x227   : > { %v8107_v35 = vpack.c.bf16 %v3120_v24, %v3119_v33 }
 0x229   : > { %8108 = vmatprep.subr.bf16.mxu1 %v8107_v35 }
 0x22a   : > { %8110 = vmatpush3.bf16.msra.mxu1 %v10983_v60 }
 0x22d   : > { %v2989_v37 = vpop.f32.mrb[36].mxu0 }
 0x22e   : > { %v2991_v38 = vpop.f32.mrb[37].mxu0  ;;  %v2990_v39 = vadd.f32 %v10967_v21, %v2989_v37 }
 0x230   : > { %v3121_v26 = vmax.f32 %v2990_v39, 0.0 }
 0x231   : > { %v2994_v41 = vpop.f32.mrb[38].mxu0 }
 0x232   : > { %v2995_v43 = vadd.f32 %v10967_v21, %v2994_v41  ;;  %v2996_v45 = vpop.f32.mrb[39].mxu0 }
 0x234   : > { %v3122_v46 = vmax.f32 %v2995_v43, 0.0  ;;  %v3144_v43 = vld [vmem:[%s13055_s1] sm:$0xff] }
 0x236   : > { %v8111_v47 = vpack.c.bf16 %v3122_v46, %v3121_v26 }
 0x238   : > { %8112 = vmatprep.subr.bf16.mxu1 %v8111_v47 }
 0x239   : > { %8114 = vmatpush3.bf16.msra.mxu1 %v11003_v36 }
 0x23a   : > { %v2999_v34 = vpop.f32.mrb[40].mxu0 }
 0x23b   : > { %v3001_v48 = vpop.f32.mrb[41].mxu0  ;;  %v3000_v49 = vadd.f32 %v10967_v21, %v2999_v34  ;;  %v3151_v34 = vld [vmem:[%s13055_s1 + $0x38] sm:$0xff] }
 0x23d   : > { %v3123_v52 = vmax.f32 %v3000_v49, 0.0 }
 0x23e   : > { %v3004_v40 = vpop.f32.mrb[42].mxu0 }
 0x23f   : > { %v3005_v60 = vadd.f32 %v10967_v21, %v3004_v40  ;;  %v3006_v51 = vpop.f32.mrb[43].mxu0 }
 0x240   : > { %v3150_v51 = vld [vmem:[%s13055_s1 + $0x30] sm:$0xff] }
 0x241   : > { %v3124_v44 = vmax.f32 %v3005_v60, 0.0 }
 0x243   : > { %v8115_v53 = vpack.c.bf16 %v3124_v44, %v3123_v52  ;;  %v3154_v52 = vld [vmem:[%s13055_s1 + $0x50] sm:$0xff] }
 0x245   : > { %8116 = vmatprep.subr.bf16.mxu1 %v8115_v53  ;;  %v3153_v53 = vld [vmem:[%s13055_s1 + $0x48] sm:$0xff] }
 0x246   : > { %8118 = vmatpush3.bf16.msra.mxu1 %v11023_v31 }
 0x249   : > { %v3009_v56 = vpop.f32.mrb[44].mxu0 }
 0x24a   : > { %v3011_v57 = vpop.f32.mrb[45].mxu0  ;;  %v3010_v59 = vadd.f32 %v10967_v21, %v3009_v56  ;;  %v3157_v56 = vld [vmem:[%s13055_s1 + $0x68] sm:$0xff] }
 0x24c   : > { %v3125_v62 = vmax.f32 %v3010_v59, 0.0  ;;  %v3156_v59 = vld [vmem:[%s13055_s1 + $0x60] sm:$0xff] }
 0x24d   : > { %v3014_v42 = vpop.f32.mrb[46].mxu0 }
 0x24e   : > { %v3015_v36 = vadd.f32 %v10967_v21, %v3014_v42  ;;  %v3016_v61 = vpop.f32.mrb[47].mxu0 }
 0x250   : > { %v3126_v50 = vmax.f32 %v3015_v36, 0.0  ;;  %v3160_v36 = vld [vmem:[%s13055_s1 + $0x80] sm:$0xff] }
 0x252   : > { %v8119_v63 = vpack.c.bf16 %v3126_v50, %v3125_v62  ;;  %v3159_v50 = vld [vmem:[%s13055_s1 + $0x78] sm:$0xff] }
 0x254   : > { %8120 = vmatprep.subr.bf16.mxu1 %v8119_v63 }
 0x255   : > { %8122 = vmatpush3.bf16.msra.mxu1 %v11043_v10 }
 0x256   : > { %v3019_v0 = vpop.f32.mrb[48].mxu0 }
 0x257   : > { %v3021_v55 = vpop.f32.mrb[49].mxu0  ;;  %v3020_v5 = vadd.f32 %v10967_v21, %v3019_v0 }
 0x258   : > { %v3163_v55 = vld [vmem:[%s13055_s1 + $0x98] sm:$0xff] }
 0x259   : > { %v3127_v11 = vmax.f32 %v3020_v5, 0.0 }
 0x25a   : > { %v3024_v7 = vpop.f32.mrb[50].mxu0 }
 0x25b   : > { %v3025_v31 = vadd.f32 %v10967_v21, %v3024_v7  ;;  %v3026_v8 = vpop.f32.mrb[51].mxu0 }
 0x25c   : > { %v3162_v8 = vld [vmem:[%s13055_s1 + $0x90] sm:$0xff] }
 0x25d   : > { %v3128_v13 = vmax.f32 %v3025_v31, 0.0 }
 0x25f   : > { %v8123_v14 = vpack.c.bf16 %v3128_v13, %v3127_v11  ;;  %v3166_v11 = vld [vmem:[%s13055_s1 + $0xb0] sm:$0xff] }
 0x261   : > { %8124 = vmatprep.subr.bf16.mxu1 %v8123_v14  ;;  %v3165_v14 = vld [vmem:[%s13055_s1 + $0xa8] sm:$0xff] }
 0x262   : > { %8126 = vmatpush3.bf16.msra.mxu1 %v11060_v54 }
 0x265   : > { %v3029_v6 = vpop.f32.mrb[52].mxu0 }
 0x266   : > { %v3031_v15 = vpop.f32.mrb[53].mxu0  ;;  %v3030_v16 = vadd.f32 %v10967_v21, %v3029_v6 }
 0x267   : > { %v3169_v15 = vld [vmem:[%s13055_s1 + $0xc8] sm:$0xff] }
 0x268   : > { %v3129_v18 = vmax.f32 %v3030_v16, 0.0 }
 0x269   : > { %v3034_v3 = vpop.f32.mrb[54].mxu0 }
 0x26a   : > { %v3035_v10 = vadd.f32 %v10967_v21, %v3034_v3  ;;  %v3036_v17 = vpop.f32.mrb[55].mxu0 }
 0x26c   : > { %v3130_v20 = vmax.f32 %v3035_v10, 0.0  ;;  %v3168_v10 = vld [vmem:[%s13055_s1 + $0xc0] sm:$0xff] }
 0x26e   : > { %v8127_v22 = vpack.c.bf16 %v3130_v20, %v3129_v18  ;;  %v3172_v20 = vld [vmem:[%s13055_s1 + $0xe0] sm:$0xff] }
 0x270   : > { %8128 = vmatprep.subr.bf16.mxu1 %v8127_v22 }
 0x271   : > { %8130 = vmatpush3.bf16.msra.mxu1 %v11066_v4 }
 0x272   : > { %v3039_v23 = vpop.f32.mrb[56].mxu0 }
 0x273   : > { %v3041_v25 = vpop.f32.mrb[57].mxu0  ;;  %v3040_v27 = vadd.f32 %v10967_v21, %v3039_v23 }
 0x275   : > { %v3131_v9 = vmax.f32 %v3040_v27, 0.0  ;;  %v3171_v27 = vld [vmem:[%s13055_s1 + $0xd8] sm:$0xff] }
 0x276   : > { %v3044_v29 = vpop.f32.mrb[58].mxu0 }
 0x277   : > { %v3045_v54 = vadd.f32 %v10967_v21, %v3044_v29  ;;  %v3046_v30 = vpop.f32.mrb[59].mxu0  ;;  %v3175_v29 = vld [vmem:[%s13055_s1 + $0xf8] sm:$0xff] }
 0x278   : > { %v3178_v30 = vld [vmem:[%s13055_s1 + $0x110] sm:$0xff] }
 0x279   : > { %v3132_v12 = vmax.f32 %v3045_v54, 0.0  ;;  %v3174_v54 = vld [vmem:[%s13055_s1 + $0xf0] sm:$0xff] }
 0x27b   : > { %v8131_v19 = vpack.c.bf16 %v3132_v12, %v3131_v9 }
 0x27d   : > { %8132 = vmatprep.subr.bf16.mxu1 %v8131_v19  ;;  %v3177_v19 = vld [vmem:[%s13055_s1 + $0x108] sm:$0xff] }
 0x27e   : > { %8134 = vmatpush3.bf16.msra.mxu1 %v11070_v58  ;;  %v3148_v58 = vld [vmem:[%s13055_s1 + $0x20] sm:$0xff] }
 0x281   : > { %v3049_v32 = vpop.f32.mrb[60].mxu0 }
 0x282   : > { %v3051_v33 = vpop.f32.mrb[61].mxu0  ;;  %v3050_v24 = vadd.f32 %v10967_v21, %v3049_v32 }
 0x283   : > { %v3181_v33 = vld [vmem:[%s13055_s1 + $0x128] sm:$0xf] }
 0x284   : > { %v3133_v38 = vmax.f32 %v3050_v24, 0.0 }
 0x285   : > { %v3054_v35 = vpop.f32.mrb[62].mxu0 }
 0x286   : > { %v3055_v4 = vadd.f32 %v10967_v21, %v3054_v35  ;;  %v3056_v37 = vpop.f32.mrb[63].mxu0 }
 0x287   : > { %v3180_v37 = vld [vmem:[%s13055_s1 + $0x120] sm:$0xf] }
 0x288   : > { %v3134_v39 = vmax.f32 %v3055_v4, 0.0 }
 0x28a   : > { %v8135_v41 = vpack.c.bf16 %v3134_v39, %v3133_v38 }
 0x28c   : > { %8136 = vmatprep.subr.bf16.mxu1 %v8135_v41 }
 0x28d   : > { %8138 = vmatpush3.bf16.msra.mxu1 %v11077_v28  ;;  %v3147_v28 = vld [vmem:[%s13055_s1 + $0x18] sm:$0xff] }
 0x28e   : > { %v3059_v45 = vpop.f32.mrb[64].mxu0  ;;  %8139 = vmatprep.subr.bf16.mxu1 %v9932_v2 }
 0x28f   : > { %v3061_v26 = vpop.f32.mrb[65].mxu0  ;;  %v3060_v46 = vadd.f32 %v10967_v21, %v3059_v45 }
 0x290   : > { %3292 = vmatmul.mubr.f32.vlgmr.msra.gmra.mrb[0].mxu1 %v3144_v43 }
 0x291   : > { %3296 = vmatprep.mubr.f32.mxu1 %v3148_v58  ;;  %v3135_v40 = vmax.f32 %v3060_v46, 0.0  ;;  %v3146_v46 = vld [vmem:[%s13055_s1 + $0x10] sm:$0xff] }
 0x292   : > { %v3064_v47 = vpop.f32.mrb[66].mxu0 }
 0x293   : > { %v3065_v48 = vadd.f32 %v10967_v21, %v3064_v47  ;;  %v3066_v49 = vpop.f32.mrb[67].mxu0  ;;  %v3155_v47 = vld [vmem:[%s13055_s1 + $0x58] sm:$0xff] }
 0x294   : > { %3297 = vmatmul.mubr.f32.gmra.mrb[2].mxu1 %v3147_v28  ;;  %v3152_v28 = vld [vmem:[%s13055_s1 + $0x40] sm:$0xff] }
 0x295   : > { %v3136_v60 = vmax.f32 %v3065_v48, 0.0  ;;  %3301 = vmatprep.mubr.f32.mxu1 %v3151_v34  ;;  %v3158_v34 = vld [vmem:[%s13055_s1 + $0x70] sm:$0xff]  ;;  %v3161_v48 = vld [vmem:[%s13055_s1 + $0x88] sm:$0xff]  ;;  %v3164_v49 = vld [vmem:[%s13055_s1 + $0xa0] sm:$0xff] }
 0x297   : > { %v8140_v44 = vpack.c.bf16 %v3136_v60, %v3135_v40  ;;  %v3167_v40 = vld [vmem:[%s13055_s1 + $0xb8] sm:$0xff]  ;;  %v3170_v60 = vld [vmem:[%s13055_s1 + $0xd0] sm:$0xff] }
 0x298   : > { %3302 = vmatmul.mubr.f32.gmra.mrb[4].mxu1 %v3150_v51  ;;  %v3173_v51 = vld [vmem:[%s13055_s1 + $0xe8] sm:$0xff] }
 0x299   : > { %8141 = vmatpush3.bf16.msra.mxu1 %v8140_v44  ;;  %3306 = vmatprep.mubr.f32.mxu1 %v3154_v52  ;;  %v3176_v52 = vld [vmem:[%s13055_s1 + $0x100] sm:$0xff]  ;;  %v3179_v44 = vld [vmem:[%s13055_s1 + $0x118] sm:$0xff] }
 0x29a   : > { %8142 = vmatprep.subr.bf16.mxu1 %v9932_v2 }
 0x29c   : > { %3307 = vmatmul.mubr.f32.gmra.mrb[6].mxu1 %v3153_v53  ;;  %v3182_v53 = vld [vmem:[%s13055_s1 + $0x130] sm:$0xf] }
 0x29d   : > { %v3069_v57 = vpop.f32.mrb[68].mxu0  ;;  %3311 = vmatprep.mubr.f32.mxu1 %v3157_v56 }
 0x29e   : > { %v3071_v42 = vpop.f32.mrb[69].mxu0  ;;  %v3070_v61 = vadd.f32 %v10967_v21, %v3069_v57 }
 0x2a0   : > { %3312 = vmatmul.mubr.f32.gmra.mrb[8].mxu1 %v3156_v59  ;;  %v3137_v5 = vmax.f32 %v3070_v61, 0.0 }
 0x2a1   : > { %v3074_v62 = vpop.f32.mrb[70].mxu0  ;;  %3316 = vmatprep.mubr.f32.mxu1 %v3160_v36 }
 0x2a2   : > { %v3075_v63 = vadd.f32 %v10967_v21, %v3074_v62  ;;  %v3076_v0 = vpop.f32.mrb[71].mxu0 }
 0x2a4   : > { %v3138_v7 = vmax.f32 %v3075_v63, 0.0  ;;  %3317 = vmatmul.mubr.f32.gmra.mrb[10].mxu1 %v3159_v50 }
 0x2a5   : > { %3321 = vmatprep.mubr.f32.mxu1 %v3163_v55 }
 0x2a6   : > { %v8143_v31 = vpack.c.bf16 %v3138_v7, %v3137_v5 }
 0x2a8   : > { %8144 = vmatpush3.bf16.msra.mxu1 %v8143_v31 }
 0x2a9   : > { %3322 = vmatmul.mubr.f32.gmra.mrb[12].mxu1 %v3162_v8  ;;  %8145 = vmatprep.subr.bf16.mxu1 %v9932_v2 }
 0x2aa   : > { %v3079_v13 = vpop.f32.mrb[72].mxu0  ;;  %3326 = vmatprep.mubr.f32.mxu1 %v3166_v11 }
 0x2ab   : > { %v3081_v6 = vpop.f32.mrb[73].mxu0  ;;  %v3080_v16 = vadd.f32 %v10967_v21, %v3079_v13 }
 0x2ad   : > { %3327 = vmatmul.mubr.f32.gmra.mrb[14].mxu1 %v3165_v14  ;;  %v3139_v22 = vmax.f32 %v3080_v16, 0.0 }
 0x2ae   : > { %v3084_v3 = vpop.f32.mrb[74].mxu0  ;;  %3331 = vmatprep.mubr.f32.mxu1 %v3169_v15 }
 0x2af   : > { %v3085_v17 = vadd.f32 %v10967_v21, %v3084_v3  ;;  %v3086_v18 = vpop.f32.mrb[75].mxu0 }
 0x2b1   : > { %v3140_v23 = vmax.f32 %v3085_v17, 0.0  ;;  %3332 = vmatmul.mubr.f32.gmra.mrb[16].mxu1 %v3168_v10 }
 0x2b2   : > { %3336 = vmatprep.mubr.f32.mxu1 %v3172_v20 }
 0x2b3   : > { %v8146_v25 = vpack.c.bf16 %v3140_v23, %v3139_v22 }
 0x2b5   : > { %8147 = vmatpush3.bf16.msra.mxu1 %v8146_v25 }
 0x2b6   : > { %3337 = vmatmul.mubr.f32.gmra.mrb[18].mxu1 %v3171_v27  ;;  %8148 = vmatprep.subr.bf16.mxu1 %v9932_v2  ;;  %v4028_v27 = vld [vmem:[%s13056_s11] sm:$0xff] }
 0x2b7   : > { %3341 = vmatprep.mubr.f32.mxu1 %v3175_v29  ;;  %v4029_v29 = vld [vmem:[%s13056_s11 + $0x8] sm:$0xff] }
 0x2b9   : > { %v3089_v9 = vpop.f32.mrb[76].mxu0 }
 0x2ba   : > { %v3091_v12 = vpop.f32.mrb[77].mxu0  ;;  %3342 = vmatmul.mubr.f32.gmra.mrb[20].mxu1 %v3174_v54  ;;  %v3090_v32 = vadd.f32 %v10967_v21, %v3089_v9  ;;  %v4030_v54 = vld [vmem:[%s13056_s11 + $0x10] sm:$0xff]  ;;  %v8152_v9 = vpack.c.bf16 %v4029_v29, %v4028_v27  ;;  %v4044_v29 = vld [vmem:[%s13056_s11 + $0x80] sm:$0xff] }
 0x2bb   : > { %3346 = vmatprep.mubr.f32.mxu1 %v3178_v30  ;;  %v4031_v12 = vld [vmem:[%s13056_s11 + $0x18] sm:$0xff] }
 0x2bc   : > { %v3141_v38 = vmax.f32 %v3090_v32, 0.0  ;;  %v8155_v32 = vpack.c.bf16 %v4031_v12, %v4030_v54  ;;  %v4045_v54 = vld [vmem:[%s13056_s11 + $0x88] sm:$0xff] }
 0x2bd   : > { %v3094_v24 = vpop.f32.mrb[78].mxu0 }
 0x2be   : > { %v3095_v35 = vadd.f32 %v10967_v21, %v3094_v24  ;;  %v3096_v4 = vpop.f32.mrb[79].mxu0  ;;  %3347 = vmatmul.mubr.f32.gmra.mrb[22].mxu1 %v3177_v19  ;;  %v4032_v24 = vld [vmem:[%s13056_s11 + $0x20] sm:$0xff] }
 0x2bf   : > { %3351 = vmatprep.mubr.f32.mxu1 %v3181_v33 }
 0x2c0   : > { %v3142_v39 = vmax.f32 %v3095_v35, 0.0  ;;  %v4033_v35 = vld [vmem:[%s13056_s11 + $0x28] sm:$0xff] }
 0x2c2   : > { %v8149_v41 = vpack.c.bf16 %v3142_v39, %v3141_v38  ;;  %3352 = vmatmul.mubr.f32.gmra.mrb[24].mxu1 %v3180_v37  ;;  %v8158_v38 = vpack.c.bf16 %v4033_v35, %v4032_v24 }
 0x2c3   : > { %7876 = vmatprep.mubr.msk.f32.mxu1 %vm9940_vm9, %v9931_v1 }
 0x2c4   : > { %v3099_v43 = vpop.f32.mrb[80].mxu0  ;;  %8150 = vmatpush3.bf16.msra.mxu1 %v8149_v41  ;;  %v4034_v41 = vld [vmem:[%s13056_s11 + $0x30] sm:$0xff] }
 0x2c5   : > { %v3100_v45 = vadd.f32 %v10967_v21, %v3099_v43  ;;  %v3101_v58 = vpop.f32.mrb[81].mxu0  ;;  %7874 = vmatprep.subr.mxu1 %v9931_v1  ;;  %v3149_v21 = vld [vmem:[%s13055_s1 + $0x28] sm:$0xff]  ;;  %v4035_v43 = vld [vmem:[%s13056_s11 + $0x38] sm:$0xff]  ;;  %s13065_s1 = sld [smem:[#allocation24_spill]] }
 0x2c7   : > { %v3143_v26 = vmax.f32 %v3100_v45, 0.0 }
 0x2c9   : > { %7875 = vmatpush3.msk.msra.mxu1 %vm3223_vm10, %v3143_v26  ;;  %v8161_v26 = vpack.c.bf16 %v4035_v43, %v4034_v41 }
 0x2ca   : > { %7877 = vmatmul.mubr.msk.f32.vlgmr.msra.gmra.mrb[26].mxu1 %vm3183_vm11, %v3146_v46  ;;  %8151 = vmatprep.subr.bf16.mxu1 %v9932_v2 }
 0x2cb   : > { %7879 = vmatprep.mubr.msk.f32.mxu1 %vm9940_vm9, %v9931_v1  ;;  %8153 = vmatpush1.bf16.msra.mxu1 %v8152_v9 }
 0x2cc   : > { %8154 = vmatprep.subr.bf16.mxu1 %v9932_v2 }
 0x2ce   : > { %7880 = vmatmul.mubr.msk.f32.gmra.mrb[28].mxu1 %vm3183_vm11, %v3149_v21 }
 0x2cf   : > { %7882 = vmatprep.mubr.msk.f32.mxu1 %vm9940_vm9, %v9931_v1  ;;  %8156 = vmatpush1.bf16.msra.mxu1 %v8155_v32 }
 0x2d0   : > { %8157 = vmatprep.subr.bf16.mxu1 %v9932_v2 }
 0x2d2   : > { %7883 = vmatmul.mubr.msk.f32.gmra.mrb[30].mxu1 %vm3183_vm11, %v3152_v28  ;;  %v4036_v28 = vld [vmem:[%s13056_s11 + $0x40] sm:$0xff] }
 0x2d3   : > { %7885 = vmatprep.mubr.msk.f32.mxu1 %vm9940_vm9, %v9931_v1  ;;  %8159 = vmatpush1.bf16.msra.mxu1 %v8158_v38 }
 0x2d4   : > { %8160 = vmatprep.subr.bf16.mxu1 %v9932_v2 }
 0x2d6   : > { %7886 = vmatmul.mubr.msk.f32.gmra.mrb[32].mxu1 %vm3183_vm11, %v3155_v47  ;;  %v4037_v47 = vld [vmem:[%s13056_s11 + $0x48] sm:$0xff] }
 0x2d7   : > { %7888 = vmatprep.mubr.msk.f32.mxu1 %vm9940_vm9, %v9931_v1  ;;  %8162 = vmatpush1.bf16.msra.mxu1 %v8161_v26 }
 0x2d8   : > { %8163 = vmatprep.subr.bf16.mxu1 %v9932_v2 }
 0x2da   : > { %7889 = vmatmul.mubr.msk.f32.gmra.mrb[34].mxu1 %vm3183_vm11, %v3158_v34 }
 0x2db   : > { %7891 = vmatprep.mubr.msk.f32.mxu1 %vm9940_vm9, %v9931_v1 }
 0x2de   : > { %7892 = vmatmul.mubr.msk.f32.gmra.mrb[36].mxu1 %vm3183_vm11, %v3161_v48  ;;  %v8164_v48 = vpack.c.bf16 %v4037_v47, %v4036_v28 }
 0x2df   : > { %7894 = vmatprep.mubr.msk.f32.mxu1 %vm9940_vm9, %v9931_v1 }
 0x2e0   : > { %8165 = vmatpush1.bf16.msra.mxu1 %v8164_v48 }
 0x2e1   : > { %8166 = vmatprep.subr.bf16.mxu1 %v9932_v2 }
 0x2e2   : > { %7895 = vmatmul.mubr.msk.f32.gmra.mrb[38].mxu1 %vm3183_vm11, %v3164_v49 }
 0x2e3   : > { %7897 = vmatprep.mubr.msk.f32.mxu1 %vm9940_vm9, %v9931_v1 }
 0x2e6   : > { %7898 = vmatmul.mubr.msk.f32.gmra.mrb[40].mxu1 %vm3183_vm11, %v3167_v40 }
 0x2e7   : > { %7900 = vmatprep.mubr.msk.f32.mxu1 %vm9940_vm9, %v9931_v1 }
 0x2ea   : > { %7901 = vmatmul.mubr.msk.f32.gmra.mrb[42].mxu1 %vm3183_vm11, %v3170_v60  ;;  %v4038_v60 = vld [vmem:[%s13056_s11 + $0x50] sm:$0xff] }
 0x2eb   : > { %7903 = vmatprep.mubr.msk.f32.mxu1 %vm9940_vm9, %v9931_v1 }
 0x2ee   : > { %7904 = vmatmul.mubr.msk.f32.gmra.mrb[44].mxu1 %vm3183_vm11, %v3173_v51  ;;  %v4039_v51 = vld [vmem:[%s13056_s11 + $0x58] sm:$0xff] }
 0x2ef   : > { %7906 = vmatprep.mubr.msk.f32.mxu1 %vm9940_vm9, %v9931_v1 }
 0x2f2   : > { %7907 = vmatmul.mubr.msk.f32.gmra.mrb[46].mxu1 %vm3183_vm11, %v3176_v52 }
 0x2f3   : > { %7909 = vmatprep.mubr.msk.f32.mxu1 %vm9940_vm9, %v9931_v1 }
 0x2f6   : > { %7910 = vmatmul.mubr.msk.f32.gmra.mrb[48].mxu1 %vm3183_vm11, %v3179_v44  ;;  %v8167_v44 = vpack.c.bf16 %v4039_v51, %v4038_v60 }
 0x2f7   : > { %7912 = vmatprep.mubr.msk.f32.mxu1 %vm9940_vm9, %v9931_v1 }
 0x2f8   : > { %8168 = vmatpush1.bf16.msra.mxu1 %v8167_v44 }
 0x2f9   : > { %8169 = vmatprep.subr.bf16.mxu1 %v9932_v2 }
 0x2fa   : > { %7913 = vmatmul.mubr.msk.f32.gmra.mrb[50].mxu1 %vm3183_vm11, %v3182_v53 }
 0x363   : > { %v7629_v56 = vpop.f32.mrb[0].mxu1 }
 0x364   : > { %v7630_v57 = vpop.f32.mrb[1].mxu1 }
 0x365   : > { %v7631_v59 = vadd.f32 %v7630_v57, %v7629_v56  ;;  %v4040_v57 = vld [vmem:[%s13056_s11 + $0x60] sm:$0xff] }
 0x367   : > { %v7632_v42 = vpop.f32.mrb[2].mxu1 }
 0x368   : > { %v7633_v36 = vpop.f32.mrb[3].mxu1 }
 0x369   : > { %v11272_v61 = vadd.f32 %v7633_v36, %v7632_v42  ;;  %v3526_v36 = vld [vmem:[#allocation3 + $0x7] sm:$0xff] }
 0x36b   : > { %v7635_v62 = vpop.f32.mrb[4].mxu1 }
 0x36c   : > { %v7636_v50 = vpop.f32.mrb[5].mxu1 }
 0x36d   : > { %v11274_v63 = vadd.f32 %v7636_v50, %v7635_v62  ;;  %v3513_v62 = vld [vmem:[#allocation3 + $0x6] sm:$0xff] }
 0x36f   : > { %v7638_v0 = vpop.f32.mrb[6].mxu1 }
 0x370   : > { %v7639_v55 = vpop.f32.mrb[7].mxu1 }
 0x371   : > { %v11276_v5 = vadd.f32 %v7639_v55, %v7638_v0 }
 0x373   : > { %v7641_v7 = vpop.f32.mrb[8].mxu1 }
 0x374   : > { %v7642_v31 = vpop.f32.mrb[9].mxu1 }
 0x375   : > { %v11278_v8 = vadd.f32 %v7642_v31, %v7641_v7 }
 0x377   : > { %v7644_v11 = vpop.f32.mrb[10].mxu1 }
 0x378   : > { %v7645_v13 = vpop.f32.mrb[11].mxu1 }
 0x379   : > { %v11280_v14 = vadd.f32 %v7645_v13, %v7644_v11  ;;  %v4042_v13 = vld [vmem:[%s13056_s11 + $0x70] sm:$0xff] }
 0x37c   : > { %v7647_v6 = vpop.f32.mrb[12].mxu1 }
 0x37d   : > { %v7648_v15 = vpop.f32.mrb[13].mxu1 }
 0x37e   : > { %v11282_v16 = vadd.f32 %v7648_v15, %v7647_v6  ;;  %v4043_v6 = vld [vmem:[%s13056_s11 + $0x78] sm:$0xff] }
 0x380   : > { %v7650_v3 = vpop.f32.mrb[14].mxu1 }
 0x381   : > { %v7651_v10 = vpop.f32.mrb[15].mxu1 }
 0x382   : > { %v11284_v17 = vadd.f32 %v7651_v10, %v7650_v3 }
 0x384   : > { %v7653_v18 = vpop.f32.mrb[16].mxu1 }
 0x385   : > { %v7654_v20 = vpop.f32.mrb[17].mxu1 }
 0x386   : > { %v11286_v22 = vadd.f32 %v7654_v20, %v7653_v18 }
 0x389   : > { %v7656_v23 = vpop.f32.mrb[18].mxu1 }
 0x38a   : > { %v7657_v25 = vpop.f32.mrb[19].mxu1 }
 0x38b   : > { %v11297_v30 = vadd.f32 %v7657_v25, %v7656_v23 }
 0x38d   : > { %v7659_v19 = vpop.f32.mrb[20].mxu1 }
 0x38e   : > { %v7660_v33 = vpop.f32.mrb[21].mxu1 }
 0x38f   : > { %v11309_v4 = vadd.f32 %v7660_v33, %v7659_v19  ;;  %v8176_v33 = vpack.c.bf16 %v4045_v54, %v4044_v29 }
 0x391   : > { %v7662_v37 = vpop.f32.mrb[22].mxu1 }
 0x392   : > { %v7663_v39 = vpop.f32.mrb[23].mxu1 }
 0x393   : > { %v11318_v45 = vadd.f32 %v7663_v39, %v7662_v37 }
 0x395   : > { %v7665_v58 = vpop.f32.mrb[24].mxu1 }
 0x396   : > { %v7666_v46 = vpop.f32.mrb[25].mxu1 }
 0x397   : > { %v11321_v21 = vadd.f32 %v7666_v46, %v7665_v58 }
 0x39d   : > { %v3423_v34 = vpop.f32.mrb[26].mxu1 }
 0x39e   : > { %v3424_v49 = vadd.f32 %v7631_v59, %v3423_v34  ;;  %v7878_v40 = vpop.f32.mrb[27].mxu1  ;;  %v4041_v59 = vld [vmem:[%s13056_s11 + $0x68] sm:$0xff]  ;;  %s13067_s11 = smov 16  }
 0x39f   : > { %v8170_v50 = vpack.c.bf16 %v4041_v59, %v4040_v57 }
 0x3a0   : > { %3487 = vst.msk [vmem:[#allocation3 + $0x10] sm:$0xff] %vm844_vm0, %v3424_v49 }
 0x3a1   : > { %v3428_v52 = vpop.f32.mrb[28].mxu1  ;;  %8171 = vmatpush1.bf16.msra.mxu1 %v8170_v50 }
 0x3a2   : > { %v3429_v53 = vadd.f32 %v11272_v61, %v3428_v52  ;;  %v7881_v56 = vpop.f32.mrb[29].mxu1  ;;  %8172 = vmatprep.subr.bf16.mxu1 %v9932_v2 }
 0x3a4   : > { %3488 = vst.msk [vmem:[#allocation3 + $0x18] sm:$0xff] %vm844_vm0, %v3429_v53 }
 0x3a5   : > { %v3433_v42 = vpop.f32.mrb[30].mxu1 }
 0x3a6   : > { %v3434_v61 = vadd.f32 %v11274_v63, %v3433_v42  ;;  %v7884_v0 = vpop.f32.mrb[31].mxu1  ;;  %v8173_v63 = vpack.c.bf16 %v4043_v6, %v4042_v13 }
 0x3a7   : > { %v3527_v55 = vld [vmem:[#allocation3 + $0xf] sm:$0xff] }
 0x3a8   : > { %v3514_v7 = vld [vmem:[#allocation3 + $0xe] sm:$0xff]  ;;  %3489 = vst.msk [vmem:[#allocation3 + $0x20] sm:$0xff] %vm844_vm0, %v3434_v61  ;;  %v9180_v31 = vpack.i.bf16 %v3527_v55, %v3526_v36  ;;  %8174 = vmatpush1.bf16.msra.mxu1 %v8173_v63 }
 0x3a9   : > { %v9175_v11 = vpack.i.bf16 %v3514_v7, %v3513_v62  ;;  %v3438_v15 = vpop.f32.mrb[32].mxu1  ;;  %v3541_v18 = vld [vmem:[#allocation3 + $0x10] sm:$0xff]  ;;  %8175 = vmatprep.subr.bf16.mxu1 %v9932_v2 }
 0x3aa   : > { %v3439_v3 = vadd.f32 %v11276_v5, %v3438_v15  ;;  %9181 = vrot.lane.b32.xlu0 %v9180_v31, %s13009_s0  ;;  %v7887_v10 = vpop.f32.mrb[33].mxu1 }
 0x3ab   : > { %9176 = vrot.lane.b32.xlu1 %v9175_v11, %s13007_s28  ;;  %v3542_v20 = vld [vmem:[#allocation3 + $0x18] sm:$0xff] }
 0x3ac   : > { %v3528_v23 = vld [vmem:[#allocation3 + $0x17] sm:$0xff]  ;;  %3490 = vst.msk [vmem:[#allocation3 + $0x28] sm:$0xff] %vm844_vm0, %v3439_v3  ;;  %v9190_v25 = vpack.i.bf16 %v3542_v20, %v3541_v18  ;;  %8177 = vmatpush1.bf16.msra.mxu1 %v8176_v33 }
 0x3ad   : > { %v9185_v27 = vpack.i.bf16 %v3528_v23, %v3527_v55  ;;  %v3443_v5 = vpop.f32.mrb[34].mxu1  ;;  %v3515_v19 = vld [vmem:[#allocation3 + $0x16] sm:$0xff]  ;;  %8178 = vmatprep.subr.bf16.mxu1 %v9932_v2 }
 0x3ae   : > { %v3444_v9 = vadd.f32 %v11278_v8, %v3443_v5  ;;  %9191 = vrot.lane.b32.xlu0 %v9190_v25, %s13057_s12  ;;  %v7890_v12 = vpop.f32.mrb[35].mxu1  ;;  %v3554_v32 = vld [vmem:[#allocation3 + $0x11] sm:$0xff] }
 0x3af   : > { %9186 = vrot.lane.b32.xlu1 %v9185_v27, %s13058_s29  ;;  %v3582_v24 = vld [vmem:[#allocation3 + $0x1b] sm:$0xff] }
 0x3b0   : > { %v3516_v35 = vld [vmem:[#allocation3 + $0x1e] sm:$0xff]  ;;  %3491 = vst.msk [vmem:[#allocation3 + $0x30] sm:$0xff] %vm844_vm0, %v3444_v9  ;;  %7500 = vmatprep.mubr.msk.f32.mxu1 %vm844_vm0, %v3582_v24 }
 0x3b1   : > { %v3555_v37 = vld [vmem:[#allocation3 + $0x19] sm:$0xff]  ;;  %v9200_v38 = vpack.i.bf16 %v3516_v35, %v3515_v19  ;;  %v3448_v41 = vpop.f32.mrb[36].mxu1 }
 0x3b2   : > { %v9195_v39 = vpack.i.bf16 %v3555_v37, %v3554_v32  ;;  %v3529_v8 = vld [vmem:[#allocation3 + $0x1f] sm:$0xff]  ;;  %v3449_v43 = vadd.f32 %v11280_v14, %v3448_v41  ;;  %v7893_v58 = vpop.f32.mrb[37].mxu1 }
 0x3b3   : > { %9201 = vrot.lane.b32.xlu0 %v9200_v38, %s13007_s28  ;;  %v3556_v26 = vld [vmem:[#allocation3 + $0x21] sm:$0xff]  ;;  %v9205_v28 = vpack.i.bf16 %v3529_v8, %v3528_v23 }
 0x3b4   : > { %9196 = vrot.lane.b32.xlu1 %v9195_v39, %s13059_s7  ;;  %3492 = vst.msk [vmem:[#allocation3 + $0x38] sm:$0xff] %vm844_vm0, %v3449_v43  ;;  %v9210_v46 = vpack.i.bf16 %v3556_v26, %v3555_v37  ;;  %v3530_v34 = vld [vmem:[#allocation3 + $0x27] sm:$0xff]  ;;  %v3569_v40 = vld [vmem:[#allocation3 + $0x1a] sm:$0xff] }
 0x3b5   : > { %v3453_v47 = vpop.f32.mrb[38].mxu1  ;;  %v3570_v48 = vld [vmem:[#allocation3 + $0x22] sm:$0xff]  ;;  %v9220_v60 = vpack.i.bf16 %v3530_v34, %v3529_v8 }
 0x3b6   : > { %v3454_v49 = vadd.f32 %v11282_v16, %v3453_v47  ;;  %v7896_v14 = vpop.f32.mrb[39].mxu1  ;;  %v9215_v51 = vpack.i.bf16 %v3570_v48, %v3569_v40  ;;  %v3544_v53 = vld [vmem:[#allocation3 + $0x28] sm:$0xff]  ;;  %v3543_v57 = vld [vmem:[#allocation3 + $0x20] sm:$0xff] }
 0x3b7   : > { %9211 = vrot.lane.b32.xlu0 %v9210_v46, %s13060_s8  ;;  %v3557_v44 = vld [vmem:[#allocation3 + $0x29] sm:$0xff]  ;;  %v9225_v42 = vpack.i.bf16 %v3544_v53, %v3543_v57 }
 0x3b8   : > { %9206 = vrot.lane.b32.xlu1 %v9205_v28, %s13009_s0  ;;  %3493 = vst.msk [vmem:[#allocation3 + $0x40] sm:$0xff] %vm844_vm0, %v3454_v49  ;;  %v9230_v59 = vpack.i.bf16 %v3557_v44, %v3556_v26  ;;  %v3531_v62 = vld [vmem:[#allocation3 + $0x2f] sm:$0xff]  ;;  %v3517_v0 = vld [vmem:[#allocation3 + $0x26] sm:$0xff] }
 0x3b9   : > { %v3458_v52 = vpop.f32.mrb[40].mxu1  ;;  %v3518_v50 = vld [vmem:[#allocation3 + $0x2e] sm:$0xff]  ;;  %v9240_v55 = vpack.i.bf16 %v3531_v62, %v3530_v34 }
 0x3ba   : > { %v3459_v56 = vadd.f32 %v11284_v17, %v3458_v52  ;;  %v7899_v16 = vpop.f32.mrb[41].mxu1  ;;  %v9235_v7 = vpack.i.bf16 %v3518_v50, %v3517_v0  ;;  %v3571_v15 = vld [vmem:[#allocation3 + $0x2a] sm:$0xff] }
 0x3bb   : > { %9221 = vrot.lane.b32.xlu0 %v9220_v60, %s13058_s29  ;;  %v3572_v11 = vld [vmem:[#allocation3 + $0x32] sm:$0xff] }
 0x3bc   : > { %9216 = vrot.lane.b32.xlu1 %v9215_v51, %s13061_s10  ;;  %3494 = vst.msk [vmem:[#allocation3 + $0x48] sm:$0xff] %vm844_vm0, %v3459_v56  ;;  %v3558_v13 = vld [vmem:[#allocation3 + $0x31] sm:$0xff]  ;;  %v9250_v63 = vpack.i.bf16 %v3572_v11, %v3571_v15 }
 0x3bd   : > { %v3463_v36 = vpop.f32.mrb[42].mxu1  ;;  %v9245_v3 = vpack.i.bf16 %v3558_v13, %v3557_v44  ;;  %v3546_v18 = vld [vmem:[#allocation3 + $0x38] sm:$0xff]  ;;  %v3545_v25 = vld [vmem:[#allocation3 + $0x30] sm:$0xff] }
 0x3be   : > { %v3464_v61 = vadd.f32 %v11286_v22, %v3463_v36  ;;  %v7902_v17 = vpop.f32.mrb[43].mxu1  ;;  %v3532_v20 = vld [vmem:[#allocation3 + $0x37] sm:$0xff]  ;;  %v9260_v27 = vpack.i.bf16 %v3546_v18, %v3545_v25 }
 0x3bf   : > { %9231 = vrot.lane.b32.xlu0 %v9230_v59, %s13059_s7  ;;  %v9255_v29 = vpack.i.bf16 %v3532_v20, %v3531_v62  ;;  %v3520_v54 = vld [vmem:[#allocation3 + $0x3e] sm:$0xff]  ;;  %v3519_v19 = vld [vmem:[#allocation3 + $0x36] sm:$0xff] }
 0x3c0   : > { %9226 = vrot.lane.b32.xlu1 %v9225_v42, %s13057_s12  ;;  %3495 = vst.msk [vmem:[#allocation3 + $0x50] sm:$0xff] %vm844_vm0, %v3464_v61  ;;  %v3559_v9 = vld [vmem:[#allocation3 + $0x39] sm:$0xff]  ;;  %v9270_v32 = vpack.i.bf16 %v3520_v54, %v3519_v19 }
 0x3c1   : > { %v3468_v31 = vpop.f32.mrb[44].mxu1  ;;  %v9265_v33 = vpack.i.bf16 %v3559_v9, %v3558_v13  ;;  %v3533_v37 = vld [vmem:[#allocation3 + $0x3f] sm:$0xff] }
 0x3c2   : > { %v3469_v6 = vadd.f32 %v11297_v30, %v3468_v31  ;;  %v7905_v22 = vpop.f32.mrb[45].mxu1  ;;  %v9275_v41 = vpack.i.bf16 %v3533_v37, %v3532_v20  ;;  %v3573_v58 = vld [vmem:[#allocation3 + $0x3a] sm:$0xff] }
 0x3c3   : > { %9241 = vrot.lane.b32.xlu0 %v9240_v55, %s13009_s0  ;;  %v3560_v35 = vld [vmem:[#allocation3 + $0x41] sm:$0xff] }
 0x3c4   : > { %9236 = vrot.lane.b32.xlu1 %v9235_v7, %s13007_s28  ;;  %3496 = vst.msk [vmem:[#allocation3 + $0x58] sm:$0xff] %vm844_vm0, %v3469_v6  ;;  %v9280_v39 = vpack.i.bf16 %v3560_v35, %v3559_v9  ;;  %v3534_v8 = vld [vmem:[#allocation3 + $0x47] sm:$0xff] }
 0x3c5   : > { %v3473_v10 = vpop.f32.mrb[46].mxu1  ;;  %v3574_v43 = vld [vmem:[#allocation3 + $0x42] sm:$0xff]  ;;  %v9290_v26 = vpack.i.bf16 %v3534_v8, %v3533_v37  ;;  %v4235_v37 = vld [vmem:[%s13062_s30] sm:$0xff] }
 0x3c6   : > { %v3474_v23 = vadd.f32 %v11309_v4, %v3473_v10  ;;  %v7908_v30 = vpop.f32.mrb[47].mxu1  ;;  %v9285_v46 = vpack.i.bf16 %v3574_v43, %v3573_v58  ;;  %v3547_v47 = vld [vmem:[#allocation3 + $0x40] sm:$0xff] }
 0x3c7   : > { %9251 = vrot.lane.b32.xlu0 %v9250_v63, %s13061_s10  ;;  %v3561_v28 = vld [vmem:[#allocation3 + $0x49] sm:$0xff] }
 0x3c8   : > { %9246 = vrot.lane.b32.xlu1 %v9245_v3, %s13060_s8  ;;  %3497 = vst.msk [vmem:[#allocation3 + $0x60] sm:$0xff] %vm844_vm0, %v3474_v23  ;;  %v9300_v34 = vpack.i.bf16 %v3561_v28, %v3560_v35  ;;  %v3535_v49 = vld [vmem:[#allocation3 + $0x4f] sm:$0xff]  ;;  %v3521_v40 = vld [vmem:[#allocation3 + $0x46] sm:$0xff]  ;;  %v9941_v23 = vmov 0   ;;  %v3581_v35 = vld [vmem:[#allocation3 + $0x7a] sm:$0xf] }
 0x3c9   : > { %v3478_v5 = vpop.f32.mrb[48].mxu1  ;;  %v3522_v14 = vld [vmem:[#allocation3 + $0x4e] sm:$0xff]  ;;  %v9310_v60 = vpack.i.bf16 %v3535_v49, %v3534_v8  ;;  %9386 = vset.pattern.permute.xlu1 %v9941_v23  ;;  %9385 = vset.pattern.permute.xlu0 %v9941_v23 }
 0x3ca   : > { %v3479_v12 = vadd.f32 %v11318_v45, %v3478_v5  ;;  %v7911_v4 = vpop.f32.mrb[49].mxu1  ;;  %v9305_v51 = vpack.i.bf16 %v3522_v14, %v3521_v40  ;;  %v3575_v53 = vld [vmem:[#allocation3 + $0x4a] sm:$0xff] }
 0x3cb   : > { %9261 = vrot.lane.b32.xlu0 %v9260_v27, %s13057_s12  ;;  %v3576_v52 = vld [vmem:[#allocation3 + $0x52] sm:$0xff]  ;;  %v3500_v40 = vld [vmem:[#allocation3 + $0x5] sm:$0xff] }
 0x3cc   : > { %9256 = vrot.lane.b32.xlu1 %v9255_v29, %s13058_s29  ;;  %3498 = vst.msk [vmem:[#allocation3 + $0x68] sm:$0xff] %vm844_vm0, %v3479_v12  ;;  %v3562_v44 = vld [vmem:[#allocation3 + $0x51] sm:$0xff]  ;;  %v9320_v56 = vpack.i.bf16 %v3576_v52, %v3575_v53 }
 0x3cd   : > { %v3483_v24 = vpop.f32.mrb[50].mxu1  ;;  %v9315_v16 = vpack.i.bf16 %v3562_v44, %v3561_v28  ;;  %v3550_v57 = vld [vmem:[#allocation3 + $0x58] sm:$0xff]  ;;  %v3549_v42 = vld [vmem:[#allocation3 + $0x50] sm:$0xff] }
 0x3ce   : > { %v3484_v38 = vadd.f32 %v11321_v21, %v3483_v24  ;;  %v7914_v45 = vpop.f32.mrb[51].mxu1  ;;  %v3548_v21 = vld [vmem:[#allocation3 + $0x48] sm:$0xff]  ;;  %v3536_v59 = vld [vmem:[#allocation3 + $0x57] sm:$0xff]  ;;  %v9330_v36 = vpack.i.bf16 %v3550_v57, %v3549_v42 }
 0x3cf   : > { %9271 = vrot.lane.b32.xlu0 %v9270_v32, %s13007_s28  ;;  %v9295_v48 = vpack.i.bf16 %v3548_v21, %v3547_v47  ;;  %v9325_v62 = vpack.i.bf16 %v3536_v59, %v3535_v49  ;;  %v3524_v50 = vld [vmem:[#allocation3 + $0x5e] sm:$0xff]  ;;  %v3523_v17 = vld [vmem:[#allocation3 + $0x56] sm:$0xff] }
 0x3d0   : > { %9266 = vrot.lane.b32.xlu1 %v9265_v33, %s13059_s7  ;;  %3499 = vst.msk [vmem:[#allocation3 + $0x70] sm:$0xf] %vm1026_vm5, %v3484_v38  ;;  %v3563_v61 = vld [vmem:[#allocation3 + $0x59] sm:$0xff]  ;;  %v9340_v0 = vpack.i.bf16 %v3524_v50, %v3523_v17 }
 0x3d1   : > { %v9335_v55 = vpack.i.bf16 %v3563_v61, %v3562_v44  ;;  %v3537_v31 = vld [vmem:[#allocation3 + $0x5f] sm:$0xff]  ;;  %v3568_v33 = vld [vmem:[#allocation3 + $0x79] sm:$0xf] }
 0x3d2   : > { %v9345_v13 = vpack.i.bf16 %v3537_v31, %v3536_v59  ;;  %v3577_v15 = vld [vmem:[#allocation3 + $0x5a] sm:$0xff]  ;;  %v3501_v59 = vld [vmem:[#allocation3 + $0xd] sm:$0xff] }
 0x3d3   : > { %9281 = vrot.lane.b32.xlu0 %v9280_v39, %s13060_s8  ;;  %v3564_v7 = vld [vmem:[#allocation3 + $0x61] sm:$0xff] }
 0x3d4   : > { %9276 = vrot.lane.b32.xlu1 %v9275_v41, %s13009_s0  ;;  %v9350_v11 = vpack.i.bf16 %v3564_v7, %v3563_v61  ;;  %v3539_v6 = vld [vmem:[#allocation3 + $0x67] sm:$0xff] }
 0x3d5   : > { %v3578_v22 = vld [vmem:[#allocation3 + $0x62] sm:$0xff]  ;;  %v9360_v63 = vpack.i.bf16 %v3539_v6, %v3537_v31 }
 0x3d6   : > { %v9355_v3 = vpack.i.bf16 %v3578_v22, %v3577_v15  ;;  %v3552_v18 = vld [vmem:[#allocation3 + $0x68] sm:$0xff]  ;;  %v3551_v20 = vld [vmem:[#allocation3 + $0x60] sm:$0xff] }
 0x3d7   : > { %9291 = vrot.lane.b32.xlu0 %v9290_v26, %s13058_s29  ;;  %v3565_v10 = vld [vmem:[#allocation3 + $0x69] sm:$0xff]  ;;  %v9365_v25 = vpack.i.bf16 %v3552_v18, %v3551_v20  ;;  %v3580_v29 = vld [vmem:[#allocation3 + $0x72] sm:$0xff] }
 0x3d8   : > { %9286 = vrot.lane.b32.xlu1 %v9285_v46, %s13061_s10  ;;  %v9370_v30 = vpack.i.bf16 %v3565_v10, %v3564_v7  ;;  %v3579_v27 = vld [vmem:[#allocation3 + $0x6a] sm:$0xff]  ;;  %v3525_v54 = vld [vmem:[#allocation3 + $0x66] sm:$0xf] }
 0x3d9   : > { %v9380_v5 = vpack.i.bf16 %v3580_v29, %v3579_v27  ;;  %v3567_v9 = vld [vmem:[#allocation3 + $0x71] sm:$0xff]  ;;  %v3538_v4 = vld [vmem:[#allocation3 + $0x67] sm:$0xf] }
 0x3da   : > { %v9375_v12 = vpack.i.bf16 %v3567_v9, %v3565_v10  ;;  %v3553_v19 = vld [vmem:[#allocation3 + $0x70] sm:$0xf] }
 0x3db   : > { %9301 = vrot.lane.b32.xlu0 %v9300_v34, %s13059_s7  ;;  %v3540_v32 = vld [vmem:[#allocation3 + $0x6f] sm:$0xf] }
 0x3dc   : > { %9296 = vrot.lane.b32.xlu1 %v9295_v48, %s13057_s12  ;;  %v3566_v24 = vld [vmem:[#allocation3 + $0x71] sm:$0xf] }
 0x3df   : > { %9311 = vrot.lane.b32.xlu0 %v9310_v60, %s13009_s0 }
 0x3e0   : > { %9306 = vrot.lane.b32.xlu1 %v9305_v51, %s13007_s28 }
 0x3e3   : > { %9321 = vrot.lane.b32.xlu0 %v9320_v56, %s13061_s10 }
 0x3e4   : > { %9316 = vrot.lane.b32.xlu1 %v9315_v16, %s13060_s8 }
 0x3e7   : > { %9331 = vrot.lane.b32.xlu0 %v9330_v36, %s13057_s12 }
 0x3e8   : > { %9326 = vrot.lane.b32.xlu1 %v9325_v62, %s13058_s29 }
 0x3eb   : > { %9341 = vrot.lane.b32.xlu0 %v9340_v0, %s13007_s28 }
 0x3ec   : > { %9336 = vrot.lane.b32.xlu1 %v9335_v55, %s13059_s7 }
 0x3ef   : > { %9351 = vrot.lane.b32.xlu0 %v9350_v11, %s13060_s8 }
 0x3f0   : > { %9346 = vrot.lane.b32.xlu1 %v9345_v13, %s13009_s0 }
 0x3f3   : > { %9361 = vrot.lane.b32.xlu0 %v9360_v63, %s13058_s29 }
 0x3f4   : > { %9356 = vrot.lane.b32.xlu1 %v9355_v3, %s13061_s10 }
 0x3f7   : > { %9371 = vrot.lane.b32.xlu0 %v9370_v30, %s13059_s7 }
 0x3f8   : > { %9366 = vrot.lane.b32.xlu1 %v9365_v25, %s13057_s12 }
 0x3fb   : > { %9381 = vrot.lane.b32.xlu0 %v9380_v5, %s13061_s10  ;;  %v3583_v5 = vld [vmem:[#allocation3 + $0x23] sm:$0xff] }
 0x3fc   : > { %3632 = vrot.lane.b32.xlu1 %v3525_v54, %s13007_s28  ;;  %s13063_s28 = smov %s13062_s30  ;;  %s13075_s30 = sld [smem:[#allocation34_spill]] }
 0x3fd   : > { %v4236_v38 = vld [vmem:[%s13063_s28 + $0x8] sm:$0xff]  ;;  %v4238_v45 = vld [vmem:[%s13063_s28 + $0x18] sm:$0xff]  ;;  %v4237_v39 = vld [vmem:[%s13063_s28 + $0x10] sm:$0xff] }
 0x3fe   : > { %v4240_v41 = vld [vmem:[%s13063_s28 + $0x28] sm:$0xff]  ;;  %v4239_v8 = vld [vmem:[%s13063_s28 + $0x20] sm:$0xff]  ;;  %v4242_v43 = vld [vmem:[%s13063_s28 + $0x38] sm:$0xff] }
 0x3ff   : > { %3684 = vrot.lane.b32.xlu0 %v3538_v4, %s13009_s0  ;;  %v4241_v58 = vld [vmem:[%s13063_s28 + $0x30] sm:$0xff]  ;;  %v4244_v26 = vld [vmem:[%s13063_s28 + $0x48] sm:$0xff]  ;;  %v4243_v46 = vld [vmem:[%s13063_s28 + $0x40] sm:$0xff] }
 0x400   : > { %9376 = vrot.lane.b32.xlu1 %v9375_v12, %s13060_s8  ;;  %v4246_v28 = vld [vmem:[%s13063_s28 + $0x58] sm:$0xff]  ;;  %v4245_v34 = vld [vmem:[%s13063_s28 + $0x50] sm:$0xff]  ;;  %v4247_v60 = vld [vmem:[%s13063_s28 + $0x60] sm:$0xf]  ;;  %s13071_s28 = sld [smem:[#allocation27_spill]] }
 0x403   : > { %3777 = vrot.lane.b32.xlu0 %v3553_v19, %s13057_s12 }
 0x404   : > { %3725 = vrot.lane.b32.xlu1 %v3540_v32, %s13058_s29 }
 0x407   : > { %3870 = vrot.lane.b32.xlu0 %v3568_v33, %s13060_s8  ;;  %v3502_v33 = vld [vmem:[#allocation3 + $0x15] sm:$0xff] }
 0x408   : > { %3829 = vrot.lane.b32.xlu1 %v3566_v24, %s13059_s7 }
 0x40b   : > { %4250 = vperm.xlu0 %9385, %v4235_v37  }
 0x40c   : > { %3922 = vrot.lane.b32.xlu1 %v3581_v35, %s13061_s10 }
 0x40f   : > { %4265 = vperm.xlu0 %9385, %v4238_v45  }
 0x410   : > { %4255 = vperm.xlu1 %9386, %v4236_v38  }
 0x413   : > { %4275 = vperm.xlu0 %9385, %v4240_v41  }
 0x414   : > { %4260 = vperm.xlu1 %9386, %v4237_v39  }
 0x417   : > { %4285 = vperm.xlu0 %9385, %v4242_v43   ;;  %v3503_v43 = vld [vmem:[#allocation3 + $0x1d] sm:$0xff] }
 0x418   : > { %4270 = vperm.xlu1 %9386, %v4239_v8   ;;  %v3584_v8 = vld [vmem:[#allocation3 + $0x2b] sm:$0xff] }
 0x41b   : > { %4295 = vperm.xlu0 %9385, %v4244_v26  }
 0x41c   : > { %4280 = vperm.xlu1 %9386, %v4241_v58   ;;  %v9182_v21 = vpop.permute.xlu0 %9181 }
 0x41d   : > { %v9177_v47 = vpop.permute.xlu1 %9176  ;;  %v9183_v51 = vunpack.i.l.bf16 %v9182_v21  ;;  %v9184_v57 = vunpack.i.h.bf16 %v9182_v21 }
 0x41e   : > { %v9178_v14 = vunpack.i.l.bf16 %v9177_v47  ;;  %v9179_v53 = vunpack.i.h.bf16 %v9177_v47 }
 0x41f   : > { %4305 = vperm.xlu0 %9385, %v4246_v28  }
 0x420   : > { %4290 = vperm.xlu1 %9386, %v4243_v46   ;;  %v9192_v48 = vpop.permute.xlu0 %9191  ;;  %v3937_v56 = vsel %vm844_vm0, %v3500_v40, %v9178_v14  ;;  %v3938_v61 = vsel %vm844_vm0, %v3501_v59, %v9179_v53 }
 0x421   : > { %v9187_v49 = vpop.permute.xlu1 %9186  ;;  %v9193_v42 = vunpack.i.l.bf16 %v9192_v48  ;;  %v3950_v36 = vsel %vm939_vm1, %v3937_v56, %v9183_v51  ;;  %v9194_v31 = vunpack.i.h.bf16 %v9192_v48  ;;  %v3951_v11 = vsel %vm939_vm1, %v3938_v61, %v9184_v57 }
 0x422   : > { %v9188_v16 = vunpack.i.l.bf16 %v9187_v49  ;;  %v9189_v17 = vunpack.i.h.bf16 %v9187_v49 }
 0x424   : > { %4300 = vperm.xlu1 %9386, %v4245_v34   ;;  %v3963_v0 = vsel %vm2475_vm2, %v3950_v36, %v9188_v16  ;;  %v3964_v15 = vsel %vm2475_vm2, %v3951_v11, %v9189_v17 }
 0x425   : > { %v9202_v52 = vpop.permute.xlu0 %9201  ;;  %v3976_v13 = vsel %vm2517_vm3, %v3963_v0, %v9193_v42  ;;  %v3977_v54 = vsel %vm2517_vm3, %v3964_v15, %v9194_v31  ;;  %v3504_v0 = vld [vmem:[#allocation3 + $0x25] sm:$0xff] }
 0x426   : > { %v9197_v44 = vpop.permute.xlu1 %9196  ;;  %v9203_v25 = vunpack.i.l.bf16 %v9202_v52  ;;  %v9204_v4 = vunpack.i.h.bf16 %v9202_v52 }
 0x427   : > { %v9198_v55 = vunpack.i.l.bf16 %v9197_v44  ;;  %v9199_v63 = vunpack.i.h.bf16 %v9197_v44 }
 0x428   : > { %4310 = vperm.xlu1 %9386, %v4247_v60   ;;  %v3939_v38 = vsel %vm844_vm0, %v3502_v33, %v9203_v25  ;;  %v3940_v46 = vsel %vm844_vm0, %v3503_v43, %v9204_v4  ;;  %v3587_v43 = vld [vmem:[#allocation3 + $0x43] sm:$0xff] }
 0x429   : > { %v9212_v62 = vpop.permute.xlu0 %9211  ;;  %v3989_v3 = vsel %vm2559_vm4, %v3976_v13, %v9198_v55  ;;  %v3990_v12 = vsel %vm2559_vm4, %v3977_v54, %v9199_v63  ;;  %v3505_v63 = vld [vmem:[#allocation3 + $0x2d] sm:$0xff] }
 0x42a   : > { %v9207_v50 = vpop.permute.xlu1 %9206  ;;  %v9213_v7 = vunpack.i.l.bf16 %v9212_v62  ;;  %v9214_v18 = vunpack.i.h.bf16 %v9212_v62 }
 0x42b   : > { %v9208_v9 = vunpack.i.l.bf16 %v9207_v50  ;;  %v9209_v24 = vunpack.i.h.bf16 %v9207_v50  ;;  %v3585_v50 = vld [vmem:[#allocation3 + $0x33] sm:$0xff] }
 0x42c   : > { %v4002_v20 = vsel %vm2601_vm6, %v3989_v3, %v9213_v7  ;;  %v4003_v32 = vsel %vm2601_vm6, %v3990_v12, %v9214_v18 }
 0x42d   : > { %v9222_v6 = vpop.permute.xlu0 %9221  ;;  %v3952_v58 = vsel %vm939_vm1, %v3939_v38, %v9208_v9  ;;  %v3953_v47 = vsel %vm939_vm1, %v3940_v46, %v9209_v24 }
 0x42e   : > { %v9217_v22 = vpop.permute.xlu1 %9216  ;;  %v9223_v19 = vunpack.i.l.bf16 %v9222_v6  ;;  %v9224_v45 = vunpack.i.h.bf16 %v9222_v6 }
 0x42f   : > { %v9218_v10 = vunpack.i.l.bf16 %v9217_v22  ;;  %v9219_v23 = vunpack.i.h.bf16 %v9217_v22  ;;  %v3586_v22 = vld [vmem:[#allocation3 + $0x3b] sm:$0xff] }
 0x430   : > { %v3965_v28 = vsel %vm2475_vm2, %v3952_v58, %v9223_v19  ;;  %v3966_v48 = vsel %vm2475_vm2, %v3953_v47, %v9224_v45 }
 0x431   : > { %v4015_v30 = vsel %vm2643_vm7, %v4002_v20, %v9218_v10  ;;  %v9232_v27 = vpop.permute.xlu0 %9231  ;;  %v4016_v37 = vsel %vm2643_vm7, %v4003_v32, %v9219_v23 }
 0x432   : > { %v9227_v29 = vpop.permute.xlu1 %9226  ;;  %4157 = vmatmul.mubr.f32.vlgmr.msra.gmra.mrb[52].mxu1 %v4015_v30  ;;  %v9233_v21 = vunpack.i.l.bf16 %v9232_v27  ;;  %v9234_v49 = vunpack.i.h.bf16 %v9232_v27 }
 0x433   : > { %7501 = vmatprep.mubr.msk.f32.mxu1 %vm844_vm0, %v3583_v5  ;;  %v9228_v35 = vunpack.i.l.bf16 %v9227_v29  ;;  %v9229_v26 = vunpack.i.h.bf16 %v9227_v29 }
 0x435   : > { %v9242_v39 = vpop.permute.xlu0 %9241  ;;  %v3978_v34 = vsel %vm2517_vm3, %v3965_v28, %v9228_v35  ;;  %v3979_v60 = vsel %vm2517_vm3, %v3966_v48, %v9229_v26 }
 0x436   : > { %v9237_v41 = vpop.permute.xlu1 %9236  ;;  %4162 = vmatmul.mubr.f32.gmra.mrb[54].mxu1 %v4016_v37  ;;  %v3991_v53 = vsel %vm2559_vm4, %v3978_v34, %v9233_v21  ;;  %v3992_v36 = vsel %vm2559_vm4, %v3979_v60, %v9234_v49  ;;  %v9243_v17 = vunpack.i.l.bf16 %v9242_v39  ;;  %v9244_v15 = vunpack.i.h.bf16 %v9242_v39  ;;  %v3506_v34 = vld [vmem:[#allocation3 + $0x35] sm:$0xff] }
 0x437   : > { %7502 = vmatprep.mubr.msk.f32.mxu1 %vm844_vm0, %v3584_v8  ;;  %v9238_v62 = vunpack.i.l.bf16 %v9237_v41  ;;  %v9239_v11 = vunpack.i.h.bf16 %v9237_v41 }
 0x439   : > { %v9252_v14 = vpop.permute.xlu0 %9251  ;;  %v3941_v13 = vsel %vm844_vm0, %v3504_v0, %v9238_v62  ;;  %v3942_v23 = vsel %vm844_vm0, %v3505_v63, %v9239_v11 }
 0x43a   : > { %v9247_v40 = vpop.permute.xlu1 %9246  ;;  %v9253_v51 = vunpack.i.l.bf16 %v9252_v14  ;;  %v9254_v16 = vunpack.i.h.bf16 %v9252_v14  ;;  %v3954_v10 = vsel %vm939_vm1, %v3941_v13, %v9243_v17  ;;  %v3955_v54 = vsel %vm939_vm1, %v3942_v23, %v9244_v15 }
 0x43b   : > { %v9249_v52 = vunpack.i.h.bf16 %v9247_v40  ;;  %v9248_v44 = vunpack.i.l.bf16 %v9247_v40 }
 0x43d   : > { %v4004_v56 = vsel %vm2601_vm6, %v3991_v53, %v9248_v44  ;;  %v9262_v57 = vpop.permute.xlu0 %9261  ;;  %v4005_v61 = vsel %vm2601_vm6, %v3992_v36, %v9249_v52  ;;  %v3588_v44 = vld [vmem:[#allocation3 + $0x4b] sm:$0xff]  ;;  %v3507_v53 = vld [vmem:[#allocation3 + $0x3d] sm:$0xff] }
 0x43e   : > { %v9257_v59 = vpop.permute.xlu1 %9256  ;;  %v4017_v42 = vsel %vm2643_vm7, %v4004_v56, %v9253_v51  ;;  %v4018_v31 = vsel %vm2643_vm7, %v4005_v61, %v9254_v16  ;;  %v9263_v3 = vunpack.i.l.bf16 %v9262_v57  ;;  %v9264_v5 = vunpack.i.h.bf16 %v9262_v57 }
 0x43f   : > { %4167 = vmatmul.mubr.f32.gmra.mrb[56].mxu1 %v4017_v42  ;;  %v9258_v6 = vunpack.i.l.bf16 %v9257_v59  ;;  %v9259_v30 = vunpack.i.h.bf16 %v9257_v59 }
 0x440   : > { %7503 = vmatprep.mubr.msk.f32.mxu1 %vm844_vm0, %v3585_v50 }
 0x441   : > { %v9272_v55 = vpop.permute.xlu0 %9271  ;;  %v3967_v25 = vsel %vm2475_vm2, %v3954_v10, %v9258_v6  ;;  %v3968_v19 = vsel %vm2475_vm2, %v3955_v54, %v9259_v30 }
 0x442   : > { %v9267_v7 = vpop.permute.xlu1 %9266  ;;  %v3980_v4 = vsel %vm2517_vm3, %v3967_v25, %v9263_v3  ;;  %v9273_v39 = vunpack.i.l.bf16 %v9272_v55  ;;  %v3981_v58 = vsel %vm2517_vm3, %v3968_v19, %v9264_v5  ;;  %v9274_v28 = vunpack.i.h.bf16 %v9272_v55  ;;  %v3508_v25 = vld [vmem:[#allocation3 + $0x45] sm:$0xff] }
 0x443   : > { %4172 = vmatmul.mubr.f32.gmra.mrb[58].mxu1 %v4018_v31  ;;  %v9268_v27 = vunpack.i.l.bf16 %v9267_v7  ;;  %v9269_v32 = vunpack.i.h.bf16 %v9267_v7 }
 0x444   : > { %7504 = vmatprep.mubr.msk.f32.mxu1 %vm844_vm0, %v3586_v22  ;;  %v3943_v40 = vsel %vm844_vm0, %v3506_v34, %v9273_v39  ;;  %v3944_v57 = vsel %vm844_vm0, %v3507_v53, %v9274_v28  ;;  %v3591_v53 = vld [vmem:[#allocation3 + $0x63] sm:$0xff] }
 0x445   : > { %v9282_v18 = vpop.permute.xlu0 %9281  ;;  %v3993_v24 = vsel %vm2559_vm4, %v3980_v4, %v9268_v27  ;;  %v3994_v46 = vsel %vm2559_vm4, %v3981_v58, %v9269_v32  ;;  %v3590_v4 = vld [vmem:[#allocation3 + $0x5b] sm:$0xff]  ;;  %v3509_v32 = vld [vmem:[#allocation3 + $0x4d] sm:$0xff] }
 0x446   : > { %v9277_v20 = vpop.permute.xlu1 %9276  ;;  %v9283_v29 = vunpack.i.l.bf16 %v9282_v18  ;;  %v9284_v35 = vunpack.i.h.bf16 %v9282_v18 }
 0x447   : > { %v9278_v26 = vunpack.i.l.bf16 %v9277_v20  ;;  %v9279_v48 = vunpack.i.h.bf16 %v9277_v20  ;;  %v3589_v20 = vld [vmem:[#allocation3 + $0x53] sm:$0xff] }
 0x448   : > { %v4006_v37 = vsel %vm2601_vm6, %v3993_v24, %v9283_v29  ;;  %v4007_v47 = vsel %vm2601_vm6, %v3994_v46, %v9284_v35 }
 0x449   : > { %v9292_v9 = vpop.permute.xlu0 %9291  ;;  %v3956_v56 = vsel %vm939_vm1, %v3943_v40, %v9278_v26  ;;  %v3957_v36 = vsel %vm939_vm1, %v3944_v57, %v9279_v48 }
 0x44a   : > { %v9287_v12 = vpop.permute.xlu1 %9286  ;;  %v9293_v21 = vunpack.i.l.bf16 %v9292_v9  ;;  %v9294_v60 = vunpack.i.h.bf16 %v9292_v9 }
 0x44b   : > { %v9288_v33 = vunpack.i.l.bf16 %v9287_v12  ;;  %v9289_v38 = vunpack.i.h.bf16 %v9287_v12 }
 0x44c   : > { %v3969_v59 = vsel %vm2475_vm2, %v3956_v56, %v9293_v21  ;;  %v3970_v50 = vsel %vm2475_vm2, %v3957_v36, %v9294_v60 }
 0x44d   : > { %v4019_v45 = vsel %vm2643_vm7, %v4006_v37, %v9288_v33  ;;  %v9302_v41 = vpop.permute.xlu0 %9301  ;;  %v4020_v14 = vsel %vm2643_vm7, %v4007_v47, %v9289_v38 }
 0x44e   : > { %v9297_v8 = vpop.permute.xlu1 %9296  ;;  %4177 = vmatmul.mubr.f32.gmra.mrb[60].mxu1 %v4019_v45  ;;  %v9303_v42 = vunpack.i.l.bf16 %v9302_v41  ;;  %v9304_v61 = vunpack.i.h.bf16 %v9302_v41 }
 0x44f   : > { %7505 = vmatprep.mubr.msk.f32.mxu1 %vm844_vm0, %v3587_v43  ;;  %v9298_v49 = vunpack.i.l.bf16 %v9297_v8  ;;  %v9299_v16 = vunpack.i.h.bf16 %v9297_v8 }
 0x451   : > { %v9312_v51 = vpop.permute.xlu0 %9311  ;;  %v3982_v62 = vsel %vm2517_vm3, %v3969_v59, %v9298_v49  ;;  %v3983_v55 = vsel %vm2517_vm3, %v3970_v50, %v9299_v16 }
 0x452   : > { %v9307_v52 = vpop.permute.xlu1 %9306  ;;  %4182 = vmatmul.mubr.f32.gmra.mrb[62].mxu1 %v4020_v14  ;;  %v3995_v13 = vsel %vm2559_vm4, %v3982_v62, %v9303_v42  ;;  %v3996_v10 = vsel %vm2559_vm4, %v3983_v55, %v9304_v61  ;;  %v9313_v30 = vunpack.i.l.bf16 %v9312_v51  ;;  %v9314_v19 = vunpack.i.h.bf16 %v9312_v51  ;;  %v3510_v62 = vld [vmem:[#allocation3 + $0x55] sm:$0xff] }
 0x453   : > { %7506 = vmatprep.mubr.msk.f32.mxu1 %vm844_vm0, %v3588_v44  ;;  %v9308_v18 = vunpack.i.l.bf16 %v9307_v52  ;;  %v9309_v54 = vunpack.i.h.bf16 %v9307_v52 }
 0x455   : > { %v9322_v17 = vpop.permute.xlu0 %9321  ;;  %v3945_v9 = vsel %vm844_vm0, %v3508_v25, %v9308_v18  ;;  %v3946_v38 = vsel %vm844_vm0, %v3509_v32, %v9309_v54 }
 0x456   : > { %v9317_v0 = vpop.permute.xlu1 %9316  ;;  %v9323_v7 = vunpack.i.l.bf16 %v9322_v17  ;;  %v9324_v22 = vunpack.i.h.bf16 %v9322_v17  ;;  %v3958_v24 = vsel %vm939_vm1, %v3945_v9, %v9313_v30  ;;  %v3959_v58 = vsel %vm939_vm1, %v3946_v38, %v9314_v19  ;;  %v3512_v9 = vld [vmem:[#allocation3 + $0x65] sm:$0xf] }
 0x457   : > { %v9319_v31 = vunpack.i.h.bf16 %v9317_v0  ;;  %v9318_v11 = vunpack.i.l.bf16 %v9317_v0 }
 0x459   : > { %v4008_v6 = vsel %vm2601_vm6, %v3995_v13, %v9318_v11  ;;  %v9332_v15 = vpop.permute.xlu0 %9331  ;;  %v4009_v23 = vsel %vm2601_vm6, %v3996_v10, %v9319_v31  ;;  %v3592_v11 = vld [vmem:[#allocation3 + $0x6b] sm:$0xff]  ;;  %v3511_v13 = vld [vmem:[#allocation3 + $0x5d] sm:$0xff] }
 0x45a   : > { %v9327_v63 = vpop.permute.xlu1 %9326  ;;  %v4021_v3 = vsel %vm2643_vm7, %v4008_v6, %v9323_v7  ;;  %v4022_v5 = vsel %vm2643_vm7, %v4009_v23, %v9324_v22  ;;  %v9333_v33 = vunpack.i.l.bf16 %v9332_v15  ;;  %v9334_v43 = vunpack.i.h.bf16 %v9332_v15 }
 0x45b   : > { %4187 = vmatmul.mubr.f32.gmra.mrb[64].mxu1 %v4021_v3  ;;  %v9328_v12 = vunpack.i.l.bf16 %v9327_v63  ;;  %v9329_v45 = vunpack.i.h.bf16 %v9327_v63 }
 0x45c   : > { %7507 = vmatprep.mubr.msk.f32.mxu1 %vm844_vm0, %v3589_v20 }
 0x45d   : > { %v9342_v27 = vpop.permute.xlu0 %9341  ;;  %v3971_v39 = vsel %vm2475_vm2, %v3958_v24, %v9328_v12  ;;  %v3972_v21 = vsel %vm2475_vm2, %v3959_v58, %v9329_v45  ;;  %v3593_v45 = vld [vmem:[#allocation3 + $0x73] sm:$0xff] }
 0x45e   : > { %v9337_v29 = vpop.permute.xlu1 %9336  ;;  %v3984_v28 = vsel %vm2517_vm3, %v3971_v39, %v9333_v33  ;;  %v9343_v51 = vunpack.i.l.bf16 %v9342_v27  ;;  %v3985_v56 = vsel %vm2517_vm3, %v3972_v21, %v9334_v43  ;;  %v9344_v59 = vunpack.i.h.bf16 %v9342_v27 }
 0x45f   : > { %4192 = vmatmul.mubr.f32.gmra.mrb[66].mxu1 %v4022_v5  ;;  %v9338_v41 = vunpack.i.l.bf16 %v9337_v29  ;;  %v9339_v47 = vunpack.i.h.bf16 %v9337_v29 }
 0x460   : > { %7508 = vmatprep.mubr.msk.f32.mxu1 %vm844_vm0, %v3590_v4  ;;  %v3947_v0 = vsel %vm844_vm0, %v3510_v62, %v9343_v51  ;;  %v3948_v15 = vsel %vm844_vm0, %v3511_v13, %v9344_v59 }
 0x461   : > { %v9352_v35 = vpop.permute.xlu0 %9351  ;;  %v3997_v48 = vsel %vm2559_vm4, %v3984_v28, %v9338_v41  ;;  %v3998_v57 = vsel %vm2559_vm4, %v3985_v56, %v9339_v47 }
 0x462   : > { %v9347_v37 = vpop.permute.xlu1 %9346  ;;  %v9353_v8 = vunpack.i.l.bf16 %v9352_v35  ;;  %v9354_v49 = vunpack.i.h.bf16 %v9352_v35 }
 0x463   : > { %v9348_v16 = vunpack.i.l.bf16 %v9347_v37  ;;  %v9349_v50 = vunpack.i.h.bf16 %v9347_v37 }
 0x464   : > { %v4010_v14 = vsel %vm2601_vm6, %v3997_v48, %v9353_v8  ;;  %v4011_v36 = vsel %vm2601_vm6, %v3998_v57, %v9354_v49  ;;  %v3594_v8 = vld [vmem:[#allocation3 + $0x7b] sm:$0xf]  ;;  %v4326_v48 = vld [vmem:[%s13064_s26] sm:$0xff] }
 0x465   : > { %v9362_v26 = vpop.permute.xlu0 %9361  ;;  %v3960_v6 = vsel %vm939_vm1, %v3947_v0, %v9348_v16  ;;  %v3961_v10 = vsel %vm939_vm1, %v3948_v15, %v9349_v50  ;;  %v4327_v49 = vld [vmem:[%s13064_s26 + $0x8] sm:$0xff]  ;;  %v4700_v50 = vld [vmem:[#allocation4 + $0x7] sm:$0xff]  ;;  %s7441_s26 = sshll.u32 %s13020_s3, 6 }
 0x466   : > { %v9357_v46 = vpop.permute.xlu1 %9356  ;;  %v9363_v42 = vunpack.i.l.bf16 %v9362_v26  ;;  %v9364_v55 = vunpack.i.h.bf16 %v9362_v26 }
 0x467   : > { %v9358_v34 = vunpack.i.l.bf16 %v9357_v46  ;;  %v9359_v40 = vunpack.i.h.bf16 %v9357_v46 }
 0x468   : > { %v3973_v63 = vsel %vm2475_vm2, %v3960_v6, %v9363_v42  ;;  %v3974_v20 = vsel %vm2475_vm2, %v3961_v10, %v9364_v55 }
 0x469   : > { %v4023_v60 = vsel %vm2643_vm7, %v4010_v14, %v9358_v34  ;;  %v9372_v52 = vpop.permute.xlu0 %9371  ;;  %v4024_v17 = vsel %vm2643_vm7, %v4011_v36, %v9359_v40  ;;  %v8179_v14 = vpack.c.bf16 %v4327_v49, %v4326_v48  ;;  %v11588_v40 = vld [vmem:[%s13065_s1] ss:$0 sm:$0xff]  ;;  %s13070_s1 = sld [smem:[#allocation29_spill]] }
 0x46a   : > { %v9367_v44 = vpop.permute.xlu1 %9366  ;;  %4197 = vmatmul.mubr.f32.gmra.mrb[68].mxu1 %v4023_v60  ;;  %v9373_v3 = vunpack.i.l.bf16 %v9372_v52  ;;  %v9374_v23 = vunpack.i.h.bf16 %v9372_v52 }
 0x46b   : > { %7509 = vmatprep.mubr.msk.f32.mxu1 %vm844_vm0, %v3591_v53  ;;  %v9368_v61 = vunpack.i.l.bf16 %v9367_v44  ;;  %v9369_v22 = vunpack.i.h.bf16 %v9367_v44  ;;  %8180 = vmatpush3.bf16.msra.mxu1 %v8179_v14 }
 0x46c   : > { %8232 = vmatprep.subr.bf16.mxu1 %v9932_v2 }
 0x46d   : > { %v9382_v7 = vpop.permute.xlu0 %9381  ;;  %v3986_v18 = vsel %vm2517_vm3, %v3973_v63, %v9368_v61  ;;  %v3987_v27 = vsel %vm2517_vm3, %v3974_v20, %v9369_v22  ;;  %v4687_v61 = vld [vmem:[#allocation4 + $0x6] sm:$0xff] }
 0x46e   : > { %v3633_v31 = vpop.permute.xlu1 %3632  ;;  %4202 = vmatmul.mubr.f32.gmra.mrb[70].mxu1 %v4024_v17  ;;  %v9383_v54 = vunpack.i.l.bf16 %v9382_v7  ;;  %v3999_v12 = vsel %vm2559_vm4, %v3986_v18, %v9373_v3  ;;  %v4000_v37 = vsel %vm2559_vm4, %v3987_v27, %v9374_v23  ;;  %v9384_v41 = vunpack.i.h.bf16 %v9382_v7 }
 0x46f   : > { %7510 = vmatprep.mubr.msk.f32.mxu1 %vm844_vm0, %v3592_v11  ;;  %v3949_v4 = vsel %vm844_vm0, %v3512_v9, %v3633_v31 }
 0x471   : > { %v3685_v30 = vpop.permute.xlu0 %3684 }
 0x472   : > { %v9377_v25 = vpop.permute.xlu1 %9376  ;;  %v3962_v32 = vsel %vm939_vm1, %v3949_v4, %v3685_v30 }
 0x473   : > { %v9379_v29 = vunpack.i.h.bf16 %v9377_v25  ;;  %v9378_v5 = vunpack.i.l.bf16 %v9377_v25 }
 0x475   : > { %v4012_v19 = vsel %vm2601_vm6, %v3999_v12, %v9378_v5  ;;  %v3778_v33 = vpop.permute.xlu0 %3777  ;;  %v4013_v39 = vsel %vm2601_vm6, %v4000_v37, %v9379_v29 }
 0x476   : > { %v3726_v24 = vpop.permute.xlu1 %3725  ;;  %v4025_v35 = vsel %vm2643_vm7, %v4012_v19, %v9383_v54  ;;  %v4026_v26 = vsel %vm2643_vm7, %v4013_v39, %v9384_v41 }
 0x477   : > { %v3975_v38 = vsel %vm2475_vm2, %v3962_v32, %v3726_v24  ;;  %4207 = vmatmul.mubr.f32.gmra.mrb[72].mxu1 %v4025_v35 }
 0x478   : > { %7511 = vmatprep.mubr.msk.f32.mxu1 %vm844_vm0, %v3593_v45  ;;  %v3988_v43 = vsel %vm2517_vm3, %v3975_v38, %v3778_v33 }
 0x479   : > { %v3871_v28 = vpop.permute.xlu0 %3870 }
 0x47a   : > { %v3830_v58 = vpop.permute.xlu1 %3829 }
 0x47b   : > { %v4001_v46 = vsel %vm2559_vm4, %v3988_v43, %v3830_v58  ;;  %4212 = vmatmul.mubr.f32.gmra.mrb[74].mxu1 %v4026_v26 }
 0x47c   : > { %7512 = vmatprep.mubr.msk.f32.mxu1 %vm844_vm0, %v3594_v8  ;;  %v4014_v21 = vsel %vm2601_vm6, %v4001_v46, %v3871_v28 }
 0x47e   : > { %v3923_v47 = vpop.permute.xlu1 %3922 }
 0x47f   : > { %v4027_v34 = vsel %vm2643_vm7, %v4014_v21, %v3923_v47 }
 0x480   : > { %4217 = vmatmul.mubr.f32.gmra.mrb[76].mxu1 %v4027_v34 }
 0x481   : > { %7919 = vmatprep.mubr.msk.f32.mxu1 %vm9940_vm9, %v9931_v1 }
 0x48a   : > { %v4251_v44 = vpop.permute.xlu0 %4250 }
 0x48e   : > { %v4266_v29 = vpop.permute.xlu0 %4265 }
 0x48f   : > { %v4256_v42 = vpop.permute.xlu1 %4255 }
 0x492   : > { %v4276_v48 = vpop.permute.xlu0 %4275 }
 0x493   : > { %v4261_v11 = vpop.permute.xlu1 %4260 }
 0x497   : > { %v4271_v39 = vpop.permute.xlu1 %4270 }
 0x505   : > { %v4158_v60 = vpop.f32.mrb[52].mxu1 }
 0x506   : > { %v4159_v51 = vadd.f32 %v11588_v40, %v4158_v60  ;;  %v4160_v52 = vpop.f32.mrb[53].mxu1 }
 0x508   : > { %v4222_v53 = vmax.f32 %v4159_v51, 0.0 }
 0x509   : > { %v4163_v56 = vpop.f32.mrb[54].mxu1 }
 0x50a   : > { %v4313_v16 = vmul.f32 %v4251_v44, %v4222_v53  ;;  %v4164_v57 = vadd.f32 %v11588_v40, %v4163_v56  ;;  %v4165_v59 = vpop.f32.mrb[55].mxu1 }
 0x50c   : > { %4661 = vst.msk [vmem:[#allocation4 + $0x10] sm:$0xff] %vm844_vm0, %v4313_v16  ;;  %v4223_v36 = vmax.f32 %v4164_v57, 0.0  ;;  %7920 = vmatmul.mubr.msk.f32.vlgmr.msra.gmra.mrb[78].mxu1 %vm844_vm0, %v4313_v16 }
 0x50d   : > { %7922 = vmatprep.mubr.msk.f32.mxu1 %vm9940_vm9, %v9931_v1 }
 0x50e   : > { %v4314_v62 = vmul.f32 %v4256_v42, %v4223_v36 }
 0x510   : > { %4662 = vst.msk [vmem:[#allocation4 + $0x18] sm:$0xff] %vm844_vm0, %v4314_v62  ;;  %7923 = vmatmul.mubr.msk.f32.gmra.mrb[80].mxu1 %vm844_vm0, %v4314_v62 }
 0x511   : > { %7925 = vmatprep.mubr.msk.f32.mxu1 %vm9940_vm9, %v9931_v1 }
 0x512   : > { %v4168_v17 = vpop.f32.mrb[56].mxu1 }
 0x513   : > { %v4169_v0 = vadd.f32 %v11588_v40, %v4168_v17  ;;  %v4170_v55 = vpop.f32.mrb[57].mxu1  ;;  %v4701_v7 = vld [vmem:[#allocation4 + $0xf] sm:$0xff]  ;;  %v4281_v17 = vpop.permute.xlu1 %4280 }
 0x514   : > { %v4688_v31 = vld [vmem:[#allocation4 + $0xe] sm:$0xff]  ;;  %v9392_v13 = vpack.i.bf16 %v4701_v7, %v4700_v50 }
 0x515   : > { %v9387_v6 = vpack.i.bf16 %v4688_v31, %v4687_v61  ;;  %v4224_v22 = vmax.f32 %v4169_v0, 0.0  ;;  %v4715_v18 = vld [vmem:[#allocation4 + $0x10] sm:$0xff] }
 0x516   : > { %9393 = vrot.lane.b32.xlu1 %v9392_v13, %s13066_s4  ;;  %v4173_v15 = vpop.f32.mrb[58].mxu1 }
 0x517   : > { %9388 = vrot.lane.b32.xlu0 %v9387_v6, %s13067_s11  ;;  %v4315_v63 = vmul.f32 %v4261_v11, %v4224_v22  ;;  %v4174_v3 = vadd.f32 %v11588_v40, %v4173_v15  ;;  %v4175_v10 = vpop.f32.mrb[59].mxu1  ;;  %v4716_v20 = vld [vmem:[#allocation4 + $0x18] sm:$0xff] }
 0x518   : > { %v4702_v23 = vld [vmem:[#allocation4 + $0x17] sm:$0xff]  ;;  %v9402_v30 = vpack.i.bf16 %v4716_v20, %v4715_v18 }
 0x519   : > { %v9397_v25 = vpack.i.bf16 %v4702_v23, %v4701_v7  ;;  %4663 = vst.msk [vmem:[#allocation4 + $0x20] sm:$0xff] %vm844_vm0, %v4315_v63  ;;  %v4225_v27 = vmax.f32 %v4174_v3, 0.0  ;;  %7926 = vmatmul.mubr.msk.f32.gmra.mrb[82].mxu1 %vm844_vm0, %v4315_v63  ;;  %v4728_v54 = vld [vmem:[#allocation4 + $0x11] sm:$0xff]  ;;  %v4286_v63 = vpop.permute.xlu0 %4285 }
 0x51a   : > { %9403 = vrot.lane.b32.xlu1 %v9402_v30, %s13057_s12  ;;  %7928 = vmatprep.mubr.msk.f32.mxu1 %vm9940_vm9, %v9931_v1  ;;  %v4689_v12 = vld [vmem:[#allocation4 + $0x16] sm:$0xff] }
 0x51b   : > { %9398 = vrot.lane.b32.xlu0 %v9397_v25, %s13058_s29  ;;  %v4316_v5 = vmul.f32 %v4266_v29, %v4225_v27 }
 0x51d   : > { %4664 = vst.msk [vmem:[#allocation4 + $0x28] sm:$0xff] %vm844_vm0, %v4316_v5  ;;  %7929 = vmatmul.mubr.msk.f32.gmra.mrb[84].mxu1 %vm844_vm0, %v4316_v5 }
 0x51e   : > { %7931 = vmatprep.mubr.msk.f32.mxu1 %vm9940_vm9, %v9931_v1 }
 0x520   : > { %v4729_v9 = vld [vmem:[#allocation4 + $0x19] sm:$0xff] }
 0x521   : > { %v4690_v4 = vld [vmem:[#allocation4 + $0x1e] sm:$0xff]  ;;  %v4178_v19 = vpop.f32.mrb[60].mxu1  ;;  %v9407_v32 = vpack.i.bf16 %v4729_v9, %v4728_v54 }
 0x522   : > { %v9412_v33 = vpack.i.bf16 %v4690_v4, %v4689_v12  ;;  %v4179_v24 = vadd.f32 %v11588_v40, %v4178_v19  ;;  %v4180_v35 = vpop.f32.mrb[61].mxu1  ;;  %v4703_v37 = vld [vmem:[#allocation4 + $0x1f] sm:$0xff] }
 0x523   : > { %9408 = vrot.lane.b32.xlu0 %v9407_v32, %s13059_s7  ;;  %v9417_v8 = vpack.i.bf16 %v4703_v37, %v4702_v23  ;;  %v4743_v34 = vld [vmem:[#allocation4 + $0x1a] sm:$0xff]  ;;  %v4291_v35 = vpop.permute.xlu1 %4290 }
 0x524   : > { %9413 = vrot.lane.b32.xlu1 %v9412_v33, %s13067_s11  ;;  %v4226_v38 = vmax.f32 %v4179_v24, 0.0  ;;  %v4730_v45 = vld [vmem:[#allocation4 + $0x21] sm:$0xff] }
 0x525   : > { %v4183_v41 = vpop.f32.mrb[62].mxu1  ;;  %v9422_v43 = vpack.i.bf16 %v4730_v45, %v4729_v9  ;;  %v4744_v28 = vld [vmem:[#allocation4 + $0x22] sm:$0xff] }
 0x526   : > { %v4317_v58 = vmul.f32 %v4271_v39, %v4226_v38  ;;  %v4184_v26 = vadd.f32 %v11588_v40, %v4183_v41  ;;  %v4185_v46 = vpop.f32.mrb[63].mxu1  ;;  %v4704_v21 = vld [vmem:[#allocation4 + $0x27] sm:$0xff]  ;;  %v9427_v49 = vpack.i.bf16 %v4744_v28, %v4743_v34  ;;  %v4296_v28 = vpop.permute.xlu0 %4295 }
 0x527   : > { %9418 = vrot.lane.b32.xlu0 %v9417_v8, %s13066_s4  ;;  %v9432_v14 = vpack.i.bf16 %v4704_v21, %v4703_v37  ;;  %v4718_v51 = vld [vmem:[#allocation4 + $0x28] sm:$0xff]  ;;  %v4717_v52 = vld [vmem:[#allocation4 + $0x20] sm:$0xff] }
 0x528   : > { %9423 = vrot.lane.b32.xlu1 %v9422_v43, %s13060_s8  ;;  %4665 = vst.msk [vmem:[#allocation4 + $0x30] sm:$0xff] %vm844_vm0, %v4317_v58  ;;  %v4227_v47 = vmax.f32 %v4184_v26, 0.0  ;;  %7932 = vmatmul.mubr.msk.f32.gmra.mrb[86].mxu1 %vm844_vm0, %v4317_v58  ;;  %v9437_v44 = vpack.i.bf16 %v4718_v51, %v4717_v52  ;;  %v4691_v59 = vld [vmem:[#allocation4 + $0x26] sm:$0xff] }
 0x529   : > { %7934 = vmatprep.mubr.msk.f32.mxu1 %vm9940_vm9, %v9931_v1 }
 0x52a   : > { %v4318_v60 = vmul.f32 %v4276_v48, %v4227_v47 }
 0x52b   : > { %9428 = vrot.lane.b32.xlu0 %v9427_v49, %s13061_s10 }
 0x52c   : > { %9433 = vrot.lane.b32.xlu1 %v9432_v14, %s13058_s29  ;;  %4666 = vst.msk [vmem:[#allocation4 + $0x38] sm:$0xff] %vm844_vm0, %v4318_v60  ;;  %7935 = vmatmul.mubr.msk.f32.gmra.mrb[88].mxu1 %vm844_vm0, %v4318_v60 }
 0x52d   : > { %7937 = vmatprep.mubr.msk.f32.mxu1 %vm9940_vm9, %v9931_v1 }
 0x52e   : > { %v4188_v53 = vpop.f32.mrb[64].mxu1 }
 0x52f   : > { %v4189_v56 = vadd.f32 %v11588_v40, %v4188_v53  ;;  %v4190_v16 = vpop.f32.mrb[65].mxu1  ;;  %9438 = vrot.lane.b32.xlu0 %v9437_v44, %s13057_s12  ;;  %v4731_v57 = vld [vmem:[#allocation4 + $0x29] sm:$0xff] }
 0x530   : > { %v4692_v42 = vld [vmem:[#allocation4 + $0x2e] sm:$0xff]  ;;  %v9442_v36 = vpack.i.bf16 %v4731_v57, %v4730_v45 }
 0x531   : > { %v9447_v62 = vpack.i.bf16 %v4692_v42, %v4691_v59  ;;  %v4228_v50 = vmax.f32 %v4189_v56, 0.0  ;;  %v4705_v61 = vld [vmem:[#allocation4 + $0x2f] sm:$0xff] }
 0x532   : > { %v4193_v0 = vpop.f32.mrb[66].mxu1  ;;  %9443 = vrot.lane.b32.xlu1 %v9442_v36, %s13059_s7  ;;  %v9452_v13 = vpack.i.bf16 %v4705_v61, %v4704_v21  ;;  %v4745_v18 = vld [vmem:[#allocation4 + $0x2a] sm:$0xff] }
 0x533   : > { %v4319_v55 = vmul.f32 %v4281_v17, %v4228_v50  ;;  %v4194_v7 = vadd.f32 %v11588_v40, %v4193_v0  ;;  %v4195_v31 = vpop.f32.mrb[67].mxu1  ;;  %9448 = vrot.lane.b32.xlu0 %v9447_v62, %s13067_s11  ;;  %v4732_v11 = vld [vmem:[#allocation4 + $0x31] sm:$0xff]  ;;  %v4301_v62 = vpop.permute.xlu1 %4300 }
 0x534   : > { %v9457_v6 = vpack.i.bf16 %v4732_v11, %v4731_v57  ;;  %v4746_v15 = vld [vmem:[#allocation4 + $0x32] sm:$0xff] }
 0x535   : > { %4667 = vst.msk [vmem:[#allocation4 + $0x40] sm:$0xff] %vm844_vm0, %v4319_v55  ;;  %v4229_v22 = vmax.f32 %v4194_v7, 0.0  ;;  %7938 = vmatmul.mubr.msk.f32.gmra.mrb[90].mxu1 %vm844_vm0, %v4319_v55  ;;  %v4706_v3 = vld [vmem:[#allocation4 + $0x37] sm:$0xff]  ;;  %v9462_v20 = vpack.i.bf16 %v4746_v15, %v4745_v18 }
 0x536   : > { %9453 = vrot.lane.b32.xlu1 %v9452_v13, %s13066_s4  ;;  %7940 = vmatprep.mubr.msk.f32.mxu1 %vm9940_vm9, %v9931_v1  ;;  %v9467_v23 = vpack.i.bf16 %v4706_v3, %v4705_v61  ;;  %v4720_v30 = vld [vmem:[#allocation4 + $0x38] sm:$0xff]  ;;  %v4719_v25 = vld [vmem:[#allocation4 + $0x30] sm:$0xff] }
 0x537   : > { %v4320_v10 = vmul.f32 %v4286_v63, %v4229_v22  ;;  %9458 = vrot.lane.b32.xlu0 %v9457_v6, %s13060_s8  ;;  %v9472_v27 = vpack.i.bf16 %v4720_v30, %v4719_v25  ;;  %v4693_v32 = vld [vmem:[#allocation4 + $0x36] sm:$0xff]  ;;  %v4306_v6 = vpop.permute.xlu0 %4305 }
 0x539   : > { %4668 = vst.msk [vmem:[#allocation4 + $0x48] sm:$0xff] %vm844_vm0, %v4320_v10  ;;  %7941 = vmatmul.mubr.msk.f32.gmra.mrb[92].mxu1 %vm844_vm0, %v4320_v10 }
 0x53a   : > { %9463 = vrot.lane.b32.xlu1 %v9462_v20, %s13061_s10  ;;  %7943 = vmatprep.mubr.msk.f32.mxu1 %vm9940_vm9, %v9931_v1 }
 0x53b   : > { %9468 = vrot.lane.b32.xlu0 %v9467_v23, %s13058_s29 }
 0x53c   : > { %v4733_v29 = vld [vmem:[#allocation4 + $0x39] sm:$0xff] }
 0x53d   : > { %v4198_v5 = vpop.f32.mrb[68].mxu1  ;;  %v9477_v54 = vpack.i.bf16 %v4733_v29, %v4732_v11  ;;  %v4694_v9 = vld [vmem:[#allocation4 + $0x3e] sm:$0xff] }
 0x53e   : > { %v4199_v12 = vadd.f32 %v11588_v40, %v4198_v5  ;;  %v4200_v4 = vpop.f32.mrb[69].mxu1  ;;  %9473 = vrot.lane.b32.xlu1 %v9472_v27, %s13057_s12  ;;  %v4707_v19 = vld [vmem:[#allocation4 + $0x3f] sm:$0xff]  ;;  %v9482_v24 = vpack.i.bf16 %v4694_v9, %v4693_v32  ;;  %v4311_v27 = vpop.permute.xlu1 %4310 }
 0x53f   : > { %9478 = vrot.lane.b32.xlu0 %v9477_v54, %s13059_s7  ;;  %v9487_v38 = vpack.i.bf16 %v4707_v19, %v4706_v3  ;;  %v4747_v46 = vld [vmem:[#allocation4 + $0x3a] sm:$0xff] }
 0x540   : > { %v4230_v33 = vmax.f32 %v4199_v12, 0.0  ;;  %v4734_v45 = vld [vmem:[#allocation4 + $0x41] sm:$0xff] }
 0x541   : > { %v4203_v37 = vpop.f32.mrb[70].mxu1  ;;  %v4748_v43 = vld [vmem:[#allocation4 + $0x42] sm:$0xff]  ;;  %v9492_v26 = vpack.i.bf16 %v4734_v45, %v4733_v29 }
 0x542   : > { %v4321_v39 = vmul.f32 %v4291_v35, %v4230_v33  ;;  %v4204_v41 = vadd.f32 %v11588_v40, %v4203_v37  ;;  %v4205_v8 = vpop.f32.mrb[71].mxu1  ;;  %9483 = vrot.lane.b32.xlu1 %v9482_v24, %s13067_s11  ;;  %v9497_v21 = vpack.i.bf16 %v4748_v43, %v4747_v46  ;;  %v4708_v47 = vld [vmem:[#allocation4 + $0x47] sm:$0xff] }
 0x543   : > { %9488 = vrot.lane.b32.xlu0 %v9487_v38, %s13066_s4  ;;  %v4722_v48 = vld [vmem:[#allocation4 + $0x48] sm:$0xff]  ;;  %v9502_v49 = vpack.i.bf16 %v4708_v47, %v4707_v19  ;;  %v4721_v14 = vld [vmem:[#allocation4 + $0x40] sm:$0xff] }
 0x544   : > { %4669 = vst.msk [vmem:[#allocation4 + $0x50] sm:$0xff] %vm844_vm0, %v4321_v39  ;;  %v4231_v58 = vmax.f32 %v4204_v41, 0.0  ;;  %7944 = vmatmul.mubr.msk.f32.gmra.mrb[94].mxu1 %vm844_vm0, %v4321_v39  ;;  %v9507_v60 = vpack.i.bf16 %v4722_v48, %v4721_v14  ;;  %v4695_v56 = vld [vmem:[#allocation4 + $0x46] sm:$0xff] }
 0x545   : > { %7946 = vmatprep.mubr.msk.f32.mxu1 %vm9940_vm9, %v9931_v1 }
 0x546   : > { %v4322_v34 = vmul.f32 %v4296_v28, %v4231_v58  ;;  %9493 = vrot.lane.b32.xlu1 %v9492_v26, %s13060_s8 }
 0x547   : > { %9498 = vrot.lane.b32.xlu0 %v9497_v21, %s13061_s10 }
 0x548   : > { %4670 = vst.msk [vmem:[#allocation4 + $0x58] sm:$0xff] %vm844_vm0, %v4322_v34  ;;  %7947 = vmatmul.mubr.msk.f32.gmra.mrb[96].mxu1 %vm844_vm0, %v4322_v34 }
 0x549   : > { %7949 = vmatprep.mubr.msk.f32.mxu1 %vm9940_vm9, %v9931_v1 }
 0x54a   : > { %v4208_v51 = vpop.f32.mrb[72].mxu1  ;;  %9503 = vrot.lane.b32.xlu1 %v9502_v49, %s13058_s29 }
 0x54b   : > { %v4209_v52 = vadd.f32 %v11588_v40, %v4208_v51  ;;  %v4210_v44 = vpop.f32.mrb[73].mxu1  ;;  %9508 = vrot.lane.b32.xlu0 %v9507_v60, %s13057_s12  ;;  %v4735_v53 = vld [vmem:[#allocation4 + $0x49] sm:$0xff] }
 0x54c   : > { %v4696_v16 = vld [vmem:[#allocation4 + $0x4e] sm:$0xff]  ;;  %v9512_v57 = vpack.i.bf16 %v4735_v53, %v4734_v45  ;;  %v4742_v44 = vld [vmem:[#allocation4 + $0x79] sm:$0xf] }
 0x54d   : > { %v9517_v59 = vpack.i.bf16 %v4696_v16, %v4695_v56  ;;  %v4232_v42 = vmax.f32 %v4209_v52, 0.0  ;;  %v4709_v36 = vld [vmem:[#allocation4 + $0x4f] sm:$0xff] }
 0x54e   : > { %v4213_v50 = vpop.f32.mrb[74].mxu1  ;;  %9513 = vrot.lane.b32.xlu1 %v9512_v57, %s13059_s7  ;;  %v9522_v7 = vpack.i.bf16 %v4709_v36, %v4708_v47  ;;  %v4749_v3 = vld [vmem:[#allocation4 + $0x4a] sm:$0xff] }
 0x54f   : > { %v4323_v61 = vmul.f32 %v4301_v62, %v4232_v42  ;;  %v4214_v17 = vadd.f32 %v11588_v40, %v4213_v50  ;;  %v4215_v0 = vpop.f32.mrb[75].mxu1  ;;  %9518 = vrot.lane.b32.xlu0 %v9517_v59, %s13067_s11  ;;  %v4736_v55 = vld [vmem:[#allocation4 + $0x51] sm:$0xff] }
 0x550   : > { %v9527_v31 = vpack.i.bf16 %v4736_v55, %v4735_v53  ;;  %v4750_v13 = vld [vmem:[#allocation4 + $0x52] sm:$0xff]  ;;  %v4755_v53 = vld [vmem:[#allocation4 + $0x7a] sm:$0xf] }
 0x551   : > { %4671 = vst.msk [vmem:[#allocation4 + $0x60] sm:$0xff] %vm844_vm0, %v4323_v61  ;;  %v4233_v11 = vmax.f32 %v4214_v17, 0.0  ;;  %7950 = vmatmul.mubr.msk.f32.gmra.mrb[98].mxu1 %vm844_vm0, %v4323_v61  ;;  %v4710_v22 = vld [vmem:[#allocation4 + $0x57] sm:$0xff]  ;;  %v9532_v20 = vpack.i.bf16 %v4750_v13, %v4749_v3 }
 0x552   : > { %9523 = vrot.lane.b32.xlu1 %v9522_v7, %s13066_s4  ;;  %7952 = vmatprep.mubr.msk.f32.mxu1 %vm9940_vm9, %v9931_v1  ;;  %v9537_v23 = vpack.i.bf16 %v4710_v22, %v4709_v36  ;;  %v4724_v30 = vld [vmem:[#allocation4 + $0x58] sm:$0xff]  ;;  %v4723_v29 = vld [vmem:[#allocation4 + $0x50] sm:$0xff] }
 0x553   : > { %v4324_v15 = vmul.f32 %v4306_v6, %v4233_v11  ;;  %v4218_v63 = vpop.f32.mrb[76].mxu1  ;;  %9528 = vrot.lane.b32.xlu0 %v9527_v31, %s13060_s8  ;;  %v4697_v19 = vld [vmem:[#allocation4 + $0x56] sm:$0xff] }
 0x554   : > { %v4219_v10 = vadd.f32 %v11588_v40, %v4218_v63  ;;  %v4220_v18 = vpop.f32.mrb[77].mxu1  ;;  %v9542_v40 = vpack.i.bf16 %v4724_v30, %v4723_v29  ;;  %v4497_v56 = vld [vmem:[%s13068_s9] sm:$0xff]  ;;  %s12079_s9 = scalar_lea.vmem [#allocation8], %s7441_s26  ;;  %s13073_s26 = sld [smem:[#allocation31_spill]] }
 0x555   : > { %4672 = vst.msk [vmem:[#allocation4 + $0x68] sm:$0xff] %vm844_vm0, %v4324_v15  ;;  %7953 = vmatmul.mubr.msk.f32.gmra.mrb[100].mxu1 %vm844_vm0, %v4324_v15  ;;  %7984 = vmatprep.mubr.msk.f32.mxu0 %vm4512_vm12, %v4497_v56  ;;  %v4500_v56 = vld [vmem:[%s13069_s6 + $0x18] sm:$0xff] }
 0x556   : > { %v4234_v25 = vmax.f32 %v4219_v10, 0.0  ;;  %9533 = vrot.lane.b32.xlu1 %v9532_v20, %s13061_s10  ;;  %7955 = vmatprep.mubr.msk.f32.mxu1 %vm9940_vm9, %v9931_v1 }
 0x557   : > { %9538 = vrot.lane.b32.xlu0 %v9537_v23, %s13058_s29 }
 0x558   : > { %v4325_v5 = vmul.f32 %v4311_v27, %v4234_v25  ;;  %v4737_v54 = vld [vmem:[#allocation4 + $0x59] sm:$0xff] }
 0x559   : > { %v9547_v9 = vpack.i.bf16 %v4737_v54, %v4736_v55  ;;  %v4698_v12 = vld [vmem:[#allocation4 + $0x5e] sm:$0xff] }
 0x55a   : > { %4673 = vst.msk [vmem:[#allocation4 + $0x70] sm:$0xf] %vm1026_vm5, %v4325_v5  ;;  %9543 = vrot.lane.b32.xlu1 %v9542_v40, %s13057_s12  ;;  %7956 = vmatmul.mubr.msk.f32.gmra.mrb[102].mxu1 %vm844_vm0, %v4325_v5  ;;  %v4711_v4 = vld [vmem:[#allocation4 + $0x5f] sm:$0xff]  ;;  %v9552_v32 = vpack.i.bf16 %v4698_v12, %v4697_v19 }
 0x55b   : > { %9548 = vrot.lane.b32.xlu0 %v9547_v9, %s13059_s7  ;;  %8022 = vmatprep.mubr.msk.f32.mxu1 %vm9940_vm9, %v9931_v1  ;;  %v9557_v33 = vpack.i.bf16 %v4711_v4, %v4710_v22  ;;  %v4751_v38 = vld [vmem:[#allocation4 + $0x5a] sm:$0xff] }
 0x55c   : > { %v4738_v24 = vld [vmem:[#allocation4 + $0x61] sm:$0xff] }
 0x55d   : > { %v4752_v35 = vld [vmem:[#allocation4 + $0x62] sm:$0xff]  ;;  %v9562_v37 = vpack.i.bf16 %v4738_v24, %v4737_v54 }
 0x55e   : > { %9553 = vrot.lane.b32.xlu1 %v9552_v32, %s13067_s11  ;;  %v9567_v45 = vpack.i.bf16 %v4752_v35, %v4751_v38  ;;  %v4713_v39 = vld [vmem:[#allocation4 + $0x67] sm:$0xff] }
 0x55f   : > { %9558 = vrot.lane.b32.xlu0 %v9557_v33, %s13066_s4  ;;  %v4726_v41 = vld [vmem:[#allocation4 + $0x68] sm:$0xff]  ;;  %v9572_v8 = vpack.i.bf16 %v4713_v39, %v4711_v4  ;;  %v4725_v43 = vld [vmem:[#allocation4 + $0x60] sm:$0xff] }
 0x560   : > { %v9577_v58 = vpack.i.bf16 %v4726_v41, %v4725_v43  ;;  %v4699_v47 = vld [vmem:[#allocation4 + $0x66] sm:$0xf] }
 0x561   : > { %v4739_v26 = vld [vmem:[#allocation4 + $0x69] sm:$0xff]  ;;  %v4754_v21 = vld [vmem:[#allocation4 + $0x72] sm:$0xff] }
 0x562   : > { %9563 = vrot.lane.b32.xlu1 %v9562_v37, %s13060_s8  ;;  %v9582_v46 = vpack.i.bf16 %v4739_v26, %v4738_v24  ;;  %v4753_v28 = vld [vmem:[#allocation4 + $0x6a] sm:$0xff] }
 0x563   : > { %9568 = vrot.lane.b32.xlu0 %v9567_v45, %s13061_s10  ;;  %v4741_v34 = vld [vmem:[#allocation4 + $0x71] sm:$0xff]  ;;  %v9592_v48 = vpack.i.bf16 %v4754_v21, %v4753_v28  ;;  %v4712_v14 = vld [vmem:[#allocation4 + $0x67] sm:$0xf] }
 0x564   : > { %v9587_v49 = vpack.i.bf16 %v4741_v34, %v4739_v26  ;;  %v4714_v60 = vld [vmem:[#allocation4 + $0x6f] sm:$0xf] }
 0x565   : > { %v4727_v51 = vld [vmem:[#allocation4 + $0x70] sm:$0xf] }
 0x566   : > { %9573 = vrot.lane.b32.xlu1 %v9572_v8, %s13058_s29  ;;  %v4740_v52 = vld [vmem:[#allocation4 + $0x71] sm:$0xf] }
 0x567   : > { %9578 = vrot.lane.b32.xlu0 %v9577_v58, %s13057_s12  ;;  %v5202_v21 = vld [vmem:[%s13070_s1] sm:$0xff] }
 0x56a   : > { %9583 = vrot.lane.b32.xlu1 %v9582_v46, %s13059_s7 }
 0x56b   : > { %4806 = vrot.lane.b32.xlu0 %v4699_v47, %s13067_s11  ;;  %v5203_v47 = vld [vmem:[%s13070_s1 + $0x8] sm:$0xff] }
 0x56e   : > { %9593 = vrot.lane.b32.xlu1 %v9592_v48, %s13061_s10 }
 0x56f   : > { %9588 = vrot.lane.b32.xlu0 %v9587_v49, %s13060_s8 }
 0x572   : > { %4858 = vrot.lane.b32.xlu1 %v4712_v14, %s13066_s4  ;;  %v4498_v14 = vld [vmem:[%s13069_s6 + $0x8] sm:$0xff] }
 0x573   : > { %4899 = vrot.lane.b32.xlu0 %v4714_v60, %s13058_s29  ;;  %v8206_v60 = vpack.c.bf16 %v5203_v47, %v5202_v21  ;;  %v5216_v47 = vld [vmem:[%s13070_s1 + $0x70] sm:$0xff] }
 0x576   : > { %4951 = vrot.lane.b32.xlu1 %v4727_v51, %s13057_s12  ;;  %v4499_v51 = vld [vmem:[%s13069_s6 + $0x10] sm:$0xff] }
 0x577   : > { %5003 = vrot.lane.b32.xlu0 %v4740_v52, %s13059_s7  ;;  %v5204_v52 = vld [vmem:[%s13070_s1 + $0x10] sm:$0xff] }
 0x57a   : > { %5044 = vrot.lane.b32.xlu1 %v4742_v44, %s13060_s8  ;;  %v5205_v44 = vld [vmem:[%s13070_s1 + $0x18] sm:$0xff] }
 0x57b   : > { %5096 = vrot.lane.b32.xlu0 %v4755_v53, %s13061_s10 }
 0x588   : > { %v11710_v7 = vpop.permute.xlu1 %9393 }
 0x589   : > { %v11708_v55 = vpop.permute.xlu0 %9388 }
 0x58c   : > { %v11716_v22 = vpop.permute.xlu1 %9403 }
 0x58d   : > { %v11712_v31 = vpop.permute.xlu0 %9398 }
 0x595   : > { %v11714_v6 = vpop.permute.xlu0 %9408 }
 0x596   : > { %v11718_v10 = vpop.permute.xlu1 %9413 }
 0x599   : > { %v11720_v18 = vpop.permute.xlu0 %9418 }
 0x59a   : > { %v11722_v20 = vpop.permute.xlu1 %9423 }
 0x59d   : > { %v11724_v30 = vpop.permute.xlu0 %9428 }
 0x59e   : > { %v11726_v40 = vpop.permute.xlu1 %9433 }
 0x5a1   : > { %v11728_v54 = vpop.permute.xlu0 %9438 }
 0x5a4   : > { %v11730_v9 = vpop.permute.xlu1 %9443 }
 0x5a5   : > { %v11732_v12 = vpop.permute.xlu0 %9448 }
 0x5a8   : > { %v11734_v19 = vpop.permute.xlu1 %9453 }
 0x5a9   : > { %v11736_v33 = vpop.permute.xlu0 %9458 }
 0x5ac   : > { %v11738_v38 = vpop.permute.xlu1 %9463 }
 0x5ad   : > { %v11740_v45 = vpop.permute.xlu0 %9468 }
 0x5b0   : > { %v11742_v39 = vpop.permute.xlu1 %9473 }
 0x5b1   : > { %v11744_v43 = vpop.permute.xlu0 %9478 }
 0x5b4   : > { %v11746_v28 = vpop.permute.xlu1 %9483 }
 0x5b5   : > { %v11754_v34 = vpop.permute.xlu0 %9488 }
 0x5b8   : > { %v11769_v53 = vpop.permute.xlu1 %9493 }
 0x5df   : > { %v4433_v16 = vpop.f32.mrb[78].mxu1 }
 0x5e0   : > { %v7921_v57 = vpop.f32.mrb[79].mxu1 }
 0x5e1   : > { %v11778_v57 = vpop.permute.xlu0 %9498 }
 0x5e3   : > { %v4438_v59 = vpop.f32.mrb[80].mxu1 }
 0x5e4   : > { %v8181_v42 = vpack.c.bf16 %v4438_v59, %v4433_v16  ;;  %v7924_v36 = vpop.f32.mrb[81].mxu1  ;;  %v8209_v16 = vpack.c.bf16 %v5205_v44, %v5204_v52  ;;  %v4501_v59 = vld [vmem:[%s13069_s6 + $0x20] sm:$0xff]  ;;  %v9400_v52 = vunpack.i.l.bf16 %v11712_v31 }
 0x5e5   : > { %v5207_v36 = vld [vmem:[%s13070_s1 + $0x28] sm:$0xff] }
 0x5e6   : > { %8182 = vmatprep.subr.bf16.mxu0 %v8181_v42 }
 0x5e7   : > { %8184 = vmatpush3.bf16.msra.mxu0 %v8181_v42  ;;  %v5206_v42 = vld [vmem:[%s13070_s1 + $0x20] sm:$0xff] }
 0x5ec   : > { %v4443_v62 = vpop.f32.mrb[82].mxu1 }
 0x5ed   : > { %v7927_v50 = vpop.f32.mrb[83].mxu1 }
 0x5ee   : > { %v4502_v50 = vld [vmem:[%s13069_s6 + $0x28] sm:$0xff] }
 0x5f0   : > { %v4448_v61 = vpop.f32.mrb[84].mxu1 }
 0x5f1   : > { %v8185_v17 = vpack.c.bf16 %v4448_v61, %v4443_v62  ;;  %v7930_v0 = vpop.f32.mrb[85].mxu1  ;;  %v11791_v62 = vpop.permute.xlu1 %9503  ;;  %v8212_v61 = vpack.c.bf16 %v5207_v36, %v5206_v42  ;;  %v5218_v42 = vld [vmem:[%s13070_s1 + $0x80] sm:$0xff]  ;;  %v9405_v36 = vunpack.i.l.bf16 %v11716_v22 }
 0x5f2   : > { %v5208_v0 = vld [vmem:[%s13070_s1 + $0x30] sm:$0xff] }
 0x5f3   : > { %8186 = vmatprep.subr.bf16.mxu0 %v8185_v17 }
 0x5f4   : > { %8188 = vmatpush3.bf16.msra.mxu0 %v8185_v17  ;;  %v4503_v17 = vld [vmem:[%s13069_s6 + $0x30] sm:$0xff] }
 0x5fb   : > { %v4453_v11 = vpop.f32.mrb[86].mxu1 }
 0x5fc   : > { %v7933_v13 = vpop.f32.mrb[87].mxu1 }
 0x5fd   : > { %v11807_v13 = vpop.permute.xlu0 %9508 }
 0x5ff   : > { %v4458_v15 = vpop.f32.mrb[88].mxu1 }
 0x600   : > { %v8189_v63 = vpack.c.bf16 %v4458_v15, %v4453_v11  ;;  %v7936_v3 = vpop.f32.mrb[89].mxu1  ;;  %v5209_v11 = vld [vmem:[%s13070_s1 + $0x38] sm:$0xff] }
 0x601   : > { %v4504_v15 = vld [vmem:[%s13069_s6 + $0x38] sm:$0xff]  ;;  %v5210_v3 = vld [vmem:[%s13070_s1 + $0x40] sm:$0xff]  ;;  %s13080_s6 = sld [smem:[#allocation35_spill]] }
 0x602   : > { %8190 = vmatprep.subr.bf16.mxu0 %v8189_v63 }
 0x603   : > { %8192 = vmatpush3.bf16.msra.mxu0 %v8189_v63  ;;  %v8215_v63 = vpack.c.bf16 %v5209_v11, %v5208_v0  ;;  %v9410_v0 = vunpack.i.l.bf16 %v11714_v6 }
 0x608   : > { %v4463_v23 = vpop.f32.mrb[90].mxu1 }
 0x609   : > { %v7939_v25 = vpop.f32.mrb[91].mxu1 }
 0x60a   : > { %v11821_v25 = vpop.permute.xlu1 %9513 }
 0x60c   : > { %v4468_v27 = vpop.f32.mrb[92].mxu1 }
 0x60d   : > { %v8193_v29 = vpack.c.bf16 %v4468_v27, %v4463_v23  ;;  %v7942_v5 = vpop.f32.mrb[93].mxu1  ;;  %v5211_v23 = vld [vmem:[%s13070_s1 + $0x48] sm:$0xff] }
 0x60e   : > { %v4756_v27 = vld [vmem:[#allocation4 + $0x1b] sm:$0xff]  ;;  %v11825_v5 = vpop.permute.xlu0 %9518 }
 0x60f   : > { %8194 = vmatprep.subr.bf16.mxu0 %v8193_v29 }
 0x610   : > { %8196 = vmatpush3.bf16.msra.mxu0 %v8193_v29  ;;  %v8218_v29 = vpack.c.bf16 %v5211_v23, %v5210_v3 }
 0x617   : > { %v4473_v4 = vpop.f32.mrb[94].mxu1 }
 0x618   : > { %v7945_v32 = vpop.f32.mrb[95].mxu1 }
 0x619   : > { %v5213_v32 = vld [vmem:[%s13070_s1 + $0x58] sm:$0xff] }
 0x61b   : > { %v4478_v24 = vpop.f32.mrb[96].mxu1 }
 0x61c   : > { %v8197_v35 = vpack.c.bf16 %v4478_v24, %v4473_v4  ;;  %v7948_v37 = vpop.f32.mrb[97].mxu1  ;;  %v5212_v4 = vld [vmem:[%s13070_s1 + $0x50] sm:$0xff]  ;;  %v11834_v24 = vpop.permute.xlu1 %9523 }
 0x61d   : > { %v5214_v37 = vld [vmem:[%s13070_s1 + $0x60] sm:$0xff] }
 0x61e   : > { %8198 = vmatprep.subr.bf16.mxu0 %v8197_v35 }
 0x61f   : > { %8200 = vmatpush3.bf16.msra.mxu0 %v8197_v35  ;;  %v8221_v35 = vpack.c.bf16 %v5213_v32, %v5212_v4  ;;  %v9420_v4 = vunpack.i.l.bf16 %v11720_v18  ;;  %v9430_v32 = vunpack.i.l.bf16 %v11724_v30 }
 0x624   : > { %v4483_v41 = vpop.f32.mrb[98].mxu1 }
 0x625   : > { %v7951_v8 = vpop.f32.mrb[99].mxu1 }
 0x626   : > { %v9390_v8 = vunpack.i.l.bf16 %v11708_v55 }
 0x628   : > { %v4488_v58 = vpop.f32.mrb[100].mxu1 }
 0x629   : > { %v8201_v26 = vpack.c.bf16 %v4488_v58, %v4483_v41  ;;  %v7954_v46 = vpop.f32.mrb[101].mxu1  ;;  %v5215_v41 = vld [vmem:[%s13070_s1 + $0x68] sm:$0xff]  ;;  %v11844_v58 = vpop.permute.xlu0 %9528 }
 0x62a   : > { %v9391_v46 = vunpack.i.h.bf16 %v11708_v55  ;;  %v8224_v21 = vpack.c.bf16 %v5215_v41, %v5214_v37  ;;  %v4676_v37 = vld [vmem:[#allocation4 + $0x15] sm:$0xff]  ;;  %v9421_v41 = vunpack.i.h.bf16 %v11720_v18 }
 0x62b   : > { %8202 = vmatprep.subr.bf16.mxu0 %v8201_v26 }
 0x62c   : > { %8204 = vmatpush3.bf16.msra.mxu0 %v8201_v26  ;;  %v4674_v26 = vld [vmem:[#allocation4 + $0x5] sm:$0xff] }
 0x62d   : > { %v4493_v48 = vpop.f32.mrb[102].mxu1  ;;  %v5111_v55 = vsel %vm844_vm0, %v4674_v26, %v9390_v8  ;;  %v9426_v8 = vunpack.i.h.bf16 %v11722_v20 }
 0x62e   : > { %v7957_v49 = vpop.f32.mrb[103].mxu1  ;;  %7982 = vmatprep.subr.msk.mxu0 %vm3223_vm10, %v4493_v48 }
 0x62f   : > { %v9395_v49 = vunpack.i.l.bf16 %v11710_v7 }
 0x630   : > { %7983 = vmatpush3.msk.msra.mxu0 %vm3223_vm10, %v4493_v48  ;;  %v5217_v48 = vld [vmem:[%s13070_s1 + $0x78] sm:$0xff] }
 0x631   : > { %7985 = vmatmul.mubr.msk.f32.vlgmr.msra.gmra.mrb[82].mxu0 %vm4512_vm12, %v4498_v14  ;;  %8205 = vmatprep.subr.bf16.mxu0 %v9932_v2  ;;  %v11855_v14 = vpop.permute.xlu1 %9533 }
 0x632   : > { %8207 = vmatpush1.bf16.msra.mxu0 %v8206_v60  ;;  %7987 = vmatprep.mubr.msk.f32.mxu0 %vm4512_vm12, %v4499_v51  ;;  %v9396_v60 = vunpack.i.h.bf16 %v11710_v7  ;;  %v4675_v51 = vld [vmem:[#allocation4 + $0xd] sm:$0xff]  ;;  %v5219_v7 = vld [vmem:[%s13070_s1 + $0x88] sm:$0xff] }
 0x633   : > { %8208 = vmatprep.subr.bf16.mxu0 %v9932_v2  ;;  %v5112_v44 = vsel %vm844_vm0, %v4675_v51, %v9391_v46  ;;  %v8230_v23 = vpack.c.bf16 %v5219_v7, %v5218_v42  ;;  %v4757_v42 = vld [vmem:[#allocation4 + $0x23] sm:$0xff] }
 0x635   : > { %7988 = vmatmul.mubr.msk.f32.gmra.mrb[84].mxu0 %vm4512_vm12, %v4500_v56  ;;  %v9401_v56 = vunpack.i.h.bf16 %v11712_v31  ;;  %v9406_v31 = vunpack.i.h.bf16 %v11716_v22  ;;  %v11880_v3 = vpop.permute.xlu1 %9543  ;;  %v9425_v22 = vunpack.i.l.bf16 %v11722_v20 }
 0x636   : > { %8210 = vmatpush1.bf16.msra.mxu0 %v8209_v16  ;;  %7990 = vmatprep.mubr.msk.f32.mxu0 %vm4512_vm12, %v4501_v59  ;;  %v8227_v16 = vpack.c.bf16 %v5217_v48, %v5216_v47  ;;  %v11862_v59 = vpop.permute.xlu0 %9538  ;;  %v9436_v47 = vunpack.i.h.bf16 %v11726_v40  ;;  %v9435_v48 = vunpack.i.l.bf16 %v11726_v40 }
 0x637   : > { %8211 = vmatprep.subr.bf16.mxu0 %v9932_v2 }
 0x639   : > { %7991 = vmatmul.mubr.msk.f32.gmra.mrb[86].mxu0 %vm4512_vm12, %v4502_v50  ;;  %v5124_v50 = vsel %vm939_vm1, %v5111_v55, %v9395_v49  ;;  %v9431_v49 = vunpack.i.h.bf16 %v11724_v30  ;;  %v9441_v55 = vunpack.i.h.bf16 %v11728_v54 }
 0x63a   : > { %8213 = vmatpush1.bf16.msra.mxu0 %v8212_v61  ;;  %7993 = vmatprep.mubr.msk.f32.mxu0 %vm4512_vm12, %v4503_v17  ;;  %v5125_v61 = vsel %vm939_vm1, %v5112_v44, %v9396_v60  ;;  %v5137_v17 = vsel %vm2475_vm2, %v5124_v50, %v9400_v52  ;;  %v11891_v26 = vpop.permute.xlu0 %9548  ;;  %v9440_v60 = vunpack.i.l.bf16 %v11728_v54  ;;  %v9445_v52 = vunpack.i.l.bf16 %v11730_v9  ;;  %v11906_v44 = vpop.permute.xlu1 %9553 }
 0x63b   : > { %8214 = vmatprep.subr.bf16.mxu0 %v9932_v2  ;;  %v5138_v11 = vsel %vm2475_vm2, %v5125_v61, %v9401_v56  ;;  %v9446_v56 = vunpack.i.h.bf16 %v11730_v9  ;;  %v9451_v50 = vunpack.i.h.bf16 %v11732_v12  ;;  %v9460_v9 = vunpack.i.l.bf16 %v11736_v33 }
 0x63d   : > { %7994 = vmatmul.mubr.msk.f32.gmra.mrb[88].mxu0 %vm4512_vm12, %v4504_v15  ;;  %v9416_v15 = vunpack.i.h.bf16 %v11718_v10 }
 0x63e   : > { %8216 = vmatpush1.bf16.msra.mxu0 %v8215_v63  ;;  %7537 = vmatprep.mubr.msk.f32.mxu0 %vm844_vm0, %v4756_v27  ;;  %v9415_v63 = vunpack.i.l.bf16 %v11718_v10  ;;  %v9411_v27 = vunpack.i.h.bf16 %v11714_v6  ;;  %v4677_v10 = vld [vmem:[#allocation4 + $0x1d] sm:$0xff]  ;;  %v5151_v6 = vsel %vm2517_vm3, %v5138_v11, %v9406_v31  ;;  %v9455_v31 = vunpack.i.l.bf16 %v11734_v19 }
 0x63f   : > { %8217 = vmatprep.subr.bf16.mxu0 %v9932_v2 }
 0x640   : > { %v5113_v46 = vsel %vm844_vm0, %v4676_v37, %v9415_v63  ;;  %v5164_v20 = vsel %vm2559_vm4, %v5151_v6, %v9411_v27  ;;  %v4678_v63 = vld [vmem:[#allocation4 + $0x25] sm:$0xff]  ;;  %v9471_v6 = vunpack.i.h.bf16 %v11740_v45 }
 0x641   : > { %v5126_v51 = vsel %vm939_vm1, %v5113_v46, %v9420_v4  ;;  %v5177_v7 = vsel %vm2601_vm6, %v5164_v20, %v9426_v8  ;;  %v9456_v4 = vunpack.i.h.bf16 %v11734_v19  ;;  %v9466_v8 = vunpack.i.h.bf16 %v11738_v38  ;;  %v11936_v46 = vpop.permute.xlu1 %9563 }
 0x642   : > { %8219 = vmatpush1.bf16.msra.mxu0 %v8218_v29  ;;  %v5150_v29 = vsel %vm2517_vm3, %v5137_v17, %v9405_v36  ;;  %v5139_v36 = vsel %vm2475_vm2, %v5126_v51, %v9435_v48  ;;  %v9470_v17 = vunpack.i.l.bf16 %v11740_v45  ;;  %v5190_v11 = vsel %vm2643_vm7, %v5177_v7, %v9431_v49 }
 0x643   : > { %8220 = vmatprep.subr.bf16.mxu0 %v9932_v2  ;;  %v5152_v61 = vsel %vm2517_vm3, %v5139_v36, %v9440_v60  ;;  %v9486_v49 = vunpack.i.h.bf16 %v11746_v28 }
 0x644   : > { %v5165_v27 = vsel %vm2559_vm4, %v5152_v61, %v9445_v52  ;;  %v9481_v52 = vunpack.i.h.bf16 %v11744_v43  ;;  %v9506_v61 = vunpack.i.h.bf16 %v11791_v62 }
 0x646   : > { %8222 = vmatpush1.bf16.msra.mxu0 %v8221_v35  ;;  %v5163_v35 = vsel %vm2559_vm4, %v5150_v29, %v9410_v0  ;;  %v11921_v0 = vpop.permute.xlu0 %9558 }
 0x647   : > { %8223 = vmatprep.subr.bf16.mxu0 %v9932_v2  ;;  %v5176_v18 = vsel %vm2601_vm6, %v5163_v35, %v9425_v22  ;;  %v4679_v22 = vld [vmem:[#allocation4 + $0x2d] sm:$0xff] }
 0x648   : > { %v5189_v40 = vsel %vm2643_vm7, %v5176_v18, %v9430_v32  ;;  %v9461_v32 = vunpack.i.h.bf16 %v11736_v33  ;;  %v4758_v35 = vld [vmem:[#allocation4 + $0x2b] sm:$0xff]  ;;  %v9476_v33 = vunpack.i.h.bf16 %v11742_v39  ;;  %v9495_v18 = vunpack.i.l.bf16 %v11769_v53 }
 0x64a   : > { %8225 = vmatpush1.bf16.msra.mxu0 %v8224_v21  ;;  %v5114_v21 = vsel %vm844_vm0, %v4677_v10, %v9416_v15  ;;  %v5116_v10 = vsel %vm844_vm0, %v4679_v22, %v9451_v50  ;;  %v11949_v20 = vpop.permute.xlu0 %9568  ;;  %v9500_v50 = vunpack.i.l.bf16 %v11778_v57 }
 0x64b   : > { %8226 = vmatprep.subr.bf16.mxu0 %v9932_v2  ;;  %v5127_v30 = vsel %vm939_vm1, %v5114_v21, %v9421_v41  ;;  %v9480_v21 = vunpack.i.l.bf16 %v11744_v43  ;;  %v5129_v60 = vsel %vm939_vm1, %v5116_v10, %v9456_v4  ;;  %v9496_v43 = vunpack.i.h.bf16 %v11769_v53 }
 0x64c   : > { %v5140_v54 = vsel %vm2475_vm2, %v5127_v30, %v9436_v47  ;;  %v5178_v47 = vsel %vm2601_vm6, %v5165_v27, %v9460_v9  ;;  %v4680_v30 = vld [vmem:[#allocation4 + $0x35] sm:$0xff]  ;;  %v9505_v9 = vunpack.i.l.bf16 %v11791_v62  ;;  %v9501_v53 = vunpack.i.h.bf16 %v11778_v57  ;;  %v4761_v57 = vld [vmem:[#allocation4 + $0x43] sm:$0xff] }
 0x64d   : > { %v5153_v15 = vsel %vm2517_vm3, %v5140_v54, %v9441_v55  ;;  %v5142_v55 = vsel %vm2475_vm2, %v5129_v60, %v9471_v6  ;;  %v9510_v62 = vunpack.i.l.bf16 %v11807_v13  ;;  %v4762_v60 = vld [vmem:[#allocation4 + $0x4b] sm:$0xff] }
 0x64e   : > { %8228 = vmatpush1.bf16.msra.mxu0 %v8227_v16  ;;  %v9450_v16 = vunpack.i.l.bf16 %v11732_v12  ;;  %v9475_v12 = vunpack.i.l.bf16 %v11742_v39  ;;  %v5166_v37 = vsel %vm2559_vm4, %v5153_v15, %v9446_v56  ;;  %v4759_v39 = vld [vmem:[#allocation4 + $0x33] sm:$0xff]  ;;  %v4681_v56 = vld [vmem:[#allocation4 + $0x3d] sm:$0xff] }
 0x64f   : > { %8229 = vmatprep.subr.bf16.mxu0 %v9932_v2  ;;  %v5179_v51 = vsel %vm2601_vm6, %v5166_v37, %v9461_v32  ;;  %v5118_v36 = vsel %vm844_vm0, %v4681_v56, %v9486_v49  ;;  %v9515_v32 = vunpack.i.l.bf16 %v11821_v25  ;;  %v9520_v37 = vunpack.i.l.bf16 %v11825_v5 }
 0x650   : > { %v5115_v29 = vsel %vm844_vm0, %v4678_v63, %v9450_v16  ;;  %v9491_v16 = vunpack.i.h.bf16 %v11754_v34  ;;  %v11973_v63 = vpop.permute.xlu0 %9578  ;;  %v9526_v49 = vunpack.i.h.bf16 %v11834_v24  ;;  %v9550_v56 = vunpack.i.l.bf16 %v11891_v26 }
 0x651   : > { %v5128_v41 = vsel %vm939_vm1, %v5115_v29, %v9455_v31  ;;  %v11964_v31 = vpop.permute.xlu1 %9573 }
 0x652   : > { %8231 = vmatpush1.bf16.msra.mxu0 %v8230_v23  ;;  %v9465_v23 = vunpack.i.l.bf16 %v11738_v38  ;;  %v5141_v19 = vsel %vm2475_vm2, %v5128_v41, %v9470_v17  ;;  %v9485_v38 = vunpack.i.l.bf16 %v11746_v28  ;;  %v5192_v28 = vsel %vm2643_vm7, %v5179_v51, %v9466_v8  ;;  %v4760_v17 = vld [vmem:[#allocation4 + $0x3b] sm:$0xff] }
 0x653   : > { %8307 = vmatprep.subr.bf16.mxu0 %v9932_v2  ;;  %v5154_v48 = vsel %vm2517_vm3, %v5141_v19, %v9475_v12  ;;  %v5131_v15 = vsel %vm939_vm1, %v5118_v36, %v9491_v16  ;;  %v9511_v12 = vunpack.i.h.bf16 %v11807_v13  ;;  %v9525_v13 = vunpack.i.l.bf16 %v11834_v24 }
 0x654   : > { %v5191_v45 = vsel %vm2643_vm7, %v5178_v47, %v9465_v23  ;;  %v5167_v7 = vsel %vm2559_vm4, %v5154_v48, %v9480_v21  ;;  %v5117_v54 = vsel %vm844_vm0, %v4680_v30, %v9485_v38  ;;  %v5144_v4 = vsel %vm2475_vm2, %v5131_v15, %v9506_v61  ;;  %v4682_v47 = vld [vmem:[#allocation4 + $0x45] sm:$0xff]  ;;  %v4683_v48 = vld [vmem:[#allocation4 + $0x4d] sm:$0xff] }
 0x655   : > { %5331 = vmatmul.mubr.f32.vlgmr.msra.gmra.mrb[90].mxu0 %v5189_v40  ;;  %v5155_v40 = vsel %vm2517_vm3, %v5142_v55, %v9476_v33  ;;  %v11985_v10 = vpop.permute.xlu1 %9583  ;;  %v9530_v41 = vunpack.i.l.bf16 %v11844_v58  ;;  %v5157_v19 = vsel %vm2517_vm3, %v5144_v4, %v9511_v12  ;;  %v9535_v33 = vunpack.i.l.bf16 %v11855_v14 }
 0x656   : > { %7538 = vmatprep.mubr.msk.f32.mxu0 %vm844_vm0, %v4757_v42  ;;  %v9490_v42 = vunpack.i.l.bf16 %v11754_v34  ;;  %v5180_v34 = vsel %vm2601_vm6, %v5167_v7, %v9495_v18  ;;  %v5168_v23 = vsel %vm2559_vm4, %v5155_v40, %v9481_v52  ;;  %v9540_v21 = vunpack.i.l.bf16 %v11862_v59 }
 0x657   : > { %v5193_v27 = vsel %vm2643_vm7, %v5180_v34, %v9500_v50  ;;  %v5181_v22 = vsel %vm2601_vm6, %v5168_v23, %v9496_v43  ;;  %v9545_v38 = vunpack.i.l.bf16 %v11880_v3  ;;  %v5119_v51 = vsel %vm844_vm0, %v4682_v47, %v9520_v37 }
 0x658   : > { %v5194_v8 = vsel %vm2643_vm7, %v5181_v22, %v9501_v53  ;;  %v9531_v55 = vunpack.i.h.bf16 %v11844_v58  ;;  %v5132_v24 = vsel %vm939_vm1, %v5119_v51, %v9525_v13  ;;  %v9536_v52 = vunpack.i.h.bf16 %v11855_v14 }
 0x659   : > { %5336 = vmatmul.mubr.f32.gmra.mrb[92].mxu0 %v5190_v11  ;;  %v5130_v11 = vsel %vm939_vm1, %v5117_v54, %v9490_v42  ;;  %v5145_v30 = vsel %vm2475_vm2, %v5132_v24, %v9540_v21  ;;  %v9555_v16 = vunpack.i.l.bf16 %v11906_v44  ;;  %v12013_v42 = vpop.permute.xlu1 %9593  ;;  %v9565_v14 = vunpack.i.l.bf16 %v11936_v46  ;;  %v4765_v21 = vld [vmem:[#allocation4 + $0x63] sm:$0xff] }
 0x65a   : > { %7539 = vmatprep.mubr.msk.f32.mxu0 %vm844_vm0, %v4758_v35  ;;  %v5143_v29 = vsel %vm2475_vm2, %v5130_v11, %v9505_v9  ;;  %v9521_v35 = vunpack.i.h.bf16 %v11825_v5  ;;  %v9516_v5 = vunpack.i.h.bf16 %v11821_v25  ;;  %v9541_v25 = vunpack.i.h.bf16 %v11862_v59 }
 0x65b   : > { %v5156_v6 = vsel %vm2517_vm3, %v5143_v29, %v9510_v62  ;;  %v5158_v7 = vsel %vm2517_vm3, %v5145_v30, %v9545_v38  ;;  %v9551_v43 = vunpack.i.h.bf16 %v11891_v26  ;;  %v9556_v50 = vunpack.i.h.bf16 %v11906_v44  ;;  %v4685_v62 = vld [vmem:[#allocation4 + $0x5d] sm:$0xff] }
 0x65c   : > { %v5169_v18 = vsel %vm2559_vm4, %v5156_v6, %v9515_v32  ;;  %v5170_v36 = vsel %vm2559_vm4, %v5157_v19, %v9516_v5  ;;  %v9560_v34 = vunpack.i.l.bf16 %v11921_v0  ;;  %v9566_v11 = vunpack.i.h.bf16 %v11936_v46 }
 0x65d   : > { %5341 = vmatmul.mubr.f32.gmra.mrb[94].mxu0 %v5191_v45  ;;  %v11998_v45 = vpop.permute.xlu0 %4806  ;;  %v5182_v40 = vsel %vm2601_vm6, %v5169_v18, %v9530_v41  ;;  %v5183_v61 = vsel %vm2601_vm6, %v5170_v36, %v9531_v55  ;;  %v9570_v26 = vunpack.i.l.bf16 %v11949_v20  ;;  %v9575_v44 = vunpack.i.l.bf16 %v11964_v31  ;;  %v4859_v4 = vpop.permute.xlu1 %4858 }
 0x65e   : > { %7540 = vmatprep.mubr.msk.f32.mxu0 %vm844_vm0, %v4759_v39  ;;  %v5120_v39 = vsel %vm844_vm0, %v4683_v48, %v9521_v35  ;;  %v5195_v58 = vsel %vm2643_vm7, %v5182_v40, %v9535_v33  ;;  %v5196_v53 = vsel %vm2643_vm7, %v5183_v61, %v9536_v52  ;;  %v5171_v12 = vsel %vm2559_vm4, %v5158_v7, %v9550_v56  ;;  %v4686_v48 = vld [vmem:[#allocation4 + $0x65] sm:$0xf]  ;;  %v4767_v56 = vld [vmem:[#allocation4 + $0x73] sm:$0xff]  ;;  %v4768_v7 = vld [vmem:[#allocation4 + $0x7b] sm:$0xf] }
 0x65f   : > { %v5133_v59 = vsel %vm939_vm1, %v5120_v39, %v9526_v49  ;;  %v5184_v22 = vsel %vm2601_vm6, %v5171_v12, %v9565_v14  ;;  %v5122_v29 = vsel %vm844_vm0, %v4685_v62, %v9556_v50  ;;  %v9561_v46 = vunpack.i.h.bf16 %v11921_v0 }
 0x660   : > { %v5146_v54 = vsel %vm2475_vm2, %v5133_v59, %v9541_v25  ;;  %v9571_v35 = vunpack.i.h.bf16 %v11949_v20  ;;  %v9580_v37 = vunpack.i.l.bf16 %v11973_v63  ;;  %v9576_v41 = vunpack.i.h.bf16 %v11964_v31 }
 0x661   : > { %5346 = vmatmul.mubr.f32.gmra.mrb[96].mxu0 %v5192_v28  ;;  %v9546_v28 = vunpack.i.h.bf16 %v11880_v3  ;;  %v4763_v3 = vld [vmem:[#allocation4 + $0x53] sm:$0xff]  ;;  %v9589_v15 = vpop.permute.xlu0 %9588  ;;  %v9585_v6 = vunpack.i.l.bf16 %v11985_v10  ;;  %v5197_v0 = vsel %vm2643_vm7, %v5184_v22, %v9570_v26  ;;  %v5135_v20 = vsel %vm939_vm1, %v5122_v29, %v9561_v46  ;;  %v4952_v18 = vpop.permute.xlu1 %4951 }
 0x662   : > { %7541 = vmatprep.mubr.msk.f32.mxu0 %vm844_vm0, %v4760_v17  ;;  %v4684_v17 = vld [vmem:[#allocation4 + $0x55] sm:$0xff]  ;;  %v9590_v19 = vunpack.i.l.bf16 %v9589_v15  ;;  %v9581_v5 = vunpack.i.h.bf16 %v11973_v63  ;;  %v5148_v49 = vsel %vm2475_vm2, %v5135_v20, %v9576_v41  ;;  %v9586_v38 = vunpack.i.h.bf16 %v11985_v10  ;;  %v4766_v63 = vld [vmem:[#allocation4 + $0x6b] sm:$0xff] }
 0x663   : > { %v5159_v9 = vsel %vm2517_vm3, %v5146_v54, %v9546_v28  ;;  %v5121_v23 = vsel %vm844_vm0, %v4684_v17, %v9555_v16  ;;  %v9591_v51 = vunpack.i.h.bf16 %v9589_v15  ;;  %v9595_v24 = vunpack.i.l.bf16 %v12013_v42 }
 0x664   : > { %v5172_v32 = vsel %vm2559_vm4, %v5159_v9, %v9551_v43  ;;  %v5161_v52 = vsel %vm2517_vm3, %v5148_v49, %v9581_v5 }
 0x665   : > { %5351 = vmatmul.mubr.f32.gmra.mrb[98].mxu0 %v5193_v27  ;;  %v4764_v27 = vld [vmem:[#allocation4 + $0x5b] sm:$0xff]  ;;  %v5185_v13 = vsel %vm2601_vm6, %v5172_v32, %v9566_v11  ;;  %v4900_v33 = vpop.permute.xlu0 %4899  ;;  %v5174_v40 = vsel %vm2559_vm4, %v5161_v52, %v9586_v38  ;;  %v5045_v59 = vpop.permute.xlu1 %5044 }
 0x666   : > { %7542 = vmatprep.mubr.msk.f32.mxu0 %vm844_vm0, %v4761_v57  ;;  %v5134_v57 = vsel %vm939_vm1, %v5121_v23, %v9560_v34  ;;  %v5198_v31 = vsel %vm2643_vm7, %v5185_v13, %v9571_v35  ;;  %v5187_v16 = vsel %vm2601_vm6, %v5174_v40, %v9591_v51 }
 0x669   : > { %5356 = vmatmul.mubr.f32.gmra.mrb[100].mxu0 %v5194_v8  ;;  %v5147_v8 = vsel %vm2475_vm2, %v5134_v57, %v9575_v44  ;;  %v5004_v10 = vpop.permute.xlu0 %5003 }
 0x66a   : > { %7543 = vmatprep.mubr.msk.f32.mxu0 %vm844_vm0, %v4762_v60  ;;  %v5160_v47 = vsel %vm2517_vm3, %v5147_v8, %v9580_v37  ;;  %v5123_v60 = vsel %vm844_vm0, %v4686_v48, %v11998_v45  ;;  %v12100_v8 = vld [vmem:[%s13072_s2] ss:$0 sm:$0xff]  ;;  %s7375_s2 = sshll.u32 %s12079_s9, 4  ;;  %s12906_s2 = int_to_ptr.vmem [resolvable:$true] %s7375_s2 }
 0x66b   : > { %v5173_v39 = vsel %vm2559_vm4, %v5160_v47, %v9585_v6  ;;  %v5136_v55 = vsel %vm939_vm1, %v5123_v60, %v4859_v4 }
 0x66c   : > { %v5186_v25 = vsel %vm2601_vm6, %v5173_v39, %v9590_v19  ;;  %v5149_v28 = vsel %vm2475_vm2, %v5136_v55, %v4900_v33 }
 0x66d   : > { %5361 = vmatmul.mubr.f32.gmra.mrb[102].mxu0 %v5195_v58  ;;  %v5199_v45 = vsel %vm2643_vm7, %v5186_v25, %v9595_v24  ;;  %v5162_v30 = vsel %vm2517_vm3, %v5149_v28, %v4952_v18  ;;  %v9596_v58 = vunpack.i.h.bf16 %v12013_v42  ;;  %v5097_v54 = vpop.permute.xlu0 %5096  ;;  %v7526_v42 = vld [vmem:[%s13071_s28] ss:$0 sm:$0xff]  ;;  %s13081_s28 = sand.u32 1, %s9921_s5  }
 0x66e   : > { %7544 = vmatprep.mubr.msk.f32.mxu0 %vm844_vm0, %v4763_v3  ;;  %v5175_v14 = vsel %vm2559_vm4, %v5162_v30, %v5004_v10 }
 0x66f   : > { %v5200_v3 = vsel %vm2643_vm7, %v5187_v16, %v9596_v58  ;;  %v5188_v36 = vsel %vm2601_vm6, %v5175_v14, %v5045_v59 }
 0x670   : > { %v5201_v43 = vsel %vm2643_vm7, %v5188_v36, %v5097_v54 }
 0x671   : > { %5366 = vmatmul.mubr.f32.gmra.mrb[104].mxu0 %v5196_v53 }
 0x672   : > { %7545 = vmatprep.mubr.msk.f32.mxu0 %vm844_vm0, %v4764_v27 }
 0x675   : > { %5371 = vmatmul.mubr.f32.gmra.mrb[106].mxu0 %v5197_v0 }
 0x676   : > { %7546 = vmatprep.mubr.msk.f32.mxu0 %vm844_vm0, %v4765_v21 }
 0x679   : > { %5376 = vmatmul.mubr.f32.gmra.mrb[108].mxu0 %v5198_v31 }
 0x67a   : > { %7547 = vmatprep.mubr.msk.f32.mxu0 %vm844_vm0, %v4766_v63 }
 0x67d   : > { %5381 = vmatmul.mubr.f32.gmra.mrb[110].mxu0 %v5199_v45 }
 0x67e   : > { %7548 = vmatprep.mubr.msk.f32.mxu0 %vm844_vm0, %v4767_v56 }
 0x681   : > { %5386 = vmatmul.mubr.f32.gmra.mrb[112].mxu0 %v5200_v3 }
 0x682   : > { %7549 = vmatprep.mubr.msk.f32.mxu0 %vm844_vm0, %v4768_v7 }
 0x685   : > { %5391 = vmatmul.mubr.f32.gmra.mrb[114].mxu0 %v5201_v43 }
 0x704   : > { %v7986_v50 = vpop.f32.mrb[82].mxu0 }
 0x705   : > { %v4612_v61 = vadd.f32 %v7986_v50, %v7526_v42  ;;  %v4606_v9 = vpop.f32.mrb[83].mxu0 }
 0x706   : > { %v4607_v17 = vadd.f32 %v7526_v42, %v4606_v9 }
 0x707   : > { %v4646_v34 = vmax.f32 %v4612_v61, 0.0 }
 0x708   : > { %v4645_v11 = vmax.f32 %v4607_v17, 0.0  ;;  %v7989_v15 = vpop.f32.mrb[84].mxu0 }
 0x709   : > { %4654 = vst.msk [vmem:[%s12079_s9 + $0x8] sm:$0xff] %vm844_vm0, %v4646_v34  ;;  %v4622_v53 = vadd.f32 %v7989_v15, %v7526_v42  ;;  %v4616_v23 = vpop.f32.mrb[85].mxu0 }
 0x70a   : > { %4653 = vst.msk [vmem:[%s12079_s9] sm:$0xff] %vm844_vm0, %v4645_v11  ;;  %v4617_v26 = vadd.f32 %v7526_v42, %v4616_v23 }
 0x70b   : > { %v4648_v44 = vmax.f32 %v4622_v53, 0.0 }
 0x70c   : > { %v4647_v12 = vmax.f32 %v4617_v26, 0.0  ;;  %v7992_v62 = vpop.f32.mrb[86].mxu0 }
 0x70d   : > { %4656 = vst.msk [vmem:[%s12079_s9 + $0x18] sm:$0xff] %vm844_vm0, %v4648_v44  ;;  %v4632_v27 = vadd.f32 %v7992_v62, %v7526_v42  ;;  %v4626_v22 = vpop.f32.mrb[87].mxu0 }
 0x70e   : > { %4655 = vst.msk [vmem:[%s12079_s9 + $0x10] sm:$0xff] %vm844_vm0, %v4647_v12  ;;  %v4627_v29 = vadd.f32 %v7526_v42, %v4626_v22 }
 0x70f   : > { %v4650_v46 = vmax.f32 %v4632_v27, 0.0 }
 0x710   : > { %v4649_v4 = vmax.f32 %v4627_v29, 0.0  ;;  %v7995_v32 = vpop.f32.mrb[88].mxu0 }
 0x711   : > { %4658 = vst.msk [vmem:[%s12079_s9 + $0x28] sm:$0xff] %vm844_vm0, %v4650_v46  ;;  %v4642_v57 = vadd.f32 %v7995_v32, %v7526_v42  ;;  %v4636_v35 = vpop.f32.mrb[89].mxu0 }
 0x712   : > { %4657 = vst.msk [vmem:[%s12079_s9 + $0x20] sm:$0xff] %vm844_vm0, %v4649_v4  ;;  %v4637_v37 = vadd.f32 %v7526_v42, %v4636_v35 }
 0x713   : > { %v4652_v13 = vmax.f32 %v4642_v57, 0.0 }
 0x714   : > { %v4651_v41 = vmax.f32 %v4637_v37, 0.0  ;;  %v5409_v37 = vld [vmem:[%s13073_s26] sm:$0xff] }
 0x715   : > { %4660 = vst.msk [vmem:[%s12079_s9 + $0x38] sm:$0xff] %vm844_vm0, %v4652_v13  ;;  %v5410_v13 = vld [vmem:[%s13073_s26 + $0x8] sm:$0xff] }
 0x716   : > { %4659 = vst.msk [vmem:[%s12079_s9 + $0x30] sm:$0xff] %vm844_vm0, %v4651_v41  ;;  %v5411_v41 = vld [vmem:[%s13073_s26 + $0x10] sm:$0xff] }
 0x728   : > { %v5332_v6 = vpop.f32.mrb[90].mxu0 }
 0x729   : > { %v5334_v0 = vpop.f32.mrb[91].mxu0  ;;  %v5333_v19 = vadd.f32 %v12100_v8, %v5332_v6  ;;  %v5413_v6 = vld [vmem:[%s13073_s26 + $0x20] sm:$0xf] }
 0x72a   : > { %v5741_v0 = vld [vmem:[%s13074_s13] sm:$0xff] }
 0x72b   : > { %v5396_v5 = vmax.f32 %v5333_v19, 0.0  ;;  %v5742_v19 = vld [vmem:[%s13074_s13 + $0x8] sm:$0xff] }
 0x72c   : > { %v5337_v33 = vpop.f32.mrb[92].mxu0 }
 0x72d   : > { %v5338_v21 = vadd.f32 %v12100_v8, %v5337_v33  ;;  %v5339_v20 = vpop.f32.mrb[93].mxu0  ;;  %v8251_v33 = vpack.c.bf16 %v5742_v19, %v5741_v0 }
 0x72e   : > { %v5744_v20 = vld [vmem:[%s13074_s13 + $0x18] sm:$0xff] }
 0x72f   : > { %v5397_v47 = vmax.f32 %v5338_v21, 0.0  ;;  %v5743_v21 = vld [vmem:[%s13074_s13 + $0x10] sm:$0xff] }
 0x730   : > { %v5342_v48 = vpop.f32.mrb[94].mxu0 }
 0x731   : > { %v8233_v31 = vpack.c.bf16 %v5397_v47, %v5396_v5  ;;  %v5344_v49 = vpop.f32.mrb[95].mxu0  ;;  %v5343_v38 = vadd.f32 %v12100_v8, %v5342_v48  ;;  %v8254_v5 = vpack.c.bf16 %v5744_v20, %v5743_v21  ;;  %v5745_v47 = vld [vmem:[%s13074_s13 + $0x20] sm:$0xff]  ;;  %v5746_v48 = vld [vmem:[%s13074_s13 + $0x28] sm:$0xff] }
 0x732   : > { %v5747_v49 = vld [vmem:[%s13074_s13 + $0x30] sm:$0xff] }
 0x733   : > { %8234 = vmatpush3.bf16.msra.mxu1 %v8233_v31  ;;  %v5398_v51 = vmax.f32 %v5343_v38, 0.0  ;;  %v8257_v31 = vpack.c.bf16 %v5746_v48, %v5745_v47  ;;  %v5748_v38 = vld [vmem:[%s13074_s13 + $0x38] sm:$0xff] }
 0x734   : > { %v5347_v60 = vpop.f32.mrb[96].mxu0  ;;  %8235 = vmatprep.subr.bf16.mxu1 %v9932_v2 }
 0x735   : > { %v5348_v18 = vadd.f32 %v12100_v8, %v5347_v60  ;;  %v5349_v39 = vpop.f32.mrb[97].mxu0  ;;  %v8260_v60 = vpack.c.bf16 %v5748_v38, %v5747_v49 }
 0x736   : > { %v5750_v39 = vld [vmem:[%s13074_s13 + $0x48] sm:$0xff] }
 0x737   : > { %v5399_v55 = vmax.f32 %v5348_v18, 0.0  ;;  %v5749_v18 = vld [vmem:[%s13074_s13 + $0x40] sm:$0xff] }
 0x738   : > { %v5352_v63 = vpop.f32.mrb[98].mxu0 }
 0x739   : > { %v8236_v25 = vpack.c.bf16 %v5399_v55, %v5398_v51  ;;  %v5354_v24 = vpop.f32.mrb[99].mxu0  ;;  %v5353_v52 = vadd.f32 %v12100_v8, %v5352_v63  ;;  %v8263_v51 = vpack.c.bf16 %v5750_v39, %v5749_v18 }
 0x73a   : > { %v5752_v24 = vld [vmem:[%s13074_s13 + $0x58] sm:$0xff] }
 0x73b   : > { %8237 = vmatpush3.bf16.msra.mxu1 %v8236_v25  ;;  %v5400_v40 = vmax.f32 %v5353_v52, 0.0  ;;  %v5751_v25 = vld [vmem:[%s13074_s13 + $0x50] sm:$0xff] }
 0x73c   : > { %v5357_v10 = vpop.f32.mrb[100].mxu0  ;;  %8238 = vmatprep.subr.bf16.mxu1 %v9932_v2  ;;  %v8266_v52 = vpack.c.bf16 %v5752_v24, %v5751_v25 }
 0x73d   : > { %v5358_v28 = vadd.f32 %v12100_v8, %v5357_v10  ;;  %v5359_v45 = vpop.f32.mrb[101].mxu0 }
 0x73e   : > { %v5753_v45 = vld [vmem:[%s13074_s13 + $0x60] sm:$0xff] }
 0x73f   : > { %v5401_v30 = vmax.f32 %v5358_v28, 0.0 }
 0x740   : > { %v5362_v56 = vpop.f32.mrb[102].mxu0 }
 0x741   : > { %v8239_v16 = vpack.c.bf16 %v5401_v30, %v5400_v40  ;;  %v5364_v58 = vpop.f32.mrb[103].mxu0  ;;  %v5363_v59 = vadd.f32 %v12100_v8, %v5362_v56  ;;  %v5754_v40 = vld [vmem:[%s13074_s13 + $0x68] sm:$0xff] }
 0x742   : > { %v8269_v30 = vpack.c.bf16 %v5754_v40, %v5753_v45  ;;  %v5755_v58 = vld [vmem:[%s13074_s13 + $0x70] sm:$0xff]  ;;  %v5873_v40 = vld [vmem:[%s12968_s15] sm:$0xff] }
 0x743   : > { %8240 = vmatpush3.bf16.msra.mxu1 %v8239_v16  ;;  %v5402_v36 = vmax.f32 %v5363_v59, 0.0  ;;  %v5756_v59 = vld [vmem:[%s13074_s13 + $0x78] sm:$0xff] }
 0x744   : > { %v5367_v7 = vpop.f32.mrb[104].mxu0  ;;  %8241 = vmatprep.subr.bf16.mxu1 %v9932_v2 }
 0x745   : > { %v5368_v14 = vadd.f32 %v12100_v8, %v5367_v7  ;;  %v5369_v3 = vpop.f32.mrb[105].mxu0 }
 0x747   : > { %v5403_v54 = vmax.f32 %v5368_v14, 0.0  ;;  %v8272_v14 = vpack.c.bf16 %v5756_v59, %v5755_v58  ;;  %v5877_v58 = vld [vmem:[%s12968_s15 + $0x20] sm:$0xf]  ;;  %v5876_v59 = vld [vmem:[%s12968_s15 + $0x18] sm:$0xff] }
 0x748   : > { %v5372_v43 = vpop.f32.mrb[106].mxu0 }
 0x749   : > { %v8242_v42 = vpack.c.bf16 %v5403_v54, %v5402_v36  ;;  %v5374_v50 = vpop.f32.mrb[107].mxu0  ;;  %v5373_v61 = vadd.f32 %v12100_v8, %v5372_v43 }
 0x74b   : > { %8243 = vmatpush3.bf16.msra.mxu1 %v8242_v42  ;;  %v5404_v11 = vmax.f32 %v5373_v61, 0.0 }
 0x74c   : > { %v5377_v9 = vpop.f32.mrb[108].mxu0  ;;  %8244 = vmatprep.subr.bf16.mxu1 %v9932_v2 }
 0x74d   : > { %v5378_v17 = vadd.f32 %v12100_v8, %v5377_v9  ;;  %v5379_v34 = vpop.f32.mrb[109].mxu0 }
 0x74e   : > { %v5757_v34 = vld [vmem:[%s13074_s13 + $0x80] sm:$0xff] }
 0x74f   : > { %v5405_v15 = vmax.f32 %v5378_v17, 0.0 }
 0x750   : > { %v5382_v53 = vpop.f32.mrb[110].mxu0 }
 0x751   : > { %v8245_v23 = vpack.c.bf16 %v5405_v15, %v5404_v11  ;;  %v5384_v26 = vpop.f32.mrb[111].mxu0  ;;  %v5383_v44 = vadd.f32 %v12100_v8, %v5382_v53  ;;  %v5758_v11 = vld [vmem:[%s13074_s13 + $0x88] sm:$0xff]  ;;  %s13076_s13 = smov %s13075_s30 }
 0x752   : > { %v8275_v15 = vpack.c.bf16 %v5758_v11, %v5757_v34 }
 0x753   : > { %8246 = vmatpush3.bf16.msra.mxu1 %v8245_v23  ;;  %v5406_v22 = vmax.f32 %v5383_v44, 0.0 }
 0x754   : > { %v5387_v12 = vpop.f32.mrb[112].mxu0  ;;  %8247 = vmatprep.subr.bf16.mxu1 %v9932_v2 }
 0x755   : > { %v5388_v62 = vadd.f32 %v12100_v8, %v5387_v12  ;;  %v5389_v27 = vpop.f32.mrb[113].mxu0 }
 0x757   : > { %v5407_v29 = vmax.f32 %v5388_v62, 0.0 }
 0x758   : > { %v5392_v46 = vpop.f32.mrb[114].mxu0 }
 0x759   : > { %v8248_v4 = vpack.c.bf16 %v5407_v29, %v5406_v22  ;;  %v5393_v32 = vadd.f32 %v12100_v8, %v5392_v46  ;;  %v5394_v57 = vpop.f32.mrb[115].mxu0  ;;  %v5412_v8 = vld [vmem:[%s13073_s26 + $0x18] sm:$0xff]  ;;  %s13078_s26 = sld [smem:[#allocation14_spill]] }
 0x75b   : > { %8249 = vmatpush3.bf16.msra.mxu1 %v8248_v4  ;;  %v5408_v35 = vmax.f32 %v5393_v32, 0.0 }
 0x75c   : > { %8020 = vmatprep.subr.mxu1 %v9931_v1 }
 0x75f   : > { %8021 = vmatpush3.msk.msra.mxu1 %vm3223_vm10, %v5408_v35 }
 0x760   : > { %8023 = vmatmul.mubr.msk.f32.vlgmr.msra.gmra.mrb[104].mxu1 %vm4512_vm12, %v5409_v37  ;;  %8250 = vmatprep.subr.bf16.mxu1 %v9932_v2 }
 0x761   : > { %8025 = vmatprep.mubr.msk.f32.mxu1 %vm9940_vm9, %v9931_v1  ;;  %8252 = vmatpush1.bf16.msra.mxu1 %v8251_v33 }
 0x762   : > { %8253 = vmatprep.subr.bf16.mxu1 %v9932_v2 }
 0x764   : > { %8026 = vmatmul.mubr.msk.f32.gmra.mrb[106].mxu1 %vm4512_vm12, %v5410_v13 }
 0x765   : > { %8028 = vmatprep.mubr.msk.f32.mxu1 %vm9940_vm9, %v9931_v1  ;;  %8255 = vmatpush1.bf16.msra.mxu1 %v8254_v5 }
 0x766   : > { %8256 = vmatprep.subr.bf16.mxu1 %v9932_v2 }
 0x768   : > { %8029 = vmatmul.mubr.msk.f32.gmra.mrb[108].mxu1 %vm4512_vm12, %v5411_v41 }
 0x769   : > { %8031 = vmatprep.mubr.msk.f32.mxu1 %vm9940_vm9, %v9931_v1  ;;  %8258 = vmatpush1.bf16.msra.mxu1 %v8257_v31 }
 0x76a   : > { %8259 = vmatprep.subr.bf16.mxu1 %v9932_v2 }
 0x76c   : > { %8032 = vmatmul.mubr.msk.f32.gmra.mrb[110].mxu1 %vm4512_vm12, %v5412_v8 }
 0x76d   : > { %8034 = vmatprep.mubr.msk.f32.mxu1 %vm9940_vm9, %v9931_v1  ;;  %8261 = vmatpush1.bf16.msra.mxu1 %v8260_v60 }
 0x76e   : > { %8262 = vmatprep.subr.bf16.mxu1 %v9932_v2 }
 0x770   : > { %8035 = vmatmul.mubr.msk.f32.gmra.mrb[112].mxu1 %vm4512_vm12, %v5413_v6 }
 0x771   : > { %8264 = vmatpush1.bf16.msra.mxu1 %v8263_v51 }
 0x772   : > { %8265 = vmatprep.subr.bf16.mxu1 %v9932_v2 }
 0x775   : > { %8267 = vmatpush1.bf16.msra.mxu1 %v8266_v52 }
 0x776   : > { %8268 = vmatprep.subr.bf16.mxu1 %v9932_v2 }
 0x779   : > { %8270 = vmatpush1.bf16.msra.mxu1 %v8269_v30  ;;  %v5563_v30 = vld [vmem:[#allocation5 + $0x2e] sm:$0xf] }
 0x77a   : > { %8271 = vmatprep.subr.bf16.mxu1 %v9932_v2 }
 0x77d   : > { %8273 = vmatpush1.bf16.msra.mxu1 %v8272_v14 }
 0x77e   : > { %8274 = vmatprep.subr.bf16.mxu1 %v9932_v2 }
 0x781   : > { %8276 = vmatpush1.bf16.msra.mxu1 %v8275_v15 }
 0x782   : > { %8277 = vmatprep.subr.bf16.mxu1 %v9932_v2 }
 0x833   : > { %v5498_v55 = vpop.f32.mrb[104].mxu1 }
 0x834   : > { %5522 = vst.msk [vmem:[#allocation5 + $0x8] sm:$0xff] %vm844_vm0, %v5498_v55  ;;  %v8024_v63 = vpop.f32.mrb[105].mxu1 }
 0x837   : > { %v5503_v10 = vpop.f32.mrb[106].mxu1 }
 0x838   : > { %5523 = vst.msk [vmem:[#allocation5 + $0x10] sm:$0xff] %vm844_vm0, %v5503_v10  ;;  %v8027_v28 = vpop.f32.mrb[107].mxu1 }
 0x839   : > { %v5558_v28 = vld [vmem:[#allocation5 + $0x2d] sm:$0xf] }
 0x83b   : > { %v5508_v56 = vpop.f32.mrb[108].mxu1  ;;  %v5537_v7 = vld [vmem:[#allocation5 + $0x3] sm:$0xff] }
 0x83c   : > { %5524 = vst.msk [vmem:[#allocation5 + $0x18] sm:$0xff] %vm844_vm0, %v5508_v56  ;;  %v8030_v16 = vpop.f32.mrb[109].mxu1  ;;  %v5532_v36 = vld [vmem:[#allocation5 + $0x2] sm:$0xff] }
 0x83d   : > { %v5547_v53 = vld [vmem:[#allocation5 + $0x8] sm:$0xff]  ;;  %v5875_v56 = vld [vmem:[%s12968_s15 + $0x10] sm:$0xff]  ;;  %v5874_v16 = vld [vmem:[%s12968_s15 + $0x8] sm:$0xff] }
 0x83e   : > { %v5542_v23 = vld [vmem:[#allocation5 + $0x7] sm:$0xff] }
 0x83f   : > { %v5538_v3 = vld [vmem:[#allocation5 + $0xb] sm:$0xff]  ;;  %v5513_v43 = vpop.f32.mrb[110].mxu1 }
 0x840   : > { %v5533_v54 = vld [vmem:[#allocation5 + $0xa] sm:$0xff]  ;;  %v9602_v42 = vpack.i.bf16 %v5538_v3, %v5537_v7  ;;  %5525 = vst.msk [vmem:[#allocation5 + $0x20] sm:$0xff] %vm844_vm0, %v5513_v43  ;;  %v8033_v9 = vpop.f32.mrb[111].mxu1 }
 0x841   : > { %v9597_v50 = vpack.i.bf16 %v5533_v54, %v5532_v36  ;;  %v5543_v61 = vld [vmem:[#allocation5 + $0xf] sm:$0xff]  ;;  %v5527_v54 = vld [vmem:[#allocation5 + $0x1] sm:$0xff] }
 0x842   : > { %v5548_v17 = vld [vmem:[#allocation5 + $0x10] sm:$0xff]  ;;  %7557 = vmatprep.mubr.msk.f32.mxu1 %vm844_vm0, %v5543_v61  ;;  %9603 = vrot.lane.b32.xlu0 %v9602_v42, %s13066_s4  ;;  %v9607_v12 = vpack.i.bf16 %v5543_v61, %v5542_v23 }
 0x843   : > { %9598 = vrot.lane.b32.xlu1 %v9597_v50, %s13067_s11  ;;  %v5518_v26 = vpop.f32.mrb[112].mxu1  ;;  %v9612_v44 = vpack.i.bf16 %v5548_v17, %v5547_v53  ;;  %v5555_v27 = vld [vmem:[#allocation5 + $0x15] sm:$0xff]  ;;  %v5554_v29 = vld [vmem:[#allocation5 + $0xd] sm:$0xff] }
 0x844   : > { %5526 = vst.msk [vmem:[#allocation5 + $0x28] sm:$0xf] %vm1026_vm5, %v5518_v26  ;;  %v8036_v62 = vpop.f32.mrb[113].mxu1  ;;  %v12223_v22 = vld [vmem:[#allocation5 + $0x11] sm:$0xff]  ;;  %v12228_v46 = vld [vmem:[#allocation5 + $0x9] sm:$0xff]  ;;  %v9622_v4 = vpack.i.bf16 %v5555_v27, %v5554_v29 }
 0x845   : > { %v9617_v32 = vpack.i.bf16 %v12223_v22, %v12228_v46  ;;  %v5560_v57 = vld [vmem:[#allocation5 + $0x16] sm:$0xff]  ;;  %v5559_v37 = vld [vmem:[#allocation5 + $0xe] sm:$0xff] }
 0x846   : > { %9613 = vrot.lane.b32.xlu0 %v9612_v44, %s13057_s12  ;;  %v5534_v13 = vld [vmem:[#allocation5 + $0x12] sm:$0xff]  ;;  %v9627_v41 = vpack.i.bf16 %v5560_v57, %v5559_v37 }
 0x847   : > { %9608 = vrot.lane.b32.xlu1 %v9607_v12, %s13058_s29  ;;  %v5535_v35 = vld [vmem:[#allocation5 + $0x1a] sm:$0xff]  ;;  %v5541_v31 = vld [vmem:[#allocation5 + $0x23] sm:$0xf] }
 0x848   : > { %v9632_v8 = vpack.i.bf16 %v5535_v35, %v5534_v13  ;;  %v5540_v6 = vld [vmem:[#allocation5 + $0x1b] sm:$0xff]  ;;  %v5539_v19 = vld [vmem:[#allocation5 + $0x13] sm:$0xff] }
 0x849   : > { %v12234_v0 = vld [vmem:[#allocation5 + $0x1f] sm:$0xff]  ;;  %v12238_v33 = vld [vmem:[#allocation5 + $0x17] sm:$0xff]  ;;  %v9637_v21 = vpack.i.bf16 %v5540_v6, %v5539_v19 }
 0x84a   : > { %9623 = vrot.lane.b32.xlu0 %v9622_v4, %s13060_s8  ;;  %v9642_v20 = vpack.i.bf16 %v12234_v0, %v12238_v33  ;;  %v5549_v5 = vld [vmem:[#allocation5 + $0x18] sm:$0xff]  ;;  %v5550_v47 = vld [vmem:[#allocation5 + $0x20] sm:$0xff] }
 0x84b   : > { %9618 = vrot.lane.b32.xlu1 %v9617_v32, %s13059_s7  ;;  %v9647_v48 = vpack.i.bf16 %v5550_v47, %v5549_v5  ;;  %v5552_v49 = vld [vmem:[#allocation5 + $0x21] sm:$0xff]  ;;  %v12246_v38 = vld [vmem:[#allocation5 + $0x19] sm:$0xff]  ;;  %v5553_v45 = vld [vmem:[#allocation5 + $0x29] sm:$0xf] }
 0x84c   : > { %v9652_v60 = vpack.i.bf16 %v5552_v49, %v12246_v38  ;;  %v5536_v18 = vld [vmem:[#allocation5 + $0x22] sm:$0xf]  ;;  %v5562_v51 = vld [vmem:[#allocation5 + $0x26] sm:$0xff] }
 0x84d   : > { %v5557_v39 = vld [vmem:[#allocation5 + $0x25] sm:$0xff]  ;;  %v5556_v55 = vld [vmem:[#allocation5 + $0x1d] sm:$0xff] }
 0x84e   : > { %9633 = vrot.lane.b32.xlu0 %v9632_v8, %s13067_s11  ;;  %v5561_v63 = vld [vmem:[#allocation5 + $0x1e] sm:$0xff]  ;;  %v9657_v25 = vpack.i.bf16 %v5557_v39, %v5556_v55  ;;  %v5551_v52 = vld [vmem:[#allocation5 + $0x28] sm:$0xf] }
 0x84f   : > { %9628 = vrot.lane.b32.xlu1 %v9627_v41, %s13061_s10  ;;  %v9662_v24 = vpack.i.bf16 %v5562_v51, %v5561_v63  ;;  %v5546_v10 = vld [vmem:[#allocation5 + $0x27] sm:$0xf] }
 0x852   : > { %9643 = vrot.lane.b32.xlu0 %v9642_v20, %s13058_s29 }
 0x853   : > { %9638 = vrot.lane.b32.xlu1 %v9637_v21, %s13066_s4 }
 0x856   : > { %5599 = vrot.lane.b32.xlu0 %v5541_v31, %s13066_s4 }
 0x857   : > { %9648 = vrot.lane.b32.xlu1 %v9647_v48, %s13057_s12 }
 0x85a   : > { %9653 = vrot.lane.b32.xlu0 %v9652_v60, %s13059_s7 }
 0x85b   : > { %5579 = vrot.lane.b32.xlu1 %v5536_v18, %s13067_s11 }
 0x85e   : > { %9663 = vrot.lane.b32.xlu0 %v9662_v24, %s13061_s10 }
 0x85f   : > { %9658 = vrot.lane.b32.xlu1 %v9657_v25, %s13060_s8 }
 0x862   : > { %5639 = vrot.lane.b32.xlu0 %v5551_v52, %s13057_s12 }
 0x863   : > { %5619 = vrot.lane.b32.xlu1 %v5546_v10, %s13058_s29 }
 0x866   : > { %5679 = vrot.lane.b32.xlu0 %v5558_v28, %s13060_s8 }
 0x867   : > { %5659 = vrot.lane.b32.xlu1 %v5553_v45, %s13059_s7 }
 0x86a   : > { %5880 = vperm.xlu0 %9385, %v5873_v40  }
 0x86b   : > { %5699 = vrot.lane.b32.xlu1 %v5563_v30, %s13061_s10 }
 0x86e   : > { %5890 = vperm.xlu0 %9385, %v5875_v56  }
 0x86f   : > { %5885 = vperm.xlu1 %9386, %v5874_v16  }
 0x872   : > { %5900 = vperm.xlu0 %9385, %v5877_v58  }
 0x873   : > { %5895 = vperm.xlu1 %9386, %v5876_v59  }
 0x8b4   : > { %v9604_v7 = vpop.permute.xlu0 %9603 }
 0x8b5   : > { %v9599_v14 = vpop.permute.xlu1 %9598  ;;  %v9605_v36 = vunpack.i.l.bf16 %v9604_v7  ;;  %v9606_v17 = vunpack.i.h.bf16 %v9604_v7 }
 0x8b6   : > { %v9600_v3 = vunpack.i.l.bf16 %v9599_v14  ;;  %v9601_v43 = vunpack.i.h.bf16 %v9599_v14 }
 0x8b8   : > { %v5706_v42 = vsel %vm844_vm0, %v5527_v54, %v9600_v3  ;;  %v9614_v50 = vpop.permute.xlu0 %9613  ;;  %v5707_v15 = vsel %vm844_vm0, %v12228_v46, %v9601_v43 }
 0x8b9   : > { %v9609_v61 = vpop.permute.xlu1 %9608  ;;  %v9615_v34 = vunpack.i.l.bf16 %v9614_v50  ;;  %v5711_v11 = vsel %vm939_vm1, %v5706_v42, %v9605_v36  ;;  %v9616_v62 = vunpack.i.h.bf16 %v9614_v50  ;;  %v5712_v27 = vsel %vm939_vm1, %v5707_v15, %v9606_v17 }
 0x8ba   : > { %v9610_v9 = vunpack.i.l.bf16 %v9609_v61  ;;  %v9611_v53 = vunpack.i.h.bf16 %v9609_v61 }
 0x8bc   : > { %v5716_v23 = vsel %vm2475_vm2, %v5711_v11, %v9610_v9  ;;  %v9624_v26 = vpop.permute.xlu0 %9623  ;;  %v5717_v32 = vsel %vm2475_vm2, %v5712_v27, %v9611_v53 }
 0x8bd   : > { %v9619_v44 = vpop.permute.xlu1 %9618  ;;  %v9625_v29 = vunpack.i.l.bf16 %v9624_v26  ;;  %v5721_v4 = vsel %vm2517_vm3, %v5716_v23, %v9615_v34  ;;  %v9626_v41 = vunpack.i.h.bf16 %v9624_v26  ;;  %v5722_v6 = vsel %vm2517_vm3, %v5717_v32, %v9616_v62  ;;  %v5564_v23 = vld [vmem:[#allocation5 + $0x27] sm:$0xff] }
 0x8be   : > { %v9620_v12 = vunpack.i.l.bf16 %v9619_v44  ;;  %v9621_v57 = vunpack.i.h.bf16 %v9619_v44  ;;  %v5565_v44 = vld [vmem:[#allocation5 + $0x2f] sm:$0xf] }
 0x8c0   : > { %v5726_v35 = vsel %vm2559_vm4, %v5721_v4, %v9620_v12  ;;  %v9634_v13 = vpop.permute.xlu0 %9633  ;;  %v5727_v20 = vsel %vm2559_vm4, %v5722_v6, %v9621_v57  ;;  %v6498_v6 = vld [vmem:[%s12972_s19 + $0x10] sm:$0xff] }
 0x8c1   : > { %v9629_v37 = vpop.permute.xlu1 %9628  ;;  %v5731_v8 = vsel %vm2601_vm6, %v5726_v35, %v9625_v29  ;;  %v5732_v48 = vsel %vm2601_vm6, %v5727_v20, %v9626_v41  ;;  %v9635_v31 = vunpack.i.l.bf16 %v9634_v13  ;;  %v9636_v51 = vunpack.i.h.bf16 %v9634_v13  ;;  %v5909_v13 = vld [vmem:[%s12969_s16 + $0x8] sm:$0xff]  ;;  %v6496_v41 = vld [vmem:[%s12972_s19] sm:$0xff] }
 0x8c2   : > { %v9630_v46 = vunpack.i.l.bf16 %v9629_v37  ;;  %v9631_v19 = vunpack.i.h.bf16 %v9629_v37  ;;  %v5908_v37 = vld [vmem:[%s12969_s16] sm:$0xff] }
 0x8c3   : > { %v5708_v55 = vsel %vm844_vm0, %v12223_v22, %v9635_v31  ;;  %v5709_v28 = vsel %vm844_vm0, %v12246_v38, %v9636_v51  ;;  %v5531_v22 = vld [vmem:[#allocation5 + $0x21] sm:$0xf] }
 0x8c4   : > { %v5736_v21 = vsel %vm2643_vm7, %v5731_v8, %v9630_v46  ;;  %v9644_v47 = vpop.permute.xlu0 %9643  ;;  %v5737_v49 = vsel %vm2643_vm7, %v5732_v48, %v9631_v19  ;;  %v8278_v46 = vpack.c.bf16 %v5909_v13, %v5908_v37  ;;  %v6497_v8 = vld [vmem:[%s12972_s19 + $0x8] sm:$0xff]  ;;  %v6502_v31 = vld [vmem:[%s12972_s19 + $0x30] sm:$0xff]  ;;  %v6512_v37 = vld [vmem:[%s12972_s19 + $0x80] sm:$0xff] }
 0x8c5   : > { %5843 = vmatmul.mubr.f32.vlgmr.msra.gmra.mrb[114].mxu1 %v5736_v21  ;;  %v9639_v5 = vpop.permute.xlu1 %9638  ;;  %v9645_v25 = vunpack.i.l.bf16 %v9644_v47  ;;  %v9646_v45 = vunpack.i.h.bf16 %v9644_v47  ;;  %v8308_v19 = vpack.c.bf16 %v6497_v8, %v6496_v41  ;;  %v6499_v21 = vld [vmem:[%s12972_s19 + $0x18] sm:$0xff]  ;;  %v6501_v47 = vld [vmem:[%s12972_s19 + $0x28] sm:$0xff] }
 0x8c6   : > { %7558 = vmatprep.mubr.msk.f32.mxu1 %vm844_vm0, %v12238_v33  ;;  %v9640_v60 = vunpack.i.l.bf16 %v9639_v5  ;;  %v9641_v63 = vunpack.i.h.bf16 %v9639_v5  ;;  %8279 = vmatpush3.bf16.msra.mxu1 %v8278_v46  ;;  %v8311_v20 = vpack.c.bf16 %v6499_v21, %v6498_v6  ;;  %v6500_v5 = vld [vmem:[%s12972_s19 + $0x20] sm:$0xff]  ;;  %v6513_v13 = vld [vmem:[%s12972_s19 + $0x88] sm:$0xff] }
 0x8c7   : > { %8280 = vmatprep.subr.bf16.mxu1 %v9932_v2  ;;  %8309 = vmatpush1.bf16.msra.mxu0 %v8308_v19  ;;  %v8314_v48 = vpack.c.bf16 %v6501_v47, %v6500_v5  ;;  %v8332_v41 = vpack.c.bf16 %v6513_v13, %v6512_v37 }
 0x8c8   : > { %v5600_v39 = vpop.permute.xlu0 %5599  ;;  %v5713_v33 = vsel %vm939_vm1, %v5708_v55, %v9640_v60  ;;  %v5714_v30 = vsel %vm939_vm1, %v5709_v28, %v9641_v63  ;;  %8310 = vmatprep.subr.bf16.mxu0 %v9932_v2 }
 0x8c9   : > { %5848 = vmatmul.mubr.f32.gmra.mrb[116].mxu1 %v5737_v49  ;;  %v9649_v18 = vpop.permute.xlu1 %9648  ;;  %v5719_v38 = vsel %vm2475_vm2, %v5714_v30, %v9646_v45  ;;  %v6503_v49 = vld [vmem:[%s12972_s19 + $0x38] sm:$0xff]  ;;  %v6505_v30 = vld [vmem:[%s12972_s19 + $0x48] sm:$0xff] }
 0x8ca   : > { %7559 = vmatprep.mubr.msk.f32.mxu1 %vm844_vm0, %v12234_v0  ;;  %v9650_v24 = vunpack.i.l.bf16 %v9649_v18  ;;  %v5718_v0 = vsel %vm2475_vm2, %v5713_v33, %v9645_v25  ;;  %v9651_v56 = vunpack.i.h.bf16 %v9649_v18  ;;  %v8317_v60 = vpack.c.bf16 %v6503_v49, %v6502_v31  ;;  %v12357_v18 = vld [vmem:[%s12967_s14] ss:$0 sm:$0xff] }
 0x8cb   : > { %8312 = vmatpush1.bf16.msra.mxu0 %v8311_v20 }
 0x8cc   : > { %v9654_v10 = vpop.permute.xlu0 %9653  ;;  %v5723_v16 = vsel %vm2517_vm3, %v5718_v0, %v9650_v24  ;;  %v5724_v42 = vsel %vm2517_vm3, %v5719_v38, %v9651_v56  ;;  %8313 = vmatprep.subr.bf16.mxu0 %v9932_v2 }
 0x8cd   : > { %v5580_v52 = vpop.permute.xlu1 %5579  ;;  %v9655_v40 = vunpack.i.l.bf16 %v9654_v10  ;;  %v9656_v58 = vunpack.i.h.bf16 %v9654_v10 }
 0x8ce   : > { %v5710_v14 = vsel %vm844_vm0, %v5531_v22, %v5580_v52  ;;  %v6507_v22 = vld [vmem:[%s12972_s19 + $0x58] sm:$0xff] }
 0x8cf   : > { %v5728_v43 = vsel %vm2559_vm4, %v5723_v16, %v9655_v40  ;;  %v5715_v9 = vsel %vm939_vm1, %v5710_v14, %v5600_v39  ;;  %v5729_v15 = vsel %vm2559_vm4, %v5724_v42, %v9656_v58  ;;  %8315 = vmatpush1.bf16.msra.mxu0 %v8314_v48  ;;  %v6504_v40 = vld [vmem:[%s12972_s19 + $0x40] sm:$0xff]  ;;  %v6506_v16 = vld [vmem:[%s12972_s19 + $0x50] sm:$0xff] }
 0x8d0   : > { %v9664_v7 = vpop.permute.xlu0 %9663  ;;  %8316 = vmatprep.subr.bf16.mxu0 %v9932_v2  ;;  %v8320_v56 = vpack.c.bf16 %v6505_v30, %v6504_v40  ;;  %v8323_v58 = vpack.c.bf16 %v6507_v22, %v6506_v16 }
 0x8d1   : > { %v9659_v59 = vpop.permute.xlu1 %9658  ;;  %v9665_v54 = vunpack.i.l.bf16 %v9664_v7  ;;  %v9666_v61 = vunpack.i.h.bf16 %v9664_v7  ;;  %v6509_v7 = vld [vmem:[%s12972_s19 + $0x68] sm:$0xff] }
 0x8d2   : > { %v9661_v3 = vunpack.i.h.bf16 %v9659_v59  ;;  %v9660_v36 = vunpack.i.l.bf16 %v9659_v59  ;;  %v6508_v59 = vld [vmem:[%s12972_s19 + $0x60] sm:$0xff] }
 0x8d3   : > { %8318 = vmatpush1.bf16.msra.mxu0 %v8317_v60 }
 0x8d4   : > { %v5733_v50 = vsel %vm2601_vm6, %v5728_v43, %v9660_v36  ;;  %v5640_v11 = vpop.permute.xlu0 %5639  ;;  %v5734_v26 = vsel %vm2601_vm6, %v5729_v15, %v9661_v3  ;;  %8319 = vmatprep.subr.bf16.mxu0 %v9932_v2  ;;  %v6510_v15 = vld [vmem:[%s12972_s19 + $0x70] sm:$0xff] }
 0x8d5   : > { %v5620_v17 = vpop.permute.xlu1 %5619  ;;  %v5738_v34 = vsel %vm2643_vm7, %v5733_v50, %v9665_v54  ;;  %v5739_v27 = vsel %vm2643_vm7, %v5734_v26, %v9666_v61  ;;  %v8326_v54 = vpack.c.bf16 %v6509_v7, %v6508_v59 }
 0x8d6   : > { %v5720_v53 = vsel %vm2475_vm2, %v5715_v9, %v5620_v17  ;;  %5853 = vmatmul.mubr.f32.gmra.mrb[118].mxu1 %v5738_v34 }
 0x8d7   : > { %7560 = vmatprep.mubr.msk.f32.mxu1 %vm844_vm0, %v5564_v23  ;;  %v5725_v12 = vsel %vm2517_vm3, %v5720_v53, %v5640_v11  ;;  %8321 = vmatpush1.bf16.msra.mxu0 %v8320_v56  ;;  %v6511_v53 = vld [vmem:[%s12972_s19 + $0x78] sm:$0xff] }
 0x8d8   : > { %v5680_v4 = vpop.permute.xlu0 %5679  ;;  %8322 = vmatprep.subr.bf16.mxu0 %v9932_v2 }
 0x8d9   : > { %v5660_v62 = vpop.permute.xlu1 %5659 }
 0x8da   : > { %v5730_v29 = vsel %vm2559_vm4, %v5725_v12, %v5660_v62  ;;  %5858 = vmatmul.mubr.f32.gmra.mrb[120].mxu1 %v5739_v27 }
 0x8db   : > { %7561 = vmatprep.mubr.msk.f32.mxu1 %vm844_vm0, %v5565_v44  ;;  %v5735_v32 = vsel %vm2601_vm6, %v5730_v29, %v5680_v4  ;;  %8324 = vmatpush1.bf16.msra.mxu0 %v8323_v58  ;;  %v8329_v44 = vpack.c.bf16 %v6511_v53, %v6510_v15 }
 0x8dc   : > { %8325 = vmatprep.subr.bf16.mxu0 %v9932_v2 }
 0x8dd   : > { %v5700_v57 = vpop.permute.xlu1 %5699 }
 0x8de   : > { %v5740_v35 = vsel %vm2643_vm7, %v5735_v32, %v5700_v57 }
 0x8df   : > { %5863 = vmatmul.mubr.f32.gmra.mrb[122].mxu1 %v5740_v35  ;;  %8327 = vmatpush1.bf16.msra.mxu0 %v8326_v54 }
 0x8e0   : > { %8041 = vmatprep.mubr.msk.f32.mxu1 %vm9940_vm9, %v9931_v1  ;;  %8328 = vmatprep.subr.bf16.mxu0 %v9932_v2 }
 0x8e3   : > { %8330 = vmatpush1.bf16.msra.mxu0 %v8329_v44 }
 0x8e4   : > { %8331 = vmatprep.subr.bf16.mxu0 %v9932_v2 }
 0x8e7   : > { %8333 = vmatpush1.bf16.msra.mxu0 %v8332_v41 }
 0x8e9   : > { %v5881_v25 = vpop.permute.xlu0 %5880 }
 0x8ed   : > { %v5891_v23 = vpop.permute.xlu0 %5890 }
 0x8ee   : > { %v5886_v45 = vpop.permute.xlu1 %5885 }
 0x8f1   : > { %v5901_v5 = vpop.permute.xlu0 %5900 }
 0x8f2   : > { %v5896_v46 = vpop.permute.xlu1 %5895 }
 0x998   : > { %v5844_v39 = vpop.f32.mrb[114].mxu1 }
 0x999   : > { %v5845_v51 = vadd.f32 %v12357_v18, %v5844_v39  ;;  %v5846_v55 = vpop.f32.mrb[115].mxu1 }
 0x99b   : > { %v5868_v63 = vmax.f32 %v5845_v51, 0.0 }
 0x99c   : > { %v5849_v33 = vpop.f32.mrb[116].mxu1 }
 0x99d   : > { %v5903_v24 = vmul.f32 %v5881_v25, %v5868_v63  ;;  %v5850_v52 = vadd.f32 %v12357_v18, %v5849_v33  ;;  %v5851_v10 = vpop.f32.mrb[117].mxu1 }
 0x99f   : > { %6277 = vst.msk [vmem:[#allocation6 + $0x8] sm:$0xff] %vm844_vm0, %v5903_v24  ;;  %v5869_v28 = vmax.f32 %v5850_v52, 0.0  ;;  %8042 = vmatmul.mubr.msk.f32.vlgmr.msra.gmra.mrb[124].mxu1 %vm844_vm0, %v5903_v24 }
 0x9a0   : > { %8044 = vmatprep.mubr.msk.f32.mxu1 %vm9940_vm9, %v9931_v1 }
 0x9a1   : > { %v5904_v0 = vmul.f32 %v5886_v45, %v5869_v28 }
 0x9a3   : > { %6278 = vst.msk [vmem:[#allocation6 + $0x10] sm:$0xff] %vm844_vm0, %v5904_v0  ;;  %8045 = vmatmul.mubr.msk.f32.gmra.mrb[126].mxu1 %vm844_vm0, %v5904_v0 }
 0x9a4   : > { %8047 = vmatprep.mubr.msk.f32.mxu1 %vm9940_vm9, %v9931_v1 }
 0x9a6   : > { %v6292_v3 = vld [vmem:[#allocation6 + $0x3] sm:$0xff] }
 0x9a7   : > { %v6287_v36 = vld [vmem:[#allocation6 + $0x2] sm:$0xff] }
 0x9a8   : > { %v6297_v62 = vld [vmem:[#allocation6 + $0x7] sm:$0xff] }
 0x9a9   : > { %v5854_v14 = vpop.f32.mrb[118].mxu1  ;;  %v6302_v4 = vld [vmem:[#allocation6 + $0x8] sm:$0xff] }
 0x9aa   : > { %v5855_v38 = vadd.f32 %v12357_v18, %v5854_v14  ;;  %v5856_v43 = vpop.f32.mrb[119].mxu1  ;;  %v6298_v42 = vld [vmem:[#allocation6 + $0xf] sm:$0xff]  ;;  %v6282_v44 = vld [vmem:[#allocation6 + $0x1] sm:$0xff] }
 0x9ab   : > { %v6293_v50 = vld [vmem:[#allocation6 + $0xb] sm:$0xff]  ;;  %7577 = vmatprep.mubr.msk.f32.mxu0 %vm844_vm0, %v6298_v42  ;;  %v9677_v32 = vpack.i.bf16 %v6298_v42, %v6297_v62 }
 0x9ac   : > { %v6288_v61 = vld [vmem:[#allocation6 + $0xa] sm:$0xff]  ;;  %v9672_v9 = vpack.i.bf16 %v6293_v50, %v6292_v3  ;;  %v5870_v34 = vmax.f32 %v5855_v38, 0.0 }
 0x9ad   : > { %v9667_v17 = vpack.i.bf16 %v6288_v61, %v6287_v36  ;;  %v6303_v11 = vld [vmem:[#allocation6 + $0x10] sm:$0xff]  ;;  %v5859_v26 = vpop.f32.mrb[120].mxu1 }
 0x9ae   : > { %9673 = vrot.lane.b32.xlu0 %v9672_v9, %s13066_s4  ;;  %v5905_v12 = vmul.f32 %v5891_v23, %v5870_v34  ;;  %v5860_v27 = vadd.f32 %v12357_v18, %v5859_v26  ;;  %v5861_v29 = vpop.f32.mrb[121].mxu1  ;;  %v9682_v57 = vpack.i.bf16 %v6303_v11, %v6302_v4  ;;  %v6309_v47 = vld [vmem:[#allocation6 + $0xd] sm:$0xff] }
 0x9af   : > { %9668 = vrot.lane.b32.xlu1 %v9667_v17, %s13067_s11  ;;  %v12419_v49 = vld [vmem:[#allocation6 + $0x9] sm:$0xff] }
 0x9b0   : > { %6279 = vst.msk [vmem:[#allocation6 + $0x18] sm:$0xff] %vm844_vm0, %v5905_v12  ;;  %v5871_v35 = vmax.f32 %v5860_v27, 0.0  ;;  %8048 = vmatmul.mubr.msk.f32.gmra.mrb[128].mxu1 %vm844_vm0, %v5905_v12  ;;  %v6314_v25 = vld [vmem:[#allocation6 + $0xe] sm:$0xff] }
 0x9b1   : > { %8050 = vmatprep.mubr.msk.f32.mxu1 %vm9940_vm9, %v9931_v1  ;;  %v6313_v9 = vld [vmem:[#allocation6 + $0x2d] sm:$0xf] }
 0x9b2   : > { %9683 = vrot.lane.b32.xlu0 %v9682_v57, %s13057_s12  ;;  %v5906_v8 = vmul.f32 %v5896_v46, %v5871_v35  ;;  %v5864_v6 = vpop.f32.mrb[122].mxu1  ;;  %v6318_v34 = vld [vmem:[#allocation6 + $0x2e] sm:$0xf] }
 0x9b3   : > { %9678 = vrot.lane.b32.xlu1 %v9677_v32, %s13058_s29  ;;  %v5865_v19 = vadd.f32 %v12357_v18, %v5864_v6  ;;  %v5866_v21 = vpop.f32.mrb[123].mxu1 }
 0x9b4   : > { %6280 = vst.msk [vmem:[#allocation6 + $0x20] sm:$0xff] %vm844_vm0, %v5906_v8  ;;  %8051 = vmatmul.mubr.msk.f32.gmra.mrb[130].mxu1 %vm844_vm0, %v5906_v8 }
 0x9b5   : > { %v5872_v20 = vmax.f32 %v5865_v19, 0.0  ;;  %8053 = vmatprep.mubr.msk.f32.mxu1 %vm9940_vm9, %v9931_v1 }
 0x9b7   : > { %v5907_v48 = vmul.f32 %v5901_v5, %v5872_v20  ;;  %v6310_v31 = vld [vmem:[#allocation6 + $0x15] sm:$0xff] }
 0x9b8   : > { %v12421_v60 = vld [vmem:[#allocation6 + $0x11] sm:$0xff]  ;;  %v9692_v39 = vpack.i.bf16 %v6310_v31, %v6309_v47 }
 0x9b9   : > { %v9687_v18 = vpack.i.bf16 %v12421_v60, %v12419_v49  ;;  %6281 = vst.msk [vmem:[#allocation6 + $0x28] sm:$0xf] %vm1026_vm5, %v5907_v48  ;;  %8054 = vmatmul.mubr.msk.f32.gmra.mrb[132].mxu1 %vm844_vm0, %v5907_v48  ;;  %v6315_v51 = vld [vmem:[#allocation6 + $0x16] sm:$0xff] }
 0x9ba   : > { %9693 = vrot.lane.b32.xlu0 %v9692_v39, %s13060_s8  ;;  %v6289_v55 = vld [vmem:[#allocation6 + $0x12] sm:$0xff]  ;;  %v9697_v24 = vpack.i.bf16 %v6315_v51, %v6314_v25 }
 0x9bb   : > { %9688 = vrot.lane.b32.xlu1 %v9687_v18, %s13059_s7  ;;  %v6290_v63 = vld [vmem:[#allocation6 + $0x1a] sm:$0xff]  ;;  %v6291_v36 = vld [vmem:[#allocation6 + $0x22] sm:$0xf] }
 0x9bc   : > { %v9702_v33 = vpack.i.bf16 %v6290_v63, %v6289_v55  ;;  %v12429_v52 = vld [vmem:[#allocation6 + $0x1f] sm:$0xff]  ;;  %v12433_v28 = vld [vmem:[#allocation6 + $0x17] sm:$0xff] }
 0x9bd   : > { %v6295_v10 = vld [vmem:[#allocation6 + $0x1b] sm:$0xff]  ;;  %v6294_v45 = vld [vmem:[#allocation6 + $0x13] sm:$0xff]  ;;  %v9712_v40 = vpack.i.bf16 %v12429_v52, %v12433_v28  ;;  %v6296_v42 = vld [vmem:[#allocation6 + $0x23] sm:$0xf] }
 0x9be   : > { %9703 = vrot.lane.b32.xlu0 %v9702_v33, %s13067_s11  ;;  %v9707_v30 = vpack.i.bf16 %v6295_v10, %v6294_v45  ;;  %v6305_v56 = vld [vmem:[#allocation6 + $0x20] sm:$0xff]  ;;  %v6304_v22 = vld [vmem:[#allocation6 + $0x18] sm:$0xff] }
 0x9bf   : > { %9698 = vrot.lane.b32.xlu1 %v9697_v24, %s13061_s10  ;;  %v12439_v16 = vld [vmem:[#allocation6 + $0x19] sm:$0xff]  ;;  %v9717_v59 = vpack.i.bf16 %v6305_v56, %v6304_v22 }
 0x9c0   : > { %v6307_v0 = vld [vmem:[#allocation6 + $0x21] sm:$0xff]  ;;  %v6308_v17 = vld [vmem:[#allocation6 + $0x29] sm:$0xf] }
 0x9c1   : > { %v9722_v58 = vpack.i.bf16 %v6307_v0, %v12439_v16  ;;  %v6317_v7 = vld [vmem:[#allocation6 + $0x26] sm:$0xff]  ;;  %v6316_v14 = vld [vmem:[#allocation6 + $0x1e] sm:$0xff] }
 0x9c2   : > { %9713 = vrot.lane.b32.xlu0 %v9712_v40, %s13058_s29  ;;  %v9732_v3 = vpack.i.bf16 %v6317_v7, %v6316_v14  ;;  %v6312_v54 = vld [vmem:[#allocation6 + $0x25] sm:$0xff]  ;;  %v6311_v38 = vld [vmem:[#allocation6 + $0x1d] sm:$0xff] }
 0x9c3   : > { %9708 = vrot.lane.b32.xlu1 %v9707_v30, %s13066_s4  ;;  %v9727_v43 = vpack.i.bf16 %v6312_v54, %v6311_v38  ;;  %v6306_v50 = vld [vmem:[#allocation6 + $0x28] sm:$0xf] }
 0x9c4   : > { %v6301_v61 = vld [vmem:[#allocation6 + $0x27] sm:$0xf] }
 0x9c6   : > { %9723 = vrot.lane.b32.xlu0 %v9722_v58, %s13059_s7 }
 0x9c7   : > { %9718 = vrot.lane.b32.xlu1 %v9717_v59, %s13057_s12 }
 0x9ca   : > { %9733 = vrot.lane.b32.xlu0 %v9732_v3, %s13061_s10 }
 0x9cb   : > { %6334 = vrot.lane.b32.xlu1 %v6291_v36, %s13067_s11 }
 0x9ce   : > { %6354 = vrot.lane.b32.xlu0 %v6296_v42, %s13066_s4 }
 0x9cf   : > { %9728 = vrot.lane.b32.xlu1 %v9727_v43, %s13060_s8 }
 0x9d2   : > { %6394 = vrot.lane.b32.xlu0 %v6306_v50, %s13057_s12 }
 0x9d3   : > { %6374 = vrot.lane.b32.xlu1 %v6301_v61, %s13058_s29 }
 0x9d6   : > { %6434 = vrot.lane.b32.xlu0 %v6313_v9, %s13060_s8 }
 0x9d7   : > { %6414 = vrot.lane.b32.xlu1 %v6308_v17, %s13059_s7 }
 0x9db   : > { %6454 = vrot.lane.b32.xlu1 %v6318_v34, %s13061_s10 }
 0xa20   : > { %v9674_v15 = vpop.permute.xlu0 %9673 }
 0xa21   : > { %v9669_v11 = vpop.permute.xlu1 %9668  ;;  %v9675_v26 = vunpack.i.l.bf16 %v9674_v15  ;;  %v9676_v4 = vunpack.i.h.bf16 %v9674_v15 }
 0xa22   : > { %v9670_v53 = vunpack.i.l.bf16 %v9669_v11  ;;  %v9671_v12 = vunpack.i.h.bf16 %v9669_v11 }
 0xa24   : > { %v6461_v62 = vsel %vm844_vm0, %v6282_v44, %v9670_v53  ;;  %v9684_v27 = vpop.permute.xlu0 %9683  ;;  %v6462_v35 = vsel %vm844_vm0, %v12419_v49, %v9671_v12 }
 0xa25   : > { %v9679_v23 = vpop.permute.xlu1 %9678  ;;  %v9685_v32 = vunpack.i.l.bf16 %v9684_v27  ;;  %v6466_v57 = vsel %vm939_vm1, %v6461_v62, %v9675_v26  ;;  %v9686_v6 = vunpack.i.h.bf16 %v9684_v27  ;;  %v6467_v19 = vsel %vm939_vm1, %v6462_v35, %v9676_v4  ;;  %v6286_v26 = vld [vmem:[#allocation6 + $0x21] sm:$0xf] }
 0xa26   : > { %v9680_v29 = vunpack.i.l.bf16 %v9679_v23  ;;  %v9681_v37 = vunpack.i.h.bf16 %v9679_v23 }
 0xa28   : > { %v6471_v13 = vsel %vm2475_vm2, %v6466_v57, %v9680_v29  ;;  %v6472_v5 = vsel %vm2475_vm2, %v6467_v19, %v9681_v37  ;;  %v6319_v37 = vld [vmem:[#allocation6 + $0x27] sm:$0xff] }
 0xa29   : > { %v6476_v20 = vsel %vm2517_vm3, %v6471_v13, %v9685_v32  ;;  %v6477_v55 = vsel %vm2517_vm3, %v6472_v5, %v9686_v6 }
 0xa2c   : > { %v9694_v46 = vpop.permute.xlu0 %9693 }
 0xa2d   : > { %v9689_v41 = vpop.permute.xlu1 %9688  ;;  %v9695_v21 = vunpack.i.l.bf16 %v9694_v46  ;;  %v9696_v18 = vunpack.i.h.bf16 %v9694_v46 }
 0xa2e   : > { %v9690_v8 = vunpack.i.l.bf16 %v9689_v41  ;;  %v9691_v47 = vunpack.i.h.bf16 %v9689_v41  ;;  %v6320_v41 = vld [vmem:[#allocation6 + $0x2f] sm:$0xf] }
 0xa30   : > { %v6481_v48 = vsel %vm2559_vm4, %v6476_v20, %v9690_v8  ;;  %v9704_v31 = vpop.permute.xlu0 %9703  ;;  %v6482_v33 = vsel %vm2559_vm4, %v6477_v55, %v9691_v47 }
 0xa31   : > { %v9699_v39 = vpop.permute.xlu1 %9698  ;;  %v6486_v51 = vsel %vm2601_vm6, %v6481_v48, %v9695_v21  ;;  %v9705_v45 = vunpack.i.l.bf16 %v9704_v31  ;;  %v6487_v40 = vsel %vm2601_vm6, %v6482_v33, %v9696_v18  ;;  %v9706_v56 = vunpack.i.h.bf16 %v9704_v31 }
 0xa32   : > { %v9700_v49 = vunpack.i.l.bf16 %v9699_v39  ;;  %v9701_v63 = vunpack.i.h.bf16 %v9699_v39 }
 0xa33   : > { %v6463_v7 = vsel %vm844_vm0, %v12421_v60, %v9705_v45  ;;  %v6464_v36 = vsel %vm844_vm0, %v12439_v16, %v9706_v56 }
 0xa34   : > { %v6491_v25 = vsel %vm2643_vm7, %v6486_v51, %v9700_v49  ;;  %v9714_v24 = vpop.permute.xlu0 %9713  ;;  %v6492_v0 = vsel %vm2643_vm7, %v6487_v40, %v9701_v63 }
 0xa35   : > { %v9709_v10 = vpop.permute.xlu1 %9708  ;;  %6598 = vmatmul.mubr.f32.vlgmr.msra.gmra.mrb[116].mxu0 %v6491_v25  ;;  %v9715_v14 = vunpack.i.l.bf16 %v9714_v24  ;;  %v9716_v54 = vunpack.i.h.bf16 %v9714_v24 }
 0xa36   : > { %7578 = vmatprep.mubr.msk.f32.mxu0 %vm844_vm0, %v12433_v28  ;;  %v9710_v30 = vunpack.i.l.bf16 %v9709_v10  ;;  %v9711_v59 = vunpack.i.h.bf16 %v9709_v10 }
 0xa38   : > { %v9724_v22 = vpop.permute.xlu0 %9723  ;;  %v6468_v28 = vsel %vm939_vm1, %v6463_v7, %v9710_v30  ;;  %v6469_v42 = vsel %vm939_vm1, %v6464_v36, %v9711_v59 }
 0xa39   : > { %v9719_v58 = vpop.permute.xlu1 %9718  ;;  %6603 = vmatmul.mubr.f32.gmra.mrb[118].mxu0 %v6492_v0  ;;  %v9725_v61 = vunpack.i.l.bf16 %v9724_v22  ;;  %v6473_v9 = vsel %vm2475_vm2, %v6468_v28, %v9715_v14  ;;  %v9726_v17 = vunpack.i.h.bf16 %v9724_v22  ;;  %v6474_v60 = vsel %vm2475_vm2, %v6469_v42, %v9716_v54  ;;  %v6628_v42 = vld [vmem:[%s12974_s21] sm:$0xff] }
 0xa3a   : > { %7579 = vmatprep.mubr.msk.f32.mxu0 %vm844_vm0, %v12429_v52  ;;  %v9720_v3 = vunpack.i.l.bf16 %v9719_v58  ;;  %v9721_v50 = vunpack.i.h.bf16 %v9719_v58 }
 0xa3c   : > { %v9734_v38 = vpop.permute.xlu0 %9733  ;;  %v6478_v52 = vsel %vm2517_vm3, %v6473_v9, %v9720_v3  ;;  %v6479_v15 = vsel %vm2517_vm3, %v6474_v60, %v9721_v50 }
 0xa3d   : > { %v6335_v43 = vpop.permute.xlu1 %6334  ;;  %v9735_v23 = vunpack.i.l.bf16 %v9734_v38  ;;  %v6483_v44 = vsel %vm2559_vm4, %v6478_v52, %v9725_v61  ;;  %v6484_v57 = vsel %vm2559_vm4, %v6479_v15, %v9726_v17  ;;  %v9736_v46 = vunpack.i.h.bf16 %v9734_v38 }
 0xa3e   : > { %v6465_v12 = vsel %vm844_vm0, %v6286_v26, %v6335_v43 }
 0xa40   : > { %v6355_v34 = vpop.permute.xlu0 %6354 }
 0xa41   : > { %v9729_v11 = vpop.permute.xlu1 %9728  ;;  %v6470_v27 = vsel %vm939_vm1, %v6465_v12, %v6355_v34  ;;  %v7576_v12 = vld [vmem:[%s12973_s20] ss:$0 sm:$0xff] }
 0xa42   : > { %v9731_v53 = vunpack.i.h.bf16 %v9729_v11  ;;  %v9730_v16 = vunpack.i.l.bf16 %v9729_v11 }
 0xa44   : > { %v6488_v62 = vsel %vm2601_vm6, %v6483_v44, %v9730_v16  ;;  %v6395_v29 = vpop.permute.xlu0 %6394  ;;  %v6489_v13 = vsel %vm2601_vm6, %v6484_v57, %v9731_v53 }
 0xa45   : > { %v6375_v4 = vpop.permute.xlu1 %6374  ;;  %v6493_v32 = vsel %vm2643_vm7, %v6488_v62, %v9735_v23  ;;  %v6494_v19 = vsel %vm2643_vm7, %v6489_v13, %v9736_v46 }
 0xa46   : > { %v6475_v35 = vsel %vm2475_vm2, %v6470_v27, %v6375_v4  ;;  %6608 = vmatmul.mubr.f32.gmra.mrb[120].mxu0 %v6493_v32 }
 0xa47   : > { %7580 = vmatprep.mubr.msk.f32.mxu0 %vm844_vm0, %v6319_v37  ;;  %v6480_v8 = vsel %vm2517_vm3, %v6475_v35, %v6395_v29 }
 0xa48   : > { %v6435_v20 = vpop.permute.xlu0 %6434 }
 0xa49   : > { %v6415_v6 = vpop.permute.xlu1 %6414 }
 0xa4a   : > { %v6485_v21 = vsel %vm2559_vm4, %v6480_v8, %v6415_v6  ;;  %6613 = vmatmul.mubr.f32.gmra.mrb[122].mxu0 %v6494_v19 }
 0xa4b   : > { %7581 = vmatprep.mubr.msk.f32.mxu0 %vm844_vm0, %v6320_v41  ;;  %v6490_v5 = vsel %vm2601_vm6, %v6485_v21, %v6435_v20 }
 0xa4d   : > { %v6455_v47 = vpop.permute.xlu1 %6454 }
 0xa4e   : > { %v6495_v48 = vsel %vm2643_vm7, %v6490_v5, %v6455_v47 }
 0xa4f   : > { %6618 = vmatmul.mubr.f32.gmra.mrb[124].mxu0 %v6495_v48 }
 0xa50   : > { %8066 = vmatprep.mubr.msk.f32.mxu0 %vm6630_vm14, %v6628_v42  ;;  %v6807_v42 = vld [vmem:[%s12975_s22 + $0x80] sm:$0xff] }
 0xa72   : > { %v5991_v31 = vpop.f32.mrb[124].mxu1 }
 0xa73   : > { %v8043_v39 = vpop.f32.mrb[125].mxu1  ;;  %v6020_v18 = vrot.slane %v5991_v31, 4 }
 0xa76   : > { %v5996_v49 = vpop.f32.mrb[126].mxu1 }
 0xa77   : > { %v9747_v51 = vpack.i.bf16 %v5996_v49, %v5991_v31  ;;  %v6021_v55 = vrot.slane %v5996_v49, 4  ;;  %v8281_v63 = vpack.c.bf16 %v5996_v49, %v5991_v31  ;;  %v8046_v25 = vpop.f32.mrb[127].mxu1 }
 0xa79   : > { %v6022_v33 = vsel %vm3223_vm10, %v6020_v18, %v6021_v55  ;;  %8282 = vmatpush1.bf16.msra.mxu1 %v8281_v63 }
 0xa7a   : > { %v9737_v24 = vpack.i.bf16 %v6022_v33, %v6020_v18  ;;  %8283 = vmatprep.subr.bf16.mxu1 %v9932_v2 }
 0xa7c   : > { %9738 = vrot.lane.b32.xlu0 %v9737_v24, %s13061_s10 }
 0xa83   : > { %v6001_v10 = vpop.f32.mrb[128].mxu1 }
 0xa84   : > { %v6023_v45 = vrot.slane %v6001_v10, 4  ;;  %v8049_v40 = vpop.f32.mrb[129].mxu1 }
 0xa86   : > { %v6024_v30 = vsel %vm3223_vm10, %v6021_v55, %v6023_v45 }
 0xa87   : > { %v6006_v0 = vpop.f32.mrb[130].mxu1  ;;  %v9757_v56 = vpack.i.bf16 %v6024_v30, %v6022_v33 }
 0xa88   : > { %v6025_v22 = vrot.slane %v6006_v0, 4  ;;  %v8284_v58 = vpack.c.bf16 %v6006_v0, %v6001_v10  ;;  %v8052_v59 = vpop.f32.mrb[131].mxu1 }
 0xa8a   : > { %v6026_v7 = vsel %vm3223_vm10, %v6023_v45, %v6025_v22  ;;  %8285 = vmatpush1.bf16.msra.mxu1 %v8284_v58 }
 0xa8b   : > { %v9742_v14 = vpack.i.bf16 %v6026_v7, %v6024_v30  ;;  %8286 = vmatprep.subr.bf16.mxu1 %v9932_v2 }
 0xa8c   : > { %v6011_v28 = vpop.f32.mrb[132].mxu1 }
 0xa8d   : > { %v9752_v3 = vpack.i.bf16 %v6011_v28, %v6001_v10  ;;  %v6027_v36 = vrot.slane %v6011_v28, 4  ;;  %9743 = vrot.lane.b32.xlu1 %v9742_v14, %s13061_s10  ;;  %v8055_v54 = vpop.f32.mrb[133].mxu1  ;;  %v6824_v14 = vld [vmem:[%s12975_s22 + $0x108] sm:$0xff] }
 0xa8f   : > { %v6028_v38 = vsel %vm3223_vm10, %v6025_v22, %v6027_v36  ;;  %v6826_v36 = vld [vmem:[%s12975_s22 + $0x118] sm:$0xff] }
 0xa90   : > { %v9762_v43 = vpack.i.bf16 %v6028_v38, %v6026_v7  ;;  %6037 = vrot.lane.b32.xlu0 %v6028_v38, %s13061_s10  ;;  %v6823_v7 = vld [vmem:[%s12975_s22 + $0x100] sm:$0xff]  ;;  %v6077_v38 = vld [vmem:[%s12971_s18 + $0x8] sm:$0xff] }
 0xa91   : > { %9748 = vrot.lane.b32.xlu1 %v9747_v51, %s13060_s8  ;;  %7568 = vmatprep.mubr.msk.f32.mxu1 %vm844_vm0, %v6077_v38  ;;  %v6805_v38 = vld [vmem:[%s12975_s22 + $0x70] sm:$0xff] }
 0xa94   : > { %9753 = vrot.lane.b32.xlu0 %v9752_v3, %s13060_s8  ;;  %v6825_v3 = vld [vmem:[%s12975_s22 + $0x110] sm:$0xff] }
 0xa95   : > { %6059 = vrot.lane.b32.xlu1 %v6020_v18, %s13059_s7  ;;  %v8378_v54 = vpack.c.bf16 %v6826_v36, %v6825_v3  ;;  %v6091_v3 = vld [vmem:[%s12971_s18 + $0x78] sm:$0xff]  ;;  %v6090_v36 = vld [vmem:[%s12971_s18 + $0x70] sm:$0xff] }
 0xa98   : > { %6050 = vrot.lane.b32.xlu0 %v6006_v0, %s13060_s8 }
 0xa99   : > { %9758 = vrot.lane.b32.xlu1 %v9757_v56, %s13059_s7 }
 0xa9c   : > { %9763 = vrot.lane.b32.xlu0 %v9762_v43, %s13059_s7  ;;  %v6076_v43 = vld [vmem:[%s12971_s18] sm:$0xff] }
 0xaee   : > { %v9739_v50 = vpop.permute.xlu0 %9738 }
 0xaef   : > { %v9741_v61 = vunpack.i.h.bf16 %v9739_v50  ;;  %v9740_v9 = vunpack.i.l.bf16 %v9739_v50  ;;  %v6808_v50 = vld [vmem:[%s12975_s22 + $0x88] sm:$0xff] }
 0xaf1   : > { %v6074_v52 = vsel %vm3223_vm10, %v6011_v28, %v9740_v9  ;;  %v8374_v28 = vpack.c.bf16 %v6824_v14, %v6823_v7  ;;  %v6792_v9 = vld [vmem:[%s12975_s22 + $0x8] sm:$0xff]  ;;  %v6821_v14 = vld [vmem:[%s12975_s22 + $0xf0] sm:$0xff] }
 0xaf2   : > { %v8287_v17 = vpack.c.bf16 %v9741_v61, %v6074_v52  ;;  %v6791_v61 = vld [vmem:[%s12975_s22] sm:$0xff]  ;;  %v8342_v52 = vpack.c.bf16 %v6808_v50, %v6807_v42 }
 0xaf4   : > { %8288 = vmatpush1.bf16.msra.mxu1 %v8287_v17  ;;  %v8344_v17 = vpack.c.bf16 %v6792_v9, %v6791_v61 }
 0xaf5   : > { %8289 = vmatprep.subr.bf16.mxu1 %v9932_v2 }
 0xaff   : > { %v9744_v60 = vpop.permute.xlu1 %9743 }
 0xb00   : > { %v9746_v34 = vunpack.i.h.bf16 %v9744_v60  ;;  %v9745_v11 = vunpack.i.l.bf16 %v9744_v60  ;;  %v6079_v60 = vld [vmem:[%s12971_s18 + $0x18] sm:$0xff] }
 0xb02   : > { %v8290_v15 = vpack.c.bf16 %v9746_v34, %v9745_v11  ;;  %v6038_v53 = vpop.permute.xlu0 %6037  ;;  %v6078_v34 = vld [vmem:[%s12971_s18 + $0x10] sm:$0xff] }
 0xb03   : > { %v9749_v16 = vpop.permute.xlu1 %9748  ;;  %v6809_v11 = vld [vmem:[%s12975_s22 + $0x90] sm:$0xff] }
 0xb04   : > { %v9750_v23 = vunpack.i.l.bf16 %v9749_v16  ;;  %8291 = vmatpush1.bf16.msra.mxu1 %v8290_v15  ;;  %v9751_v62 = vunpack.i.h.bf16 %v9749_v16  ;;  %v6810_v15 = vld [vmem:[%s12975_s22 + $0x98] sm:$0xff] }
 0xb05   : > { %8292 = vmatprep.subr.bf16.mxu1 %v9932_v2  ;;  %v6794_v16 = vld [vmem:[%s12975_s22 + $0x18] sm:$0xff] }
 0xb06   : > { %v8293_v26 = vpack.c.bf16 %v9750_v23, %v6038_v53  ;;  %v9754_v44 = vpop.permute.xlu0 %9753  ;;  %v6793_v53 = vld [vmem:[%s12975_s22 + $0x10] sm:$0xff]  ;;  %v8346_v23 = vpack.c.bf16 %v6810_v15, %v6809_v11 }
 0xb07   : > { %v9756_v27 = vunpack.i.h.bf16 %v9754_v44  ;;  %v9755_v29 = vunpack.i.l.bf16 %v9754_v44  ;;  %v6060_v32 = vpop.permute.xlu1 %6059  ;;  %v6811_v44 = vld [vmem:[%s12975_s22 + $0xa0] sm:$0xff] }
 0xb08   : > { %v6599_v4 = vpop.f32.mrb[116].mxu0  ;;  %8294 = vmatpush1.bf16.msra.mxu1 %v8293_v26  ;;  %v6081_v26 = vld [vmem:[%s12971_s18 + $0x28] sm:$0xff] }
 0xb09   : > { %v6601_v57 = vpop.f32.mrb[117].mxu0  ;;  %v8296_v35 = vpack.c.bf16 %v9755_v29, %v9751_v62  ;;  %v6600_v37 = vadd.f32 %v7576_v12, %v6599_v4  ;;  %8295 = vmatprep.subr.bf16.mxu1 %v9932_v2  ;;  %v6075_v46 = vsel %vm3223_vm10, %v9756_v27, %v6060_v32  ;;  %v6812_v62 = vld [vmem:[%s12975_s22 + $0xa8] sm:$0xff]  ;;  %v6795_v29 = vld [vmem:[%s12975_s22 + $0x20] sm:$0xff] }
 0xb0a   : > { %v6051_v13 = vpop.permute.xlu0 %6050  ;;  %v8350_v27 = vpack.c.bf16 %v6812_v62, %v6811_v44  ;;  %v6796_v4 = vld [vmem:[%s12975_s22 + $0x28] sm:$0xff]  ;;  %v6080_v32 = vld [vmem:[%s12971_s18 + $0x20] sm:$0xff]  ;;  %v6813_v57 = vld [vmem:[%s12975_s22 + $0xb0] sm:$0xff] }
 0xb0b   : > { %v9759_v8 = vpop.permute.xlu1 %9758  ;;  %v6623_v21 = vmax.f32 %v6600_v37, 0.0  ;;  %v8299_v20 = vpack.c.bf16 %v6075_v46, %v6051_v13  ;;  %v6083_v37 = vld [vmem:[%s12971_s18 + $0x38] sm:$0xff]  ;;  %v8352_v13 = vpack.c.bf16 %v6796_v4, %v6795_v29  ;;  %v6991_v4 = vld [vmem:[%s12977_s24] sm:$0xff] }
 0xb0c   : > { %v6604_v41 = vpop.f32.mrb[118].mxu0  ;;  %8297 = vmatpush1.bf16.msra.mxu1 %v8296_v35  ;;  %v9761_v47 = vunpack.i.h.bf16 %v9759_v8  ;;  %v9760_v48 = vunpack.i.l.bf16 %v9759_v8  ;;  %v6814_v35 = vld [vmem:[%s12975_s22 + $0xb8] sm:$0xff] }
 0xb0d   : > { %v6605_v6 = vadd.f32 %v7576_v12, %v6604_v41  ;;  %v6606_v19 = vpop.f32.mrb[119].mxu0  ;;  %8298 = vmatprep.subr.bf16.mxu1 %v9932_v2  ;;  %v8354_v46 = vpack.c.bf16 %v6814_v35, %v6813_v57  ;;  %v6797_v41 = vld [vmem:[%s12975_s22 + $0x30] sm:$0xff]  ;;  %v6798_v8 = vld [vmem:[%s12975_s22 + $0x38] sm:$0xff] }
 0xb0e   : > { %v9764_v31 = vpop.permute.xlu0 %9763  ;;  %v8302_v49 = vpack.c.bf16 %v9761_v47, %v9760_v48  ;;  %v6815_v19 = vld [vmem:[%s12975_s22 + $0xc0] sm:$0xff] }
 0xb0f   : > { %v6624_v5 = vmax.f32 %v6605_v6, 0.0  ;;  %v9766_v18 = vunpack.i.h.bf16 %v9764_v31  ;;  %v9765_v51 = vunpack.i.l.bf16 %v9764_v31  ;;  %v6082_v6 = vld [vmem:[%s12971_s18 + $0x30] sm:$0xff]  ;;  %v6799_v48 = vld [vmem:[%s12975_s22 + $0x40] sm:$0xff]  ;;  %v6800_v31 = vld [vmem:[%s12975_s22 + $0x48] sm:$0xff] }
 0xb10   : > { %8300 = vmatpush1.bf16.msra.mxu1 %v8299_v20  ;;  %v6085_v20 = vld [vmem:[%s12971_s18 + $0x48] sm:$0xff] }
 0xb11   : > { %v8334_v39 = vpack.c.bf16 %v6624_v5, %v6623_v21  ;;  %8301 = vmatprep.subr.bf16.mxu1 %v9932_v2  ;;  %v8305_v55 = vpack.c.bf16 %v9766_v18, %v9765_v51  ;;  %v6816_v21 = vld [vmem:[%s12975_s22 + $0xc8] sm:$0xff]  ;;  %v8356_v5 = vpack.c.bf16 %v6798_v8, %v6797_v41  ;;  %v6818_v18 = vld [vmem:[%s12975_s22 + $0xd8] sm:$0xff] }
 0xb12   : > { %v8358_v47 = vpack.c.bf16 %v6816_v21, %v6815_v19  ;;  %v6087_v51 = vld [vmem:[%s12971_s18 + $0x58] sm:$0xff] }
 0xb13   : > { %8335 = vmatprep.subr.bf16.mxu0 %v8334_v39 }
 0xb14   : > { %8337 = vmatpush3.bf16.msra.mxu0 %v8334_v39  ;;  %8303 = vmatpush1.bf16.msra.mxu1 %v8302_v49  ;;  %v6084_v39 = vld [vmem:[%s12971_s18 + $0x40] sm:$0xff]  ;;  %v6817_v49 = vld [vmem:[%s12975_s22 + $0xd0] sm:$0xff] }
 0xb15   : > { %8304 = vmatprep.subr.bf16.mxu1 %v9932_v2  ;;  %v6629_v2 = vld [vmem:[%s12974_s21 + $0x8] sm:$0xff] }
 0xb18   : > { %8306 = vmatpush1.bf16.msra.mxu1 %v8305_v55  ;;  %v8360_v55 = vpack.c.bf16 %v6800_v31, %v6799_v48 }
 0xb19   : > { %v6609_v63 = vpop.f32.mrb[120].mxu0  ;;  %8343 = vmatprep.subr.bf16.mxu1 %v8342_v52 }
 0xb1a   : > { %v6611_v25 = vpop.f32.mrb[121].mxu0  ;;  %v6610_v33 = vadd.f32 %v7576_v12, %v6609_v63  ;;  %v8362_v63 = vpack.c.bf16 %v6818_v18, %v6817_v49 }
 0xb1b   : > { %6188 = vmatmul.mubr.f32.vlgmr.msra.gmra.mrb[134].mxu1 %v6076_v43  ;;  %v6801_v25 = vld [vmem:[%s12975_s22 + $0x50] sm:$0xff]  ;;  %v6806_v43 = vld [vmem:[%s12975_s22 + $0x78] sm:$0xff] }
 0xb1c   : > { %v6625_v40 = vmax.f32 %v6610_v33, 0.0  ;;  %7569 = vmatprep.mubr.msk.f32.mxu1 %vm844_vm0, %v6079_v60  ;;  %8345 = vmatpush3.bf16.msra.mxu1 %v8344_v17  ;;  %v6802_v33 = vld [vmem:[%s12975_s22 + $0x58] sm:$0xff]  ;;  %v8372_v42 = vpack.c.bf16 %v6806_v43, %v6805_v38 }
 0xb1d   : > { %v6614_v24 = vpop.f32.mrb[122].mxu0  ;;  %8347 = vmatprep.subr.bf16.mxu1 %v8346_v23 }
 0xb1e   : > { %v6615_v10 = vadd.f32 %v7576_v12, %v6614_v24  ;;  %v6616_v45 = vpop.f32.mrb[123].mxu0  ;;  %v6086_v24 = vld [vmem:[%s12971_s18 + $0x50] sm:$0xff] }
 0xb1f   : > { %6193 = vmatmul.mubr.f32.gmra.mrb[136].mxu1 %v6078_v34  ;;  %v6819_v45 = vld [vmem:[%s12975_s22 + $0xe0] sm:$0xff] }
 0xb20   : > { %v6626_v30 = vmax.f32 %v6615_v10, 0.0  ;;  %7570 = vmatprep.mubr.msk.f32.mxu1 %vm844_vm0, %v6081_v26  ;;  %v8364_v10 = vpack.c.bf16 %v6802_v33, %v6801_v25 }
 0xb22   : > { %v8338_v0 = vpack.c.bf16 %v6626_v30, %v6625_v40  ;;  %v6619_v56 = vpop.f32.mrb[124].mxu0  ;;  %v6820_v40 = vld [vmem:[%s12975_s22 + $0xe8] sm:$0xff] }
 0xb23   : > { %v6620_v22 = vadd.f32 %v7576_v12, %v6619_v56  ;;  %v6621_v58 = vpop.f32.mrb[125].mxu0  ;;  %v8348_v12 = vpack.c.bf16 %v6794_v16, %v6793_v53  ;;  %6198 = vmatmul.mubr.f32.gmra.mrb[138].mxu1 %v6080_v32  ;;  %v8366_v56 = vpack.c.bf16 %v6820_v40, %v6819_v45  ;;  %v6992_v32 = vld [vmem:[%s12977_s24 + $0x8] sm:$0xff] }
 0xb24   : > { %8339 = vmatprep.subr.bf16.mxu0 %v8338_v0  ;;  %7571 = vmatprep.mubr.msk.f32.mxu1 %vm844_vm0, %v6083_v37  ;;  %v6804_v58 = vld [vmem:[%s12975_s22 + $0x68] sm:$0xff] }
 0xb25   : > { %v6627_v59 = vmax.f32 %v6620_v22, 0.0  ;;  %8341 = vmatpush3.bf16.msra.mxu0 %v8338_v0  ;;  %8349 = vmatpush3.bf16.msra.mxu1 %v8348_v12  ;;  %v6089_v0 = vld [vmem:[%s12971_s18 + $0x68] sm:$0xff]  ;;  %v6803_v22 = vld [vmem:[%s12975_s22 + $0x60] sm:$0xff] }
 0xb26   : > { %8351 = vmatprep.subr.bf16.mxu1 %v8350_v27  ;;  %v8368_v7 = vpack.c.bf16 %v6804_v58, %v6803_v22 }
 0xb27   : > { %8064 = vmatprep.subr.msk.mxu0 %vm3223_vm10, %v6627_v59  ;;  %6203 = vmatmul.mubr.f32.gmra.mrb[140].mxu1 %v6082_v6 }
 0xb28   : > { %7572 = vmatprep.mubr.msk.f32.mxu1 %vm844_vm0, %v6085_v20 }
 0xb29   : > { %8065 = vmatpush3.msk.msra.mxu0 %vm3223_vm10, %v6627_v59  ;;  %8353 = vmatpush3.bf16.msra.mxu1 %v8352_v13 }
 0xb2a   : > { %8067 = vmatmul.mubr.msk.f32.vlgmr.msra.gmra.mrb[126].mxu0 %vm6630_vm14, %v6629_v2  ;;  %8375 = vmatprep.subr.bf16.mxu0 %v8374_v28  ;;  %v6088_v2 = vld [vmem:[%s12971_s18 + $0x60] sm:$0xff] }
 0xb2b   : > { %8377 = vmatpush3.bf16.msra.mxu0 %v8374_v28  ;;  %8355 = vmatprep.subr.bf16.mxu1 %v8354_v46  ;;  %v6822_v28 = vld [vmem:[%s12975_s22 + $0xf8] sm:$0xff] }
 0xb2c   : > { %8379 = vmatprep.subr.bf16.mxu0 %v8378_v54  ;;  %6208 = vmatmul.mubr.f32.gmra.mrb[142].mxu1 %v6084_v39 }
 0xb2d   : > { %8357 = vmatpush3.bf16.msra.mxu1 %v8356_v5  ;;  %7573 = vmatprep.mubr.msk.f32.mxu1 %vm844_vm0, %v6087_v51 }
 0xb2e   : > { %8359 = vmatprep.subr.bf16.mxu1 %v8358_v47 }
 0xb2f   : > { %8381 = vmatpush3.bf16.msra.mxu0 %v8378_v54  ;;  %v8370_v54 = vpack.c.bf16 %v6822_v28, %v6821_v14 }
 0xb30   : > { %6213 = vmatmul.mubr.f32.gmra.mrb[144].mxu1 %v6086_v24 }
 0xb31   : > { %8361 = vmatpush3.bf16.msra.mxu1 %v8360_v55  ;;  %7574 = vmatprep.mubr.msk.f32.mxu1 %vm844_vm0, %v6089_v0 }
 0xb32   : > { %8363 = vmatprep.subr.bf16.mxu1 %v8362_v63 }
 0xb34   : > { %6218 = vmatmul.mubr.f32.gmra.mrb[146].mxu1 %v6088_v2 }
 0xb35   : > { %8365 = vmatpush3.bf16.msra.mxu1 %v8364_v10  ;;  %7575 = vmatprep.mubr.msk.f32.mxu1 %vm844_vm0, %v6091_v3  ;;  %vm6268_vm0 = vcmask 261248  }
 0xb36   : > { %8367 = vmatprep.subr.bf16.mxu1 %v8366_v56 }
 0xb38   : > { %6223 = vmatmul.mubr.f32.gmra.mrb[148].mxu1 %v6090_v36 }
 0xb39   : > { %8369 = vmatpush3.bf16.msra.mxu1 %v8368_v7 }
 0xb3a   : > { %8371 = vmatprep.subr.bf16.mxu1 %v8370_v54 }
 0xb3d   : > { %8373 = vmatpush3.bf16.msra.mxu1 %v8372_v42 }
 0xbee   : > { %v12717_v57 = vpop.f32.mrb[134].mxu1 }
 0xbef   : > { %v6191_v35 = vpop.f32.mrb[135].mxu1 }
 0xbf2   : > { %v12719_v37 = vpop.f32.mrb[136].mxu1 }
 0xbf3   : > { %v6196_v13 = vpop.f32.mrb[137].mxu1 }
 0xbf4   : > { %v7585_v13 = vld [vmem:[%s12976_s23] ss:$0 sm:$0xff] }
 0xbf6   : > { %v12721_v46 = vpop.f32.mrb[138].mxu1 }
 0xbf7   : > { %v6201_v41 = vpop.f32.mrb[139].mxu1 }
 0xbfa   : > { %v12723_v8 = vpop.f32.mrb[140].mxu1 }
 0xbfb   : > { %v6206_v6 = vpop.f32.mrb[141].mxu1 }
 0xbfd   : > { %v8068_v30 = vpop.f32.mrb[126].mxu0 }
 0xbfe   : > { %6716 = vst.msk [vmem:[#allocation7 + $0x10] sm:$0xff] %vm939_vm1, %v8068_v30  ;;  %v6706_v59 = vpop.f32.mrb[127].mxu0 }
 0xbff   : > { %6715 = vst.msk [vmem:[#allocation7 + $0x8] sm:$0xff] %vm939_vm1, %v6706_v59  ;;  %v12725_v21 = vpop.f32.mrb[142].mxu1 }
 0xc00   : > { %v6211_v48 = vpop.f32.mrb[143].mxu1 }
 0xc03   : > { %v12729_v25 = vpop.f32.mrb[144].mxu1 }
 0xc04   : > { %v6216_v45 = vpop.f32.mrb[145].mxu1 }
 0xc05   : > { %v6728_v53 = vld [vmem:[#allocation7 + $0x11] sm:$0xff] }
 0xc06   : > { %v6719_v50 = vld [vmem:[#allocation7 + $0x4] sm:$0xff]  ;;  %v6720_v34 = vld [vmem:[#allocation7 + $0xc] sm:$0xff]  ;;  %v6731_v16 = vld [vmem:[#allocation7 + $0x15] sm:$0xff] }
 0xc07   : > { %v6727_v61 = vld [vmem:[#allocation7 + $0x9] sm:$0xff]  ;;  %v9782_v26 = vpack.i.bf16 %v6720_v34, %v6728_v53  ;;  %v6729_v44 = vld [vmem:[#allocation7 + $0x13] sm:$0xff] }
 0xc08   : > { %v12700_v9 = vld [vmem:[#allocation7 + $0xb] sm:$0xff]  ;;  %v9767_v52 = vpack.i.bf16 %v6719_v50, %v6727_v61  ;;  %v6730_v62 = vld [vmem:[#allocation7 + $0x14] sm:$0xff]  ;;  %v6717_v31 = vld [vmem:[#allocation7 + $0x3] sm:$0xff] }
 0xc09   : > { %v6721_v17 = vld [vmem:[#allocation7 + $0x5] sm:$0xff]  ;;  %v6722_v15 = vld [vmem:[#allocation7 + $0xd] sm:$0xff] }
 0xc0a   : > { %v9772_v60 = vpack.i.bf16 %v6721_v17, %v12700_v9  ;;  %v6723_v11 = vld [vmem:[#allocation7 + $0x7] sm:$0xff]  ;;  %9768 = vrot.lane.b32.xlu1 %v9767_v52, %s13066_s4  ;;  %8077 = vmatprep.mubr.msk.f32.mxu0 %vm939_vm1, %v6722_v15  ;;  %v6724_v12 = vld [vmem:[#allocation7 + $0xf] sm:$0xff]  ;;  %v9787_v27 = vpack.i.bf16 %v6722_v15, %v6729_v44  ;;  %v12743_v52 = vpop.f32.mrb[146].mxu1 }
 0xc0b   : > { %8078 = vmatmul.mubr.msk.f32.vlgmr.msra.gmra.mrb[128].mxu0 %vm939_vm1, %v6731_v16  ;;  %v9777_v23 = vpack.i.bf16 %v6723_v11, %v6720_v34  ;;  %v9792_v29 = vpack.i.bf16 %v6724_v12, %v6730_v62  ;;  %v6725_v18 = vld [vmem:[#allocation7 + $0x8] sm:$0xff]  ;;  %v6726_v28 = vld [vmem:[#allocation7 + $0x10] sm:$0xff]  ;;  %v6221_v17 = vpop.f32.mrb[147].mxu1  ;;  %v7008_v11 = vld [vmem:[%s12978_s25 + $0x18] sm:$0xff] }
 0xc0c   : > { %9773 = vrot.lane.b32.xlu0 %v9772_v60, %s13057_s12  ;;  %v12745_v60 = vpop.f32.mrb[148].mxu1  ;;  %v7005_v16 = vld [vmem:[%s12978_s25] sm:$0xff]  ;;  %v7010_v12 = vld [vmem:[%s12978_s25 + $0x28] sm:$0xff]  ;;  %v7012_v62 = vld [vmem:[%s12978_s25 + $0x38] sm:$0xff] }
 0xc0d   : > { %v6226_v34 = vpop.f32.mrb[149].mxu1 }
 0xc0e   : > { %9778 = vrot.lane.b32.xlu1 %v9777_v23, %s13060_s8  ;;  %v7007_v23 = vld [vmem:[%s12978_s25 + $0x10] sm:$0xff] }
 0xc0f   : > { %v8384_v44 = vpack.c.bf16 %v7007_v23, %v7005_v16 }
 0xc10   : > { %9783 = vrot.lane.b32.xlu0 %v9782_v26, %s13066_s4 }
 0xc12   : > { %9788 = vrot.lane.b32.xlu1 %v9787_v27, %s13057_s12  ;;  %v8386_v27 = vpack.c.bf16 %v7012_v62, %v7010_v12 }
 0xc14   : > { %9793 = vrot.lane.b32.xlu0 %v9792_v29, %s13060_s8  ;;  %v7009_v29 = vld [vmem:[%s12978_s25 + $0x20] sm:$0xff] }
 0xc16   : > { %6995 = vperm.xlu1 %9386, %v6991_v4   ;;  %v7011_v4 = vld [vmem:[%s12978_s25 + $0x30] sm:$0xff] }
 0xc18   : > { %7000 = vperm.xlu0 %9385, %v6992_v32   ;;  %v8388_v32 = vpack.c.bf16 %v7011_v4, %v7009_v29 }
 0xc7c   : > { %v9769_v19 = vpop.permute.xlu1 %9768 }
 0xc7d   : > { %v9771_v20 = vunpack.i.h.bf16 %v9769_v19  ;;  %v9770_v5 = vunpack.i.l.bf16 %v9769_v19 }
 0xc7e   : > { %v9774_v47 = vpop.permute.xlu0 %9773 }
 0xc7f   : > { %v9776_v39 = vunpack.i.h.bf16 %v9774_v47  ;;  %v9775_v49 = vunpack.i.l.bf16 %v9774_v47  ;;  %v6779_v51 = vsel %vm939_vm1, %v6717_v31, %v9771_v20  ;;  %v6785_v55 = vsel %vm939_vm1, %v6725_v18, %v9770_v5 }
 0xc80   : > { %v9779_v63 = vpop.permute.xlu1 %9778 }
 0xc81   : > { %v9781_v33 = vunpack.i.h.bf16 %v9779_v63  ;;  %v9780_v24 = vunpack.i.l.bf16 %v9779_v63  ;;  %v6781_v40 = vsel %vm2517_vm3, %v6779_v51, %v9776_v39  ;;  %v6787_v56 = vsel %vm2517_vm3, %v6785_v55, %v9775_v49 }
 0xc82   : > { %v9784_v10 = vpop.permute.xlu0 %9783 }
 0xc83   : > { %v9786_v30 = vunpack.i.h.bf16 %v9784_v10  ;;  %v9785_v0 = vunpack.i.l.bf16 %v9784_v10  ;;  %v6789_v22 = vsel %vm2601_vm6, %v6787_v56, %v9780_v24  ;;  %v6783_v58 = vsel %vm2601_vm6, %v6781_v40, %v9781_v33 }
 0xc84   : > { %v9789_v59 = vpop.permute.xlu1 %9788  ;;  %6903 = vmatprep.mubr.f32.mxu1 %v6789_v22 }
 0xc85   : > { %v9791_v2 = vunpack.i.h.bf16 %v9789_v59  ;;  %v9790_v7 = vunpack.i.l.bf16 %v9789_v59  ;;  %6904 = vmatmul.mubr.f32.vlgmr.msra.gmra.mrb[150].mxu1 %v6783_v58  ;;  %v6786_v54 = vsel %vm939_vm1, %v6726_v28, %v9785_v0  ;;  %v6780_v38 = vsel %vm939_vm1, %v12700_v9, %v9786_v30  ;;  %v7006_v9 = vld [vmem:[%s12978_s25 + $0x8] sm:$0xff] }
 0xc86   : > { %v9794_v14 = vpop.permute.xlu0 %9793  ;;  %v8382_v53 = vpack.c.bf16 %v7008_v11, %v7006_v9  ;;  %v7185_v59 = vld [vmem:[%s13075_s30 + $0x8] sm:$0xff] }
 0xc87   : > { %v9796_v3 = vunpack.i.h.bf16 %v9794_v14  ;;  %v9795_v36 = vunpack.i.l.bf16 %v9794_v14  ;;  %v6788_v43 = vsel %vm2517_vm3, %v6786_v54, %v9790_v7  ;;  %v6782_v42 = vsel %vm2517_vm3, %v6780_v38, %v9791_v2  ;;  %7271 = vmatprep.mubr.f32.mxu0 %v7185_v59 }
 0xc88   : > { %8383 = vmatprep.subr.bf16.mxu1 %v8382_v53 }
 0xc89   : > { %v6790_v50 = vsel %vm2601_vm6, %v6788_v43, %v9795_v36  ;;  %v6784_v61 = vsel %vm2601_vm6, %v6782_v42, %v9796_v3  ;;  %8385 = vmatpush1.bf16.msra.mxu1 %v8384_v44 }
 0xc8a   : > { %6908 = vmatprep.mubr.f32.mxu1 %v6790_v50  ;;  %8387 = vmatprep.subr.bf16.mxu1 %v8386_v27 }
 0xc8b   : > { %6909 = vmatmul.mubr.f32.gmra.mrb[152].mxu1 %v6784_v61 }
 0xc8c   : > { %7083 = vmatprep.mubr.f32.mxu1 %v9931_v1 }
 0xc8d   : > { %8389 = vmatpush1.bf16.msra.mxu1 %v8388_v32 }
 0xc95   : > { %v6996_v39 = vpop.permute.xlu1 %6995 }
 0xc97   : > { %v7001_v63 = vpop.permute.xlu0 %7000 }
 0xcde   : > { %v8079_v15 = vpop.f32.mrb[128].mxu0 }
 0xcdf   : > { %v6980_v26 = vpop.f32.mrb[129].mxu0 }
 0xd58   : > { %v7790_v35 = vpop.f32.mrb[150].mxu1 }
 0xd59   : > { %v7791_v41 = vpop.f32.mrb[151].mxu1 }
 0xd5a   : > { %v7792_v6 = vadd.f32 %v7791_v41, %v7790_v35 }
 0xd5c   : > { %v6906_v19 = vadd.f32 %v7792_v6, %v7585_v13 }
 0xd5e   : > { %v7793_v20 = vpop.f32.mrb[152].mxu1  ;;  %v6981_v5 = vadd.f32 %v6980_v26, %v6906_v19 }
 0xd5f   : > { %v7794_v47 = vpop.f32.mrb[153].mxu1 }
 0xd60   : > { %v7795_v48 = vadd.f32 %v7794_v47, %v7793_v20  ;;  %v6989_v31 = vmax.f32 %v6981_v5, 0.0 }
 0xd62   : > { %v6911_v49 = vadd.f32 %v7795_v48, %v7585_v13  ;;  %v7003_v18 = vmul.f32 %v6996_v39, %v6989_v31 }
 0xd64   : > { %v6986_v51 = vadd.f32 %v8079_v15, %v6911_v49  ;;  %7588 = vmatmul.mubr.msk.f32.vlgmr.msra.gmra.mrb[154].mxu1 %vm939_vm1, %v7003_v18 }
 0xd65   : > { %7089 = vmatprep.mubr.f32.mxu1 %v9931_v1  ;;  %v7567_v1 = vld [vmem:[%s12970_s17] ss:$0 sm:$0xff] }
 0xd66   : > { %v6990_v55 = vmax.f32 %v6986_v51, 0.0  ;;  %v6195_v58 = vadd.f32 %v7567_v1, %v12719_v37  ;;  %v6190_v2 = vadd.f32 %v7567_v1, %v12717_v57  ;;  %v6205_v14 = vadd.f32 %v7567_v1, %v12723_v8 }
 0xd67   : > { %v6200_v3 = vadd.f32 %v7567_v1, %v12721_v46  ;;  %v6215_v36 = vadd.f32 %v7567_v1, %v12729_v25  ;;  %v6210_v57 = vadd.f32 %v7567_v1, %v12725_v21  ;;  %v6225_v8 = vadd.f32 %v7567_v1, %v12745_v60 }
 0xd68   : > { %v7004_v33 = vmul.f32 %v7001_v63, %v6990_v55  ;;  %v6229_v7 = vmax.f32 %v6195_v58, 0.0  ;;  %v6228_v28 = vmax.f32 %v6190_v2, 0.0  ;;  %v6231_v37 = vmax.f32 %v6205_v14, 0.0 }
 0xd69   : > { %v6230_v54 = vmax.f32 %v6200_v3, 0.0  ;;  %v6233_v38 = vmax.f32 %v6215_v36, 0.0  ;;  %v6232_v43 = vmax.f32 %v6210_v57, 0.0  ;;  %v6220_v46 = vadd.f32 %v7567_v1, %v12743_v52 }
 0xd6a   : > { %7589 = vmatmul.mubr.msk.f32.gmra.mrb[156].mxu1 %vm939_vm1, %v7004_v33  ;;  %v6235_v42 = vmax.f32 %v6225_v8, 0.0  ;;  %vm7352_vm1 = vcmask 392448  }
 0xd6b   : > { %v6234_v50 = vmax.f32 %v6220_v46, 0.0 }
 0xe37   : > { %v7085_v24 = vpop.f32.mrb[154].mxu1 }
 0xe38   : > { %v7087_v10 = vpop.f32.mrb[155].mxu1 }
 0xe3d   : > { %v7091_v45 = vpop.f32.mrb[156].mxu1 }
 0xe3e   : > { %v7093_v40 = vpop.f32.mrb[157].mxu1  ;;  %v9797_v30 = vpack.i.bf16 %v7091_v45, %v7085_v24  ;;  %v8392_v0 = vpack.c.bf16 %v7091_v45, %v7085_v24 }
 0xe3f   : > { %v9827_v56 = vpack.i.bf16 %v7093_v40, %v7087_v10  ;;  %v8390_v22 = vpack.c.bf16 %v7093_v40, %v7087_v10 }
 0xe40   : > { %9798 = vrot.lane.b32.xlu0 %v9797_v30, %s13061_s10 }
 0xe41   : > { %9828 = vrot.lane.b32.xlu1 %v9827_v56, %s13061_s10  ;;  %8391 = vmatprep.subr.bf16.mxu0 %v8390_v22  ;;  %s12912_s10 = scalar_lea.sflag [#allocation9], %s13081_s28 }
 0xe42   : > { %8393 = vmatpush3.bf16.msra.mxu0 %v8392_v0 }
 0xe44   : > { %9803 = vrot.lane.b32.xlu0 %v9797_v30, %s13060_s8 }
 0xe45   : > { %9833 = vrot.lane.b32.xlu1 %v9827_v56, %s13060_s8  ;;  %s9867_s8 = scalar_lea.vmem %s12906_s2, 1024 }
 0xe46   : > { %p9868_p11 = scmp.ne.s32.totalorder %s12906_s2, %s9867_s8 }
 0xe48   : > { %9808 = vrot.lane.b32.xlu0 %v9797_v30, %s13059_s7  ;;  %p9869_p12 = pnand %p9868_p11, %p10128_p5 }
 0xe49   : > { %9838 = vrot.lane.b32.xlu1 %v9827_v56, %s13059_s7  ;;  %s9942_s7 = smov [#allocation8]  }
 0xe4a   : > { %p9870_p13 = pneg %p9869_p12  ;;  %s9871_s30 = sshll.u32 %s9942_s7, 4  ;;  %s9872_s30 = int_to_ptr.vmem [resolvable:$false] %s9871_s30 }
 0xe4b   : > { %p9874_p0 = scmp.lt.s32.totalorder %s12906_s2, %s9872_s30 }
 0xe4c   : > { %9813 = vrot.lane.b32.xlu0 %v9797_v30, %s13057_s12 }
 0xe4d   : > { %9843 = vrot.lane.b32.xlu1 %v9827_v56, %s13057_s12  ;;  %s9873_s12 = scalar_lea.vmem %s9872_s30, 2048 }
 0xe4e   : > { %p9875_p1 = scmp.lt.s32.totalorder %s9873_s12, %s9867_s8 }
 0xe50   : > { %9818 = vrot.lane.b32.xlu0 %v9797_v30, %s13058_s29  ;;  %p9876_p2 = por %p9875_p1, %p9874_p0 }
 0xe51   : > { %9848 = vrot.lane.b32.xlu1 %v9827_v56, %s13058_s29 }
 0xe52   : > { %p9877_p3 = pnand %p9876_p2, %p9870_p13 }
 0xe54   : > { %9823 = vrot.lane.b32.xlu0 %v9797_v30, %s13066_s4 }
 0xe55   : > { %9853 = vrot.lane.b32.xlu1 %v9827_v56, %s13066_s4 }
 0xe58   : > { %9863 = vrot.lane.b32.xlu0 %v9797_v30, %s13067_s11 }
 0xe59   : > { %9858 = vrot.lane.b32.xlu1 %v9827_v56, %s13067_s11 }
 0xe5c   : > { %6246 = vrot.lane.b32.xlu0 %v6229_v7, %s13067_s11 }
 0xe5d   : > { %6244 = vrot.lane.b32.xlu1 %v6228_v28, %s13067_s11 }
 0xe60   : > { %6250 = vrot.lane.b32.xlu0 %v6231_v37, %s13067_s11 }
 0xe61   : > { %6248 = vrot.lane.b32.xlu1 %v6230_v54, %s13067_s11 }
 0xe64   : > { %6254 = vrot.lane.b32.xlu0 %v6233_v38, %s13067_s11  ;;  %v7184_v38 = vld [vmem:[%s13076_s13] sm:$0xff] }
 0xe65   : > { %6252 = vrot.lane.b32.xlu1 %v6232_v43, %s13067_s11  ;;  %v7187_v43 = vld [vmem:[%s13076_s13 + $0x18] sm:$0xff] }
 0xe68   : > { %6258 = vrot.lane.b32.xlu0 %v6235_v42, %s13067_s11  ;;  %v7186_v42 = vld [vmem:[%s13076_s13 + $0x10] sm:$0xff] }
 0xe69   : > { %6256 = vrot.lane.b32.xlu1 %v6234_v50, %s13067_s11  ;;  %s13077_s11 = sld [smem:[#allocation33_spill]] }
 0xeb2   : > { %v9799_v21 = vpop.permute.xlu0 %9798 }
 0xeb3   : > { %v9801_v25 = vunpack.i.h.bf16 %v9799_v21  ;;  %v9800_v61 = vunpack.i.l.bf16 %v9799_v21  ;;  %v9829_v17 = vpop.permute.xlu1 %9828  ;;  %v7189_v21 = vld [vmem:[%s13076_s13 + $0x28] sm:$0xff] }
 0xeb4   : > { %v9831_v34 = vunpack.i.h.bf16 %v9829_v17  ;;  %v9830_v9 = vunpack.i.l.bf16 %v9829_v17 }
 0xeb5   : > { %v8396_v15 = vpack.c.bf16 %v9801_v25, %v9800_v61  ;;  %v7188_v61 = vld [vmem:[%s13076_s13 + $0x20] sm:$0xff] }
 0xeb6   : > { %v8394_v60 = vpack.c.bf16 %v9831_v34, %v9830_v9  ;;  %v9804_v11 = vpop.permute.xlu0 %9803  ;;  %v7191_v34 = vld [vmem:[%s13076_s13 + $0x38] sm:$0xff] }
 0xeb7   : > { %v9806_v52 = vunpack.i.h.bf16 %v9804_v11  ;;  %v9805_v53 = vunpack.i.l.bf16 %v9804_v11  ;;  %v9834_v16 = vpop.permute.xlu1 %9833  ;;  %v7193_v11 = vld [vmem:[%s13076_s13 + $0x48] sm:$0xff] }
 0xeb8   : > { %v9836_v23 = vunpack.i.h.bf16 %v9834_v16  ;;  %v9835_v26 = vunpack.i.l.bf16 %v9834_v16  ;;  %8395 = vmatprep.subr.bf16.mxu0 %v8394_v60  ;;  %v7190_v60 = vld [vmem:[%s13076_s13 + $0x30] sm:$0xff]  ;;  %v7197_v16 = vld [vmem:[%s13076_s13 + $0x68] sm:$0xff] }
 0xeb9   : > { %8397 = vmatpush3.bf16.msra.mxu0 %v8396_v15  ;;  %v8400_v62 = vpack.c.bf16 %v9806_v52, %v9805_v53  ;;  %v7192_v15 = vld [vmem:[%s13076_s13 + $0x40] sm:$0xff]  ;;  %v7195_v52 = vld [vmem:[%s13076_s13 + $0x58] sm:$0xff]  ;;  %v7194_v53 = vld [vmem:[%s13076_s13 + $0x50] sm:$0xff] }
 0xeba   : > { %v8398_v44 = vpack.c.bf16 %v9836_v23, %v9835_v26  ;;  %v9809_v12 = vpop.permute.xlu0 %9808  ;;  %v7196_v23 = vld [vmem:[%s13076_s13 + $0x60] sm:$0xff]  ;;  %v7199_v26 = vld [vmem:[%s13076_s13 + $0x78] sm:$0xff] }
 0xebb   : > { %v9811_v27 = vunpack.i.h.bf16 %v9809_v12  ;;  %v9810_v29 = vunpack.i.l.bf16 %v9809_v12  ;;  %v9839_v4 = vpop.permute.xlu1 %9838 }
 0xebc   : > { %v9841_v32 = vunpack.i.h.bf16 %v9839_v4  ;;  %v9840_v35 = vunpack.i.l.bf16 %v9839_v4  ;;  %8399 = vmatprep.subr.bf16.mxu0 %v8398_v44  ;;  %v7198_v44 = vld [vmem:[%s13076_s13 + $0x70] sm:$0xff] }
 0xebd   : > { %8401 = vmatpush3.bf16.msra.mxu0 %v8400_v62  ;;  %v8404_v6 = vpack.c.bf16 %v9811_v27, %v9810_v29  ;;  %v7590_v62 = vld [vmem:[%s13077_s11] ss:$0 sm:$0xff] }
 0xebe   : > { %v8402_v13 = vpack.c.bf16 %v9841_v32, %v9840_v35  ;;  %v9814_v41 = vpop.permute.xlu0 %9813 }
 0xebf   : > { %v9816_v19 = vunpack.i.h.bf16 %v9814_v41  ;;  %v9815_v20 = vunpack.i.l.bf16 %v9814_v41  ;;  %v9844_v5 = vpop.permute.xlu1 %9843 }
 0xec0   : > { %v9846_v47 = vunpack.i.h.bf16 %v9844_v5  ;;  %v9845_v48 = vunpack.i.l.bf16 %v9844_v5  ;;  %8403 = vmatprep.subr.bf16.mxu0 %v8402_v13 }
 0xec1   : > { %8405 = vmatpush3.bf16.msra.mxu0 %v8404_v6  ;;  %v8408_v49 = vpack.c.bf16 %v9816_v19, %v9815_v20 }
 0xec2   : > { %v8406_v31 = vpack.c.bf16 %v9846_v47, %v9845_v48  ;;  %v9819_v39 = vpop.permute.xlu0 %9818 }
 0xec3   : > { %v9821_v18 = vunpack.i.h.bf16 %v9819_v39  ;;  %v9820_v51 = vunpack.i.l.bf16 %v9819_v39  ;;  %v9849_v55 = vpop.permute.xlu1 %9848 }
 0xec4   : > { %v9851_v63 = vunpack.i.h.bf16 %v9849_v55  ;;  %v9850_v33 = vunpack.i.l.bf16 %v9849_v55  ;;  %8407 = vmatprep.subr.bf16.mxu0 %v8406_v31 }
 0xec5   : > { %8409 = vmatpush3.bf16.msra.mxu0 %v8408_v49  ;;  %v8412_v45 = vpack.c.bf16 %v9821_v18, %v9820_v51 }
 0xec6   : > { %v8410_v24 = vpack.c.bf16 %v9851_v63, %v9850_v33  ;;  %v9824_v10 = vpop.permute.xlu0 %9823 }
 0xec7   : > { %v9826_v40 = vunpack.i.h.bf16 %v9824_v10  ;;  %v9825_v30 = vunpack.i.l.bf16 %v9824_v10  ;;  %v9854_v0 = vpop.permute.xlu1 %9853 }
 0xec8   : > { %v9856_v56 = vunpack.i.h.bf16 %v9854_v0  ;;  %v9855_v22 = vunpack.i.l.bf16 %v9854_v0  ;;  %8411 = vmatprep.subr.bf16.mxu0 %v8410_v24 }
 0xec9   : > { %8413 = vmatpush3.bf16.msra.mxu0 %v8412_v45  ;;  %v8416_v59 = vpack.c.bf16 %v9826_v40, %v9825_v30 }
 0xeca   : > { %v8414_v1 = vpack.c.bf16 %v9856_v56, %v9855_v22  ;;  %v9864_v58 = vpop.permute.xlu0 %9863 }
 0xecb   : > { %v9866_v2 = vunpack.i.h.bf16 %v9864_v58  ;;  %v9865_v7 = vunpack.i.l.bf16 %v9864_v58  ;;  %v9859_v14 = vpop.permute.xlu1 %9858 }
 0xecc   : > { %v9861_v28 = vunpack.i.h.bf16 %v9859_v14  ;;  %v9860_v3 = vunpack.i.l.bf16 %v9859_v14  ;;  %8415 = vmatprep.subr.bf16.mxu0 %v8414_v1 }
 0xecd   : > { %8417 = vmatpush3.bf16.msra.mxu0 %v8416_v59  ;;  %v8420_v54 = vpack.c.bf16 %v9866_v2, %v9865_v7 }
 0xece   : > { %v8418_v37 = vpack.c.bf16 %v9861_v28, %v9860_v3  ;;  %v6247_v36 = vpop.permute.xlu0 %6246 }
 0xecf   : > { %6270 = vst.msk [vmem:[%s12079_s9 + $0x8] sm:$0xff] %vm6268_vm0, %v6247_v36  ;;  %v6245_v57 = vpop.permute.xlu1 %6244 }
 0xed0   : > { %6269 = vst.msk [vmem:[%s12079_s9] sm:$0xff] %vm6268_vm0, %v6245_v57  ;;  %8419 = vmatprep.subr.bf16.mxu0 %v8418_v37 }
 0xed1   : > { %8421 = vmatpush3.bf16.msra.mxu0 %v8420_v54 }
 0xed2   : > { %v6251_v8 = vpop.permute.xlu0 %6250 }
 0xed3   : > { %6272 = vst.msk [vmem:[%s12079_s9 + $0x18] sm:$0xff] %vm6268_vm0, %v6251_v8  ;;  %v6249_v46 = vpop.permute.xlu1 %6248 }
 0xed4   : > { %6271 = vst.msk [vmem:[%s12079_s9 + $0x10] sm:$0xff] %vm6268_vm0, %v6249_v46  ;;  %7272 = vmatmul.mubr.f32.vlgmr.msra.gmra.mrb[130].mxu0 %v7184_v38 }
 0xed5   : > { %7276 = vmatprep.mubr.f32.mxu0 %v7187_v43 }
 0xed6   : > { %v6255_v50 = vpop.permute.xlu0 %6254 }
 0xed7   : > { %6274 = vst.msk [vmem:[%s12079_s9 + $0x28] sm:$0xff] %vm6268_vm0, %v6255_v50  ;;  %v6253_v25 = vpop.permute.xlu1 %6252 }
 0xed8   : > { %6273 = vst.msk [vmem:[%s12079_s9 + $0x20] sm:$0xff] %vm6268_vm0, %v6253_v25  ;;  %7277 = vmatmul.mubr.f32.gmra.mrb[132].mxu0 %v7186_v42 }
 0xed9   : > { %7281 = vmatprep.mubr.f32.mxu0 %v7189_v21 }
 0xeda   : > { %v6259_v17 = vpop.permute.xlu0 %6258 }
 0xedb   : > { %6276 = vst.msk [vmem:[%s12079_s9 + $0x38] sm:$0xff] %vm6268_vm0, %v6259_v17  ;;  %v6257_v9 = vpop.permute.xlu1 %6256 }
 0xedc   : > { %6275 = vst.msk [vmem:[%s12079_s9 + $0x30] sm:$0xff] %vm6268_vm0, %v6257_v9  ;;  %7282 = vmatmul.mubr.f32.gmra.mrb[134].mxu0 %v7188_v61 }
 0xedd   : > { %7286 = vmatprep.mubr.f32.mxu0 %v7191_v34 }
 0xee0   : > { %7287 = vmatmul.mubr.f32.gmra.mrb[136].mxu0 %v7190_v60 }
 0xee1   : > { %7291 = vmatprep.mubr.f32.mxu0 %v7193_v11 }
 0xee4   : > { %7292 = vmatmul.mubr.f32.gmra.mrb[138].mxu0 %v7192_v15 }
 0xee5   : > { %7296 = vmatprep.mubr.f32.mxu0 %v7195_v52 }
 0xee8   : > { %7297 = vmatmul.mubr.f32.gmra.mrb[140].mxu0 %v7194_v53 }
 0xee9   : > { %7301 = vmatprep.mubr.f32.mxu0 %v7197_v16 }
 0xeec   : > { %7302 = vmatmul.mubr.f32.gmra.mrb[142].mxu0 %v7196_v23 }
 0xeed   : > { %7306 = vmatprep.mubr.f32.mxu0 %v7199_v26 }
 0xef0   : > { %7307 = vmatmul.mubr.f32.gmra.mrb[144].mxu0 %v7198_v44 }
 0xfa7   : > { %v7834_v12 = vpop.f32.mrb[130].mxu0 }
 0xfa8   : > { %v7835_v27 = vpop.f32.mrb[131].mxu0 }
 0xfa9   : > { %v7836_v29 = vadd.f32 %v7835_v27, %v7834_v12 }
 0xfab   : > { %v7274_v4 = vadd.f32 %v7836_v29, %v7590_v62  ;;  %v7837_v32 = vpop.f32.mrb[132].mxu0 }
 0xfac   : > { %v7838_v35 = vpop.f32.mrb[133].mxu0 }
 0xfad   : > { %v7312_v13 = vmax.f32 %v7274_v4, 0.0  ;;  %v7839_v41 = vadd.f32 %v7838_v35, %v7837_v32 }
 0xfaf   : > { %v7279_v6 = vadd.f32 %v7839_v41, %v7590_v62  ;;  %v7840_v19 = vpop.f32.mrb[134].mxu0  ;;  %7328 = vrot.lane.b32.xlu1 %v7312_v13, %s13066_s4 }
 0xfb0   : > { %v7841_v20 = vpop.f32.mrb[135].mxu0 }
 0xfb1   : > { %v7313_v5 = vmax.f32 %v7279_v6, 0.0  ;;  %v7842_v47 = vadd.f32 %v7841_v20, %v7840_v19 }
 0xfb3   : > { %v7284_v48 = vadd.f32 %v7842_v47, %v7590_v62  ;;  %v7843_v31 = vpop.f32.mrb[136].mxu0  ;;  %7330 = vrot.lane.b32.xlu0 %v7313_v5, %s13066_s4 }
 0xfb4   : > { %v7844_v39 = vpop.f32.mrb[137].mxu0 }
 0xfb5   : > { %v7314_v49 = vmax.f32 %v7284_v48, 0.0  ;;  %v7845_v18 = vadd.f32 %v7844_v39, %v7843_v31 }
 0xfb7   : > { %v7289_v51 = vadd.f32 %v7845_v18, %v7590_v62  ;;  %v7846_v55 = vpop.f32.mrb[138].mxu0  ;;  %7332 = vrot.lane.b32.xlu1 %v7314_v49, %s13066_s4 }
 0xfb8   : > { %v7847_v63 = vpop.f32.mrb[139].mxu0 }
 0xfb9   : > { %v7315_v33 = vmax.f32 %v7289_v51, 0.0  ;;  %v7848_v24 = vadd.f32 %v7847_v63, %v7846_v55 }
 0xfbb   : > { %v7294_v10 = vadd.f32 %v7848_v24, %v7590_v62  ;;  %v7849_v45 = vpop.f32.mrb[140].mxu0  ;;  %7334 = vrot.lane.b32.xlu0 %v7315_v33, %s13066_s4 }
 0xfbc   : > { %v7850_v40 = vpop.f32.mrb[141].mxu0 }
 0xfbd   : > { %v7316_v30 = vmax.f32 %v7294_v10, 0.0  ;;  %v7851_v0 = vadd.f32 %v7850_v40, %v7849_v45 }
 0xfbf   : > { %v7299_v56 = vadd.f32 %v7851_v0, %v7590_v62  ;;  %v7852_v22 = vpop.f32.mrb[142].mxu0  ;;  %7336 = vrot.lane.b32.xlu1 %v7316_v30, %s13066_s4 }
 0xfc0   : > { %v7853_v1 = vpop.f32.mrb[143].mxu0 }
 0xfc1   : > { %v7317_v58 = vmax.f32 %v7299_v56, 0.0  ;;  %v7854_v59 = vadd.f32 %v7853_v1, %v7852_v22 }
 0xfc3   : > { %v7304_v2 = vadd.f32 %v7854_v59, %v7590_v62  ;;  %v7855_v7 = vpop.f32.mrb[144].mxu0  ;;  %7338 = vrot.lane.b32.xlu0 %v7317_v58, %s13066_s4 }
 0xfc4   : > { %v7856_v14 = vpop.f32.mrb[145].mxu0 }
 0xfc5   : > { %v7318_v28 = vmax.f32 %v7304_v2, 0.0  ;;  %v7857_v3 = vadd.f32 %v7856_v14, %v7855_v7 }
 0xfc7   : > { %v7309_v37 = vadd.f32 %v7857_v3, %v7590_v62  ;;  %7340 = vrot.lane.b32.xlu1 %v7318_v28, %s13066_s4 }
 0xfc9   : > { %v7319_v36 = vmax.f32 %v7309_v37, 0.0 }
 0xfcb   : > { %7342 = vrot.lane.b32.xlu0 %v7319_v36, %s13066_s4  ;;  %s7596_s4 = sshll.u32 %s13078_s26, 10 }
 0xfcc   : > { %s12904_s1 = scalar_lea.hbm %s13080_s6, %s7596_s4 }
0x1021   : > { %v7329_v54 = vpop.permute.xlu1 %7328 }
0x1022   : > { %7353 = vst.msk [vmem:[%s12079_s9] sm:$0xff] %vm7352_vm1, %v7329_v54 }
0x1025   : > { %v7331_v57 = vpop.permute.xlu0 %7330 }
0x1026   : > { %7354 = vst.msk [vmem:[%s12079_s9 + $0x8] sm:$0xff] %vm7352_vm1, %v7331_v57 }
0x1029   : > { %v7333_v38 = vpop.permute.xlu1 %7332 }
0x102a   : > { %7355 = vst.msk [vmem:[%s12079_s9 + $0x10] sm:$0xff] %vm7352_vm1, %v7333_v38 }
0x102d   : > { %v7335_v8 = vpop.permute.xlu0 %7334 }
0x102e   : > { %7356 = vst.msk [vmem:[%s12079_s9 + $0x18] sm:$0xff] %vm7352_vm1, %v7335_v8 }
0x1031   : > { %v7337_v43 = vpop.permute.xlu1 %7336 }
0x1032   : > { %7357 = vst.msk [vmem:[%s12079_s9 + $0x20] sm:$0xff] %vm7352_vm1, %v7337_v43 }
0x1035   : > { %v7339_v46 = vpop.permute.xlu0 %7338 }
0x1036   : > { %7358 = vst.msk [vmem:[%s12079_s9 + $0x28] sm:$0xff] %vm7352_vm1, %v7339_v46 }
0x1039   : > { %v7341_v42 = vpop.permute.xlu1 %7340 }
0x103a   : > { %7359 = vst.msk [vmem:[%s12079_s9 + $0x30] sm:$0xff] %vm7352_vm1, %v7341_v42 }
0x103d   : > { %v7343_v50 = vpop.permute.xlu0 %7342 }
0x103e   : > { %7360 = vst.msk [vmem:[%s12079_s9 + $0x38] sm:$0xff] %vm7352_vm1, %v7343_v50 }
0x103f   : > { %9880 = shalt.err (!%p9877_p3)
}
0x1040   : > { %s9881_s9 = scalar_lea.hbm %s12904_s1, 1024  ;;  %s9885_s26 = scalar_lea.hbm %s13080_s6, 2048 }
0x1041   : > { %p9882_p4 = scmp.ne.s32.totalorder %s12904_s1, %s9881_s9  ;;  %p9886_p9 = scmp.lt.u32.totalorder %s12904_s1, %s13080_s6 }
0x1042   : > { %p9887_p10 = scmp.lt.u32.totalorder %s9885_s26, %s9881_s9  ;;  %p9889_p12 = scmp.lt.u32.totalorder %s9881_s9, %s12904_s1 }
0x1043   : > { %p9883_p7 = pnand %p9882_p4, %p10128_p5 }
0x1044   : > { %p9888_p11 = por %p9887_p10, %p9886_p9 }
0x1045   : > { %p9884_p8 = pneg %p9883_p7 }
0x1046   : > { %p9890_p13 = por %p9889_p12, %p9888_p11 }
0x1048   : > { %p9891_p0 = pnand %p9890_p13, %p9884_p8 }
0x104a   : > { %9894 = shalt.err (!%p9891_p0)
}
0x104b   : > { %s9943_s3 = smov 128   ;;  %s9944_s28 = smov 8  }
0x104c   : > { %8423 = dma.vmem_to_hbm [thread:$0]  (%p10128_p5), %s12906_s2, 1024, %s12904_s1, %s12912_s10, %s9943_s3, %s9943_s3, %s9944_s28  }
0x104d PF: > { %s13082_s8 = sld [smem:[#allocation13_spill]]  ;;  %s13083_s7 = sld [smem:[#allocation11_spill]] }
0x1053   : > { %p8429_p1 = scmp.ge.s32.totalorder %s13082_s8, 2  ;;  %s7390_s12 = sand.u32 1, %s13083_s7  }
0x1054   : > { %s7391_s9 = scalar_lea.sflag [#allocation9], %s7390_s12 }
0x1055   : > { %p8426_p2 = pnand %p8429_p1, %p10132_p6 }
0x1057   : > { %9912 = dma.done.wait (!%p8426_p2), %s7391_s9, 1024  }
0x1058   : > { %9914 = vsyncadd (!%p8426_p2), %s7391_s9, 4294966272  ;;  %s13085_s30 = sld [smem:[#allocation15_spill]]  ;;  %s13086_s29 = sld [smem:[#allocation12_spill]] }
0x1059   : > { %s13087_s9 = sld [smem:[#allocation16_spill]]  ;;  %s13088_s8 = smov %s9921_s5 }
0x105e   : > { %p38_p3 = scmp.ge.s32.totalorder %s13085_s30, 4   ;;  %s13089_s5 = smov %s13086_s29 }
0x1060   :  { %40 = sbr.rel (!%p38_p3) target bundleno = 21 (0x15), region = 167 }
0x1067   :  { %7396 = vsyncpa [#allocation9], 1 }
0x1068   :  { %7398 = vsyncpa [#allocation9 + $0x1], 1 }

</bundles_post_ra>
